<compile_context>
chip_gen: v7x
topology: tpu7x:2x2x1
jax: 0.10.0
libtpu: 0.0.40
codegen_flags: <defaults>
</compile_context>

<pallas_src>
import jax
import jax.numpy as jnp
from jax.experimental import pallas as pl
from jax.experimental.pallas import tpu as pltpu

N_EMBD = 384
HIDDEN = 4 * N_EMBD  # 1536


def ffn_kernel(x_ref, w1_ref, b1_ref, w2_ref, b2_ref, o_ref):
    """One row-tile: (TM, C) -> Linear -> ReLU -> Linear -> (TM, C)."""
    x = x_ref[...]                                                      # (TM, C) bf16

    # First linear: bf16 x bf16 -> f32 accumulation on the MXU, bias in f32.
    h = jnp.dot(x, w1_ref[...], preferred_element_type=jnp.float32)    # (TM, 4C) f32
    h = h + b1_ref[...]                                                 # (1, 4C) f32 broadcast

    # ReLU on the VPU.
    h = jnp.maximum(h, jnp.float32(0.0))

    # Second linear: cast the hidden activation back to bf16 for the MXU,
    # accumulate in f32.  Hidden never leaves VMEM.
    h = h.astype(jnp.bfloat16)
    out = jnp.dot(h, w2_ref[...], preferred_element_type=jnp.float32)  # (TM, C) f32
    out = out + b2_ref[...]                                             # (1, C) f32 broadcast

    # Final dropout: identity in eval mode.
    o_ref[...] = out.astype(o_ref.dtype)


def feed_forward(x, w1_t, b1, w2_t, b2, *, tile_m=512):
    """x: (B, T, C).  w1_t: (C, 4C).  b1: (4C,).  w2_t: (4C, C).  b2: (C,).

    w1_t / w2_t are expected pre-stored in the kernel layout (i.e. the
    transpose of nn.Linear.weight) so no per-call transpose copy is made.
    """
    B, T, C = x.shape
    H = w1_t.shape[1]
    assert w2_t.shape == (H, C)

    M = B * T
    x2 = x.reshape(M, C)

    if M <= tile_m:
        # Small-M / decode regime: one grid step, weights DMA'd exactly once.
        tm = M
        grid_steps = 1
    else:
        # Large-M regime: big tiles (multiple of 8), ragged last block is
        # masked by Pallas -- no host-side pad/slice HBM copies.
        tm = tile_m
        grid_steps = pl.cdiv(M, tm)

    # bf16 on the MXU path; biases stay f32 (added after f32 accumulation).
    x_bf = x2.astype(jnp.bfloat16)
    w1_bf = w1_t.astype(jnp.bfloat16)
    w2_bf = w2_t.astype(jnp.bfloat16)
    b1_2d = b1.reshape(1, H).astype(jnp.float32)
    b2_2d = b2.reshape(1, C).astype(jnp.float32)

    # "parallel" only pays off (on v7x megacore) once there are enough row
    # tiles that duplicating the resident-weight DMA per core is amortized.
    dim_sem = ("parallel",) if grid_steps >= 4 else ("arbitrary",)

    out = pl.pallas_call(
        ffn_kernel,
        out_shape=jax.ShapeDtypeStruct((M, C), x.dtype),
        grid=(grid_steps,),
        in_specs=[
            # Activation row tile: double-buffered by default (pipelined).
            pl.BlockSpec((tm, C), lambda i: (i, 0)),
            # Weights / biases: constant index_map -> resident in VMEM,
            # single-buffered (no point double-buffering an unchanging block).
            pl.BlockSpec((C, H), lambda i: (0, 0), pipeline_mode=pl.Buffered(1)),
            pl.BlockSpec((1, H), lambda i: (0, 0), pipeline_mode=pl.Buffered(1)),
            pl.BlockSpec((H, C), lambda i: (0, 0), pipeline_mode=pl.Buffered(1)),
            pl.BlockSpec((1, C), lambda i: (0, 0), pipeline_mode=pl.Buffered(1)),
        ],
        out_specs=pl.BlockSpec((tm, C), lambda i: (i, 0)),
        compiler_params=pltpu.CompilerParams(
            dimension_semantics=dim_sem,
            # Cheap insurance for large tiles; well under physical VMEM on
            # v5e / v6e (128 MiB) and v7x (64 MiB).
            vmem_limit_bytes=32 * 1024 * 1024,
        ),
    )(x_bf, w1_bf, b1_2d, w2_bf, b2_2d)

    return out.reshape(B, T, C)


def reference(x, w1_t, b1, w2_t, b2):
    """Pure-JAX f32 reference mirroring the PyTorch forward (eval mode)."""
    h = jnp.maximum(x @ w1_t + b1, 0.0)
    return h @ w2_t + b2


if __name__ == "__main__":
    B, T = 2, 128
    key = jax.random.PRNGKey(0)
    kx, k1w, k1b, k2w, k2b = jax.random.split(key, 5)

    x = jax.random.normal(kx, (B, T, N_EMBD), dtype=jnp.float32)

    # Weights generated directly in the kernel layout (== nn.Linear.weight.T):
    #   nn.Linear(n_embd, 4*n_embd).weight has shape (4C, C) -> we store (C, 4C)
    #   nn.Linear(4*n_embd, n_embd).weight has shape (C, 4C) -> we store (4C, C)
    w1_t = jax.random.normal(k1w, (N_EMBD, HIDDEN), jnp.float32) * 0.02
    b1 = jax.random.normal(k1b, (HIDDEN,), jnp.float32) * 0.02
    w2_t = jax.random.normal(k2w, (HIDDEN, N_EMBD), jnp.float32) * 0.02
    b2 = jax.random.normal(k2b, (N_EMBD,), jnp.float32) * 0.02

    out = feed_forward(x, w1_t, b1, w2_t, b2)
    out = jax.block_until_ready(out)

    ref = reference(x, w1_t, b1, w2_t, b2)
    assert out.shape == (B, T, N_EMBD)
    # bf16 MXU path vs f32 reference: loose-but-meaningful tolerance.
    assert jnp.allclose(out, ref, atol=2e-2, rtol=2e-2), "mismatch vs reference"

    print("KERNEL_OK")
</pallas_src>

<mosaic_0001>
module attributes {stable_mosaic.version = 11 : i64} {
  func.func @ffn_kernel(%arg0: i32, %arg1: memref<256x384xbf16, #tpu.memory_space<vmem>>, %arg2: memref<384x1536xbf16, #tpu.memory_space<vmem>>, %arg3: memref<1x1536xf32, #tpu.memory_space<vmem>>, %arg4: memref<1536x384xbf16, #tpu.memory_space<vmem>>, %arg5: memref<1x384xf32, #tpu.memory_space<vmem>>, %arg6: memref<256x384xf32, #tpu.memory_space<vmem>>) attributes {dimension_semantics = [#tpu.dimension_semantics<arbitrary>], iteration_bounds = array<i64: 1>, scalar_prefetch = 0 : i64, scratch_operands = 0 : i64, tpu.core_type = #tpu.core_type<tc>, window_params = [{transform_indices = @transform_0, window_bounds = array<i64: 256, 384>}, {pipeline_mode = #tpu.pipeline_mode<synchronous>, transform_indices = @transform_1, window_bounds = array<i64: 384, 1536>}, {pipeline_mode = #tpu.pipeline_mode<synchronous>, transform_indices = @transform_2, window_bounds = array<i64: 1, 1536>}, {pipeline_mode = #tpu.pipeline_mode<synchronous>, transform_indices = @transform_3, window_bounds = array<i64: 1536, 384>}, {pipeline_mode = #tpu.pipeline_mode<synchronous>, transform_indices = @transform_4, window_bounds = array<i64: 1, 384>}, {transform_indices = @transform_5, window_bounds = array<i64: 256, 384>}]} {
    %c0 = arith.constant 0 : index
    %c0_0 = arith.constant 0 : index
    %0 = vector.load %arg1[%c0, %c0_0] : memref<256x384xbf16, #tpu.memory_space<vmem>>, vector<256x384xbf16>
    %c0_1 = arith.constant 0 : index
    %c0_2 = arith.constant 0 : index
    %1 = vector.load %arg2[%c0_1, %c0_2] : memref<384x1536xbf16, #tpu.memory_space<vmem>>, vector<384x1536xbf16>
    %cst = arith.constant dense<0.000000e+00> : vector<256x1536xf32>
    %2 = tpu.matmul %0, %1, %cst {dimension_numbers = #tpu.dot_dimension_numbers<[1], [0], [0], [1], [0, 0, 1, 1], [], []>} : vector<256x384xbf16>, vector<384x1536xbf16>, vector<256x1536xf32> -> vector<256x1536xf32>
    %c0_3 = arith.constant 0 : index
    %c0_4 = arith.constant 0 : index
    %3 = vector.load %arg3[%c0_3, %c0_4] : memref<1x1536xf32, #tpu.memory_space<vmem>>, vector<1x1536xf32>
    %4 = vector.broadcast %3 : vector<1x1536xf32> to vector<256x1536xf32>
    %5 = arith.addf %2, %4 : vector<256x1536xf32>
    %cst_5 = arith.constant 0.000000e+00 : f32
    %6 = vector.broadcast %cst_5 : f32 to vector<256x1536xf32>
    %7 = arith.maximumf %5, %6 : vector<256x1536xf32>
    %8 = arith.truncf %7 : vector<256x1536xf32> to vector<256x1536xbf16>
    %c0_6 = arith.constant 0 : index
    %c0_7 = arith.constant 0 : index
    %9 = vector.load %arg4[%c0_6, %c0_7] : memref<1536x384xbf16, #tpu.memory_space<vmem>>, vector<1536x384xbf16>
    %cst_8 = arith.constant dense<0.000000e+00> : vector<256x384xf32>
    %10 = tpu.matmul %8, %9, %cst_8 {dimension_numbers = #tpu.dot_dimension_numbers<[1], [0], [0], [1], [0, 0, 1, 1], [], []>} : vector<256x1536xbf16>, vector<1536x384xbf16>, vector<256x384xf32> -> vector<256x384xf32>
    %c0_9 = arith.constant 0 : index
    %c0_10 = arith.constant 0 : index
    %11 = vector.load %arg5[%c0_9, %c0_10] : memref<1x384xf32, #tpu.memory_space<vmem>>, vector<1x384xf32>
    %12 = vector.broadcast %11 : vector<1x384xf32> to vector<256x384xf32>
    %13 = arith.addf %10, %12 : vector<256x384xf32>
    %c0_11 = arith.constant 0 : index
    %c0_12 = arith.constant 0 : index
    %14 = vector.load %arg6[%c0_11, %c0_12] : memref<256x384xf32, #tpu.memory_space<vmem>>, vector<256x384xf32>
    tpu.vector_store %arg6[%c0_11, %c0_12], %13 {strides = array<i32>} : memref<256x384xf32, #tpu.memory_space<vmem>>, vector<256x384xf32>,
    return
  }
  func.func @transform_0(%arg0: i32) -> (i32, i32) {
    %c0_i32 = arith.constant 0 : i32
    %c0_i32_0 = arith.constant 0 : i32
    return %arg0, %c0_i32 : i32, i32
  }
  func.func @transform_1(%arg0: i32) -> (i32, i32) {
    %c0_i32 = arith.constant 0 : i32
    %c0_i32_0 = arith.constant 0 : i32
    %c0_i32_1 = arith.constant 0 : i32
    return %c0_i32, %c0_i32_0 : i32, i32
  }
  func.func @transform_2(%arg0: i32) -> (i32, i32) {
    %c0_i32 = arith.constant 0 : i32
    %c0_i32_0 = arith.constant 0 : i32
    %c0_i32_1 = arith.constant 0 : i32
    return %c0_i32, %c0_i32_0 : i32, i32
  }
  func.func @transform_3(%arg0: i32) -> (i32, i32) {
    %c0_i32 = arith.constant 0 : i32
    %c0_i32_0 = arith.constant 0 : i32
    %c0_i32_1 = arith.constant 0 : i32
    return %c0_i32, %c0_i32_0 : i32, i32
  }
  func.func @transform_4(%arg0: i32) -> (i32, i32) {
    %c0_i32 = arith.constant 0 : i32
    %c0_i32_0 = arith.constant 0 : i32
    %c0_i32_1 = arith.constant 0 : i32
    return %c0_i32, %c0_i32_0 : i32, i32
  }
  func.func @transform_5(%arg0: i32) -> (i32, i32) {
    %c0_i32 = arith.constant 0 : i32
    %c0_i32_0 = arith.constant 0 : i32
    return %arg0, %c0_i32 : i32, i32
  }
}

</mosaic_0001>

<bundles_post_ra>
// kernel: tpu_custom_call.1
= control target key start
LH: loop header
LB: loop body
LE: loop exit
PB: predicated region body
PF: predicated region fallthrough
CT: control target
= control target key end

     0   :  { %10 = vsyncpa [#allocation3], 0  ;;  %s14843_s0 = inlined_call_operand.hbm [shape: bf16[256,384], index: 0, kind: input, shape index: {}]   ;;  %s14844_s1 = inlined_call_operand.hbm [shape: bf16[384,1536], index: 1, kind: input, shape index: {}]   ;;  %s14845_s2 = inlined_call_operand.hbm [shape: f32[1,1536], index: 2, kind: input, shape index: {}]   ;;  %s14846_s3 = inlined_call_operand.hbm [shape: bf16[1536,384], index: 3, kind: input, shape index: {}]   ;;  %s14847_s4 = inlined_call_operand.hbm [shape: f32[1,384], index: 4, kind: input, shape index: {}]   ;;  %s14848_s5 = inlined_call_operand.hbm [shape: f32[256,384], index: 5, kind: output, shape index: {}]  }
   0x1   :  { %11 = vsyncpa [#allocation6], 0 }
   0x2   :  { %12 = vsyncpa [#allocation9], 0 }
   0x3   :  { %13 = vsyncpa [#allocation4], 0  ;;  %s12845_s18 = smov [#allocation5]   ;;  %s12705_s22 = scalar_lea.hbm %s14844_s1, 36864 }
   0x4   :  { %s31_s19 = sshll.u32 %s12845_s18, 4  ;;  %p12706_p0 = scmp.ne.s32.totalorder %s14844_s1, %s12705_s22  ;;  %s32_s19 = int_to_ptr.vmem [resolvable:$true] %s31_s19 }
   0x5   :  { %p12709_p1 = scmp.lt.u32.totalorder %s12705_s22, %s14844_s1 }
   0x7   :  { %p12711_p2 = pnand %p12709_p1, %p12706_p0 }
   0x9   :  { %12714 = shalt.err (!%p12711_p2)
}
   0xa   :  { %s12715_s27 = scalar_lea.vmem %s32_s19, 36864  ;;  %p12720_p4 = scmp.lt.s32.totalorder %s32_s19, %s32_s19 }
   0xb   :  { %p12716_p3 = scmp.ne.s32.totalorder %s32_s19, %s12715_s27  ;;  %p12721_p5 = scmp.lt.s32.totalorder %s12715_s27, %s12715_s27 }
   0xd   :  { %p12722_p6 = por %p12721_p5, %p12720_p4 }
   0xf   :  { %p12723_p7 = pnand %p12722_p6, %p12716_p3 }
  0x11   :  { %12726 = shalt.err (!%p12723_p7)
}
  0x12   :  { %s12846_s28 = smov 768   ;;  %s12847_s29 = smov 48  }
  0x13   :  { %37 = dma.hbm_to_vmem [thread:$0]  %s14844_s1, 36864, %s32_s19, [#allocation6], %s12846_s28, %s12846_s28, %s12847_s29  }
  0x14   :  { %s12848_s7 = smov [#allocation8]   ;;  %s12849_s9 = smov [#allocation2]  }
  0x15   :  { %s53_s8 = sshll.u32 %s12848_s7, 4  ;;  %s19_s10 = sshll.u32 %s12849_s9, 4  ;;  %s54_s8 = int_to_ptr.vmem [resolvable:$true] %s53_s8  ;;  %s20_s10 = int_to_ptr.vmem [resolvable:$true] %s19_s10 }
  0x16   :  { %s12727_s13 = scalar_lea.hbm %s14846_s3, 36864 }
  0x17   :  { %p12728_p8 = scmp.ne.s32.totalorder %s14846_s3, %s12727_s13  ;;  %p12731_p9 = scmp.lt.u32.totalorder %s12727_s13, %s14846_s3 }
  0x19   :  { %p12733_p10 = pnand %p12731_p9, %p12728_p8 }
  0x1b   :  { %12736 = shalt.err (!%p12733_p10)
}
  0x1c   :  { %s12737_s1 = scalar_lea.vmem %s54_s8, 36864  ;;  %p12742_p12 = scmp.lt.s32.totalorder %s54_s8, %s54_s8 }
  0x1d   :  { %p12738_p11 = scmp.ne.s32.totalorder %s54_s8, %s12737_s1  ;;  %p12743_p13 = scmp.lt.s32.totalorder %s12737_s1, %s12737_s1 }
  0x1f   :  { %p12744_p0 = por %p12743_p13, %p12742_p12 }
  0x21   :  { %p12745_p1 = pnand %p12744_p0, %p12738_p11 }
  0x23   :  { %12748 = shalt.err (!%p12745_p1)
}
  0x24   :  { %s12850_s18 = smov 192   ;;  %s12851_s19 = smov 12  }
  0x25   :  { %59 = dma.hbm_to_vmem [thread:$0]  %s14846_s3, 36864, %s54_s8, [#allocation9], %s12850_s18, %s12850_s18, %s12851_s19  }
  0x26   :  { %s12749_s24 = scalar_lea.hbm %s14843_s0, 6144 }
  0x27   :  { %p12750_p2 = scmp.ne.s32.totalorder %s14843_s0, %s12749_s24  ;;  %p12753_p3 = scmp.lt.u32.totalorder %s12749_s24, %s14843_s0 }
  0x29   :  { %p12755_p4 = pnand %p12753_p3, %p12750_p2 }
  0x2b   :  { %12758 = shalt.err (!%p12755_p4)
}
  0x2c   :  { %s12759_s29 = scalar_lea.vmem %s20_s10, 6144  ;;  %p12764_p6 = scmp.lt.s32.totalorder %s20_s10, %s20_s10 }
  0x2d   :  { %p12760_p5 = scmp.ne.s32.totalorder %s20_s10, %s12759_s29  ;;  %p12765_p7 = scmp.lt.s32.totalorder %s12759_s29, %s12759_s29 }
  0x2f   :  { %p12766_p8 = por %p12765_p7, %p12764_p6 }
  0x31   :  { %p12767_p9 = pnand %p12766_p8, %p12760_p5 }
  0x33   :  { %12770 = shalt.err (!%p12767_p9)
}
  0x34   :  { %25 = dma.hbm_to_vmem [thread:$0]  %s14843_s0, 6144, %s20_s10, [#allocation3], %s12850_s18, %s12850_s18, %s12851_s19  }
  0x35   :  { %s12852_s6 = smov [#allocation7]   ;;  %s12853_s8 = smov [#allocation10]  }
  0x36   :  { %s44_s7 = sshll.u32 %s12852_s6, 4  ;;  %s66_s9 = sshll.u32 %s12853_s8, 4  ;;  %s45_s7 = int_to_ptr.vmem [resolvable:$true] %s44_s7  ;;  %s67_s9 = int_to_ptr.vmem [resolvable:$true] %s66_s9 }
  0x37   :  { %s12771_s13 = scalar_lea.hbm %s14845_s2, 192 }
  0x38   :  { %p12772_p10 = scmp.ne.s32.totalorder %s14845_s2, %s12771_s13  ;;  %p12775_p11 = scmp.lt.u32.totalorder %s12771_s13, %s14845_s2 }
  0x3a   :  { %p12777_p12 = pnand %p12775_p11, %p12772_p10 }
  0x3c   :  { %12780 = shalt.err (!%p12777_p12)
}
  0x3d   :  { %s12781_s0 = scalar_lea.vmem %s45_s7, 192  ;;  %p12786_p0 = scmp.lt.s32.totalorder %s45_s7, %s45_s7 }
  0x3e   :  { %p12782_p13 = scmp.ne.s32.totalorder %s45_s7, %s12781_s0  ;;  %p12787_p1 = scmp.lt.s32.totalorder %s12781_s0, %s12781_s0 }
  0x40   :  { %p12788_p2 = por %p12787_p1, %p12786_p0 }
  0x42   :  { %p12789_p3 = pnand %p12788_p2, %p12782_p13 }
  0x44   :  { %12792 = shalt.err (!%p12789_p3)
}
  0x45   :  { %47 = dma.hbm_to_vmem [thread:$0]  %s14845_s2, 192, %s45_s7, [#allocation6]  }
  0x46   :  { %s12793_s20 = scalar_lea.hbm %s14847_s4, 48 }
  0x47   :  { %p12794_p4 = scmp.ne.s32.totalorder %s14847_s4, %s12793_s20  ;;  %p12797_p5 = scmp.lt.u32.totalorder %s12793_s20, %s14847_s4 }
  0x49   :  { %p12799_p6 = pnand %p12797_p5, %p12794_p4 }
  0x4b   :  { %12802 = shalt.err (!%p12799_p6)
}
  0x4c   :  { %s12803_s25 = scalar_lea.vmem %s67_s9, 48  ;;  %s12807_s26 = scalar_lea.vmem %s67_s9, 64 }
  0x4d   :  { %p12804_p7 = scmp.ne.s32.totalorder %s67_s9, %s12803_s25  ;;  %p12808_p8 = scmp.lt.s32.totalorder %s67_s9, %s67_s9 }
  0x4e   :  { %p12809_p9 = scmp.lt.s32.totalorder %s12807_s26, %s12803_s25 }
  0x50   :  { %p12810_p10 = por %p12809_p9, %p12808_p8 }
  0x52   :  { %p12811_p11 = pnand %p12810_p10, %p12804_p7 }
  0x54   :  { %12814 = shalt.err (!%p12811_p11)
}
  0x55   :  { %69 = dma.hbm_to_vmem [thread:$0]  %s14847_s4, 48, %s67_s9, [#allocation9]  }
  0x56   :  { %12837 = dma.done.wait [#allocation3], 6144  }
  0x57   :  { %12838 = vsyncadd [#allocation3], 4294961152 }
  0x58   :  { %12839 = dma.done.wait [#allocation6], 37056  }
  0x59   :  { %12840 = vsyncadd [#allocation6], 4294930240 }
  0x5a   :  { %12841 = dma.done.wait [#allocation9], 36912  }
  0x5b   :  { %12842 = vsyncadd [#allocation9], 4294930384  ;;  %v11727_v0 = vld [vmem:[#allocation5 + $0x4] ss:$48 sps:$4 sm:$0xff]   ;;  %v11729_v1 = vld [vmem:[#allocation5 + $0xc] ss:$48 sps:$4 sm:$0xff]  }
  0x5c   :  { %2198 = vmatprep.subr.bf16.mxu0 %v11727_v0  ;;  %v11731_v2 = vld [vmem:[#allocation5] ss:$48 sps:$4 sm:$0xff]   ;;  %v11732_v3 = vld [vmem:[#allocation5 + $0x8] ss:$48 sps:$4 sm:$0xff]   ;;  %2584 = vmatprep.subr.bf16.mxu1 %v11729_v1  ;;  %v11733_v4 = vld [vmem:[#allocation5 + $0x64] ss:$48 sps:$4 sm:$0xff]  }
  0x5d   :  { %2199 = vmatpush1.bf16.msra.mxu0 %v11731_v2  ;;  %2585 = vmatpush1.bf16.msra.mxu1 %v11732_v3  ;;  %v11735_v5 = vld [vmem:[#allocation5 + $0x6c] ss:$48 sps:$4 sm:$0xff]   ;;  %v11737_v6 = vld [vmem:[#allocation5 + $0x60] ss:$48 sps:$4 sm:$0xff]   ;;  %v11738_v7 = vld [vmem:[#allocation5 + $0x68] ss:$48 sps:$4 sm:$0xff]  }
  0x5e   :  { %2200 = vmatprep.subr.bf16.mxu0 %v11733_v4  ;;  %2586 = vmatprep.subr.bf16.mxu1 %v11735_v5  ;;  %v11739_v8 = vld [vmem:[#allocation5 + $0xc4] ss:$48 sps:$4 sm:$0xff]   ;;  %v11741_v9 = vld [vmem:[#allocation5 + $0xcc] ss:$48 sps:$4 sm:$0xff]   ;;  %v11743_v10 = vld [vmem:[#allocation5 + $0xc0] ss:$48 sps:$4 sm:$0xff]  }
  0x5f   :  { %v11744_v11 = vld [vmem:[#allocation5 + $0xc8] ss:$48 sps:$4 sm:$0xff]   ;;  %v11745_v12 = vld [vmem:[#allocation5 + $0x124] ss:$48 sps:$4 sm:$0xff]   ;;  %v11747_v13 = vld [vmem:[#allocation5 + $0x12c] ss:$48 sps:$4 sm:$0xff]  }
  0x60   :  { %v11749_v14 = vld [vmem:[#allocation5 + $0x120] ss:$48 sps:$4 sm:$0xff]   ;;  %v11750_v15 = vld [vmem:[#allocation5 + $0x128] ss:$48 sps:$4 sm:$0xff]   ;;  %v11751_v16 = vld [vmem:[#allocation5 + $0x184] ss:$48 sps:$4 sm:$0xff]  }
  0x61   :  { %2201 = vmatpush1.bf16.msra.mxu0 %v11737_v6  ;;  %2587 = vmatpush1.bf16.msra.mxu1 %v11738_v7  ;;  %v11753_v17 = vld [vmem:[#allocation5 + $0x18c] ss:$48 sps:$4 sm:$0xff]   ;;  %v11755_v18 = vld [vmem:[#allocation5 + $0x180] ss:$48 sps:$4 sm:$0xff]   ;;  %v11756_v19 = vld [vmem:[#allocation5 + $0x188] ss:$48 sps:$4 sm:$0xff]  }
  0x62   :  { %2202 = vmatprep.subr.bf16.mxu0 %v11739_v8  ;;  %2588 = vmatprep.subr.bf16.mxu1 %v11741_v9  ;;  %v11757_v20 = vld [vmem:[#allocation5 + $0x1e4] ss:$48 sps:$4 sm:$0xff]   ;;  %v11759_v21 = vld [vmem:[#allocation5 + $0x1ec] ss:$48 sps:$4 sm:$0xff]   ;;  %v11761_v22 = vld [vmem:[#allocation5 + $0x1e0] ss:$48 sps:$4 sm:$0xff]  }
  0x63   :  { %v11762_v23 = vld [vmem:[#allocation5 + $0x1e8] ss:$48 sps:$4 sm:$0xff]   ;;  %v11763_v24 = vld [vmem:[#allocation5 + $0x244] ss:$48 sps:$4 sm:$0xff]   ;;  %v11765_v25 = vld [vmem:[#allocation5 + $0x24c] ss:$48 sps:$4 sm:$0xff]  }
  0x64   :  { %v11767_v26 = vld [vmem:[#allocation5 + $0x240] ss:$48 sps:$4 sm:$0xff]   ;;  %v11768_v27 = vld [vmem:[#allocation5 + $0x248] ss:$48 sps:$4 sm:$0xff]   ;;  %v11769_v28 = vld [vmem:[#allocation5 + $0x2a4] ss:$48 sps:$4 sm:$0xff]  }
  0x65   :  { %2203 = vmatpush1.bf16.msra.mxu0 %v11743_v10  ;;  %2589 = vmatpush1.bf16.msra.mxu1 %v11744_v11  ;;  %v11771_v29 = vld [vmem:[#allocation5 + $0x2ac] ss:$48 sps:$4 sm:$0xff]   ;;  %v11773_v30 = vld [vmem:[#allocation5 + $0x2a0] ss:$48 sps:$4 sm:$0xff]   ;;  %v11774_v31 = vld [vmem:[#allocation5 + $0x2a8] ss:$48 sps:$4 sm:$0xff]  }
  0x66   :  { %2204 = vmatprep.subr.bf16.mxu0 %v11745_v12  ;;  %2590 = vmatprep.subr.bf16.mxu1 %v11747_v13  ;;  %v11775_v32 = vld [vmem:[#allocation5 + $0x304] ss:$48 sps:$4 sm:$0xff]   ;;  %v11777_v33 = vld [vmem:[#allocation5 + $0x30c] ss:$48 sps:$4 sm:$0xff]   ;;  %v11779_v34 = vld [vmem:[#allocation5 + $0x300] ss:$48 sps:$4 sm:$0xff]  }
  0x67   :  { %v11780_v35 = vld [vmem:[#allocation5 + $0x308] ss:$48 sps:$4 sm:$0xff]   ;;  %v11781_v36 = vld [vmem:[#allocation5 + $0x364] ss:$48 sps:$4 sm:$0xff]   ;;  %v11783_v37 = vld [vmem:[#allocation5 + $0x36c] ss:$48 sps:$4 sm:$0xff]  }
  0x68   :  { %v11785_v38 = vld [vmem:[#allocation5 + $0x360] ss:$48 sps:$4 sm:$0xff]   ;;  %v11786_v39 = vld [vmem:[#allocation5 + $0x368] ss:$48 sps:$4 sm:$0xff]   ;;  %v11787_v40 = vld [vmem:[#allocation5 + $0x3c4] ss:$48 sps:$4 sm:$0xff]  }
  0x69   :  { %2205 = vmatpush1.bf16.msra.mxu0 %v11749_v14  ;;  %2591 = vmatpush1.bf16.msra.mxu1 %v11750_v15  ;;  %v11789_v41 = vld [vmem:[#allocation5 + $0x3cc] ss:$48 sps:$4 sm:$0xff]   ;;  %v11791_v42 = vld [vmem:[#allocation5 + $0x3c0] ss:$48 sps:$4 sm:$0xff]   ;;  %v11792_v43 = vld [vmem:[#allocation5 + $0x3c8] ss:$48 sps:$4 sm:$0xff]  }
  0x6a   :  { %2206 = vmatprep.subr.bf16.mxu0 %v11751_v16  ;;  %2592 = vmatprep.subr.bf16.mxu1 %v11753_v17  ;;  %v11793_v44 = vld [vmem:[#allocation5 + $0x424] ss:$48 sps:$4 sm:$0xff]   ;;  %v11795_v45 = vld [vmem:[#allocation5 + $0x42c] ss:$48 sps:$4 sm:$0xff]   ;;  %v11797_v46 = vld [vmem:[#allocation5 + $0x420] ss:$48 sps:$4 sm:$0xff]  }
  0x6b   :  { %v11798_v47 = vld [vmem:[#allocation5 + $0x428] ss:$48 sps:$4 sm:$0xff]   ;;  %v11823_v48 = vld [vmem:[#allocation2 + $0x4] ss:$12 sps:$4 sm:$0xff]   ;;  %v11801_v50 = vld [vmem:[#allocation5 + $0x48c] ss:$48 sps:$4 sm:$0xff]  }
  0x6c   :  { %v11799_v49 = vld [vmem:[#allocation5 + $0x484] ss:$48 sps:$4 sm:$0xff]   ;;  %2230 = vmatprep.mubr.bf16.mxu0 %v11823_v48  ;;  %2616 = vmatprep.mubr.bf16.mxu1 %v11823_v48  ;;  %v11803_v51 = vld [vmem:[#allocation5 + $0x480] ss:$48 sps:$4 sm:$0xff]   ;;  %v11804_v52 = vld [vmem:[#allocation5 + $0x488] ss:$48 sps:$4 sm:$0xff]  }
  0x6d   :  { %2207 = vmatpush1.bf16.msra.mxu0 %v11755_v18  ;;  %2593 = vmatpush1.bf16.msra.mxu1 %v11756_v19  ;;  %v11805_v53 = vld [vmem:[#allocation5 + $0x4e4] ss:$48 sps:$4 sm:$0xff]   ;;  %v11807_v54 = vld [vmem:[#allocation5 + $0x4ec] ss:$48 sps:$4 sm:$0xff]   ;;  %v11809_v55 = vld [vmem:[#allocation5 + $0x4e0] ss:$48 sps:$4 sm:$0xff]  }
  0x6e   :  { %2208 = vmatprep.subr.bf16.mxu0 %v11757_v20  ;;  %2594 = vmatprep.subr.bf16.mxu1 %v11759_v21  ;;  %v11810_v56 = vld [vmem:[#allocation5 + $0x4e8] ss:$48 sps:$4 sm:$0xff]   ;;  %v11811_v57 = vld [vmem:[#allocation5 + $0x544] ss:$48 sps:$4 sm:$0xff]   ;;  %v11813_v58 = vld [vmem:[#allocation5 + $0x54c] ss:$48 sps:$4 sm:$0xff]  }
  0x6f   :  { %v11815_v59 = vld [vmem:[#allocation5 + $0x540] ss:$48 sps:$4 sm:$0xff]   ;;  %v11816_v60 = vld [vmem:[#allocation5 + $0x548] ss:$48 sps:$4 sm:$0xff]   ;;  %v11817_v61 = vld [vmem:[#allocation5 + $0x5a4] ss:$48 sps:$4 sm:$0xff]  }
  0x70   :  { %v11819_v62 = vld [vmem:[#allocation5 + $0x5ac] ss:$48 sps:$4 sm:$0xff]   ;;  %v11821_v63 = vld [vmem:[#allocation5 + $0x5a0] ss:$48 sps:$4 sm:$0xff]   ;;  %v11822_v0 = vld [vmem:[#allocation5 + $0x5a8] ss:$48 sps:$4 sm:$0xff]  }
  0x71   :  { %2209 = vmatpush1.bf16.msra.mxu0 %v11761_v22  ;;  %2595 = vmatpush1.bf16.msra.mxu1 %v11762_v23  ;;  %v11828_v1 = vld [vmem:[#allocation5 + $0x60c] ss:$48 sps:$4 sm:$0xff]   ;;  %v11831_v2 = vld [vmem:[#allocation5 + $0x604] ss:$48 sps:$4 sm:$0xff]   ;;  %v11826_v4 = vld [vmem:[#allocation5 + $0x608] ss:$48 sps:$4 sm:$0xff]  }
  0x72   :  { %2210 = vmatprep.subr.bf16.mxu0 %v11763_v24  ;;  %2596 = vmatprep.subr.bf16.mxu1 %v11765_v25  ;;  %v11825_v3 = vld [vmem:[#allocation2] ss:$12 sps:$4 sm:$0xff]   ;;  %v11832_v6 = vld [vmem:[#allocation2 + $0x1c] ss:$12 sps:$4 sm:$0xff]   ;;  %v11843_v8 = vld [vmem:[#allocation5 + $0x664] ss:$48 sps:$4 sm:$0xff]  }
  0x73   :  { %v11829_v5 = vld [vmem:[#allocation5 + $0x600] ss:$48 sps:$4 sm:$0xff]   ;;  %v11840_v7 = vld [vmem:[#allocation5 + $0x66c] ss:$48 sps:$4 sm:$0xff]   ;;  %v11838_v9 = vld [vmem:[#allocation5 + $0x668] ss:$48 sps:$4 sm:$0xff]  }
  0x74   :  { %v11841_v10 = vld [vmem:[#allocation5 + $0x660] ss:$48 sps:$4 sm:$0xff]   ;;  %v11852_v11 = vld [vmem:[#allocation5 + $0x6cc] ss:$48 sps:$4 sm:$0xff]   ;;  %v11855_v12 = vld [vmem:[#allocation5 + $0x6c4] ss:$48 sps:$4 sm:$0xff]  }
  0x75   :  { %2211 = vmatpush1.bf16.msra.mxu0 %v11767_v26  ;;  %2597 = vmatpush1.bf16.msra.mxu1 %v11768_v27  ;;  %v11834_v13 = vld [vmem:[#allocation2 + $0x18] ss:$12 sps:$4 sm:$0xff]   ;;  %v11835_v14 = vld [vmem:[#allocation2 + $0x34] ss:$12 sps:$4 sm:$0xff]   ;;  %v11864_v17 = vld [vmem:[#allocation5 + $0x72c] ss:$48 sps:$4 sm:$0xff]  }
  0x76   :  { %2212 = vmatprep.subr.bf16.mxu0 %v11769_v28  ;;  %2598 = vmatprep.subr.bf16.mxu1 %v11771_v29  ;;  %v11850_v15 = vld [vmem:[#allocation5 + $0x6c8] ss:$48 sps:$4 sm:$0xff]   ;;  %v11853_v16 = vld [vmem:[#allocation5 + $0x6c0] ss:$48 sps:$4 sm:$0xff]   ;;  %v11867_v18 = vld [vmem:[#allocation5 + $0x724] ss:$48 sps:$4 sm:$0xff]  }
  0x77   :  { %v11862_v19 = vld [vmem:[#allocation5 + $0x728] ss:$48 sps:$4 sm:$0xff]   ;;  %v11865_v20 = vld [vmem:[#allocation5 + $0x720] ss:$48 sps:$4 sm:$0xff]   ;;  %v11876_v21 = vld [vmem:[#allocation5 + $0x78c] ss:$48 sps:$4 sm:$0xff]  }
  0x78   :  { %v11879_v22 = vld [vmem:[#allocation5 + $0x784] ss:$48 sps:$4 sm:$0xff]   ;;  %v11837_v23 = vld [vmem:[#allocation2 + $0x30] ss:$12 sps:$4 sm:$0xff]   ;;  %v11844_v24 = vld [vmem:[#allocation2 + $0x4c] ss:$12 sps:$4 sm:$0xff]  }
  0x79   :  { %2213 = vmatpush1.bf16.msra.mxu0 %v11773_v30  ;;  %2599 = vmatpush1.bf16.msra.mxu1 %v11774_v31  ;;  %v11874_v25 = vld [vmem:[#allocation5 + $0x788] ss:$48 sps:$4 sm:$0xff]   ;;  %v11877_v26 = vld [vmem:[#allocation5 + $0x780] ss:$48 sps:$4 sm:$0xff]   ;;  %v11888_v27 = vld [vmem:[#allocation5 + $0x7ec] ss:$48 sps:$4 sm:$0xff]  }
  0x7a   :  { %2214 = vmatprep.subr.bf16.mxu0 %v11775_v32  ;;  %2600 = vmatprep.subr.bf16.mxu1 %v11777_v33  ;;  %v11891_v28 = vld [vmem:[#allocation5 + $0x7e4] ss:$48 sps:$4 sm:$0xff]   ;;  %v11886_v29 = vld [vmem:[#allocation5 + $0x7e8] ss:$48 sps:$4 sm:$0xff]   ;;  %v11889_v30 = vld [vmem:[#allocation5 + $0x7e0] ss:$48 sps:$4 sm:$0xff]  }
  0x7b   :  { %v11900_v31 = vld [vmem:[#allocation5 + $0x84c] ss:$48 sps:$4 sm:$0xff]   ;;  %v11903_v32 = vld [vmem:[#allocation5 + $0x844] ss:$48 sps:$4 sm:$0xff]   ;;  %s12855_s4 = smov [#allocation11]  }
  0x7c   :  { %v11846_v33 = vld [vmem:[#allocation2 + $0x48] ss:$12 sps:$4 sm:$0xff]   ;;  %v11868_v48 = vld [vmem:[#allocation2 + $0xac] ss:$12 sps:$4 sm:$0xff]   ;;  %s9252_s28 = sshll.u32 %s12855_s4, 4  ;;  %s9253_s28 = int_to_ptr.vmem [resolvable:$true] %s9252_s28 }
  0x7d   :  { %2215 = vmatpush1.bf16.msra.mxu0 %v11779_v34  ;;  %2601 = vmatpush1.bf16.msra.mxu1 %v11780_v35  ;;  %v11847_v34 = vld [vmem:[#allocation2 + $0x64] ss:$12 sps:$4 sm:$0xff]   ;;  %v11898_v35 = vld [vmem:[#allocation5 + $0x848] ss:$48 sps:$4 sm:$0xff]   ;;  %s12815_s29 = scalar_lea.vmem %s9253_s28, 12288  ;;  %p12820_p13 = scmp.lt.s32.totalorder %s9253_s28, %s9253_s28 }
  0x7e   :  { %2216 = vmatprep.subr.bf16.mxu0 %v11781_v36  ;;  %2602 = vmatprep.subr.bf16.mxu1 %v11783_v37  ;;  %v11901_v36 = vld [vmem:[#allocation5 + $0x840] ss:$48 sps:$4 sm:$0xff]   ;;  %v11912_v37 = vld [vmem:[#allocation5 + $0x8ac] ss:$48 sps:$4 sm:$0xff]   ;;  %p12816_p12 = scmp.ne.s32.totalorder %s9253_s28, %s12815_s29  ;;  %p12821_p0 = scmp.lt.s32.totalorder %s12815_s29, %s12815_s29 }
  0x80   :  { %p12822_p1 = por %p12821_p0, %p12820_p13 }
  0x81   :  { %2217 = vmatpush1.bf16.msra.mxu0 %v11785_v38  ;;  %2603 = vmatpush1.bf16.msra.mxu1 %v11786_v39  ;;  %v11915_v38 = vld [vmem:[#allocation5 + $0x8a4] ss:$48 sps:$4 sm:$0xff]   ;;  %v11910_v39 = vld [vmem:[#allocation5 + $0x8a8] ss:$48 sps:$4 sm:$0xff]  }
  0x82   :  { %2218 = vmatprep.subr.bf16.mxu0 %v11787_v40  ;;  %2604 = vmatprep.subr.bf16.mxu1 %v11789_v41  ;;  %v11913_v40 = vld [vmem:[#allocation5 + $0x8a0] ss:$48 sps:$4 sm:$0xff]   ;;  %v11922_v41 = vld [vmem:[#allocation5 + $0x1c] ss:$48 sps:$4 sm:$0xff]   ;;  %p12823_p2 = pnand %p12822_p1, %p12816_p12 }
  0x85   :  { %2219 = vmatpush1.bf16.msra.mxu0 %v11791_v42  ;;  %2605 = vmatpush1.bf16.msra.mxu1 %v11792_v43  ;;  %v11925_v42 = vld [vmem:[#allocation5 + $0x14] ss:$48 sps:$4 sm:$0xff]   ;;  %v11849_v43 = vld [vmem:[#allocation2 + $0x60] ss:$12 sps:$4 sm:$0xff]  }
  0x86   :  { %2220 = vmatprep.subr.bf16.mxu0 %v11793_v44  ;;  %2606 = vmatprep.subr.bf16.mxu1 %v11795_v45  ;;  %v11856_v44 = vld [vmem:[#allocation2 + $0x7c] ss:$12 sps:$4 sm:$0xff]   ;;  %v11858_v45 = vld [vmem:[#allocation2 + $0x78] ss:$12 sps:$4 sm:$0xff]  }
  0x89   :  { %2221 = vmatpush1.bf16.msra.mxu0 %v11797_v46  ;;  %2607 = vmatpush1.bf16.msra.mxu1 %v11798_v47  ;;  %v11859_v46 = vld [vmem:[#allocation2 + $0x94] ss:$12 sps:$4 sm:$0xff]   ;;  %v11861_v47 = vld [vmem:[#allocation2 + $0x90] ss:$12 sps:$4 sm:$0xff]  }
  0x8a   :  { %2222 = vmatprep.subr.bf16.mxu0 %v11799_v49  ;;  %2608 = vmatprep.subr.bf16.mxu1 %v11801_v50  ;;  %v11870_v49 = vld [vmem:[#allocation2 + $0xa8] ss:$12 sps:$4 sm:$0xff]   ;;  %v11871_v50 = vld [vmem:[#allocation2 + $0xc4] ss:$12 sps:$4 sm:$0xff]  }
  0x8d   :  { %2223 = vmatpush1.bf16.msra.mxu0 %v11803_v51  ;;  %2609 = vmatpush1.bf16.msra.mxu1 %v11804_v52  ;;  %v11873_v51 = vld [vmem:[#allocation2 + $0xc0] ss:$12 sps:$4 sm:$0xff]   ;;  %v11880_v52 = vld [vmem:[#allocation2 + $0xdc] ss:$12 sps:$4 sm:$0xff]  }
  0x8e   :  { %2224 = vmatprep.subr.bf16.mxu0 %v11805_v53  ;;  %2610 = vmatprep.subr.bf16.mxu1 %v11807_v54  ;;  %v11882_v53 = vld [vmem:[#allocation2 + $0xd8] ss:$12 sps:$4 sm:$0xff]   ;;  %v11883_v54 = vld [vmem:[#allocation2 + $0xf4] ss:$12 sps:$4 sm:$0xff]  }
  0x91   :  { %2225 = vmatpush1.bf16.msra.mxu0 %v11809_v55  ;;  %2611 = vmatpush1.bf16.msra.mxu1 %v11810_v56  ;;  %v11885_v55 = vld [vmem:[#allocation2 + $0xf0] ss:$12 sps:$4 sm:$0xff]   ;;  %v11892_v56 = vld [vmem:[#allocation2 + $0x10c] ss:$12 sps:$4 sm:$0xff]  }
  0x92   :  { %2226 = vmatprep.subr.bf16.mxu0 %v11811_v57  ;;  %2612 = vmatprep.subr.bf16.mxu1 %v11813_v58  ;;  %v11894_v57 = vld [vmem:[#allocation2 + $0x108] ss:$12 sps:$4 sm:$0xff]   ;;  %v11895_v58 = vld [vmem:[#allocation2 + $0x124] ss:$12 sps:$4 sm:$0xff]  }
  0x95   :  { %2227 = vmatpush1.bf16.msra.mxu0 %v11815_v59  ;;  %2613 = vmatpush1.bf16.msra.mxu1 %v11816_v60  ;;  %v11897_v59 = vld [vmem:[#allocation2 + $0x120] ss:$12 sps:$4 sm:$0xff]   ;;  %v11904_v60 = vld [vmem:[#allocation2 + $0x13c] ss:$12 sps:$4 sm:$0xff]  }
  0x96   :  { %2228 = vmatprep.subr.bf16.mxu0 %v11817_v61  ;;  %2614 = vmatprep.subr.bf16.mxu1 %v11819_v62  ;;  %v11906_v61 = vld [vmem:[#allocation2 + $0x138] ss:$12 sps:$4 sm:$0xff]   ;;  %v11907_v62 = vld [vmem:[#allocation2 + $0x154] ss:$12 sps:$4 sm:$0xff]  }
  0x99   :  { %2229 = vmatpush1.bf16.msra.mxu0 %v11821_v63  ;;  %2615 = vmatpush1.bf16.msra.mxu1 %v11822_v0  ;;  %v11909_v63 = vld [vmem:[#allocation2 + $0x150] ss:$12 sps:$4 sm:$0xff]   ;;  %v11916_v0 = vld [vmem:[#allocation2 + $0x16c] ss:$12 sps:$4 sm:$0xff]  }
  0x9a   :  { %2777 = vmatprep.subr.bf16.mxu1 %v11828_v1  ;;  %2391 = vmatprep.subr.bf16.mxu0 %v11831_v2  ;;  %v11918_v1 = vld [vmem:[#allocation2 + $0x168] ss:$12 sps:$4 sm:$0xff]   ;;  %v14850_v2 = vmov 0  }
  0x9c   :  { %2231 = vmatmul.mubr.bf16.vlgmr.msra.gmra.mrb[0].mxu0 %v11825_v3  ;;  %2617 = vmatmul.mubr.bf16.vlgmr.msra.gmra.mrb[0].mxu1 %v11825_v3  ;;  %v11919_v3 = vld [vmem:[#allocation2 + $0x8] ss:$12 sps:$4 sm:$0xff]  }
  0x9d   :  { %2778 = vmatpush1.bf16.msra.mxu1 %v11826_v4  ;;  %2392 = vmatpush1.bf16.msra.mxu0 %v11829_v5  ;;  %v11920_v4 = vld [vmem:[#allocation5 + $0x18] ss:$48 sps:$4 sm:$0xff]   ;;  %v11923_v5 = vld [vmem:[#allocation5 + $0x10] ss:$48 sps:$4 sm:$0xff]  }
  0x9e   :  { %2240 = vmatprep.mubr.bf16.mxu0 %v11832_v6  ;;  %2626 = vmatprep.mubr.bf16.mxu1 %v11832_v6  ;;  %v11929_v6 = vld [vmem:[#allocation5 + $0x7c] ss:$48 sps:$4 sm:$0xff]  }
  0x9f   :  { %2779 = vmatprep.subr.bf16.mxu1 %v11840_v7  ;;  %2393 = vmatprep.subr.bf16.mxu0 %v11843_v8  ;;  %v11932_v7 = vld [vmem:[#allocation5 + $0x74] ss:$48 sps:$4 sm:$0xff]   ;;  %v11927_v8 = vld [vmem:[#allocation5 + $0x78] ss:$48 sps:$4 sm:$0xff]  }
  0xa1   :  { %2780 = vmatpush1.bf16.msra.mxu1 %v11838_v9  ;;  %2394 = vmatpush1.bf16.msra.mxu0 %v11841_v10  ;;  %v11930_v9 = vld [vmem:[#allocation5 + $0x70] ss:$48 sps:$4 sm:$0xff]   ;;  %v11936_v10 = vld [vmem:[#allocation5 + $0xdc] ss:$48 sps:$4 sm:$0xff]  }
  0xa2   :  { %2781 = vmatprep.subr.bf16.mxu1 %v11852_v11  ;;  %2395 = vmatprep.subr.bf16.mxu0 %v11855_v12  ;;  %v11939_v11 = vld [vmem:[#allocation5 + $0xd4] ss:$48 sps:$4 sm:$0xff]   ;;  %v11926_v12 = vld [vmem:[#allocation2 + $0x20] ss:$12 sps:$4 sm:$0xff]  }
  0xa4   :  { %2241 = vmatmul.mubr.bf16.gmra.mrb[4].mxu0 %v11834_v13  ;;  %2627 = vmatmul.mubr.bf16.gmra.mrb[4].mxu1 %v11834_v13  ;;  %v11934_v13 = vld [vmem:[#allocation5 + $0xd8] ss:$48 sps:$4 sm:$0xff]  }
  0xa5   :  { %2250 = vmatprep.mubr.bf16.mxu0 %v11835_v14  ;;  %2636 = vmatprep.mubr.bf16.mxu1 %v11835_v14  ;;  %v11937_v14 = vld [vmem:[#allocation5 + $0xd0] ss:$48 sps:$4 sm:$0xff]  }
  0xa6   :  { %2782 = vmatpush1.bf16.msra.mxu1 %v11850_v15  ;;  %2396 = vmatpush1.bf16.msra.mxu0 %v11853_v16  ;;  %v11943_v15 = vld [vmem:[#allocation5 + $0x13c] ss:$48 sps:$4 sm:$0xff]   ;;  %v11946_v16 = vld [vmem:[#allocation5 + $0x134] ss:$48 sps:$4 sm:$0xff]  }
  0xa7   :  { %2783 = vmatprep.subr.bf16.mxu1 %v11864_v17  ;;  %2397 = vmatprep.subr.bf16.mxu0 %v11867_v18  ;;  %v11941_v17 = vld [vmem:[#allocation5 + $0x138] ss:$48 sps:$4 sm:$0xff]   ;;  %v11944_v18 = vld [vmem:[#allocation5 + $0x130] ss:$48 sps:$4 sm:$0xff]  }
  0xaa   :  { %2784 = vmatpush1.bf16.msra.mxu1 %v11862_v19  ;;  %2398 = vmatpush1.bf16.msra.mxu0 %v11865_v20  ;;  %v11950_v19 = vld [vmem:[#allocation5 + $0x19c] ss:$48 sps:$4 sm:$0xff]   ;;  %v11953_v20 = vld [vmem:[#allocation5 + $0x194] ss:$48 sps:$4 sm:$0xff]  }
  0xab   :  { %2785 = vmatprep.subr.bf16.mxu1 %v11876_v21  ;;  %2399 = vmatprep.subr.bf16.mxu0 %v11879_v22  ;;  %v11933_v21 = vld [vmem:[#allocation2 + $0x38] ss:$12 sps:$4 sm:$0xff]  }
  0xac   :  { %2251 = vmatmul.mubr.bf16.gmra.mrb[8].mxu0 %v11837_v23  ;;  %2637 = vmatmul.mubr.bf16.gmra.mrb[8].mxu1 %v11837_v23  ;;  %v11948_v22 = vld [vmem:[#allocation5 + $0x198] ss:$48 sps:$4 sm:$0xff]   ;;  %v11951_v23 = vld [vmem:[#allocation5 + $0x190] ss:$48 sps:$4 sm:$0xff]  }
  0xad   :  { %2260 = vmatprep.mubr.bf16.mxu0 %v11844_v24  ;;  %2646 = vmatprep.mubr.bf16.mxu1 %v11844_v24  ;;  %v11957_v24 = vld [vmem:[#allocation5 + $0x1fc] ss:$48 sps:$4 sm:$0xff]  }
  0xae   :  { %2786 = vmatpush1.bf16.msra.mxu1 %v11874_v25  ;;  %2400 = vmatpush1.bf16.msra.mxu0 %v11877_v26  ;;  %v11960_v25 = vld [vmem:[#allocation5 + $0x1f4] ss:$48 sps:$4 sm:$0xff]   ;;  %v11955_v26 = vld [vmem:[#allocation5 + $0x1f8] ss:$48 sps:$4 sm:$0xff]  }
  0xaf   :  { %2787 = vmatprep.subr.bf16.mxu1 %v11888_v27  ;;  %2401 = vmatprep.subr.bf16.mxu0 %v11891_v28  ;;  %v11958_v27 = vld [vmem:[#allocation5 + $0x1f0] ss:$48 sps:$4 sm:$0xff]   ;;  %v11964_v28 = vld [vmem:[#allocation5 + $0x25c] ss:$48 sps:$4 sm:$0xff]  }
  0xb2   :  { %2788 = vmatpush1.bf16.msra.mxu1 %v11886_v29  ;;  %2402 = vmatpush1.bf16.msra.mxu0 %v11889_v30  ;;  %v11967_v29 = vld [vmem:[#allocation5 + $0x254] ss:$48 sps:$4 sm:$0xff]   ;;  %v11940_v30 = vld [vmem:[#allocation2 + $0x50] ss:$12 sps:$4 sm:$0xff]  }
  0xb3   :  { %2789 = vmatprep.subr.bf16.mxu1 %v11900_v31  ;;  %2403 = vmatprep.subr.bf16.mxu0 %v11903_v32  ;;  %v11962_v31 = vld [vmem:[#allocation5 + $0x258] ss:$48 sps:$4 sm:$0xff]   ;;  %v11965_v32 = vld [vmem:[#allocation5 + $0x250] ss:$48 sps:$4 sm:$0xff]  }
  0xb4   :  { %2261 = vmatmul.mubr.bf16.gmra.mrb[12].mxu0 %v11846_v33  ;;  %2647 = vmatmul.mubr.bf16.gmra.mrb[12].mxu1 %v11846_v33  ;;  %v11971_v33 = vld [vmem:[#allocation5 + $0x2bc] ss:$48 sps:$4 sm:$0xff]  }
  0xb5   :  { %2270 = vmatprep.mubr.bf16.mxu0 %v11847_v34  ;;  %2656 = vmatprep.mubr.bf16.mxu1 %v11847_v34  ;;  %v11974_v34 = vld [vmem:[#allocation5 + $0x2b4] ss:$48 sps:$4 sm:$0xff]  }
  0xb6   :  { %2790 = vmatpush1.bf16.msra.mxu1 %v11898_v35  ;;  %2404 = vmatpush1.bf16.msra.mxu0 %v11901_v36  ;;  %v11969_v35 = vld [vmem:[#allocation5 + $0x2b8] ss:$48 sps:$4 sm:$0xff]   ;;  %v11972_v36 = vld [vmem:[#allocation5 + $0x2b0] ss:$48 sps:$4 sm:$0xff]  }
  0xb7   :  { %2791 = vmatprep.subr.bf16.mxu1 %v11912_v37  ;;  %2405 = vmatprep.subr.bf16.mxu0 %v11915_v38  ;;  %v11978_v37 = vld [vmem:[#allocation5 + $0x31c] ss:$48 sps:$4 sm:$0xff]   ;;  %v11981_v38 = vld [vmem:[#allocation5 + $0x314] ss:$48 sps:$4 sm:$0xff]  }
  0xba   :  { %2792 = vmatpush1.bf16.msra.mxu1 %v11910_v39  ;;  %2406 = vmatpush1.bf16.msra.mxu0 %v11913_v40  ;;  %v11947_v39 = vld [vmem:[#allocation2 + $0x68] ss:$12 sps:$4 sm:$0xff]  }
  0xbb   :  { %3356 = vmatprep.subr.bf16.mxu1 %v11922_v41  ;;  %2970 = vmatprep.subr.bf16.mxu0 %v11925_v42  ;;  %v11976_v40 = vld [vmem:[#allocation5 + $0x318] ss:$48 sps:$4 sm:$0xff]   ;;  %v11979_v41 = vld [vmem:[#allocation5 + $0x310] ss:$48 sps:$4 sm:$0xff]   ;;  %v11985_v42 = vld [vmem:[#allocation5 + $0x37c] ss:$48 sps:$4 sm:$0xff]  }
  0xbc   :  { %2271 = vmatmul.mubr.bf16.gmra.mrb[16].mxu0 %v11849_v43  ;;  %2657 = vmatmul.mubr.bf16.gmra.mrb[16].mxu1 %v11849_v43  ;;  %v11988_v43 = vld [vmem:[#allocation5 + $0x374] ss:$48 sps:$4 sm:$0xff]  }
  0xbd   :  { %2280 = vmatprep.mubr.bf16.mxu0 %v11856_v44  ;;  %2666 = vmatprep.mubr.bf16.mxu1 %v11856_v44  ;;  %v11983_v44 = vld [vmem:[#allocation5 + $0x378] ss:$48 sps:$4 sm:$0xff]  }
  0xc4   :  { %2281 = vmatmul.mubr.bf16.gmra.mrb[20].mxu0 %v11858_v45  ;;  %2667 = vmatmul.mubr.bf16.gmra.mrb[20].mxu1 %v11858_v45  ;;  %v11986_v45 = vld [vmem:[#allocation5 + $0x370] ss:$48 sps:$4 sm:$0xff]  }
  0xc5   :  { %2290 = vmatprep.mubr.bf16.mxu0 %v11859_v46  ;;  %2676 = vmatprep.mubr.bf16.mxu1 %v11859_v46  ;;  %v11992_v46 = vld [vmem:[#allocation5 + $0x3dc] ss:$48 sps:$4 sm:$0xff]  }
  0xcc   :  { %2291 = vmatmul.mubr.bf16.gmra.mrb[24].mxu0 %v11861_v47  ;;  %2677 = vmatmul.mubr.bf16.gmra.mrb[24].mxu1 %v11861_v47  ;;  %v11995_v47 = vld [vmem:[#allocation5 + $0x3d4] ss:$48 sps:$4 sm:$0xff]  }
  0xcd   :  { %2300 = vmatprep.mubr.bf16.mxu0 %v11868_v48  ;;  %2686 = vmatprep.mubr.bf16.mxu1 %v11868_v48  ;;  %v11954_v48 = vld [vmem:[#allocation2 + $0x80] ss:$12 sps:$4 sm:$0xff]  }
  0xd4   :  { %2301 = vmatmul.mubr.bf16.gmra.mrb[28].mxu0 %v11870_v49  ;;  %2687 = vmatmul.mubr.bf16.gmra.mrb[28].mxu1 %v11870_v49  ;;  %v11990_v49 = vld [vmem:[#allocation5 + $0x3d8] ss:$48 sps:$4 sm:$0xff]  }
  0xd5   :  { %2310 = vmatprep.mubr.bf16.mxu0 %v11871_v50  ;;  %2696 = vmatprep.mubr.bf16.mxu1 %v11871_v50  ;;  %v11993_v50 = vld [vmem:[#allocation5 + $0x3d0] ss:$48 sps:$4 sm:$0xff]  }
  0xdc   :  { %2311 = vmatmul.mubr.bf16.gmra.mrb[32].mxu0 %v11873_v51  ;;  %2697 = vmatmul.mubr.bf16.gmra.mrb[32].mxu1 %v11873_v51  ;;  %v11999_v51 = vld [vmem:[#allocation5 + $0x43c] ss:$48 sps:$4 sm:$0xff]  }
  0xdd   :  { %2320 = vmatprep.mubr.bf16.mxu0 %v11880_v52  ;;  %2706 = vmatprep.mubr.bf16.mxu1 %v11880_v52  ;;  %v12002_v52 = vld [vmem:[#allocation5 + $0x434] ss:$48 sps:$4 sm:$0xff]  }
  0xe4   :  { %2321 = vmatmul.mubr.bf16.gmra.mrb[36].mxu0 %v11882_v53  ;;  %2707 = vmatmul.mubr.bf16.gmra.mrb[36].mxu1 %v11882_v53  ;;  %v11997_v53 = vld [vmem:[#allocation5 + $0x438] ss:$48 sps:$4 sm:$0xff]  }
  0xe5   :  { %2330 = vmatprep.mubr.bf16.mxu0 %v11883_v54  ;;  %2716 = vmatprep.mubr.bf16.mxu1 %v11883_v54  ;;  %v12000_v54 = vld [vmem:[#allocation5 + $0x430] ss:$48 sps:$4 sm:$0xff]  }
  0xec   :  { %2331 = vmatmul.mubr.bf16.gmra.mrb[40].mxu0 %v11885_v55  ;;  %2717 = vmatmul.mubr.bf16.gmra.mrb[40].mxu1 %v11885_v55  ;;  %v12006_v55 = vld [vmem:[#allocation5 + $0x49c] ss:$48 sps:$4 sm:$0xff]  }
  0xed   :  { %2340 = vmatprep.mubr.bf16.mxu0 %v11892_v56  ;;  %2726 = vmatprep.mubr.bf16.mxu1 %v11892_v56  ;;  %v12009_v56 = vld [vmem:[#allocation5 + $0x494] ss:$48 sps:$4 sm:$0xff]  }
  0xf4   :  { %2341 = vmatmul.mubr.bf16.gmra.mrb[44].mxu0 %v11894_v57  ;;  %2727 = vmatmul.mubr.bf16.gmra.mrb[44].mxu1 %v11894_v57  ;;  %v11961_v57 = vld [vmem:[#allocation2 + $0x98] ss:$12 sps:$4 sm:$0xff]  }
  0xf5   :  { %2350 = vmatprep.mubr.bf16.mxu0 %v11895_v58  ;;  %2736 = vmatprep.mubr.bf16.mxu1 %v11895_v58  ;;  %v12004_v58 = vld [vmem:[#allocation5 + $0x498] ss:$48 sps:$4 sm:$0xff]  }
  0xfc   :  { %2351 = vmatmul.mubr.bf16.gmra.mrb[48].mxu0 %v11897_v59  ;;  %2737 = vmatmul.mubr.bf16.gmra.mrb[48].mxu1 %v11897_v59  ;;  %v12007_v59 = vld [vmem:[#allocation5 + $0x490] ss:$48 sps:$4 sm:$0xff]  }
  0xfd   :  { %2360 = vmatprep.mubr.bf16.mxu0 %v11904_v60  ;;  %2746 = vmatprep.mubr.bf16.mxu1 %v11904_v60  ;;  %v12013_v60 = vld [vmem:[#allocation5 + $0x4fc] ss:$48 sps:$4 sm:$0xff]  }
 0x104   :  { %2361 = vmatmul.mubr.bf16.gmra.mrb[52].mxu0 %v11906_v61  ;;  %2747 = vmatmul.mubr.bf16.gmra.mrb[52].mxu1 %v11906_v61  ;;  %v12016_v61 = vld [vmem:[#allocation5 + $0x4f4] ss:$48 sps:$4 sm:$0xff]  }
 0x105   :  { %2370 = vmatprep.mubr.bf16.mxu0 %v11907_v62  ;;  %2756 = vmatprep.mubr.bf16.mxu1 %v11907_v62  ;;  %v12011_v62 = vld [vmem:[#allocation5 + $0x4f8] ss:$48 sps:$4 sm:$0xff]  }
 0x10c   :  { %2371 = vmatmul.mubr.bf16.gmra.mrb[56].mxu0 %v11909_v63  ;;  %2757 = vmatmul.mubr.bf16.gmra.mrb[56].mxu1 %v11909_v63  ;;  %v12014_v63 = vld [vmem:[#allocation5 + $0x4f0] ss:$48 sps:$4 sm:$0xff]  }
 0x10d   :  { %2380 = vmatprep.mubr.bf16.mxu0 %v11916_v0  ;;  %2766 = vmatprep.mubr.bf16.mxu1 %v11916_v0  ;;  %v12020_v0 = vld [vmem:[#allocation5 + $0x55c] ss:$48 sps:$4 sm:$0xff]  }
 0x114   :  { %2381 = vmatmul.mubr.bf16.gmra.mrb[60].mxu0 %v11918_v1  ;;  %2767 = vmatmul.mubr.bf16.gmra.mrb[60].mxu1 %v11918_v1  ;;  %v12023_v1 = vld [vmem:[#allocation5 + $0x554] ss:$48 sps:$4 sm:$0xff]  }
 0x115   :  { %2423 = vmatprep.mubr.bf16.mxu0 %v14850_v2  ;;  %2809 = vmatprep.mubr.bf16.mxu1 %v14850_v2 }
 0x11c   :  { %2424 = vmatmul.mubr.bf16.vlgmr.msra.gmra.mrb[0].mxu0 %v11919_v3  ;;  %2810 = vmatmul.mubr.bf16.vlgmr.msra.gmra.mrb[0].mxu1 %v11919_v3  ;;  %v11968_v3 = vld [vmem:[#allocation2 + $0xb0] ss:$12 sps:$4 sm:$0xff]  }
 0x11d   :  { %3357 = vmatpush1.bf16.msra.mxu1 %v11920_v4  ;;  %2971 = vmatpush1.bf16.msra.mxu0 %v11923_v5  ;;  %v12018_v4 = vld [vmem:[#allocation5 + $0x558] ss:$48 sps:$4 sm:$0xff]   ;;  %v12021_v5 = vld [vmem:[#allocation5 + $0x550] ss:$48 sps:$4 sm:$0xff]  }
 0x11e   :  { %2433 = vmatprep.mubr.bf16.mxu0 %v14850_v2  ;;  %2819 = vmatprep.mubr.bf16.mxu1 %v14850_v2 }
 0x11f   :  { %3358 = vmatprep.subr.bf16.mxu1 %v11929_v6  ;;  %2972 = vmatprep.subr.bf16.mxu0 %v11932_v7  ;;  %v12027_v6 = vld [vmem:[#allocation5 + $0x5bc] ss:$48 sps:$4 sm:$0xff]   ;;  %v12030_v7 = vld [vmem:[#allocation5 + $0x5b4] ss:$48 sps:$4 sm:$0xff]  }
 0x121   :  { %3359 = vmatpush1.bf16.msra.mxu1 %v11927_v8  ;;  %2973 = vmatpush1.bf16.msra.mxu0 %v11930_v9  ;;  %v12025_v8 = vld [vmem:[#allocation5 + $0x5b8] ss:$48 sps:$4 sm:$0xff]   ;;  %v12028_v9 = vld [vmem:[#allocation5 + $0x5b0] ss:$48 sps:$4 sm:$0xff]  }
 0x122   :  { %3360 = vmatprep.subr.bf16.mxu1 %v11936_v10  ;;  %2974 = vmatprep.subr.bf16.mxu0 %v11939_v11  ;;  %v12033_v10 = vld [vmem:[#allocation5 + $0x61c] ss:$48 sps:$4 sm:$0xff]   ;;  %v12036_v11 = vld [vmem:[#allocation5 + $0x614] ss:$48 sps:$4 sm:$0xff]  }
 0x124   :  { %2434 = vmatmul.mubr.bf16.gmra.mrb[4].mxu0 %v11926_v12  ;;  %2820 = vmatmul.mubr.bf16.gmra.mrb[4].mxu1 %v11926_v12  ;;  %v11975_v12 = vld [vmem:[#allocation2 + $0xc8] ss:$12 sps:$4 sm:$0xff]  }
 0x125   :  { %2443 = vmatprep.mubr.bf16.mxu0 %v14850_v2  ;;  %2829 = vmatprep.mubr.bf16.mxu1 %v14850_v2 }
 0x126   :  { %3361 = vmatpush1.bf16.msra.mxu1 %v11934_v13  ;;  %2975 = vmatpush1.bf16.msra.mxu0 %v11937_v14  ;;  %v11982_v13 = vld [vmem:[#allocation2 + $0xe0] ss:$12 sps:$4 sm:$0xff]   ;;  %v11989_v14 = vld [vmem:[#allocation2 + $0xf8] ss:$12 sps:$4 sm:$0xff]  }
 0x127   :  { %3362 = vmatprep.subr.bf16.mxu1 %v11943_v15  ;;  %2976 = vmatprep.subr.bf16.mxu0 %v11946_v16  ;;  %v11996_v15 = vld [vmem:[#allocation2 + $0x110] ss:$12 sps:$4 sm:$0xff]   ;;  %v12003_v16 = vld [vmem:[#allocation2 + $0x128] ss:$12 sps:$4 sm:$0xff]  }
 0x12a   :  { %3363 = vmatpush1.bf16.msra.mxu1 %v11941_v17  ;;  %2977 = vmatpush1.bf16.msra.mxu0 %v11944_v18  ;;  %v12010_v17 = vld [vmem:[#allocation2 + $0x140] ss:$12 sps:$4 sm:$0xff]   ;;  %v12017_v18 = vld [vmem:[#allocation2 + $0x158] ss:$12 sps:$4 sm:$0xff]  }
 0x12b   :  { %3364 = vmatprep.subr.bf16.mxu1 %v11950_v19  ;;  %2978 = vmatprep.subr.bf16.mxu0 %v11953_v20  ;;  %v12024_v19 = vld [vmem:[#allocation2 + $0x170] ss:$12 sps:$4 sm:$0xff]  }
 0x12c   :  { %2444 = vmatmul.mubr.bf16.gmra.mrb[8].mxu0 %v11933_v21  ;;  %2830 = vmatmul.mubr.bf16.gmra.mrb[8].mxu1 %v11933_v21  ;;  %v12607_v20 = vld [vmem:[#allocation2 + $0x4] ss:$12 sps:$4 sm:$0xff]   ;;  %v12031_v21 = vld [vmem:[#allocation5 + $0x618] ss:$48 sps:$4 sm:$0xff]  }
 0x12d   :  { %2453 = vmatprep.mubr.bf16.mxu0 %v14850_v2  ;;  %2839 = vmatprep.mubr.bf16.mxu1 %v14850_v2 }
 0x12e   :  { %3365 = vmatpush1.bf16.msra.mxu1 %v11948_v22  ;;  %2979 = vmatpush1.bf16.msra.mxu0 %v11951_v23  ;;  %v12034_v22 = vld [vmem:[#allocation5 + $0x610] ss:$48 sps:$4 sm:$0xff]   ;;  %v12039_v23 = vld [vmem:[#allocation5 + $0x67c] ss:$48 sps:$4 sm:$0xff]  }
 0x12f   :  { %3366 = vmatprep.subr.bf16.mxu1 %v11957_v24  ;;  %2980 = vmatprep.subr.bf16.mxu0 %v11960_v25  ;;  %v12042_v24 = vld [vmem:[#allocation5 + $0x674] ss:$48 sps:$4 sm:$0xff]   ;;  %v12037_v25 = vld [vmem:[#allocation5 + $0x678] ss:$48 sps:$4 sm:$0xff]  }
 0x132   :  { %3367 = vmatpush1.bf16.msra.mxu1 %v11955_v26  ;;  %2981 = vmatpush1.bf16.msra.mxu0 %v11958_v27  ;;  %v12040_v26 = vld [vmem:[#allocation5 + $0x670] ss:$48 sps:$4 sm:$0xff]  }
 0x133   :  { %3368 = vmatprep.subr.bf16.mxu1 %v11964_v28  ;;  %2982 = vmatprep.subr.bf16.mxu0 %v11967_v29  ;;  %v12608_v27 = vld [vmem:[#allocation2] ss:$12 sps:$4 sm:$0xff]   ;;  %v12048_v29 = vld [vmem:[#allocation5 + $0x6d4] ss:$48 sps:$4 sm:$0xff]  }
 0x134   :  { %2454 = vmatmul.mubr.bf16.gmra.mrb[12].mxu0 %v11940_v30  ;;  %2840 = vmatmul.mubr.bf16.gmra.mrb[12].mxu1 %v11940_v30  ;;  %v12045_v28 = vld [vmem:[#allocation5 + $0x6dc] ss:$48 sps:$4 sm:$0xff]  }
 0x135   :  { %2463 = vmatprep.mubr.bf16.mxu0 %v14850_v2  ;;  %2849 = vmatprep.mubr.bf16.mxu1 %v14850_v2  ;;  %v12609_v30 = vld [vmem:[#allocation2 + $0x1c] ss:$12 sps:$4 sm:$0xff]  }
 0x136   :  { %3369 = vmatpush1.bf16.msra.mxu1 %v11962_v31  ;;  %2983 = vmatpush1.bf16.msra.mxu0 %v11965_v32  ;;  %v12043_v31 = vld [vmem:[#allocation5 + $0x6d8] ss:$48 sps:$4 sm:$0xff]   ;;  %v12046_v32 = vld [vmem:[#allocation5 + $0x6d0] ss:$48 sps:$4 sm:$0xff]  }
 0x137   :  { %3370 = vmatprep.subr.bf16.mxu1 %v11971_v33  ;;  %2984 = vmatprep.subr.bf16.mxu0 %v11974_v34  ;;  %v12051_v33 = vld [vmem:[#allocation5 + $0x73c] ss:$48 sps:$4 sm:$0xff]   ;;  %v12054_v34 = vld [vmem:[#allocation5 + $0x734] ss:$48 sps:$4 sm:$0xff]  }
 0x13a   :  { %3371 = vmatpush1.bf16.msra.mxu1 %v11969_v35  ;;  %2985 = vmatpush1.bf16.msra.mxu0 %v11972_v36  ;;  %v12610_v35 = vld [vmem:[#allocation2 + $0x18] ss:$12 sps:$4 sm:$0xff]   ;;  %v12611_v36 = vld [vmem:[#allocation2 + $0x34] ss:$12 sps:$4 sm:$0xff]  }
 0x13b   :  { %3372 = vmatprep.subr.bf16.mxu1 %v11978_v37  ;;  %2986 = vmatprep.subr.bf16.mxu0 %v11981_v38  ;;  %v12049_v37 = vld [vmem:[#allocation5 + $0x738] ss:$48 sps:$4 sm:$0xff]   ;;  %v12052_v38 = vld [vmem:[#allocation5 + $0x730] ss:$48 sps:$4 sm:$0xff]  }
 0x13c   :  { %2464 = vmatmul.mubr.bf16.gmra.mrb[16].mxu0 %v11947_v39  ;;  %2850 = vmatmul.mubr.bf16.gmra.mrb[16].mxu1 %v11947_v39  ;;  %v12057_v39 = vld [vmem:[#allocation5 + $0x79c] ss:$48 sps:$4 sm:$0xff]  }
 0x13d   :  { %2473 = vmatprep.mubr.bf16.mxu0 %v14850_v2  ;;  %2859 = vmatprep.mubr.bf16.mxu1 %v14850_v2 }
 0x13e   :  { %3373 = vmatpush1.bf16.msra.mxu1 %v11976_v40  ;;  %2987 = vmatpush1.bf16.msra.mxu0 %v11979_v41  ;;  %v12060_v40 = vld [vmem:[#allocation5 + $0x794] ss:$48 sps:$4 sm:$0xff]   ;;  %v12055_v41 = vld [vmem:[#allocation5 + $0x798] ss:$48 sps:$4 sm:$0xff]  }
 0x13f   :  { %3374 = vmatprep.subr.bf16.mxu1 %v11985_v42  ;;  %2988 = vmatprep.subr.bf16.mxu0 %v11988_v43  ;;  %v12058_v42 = vld [vmem:[#allocation5 + $0x790] ss:$48 sps:$4 sm:$0xff]   ;;  %v12063_v43 = vld [vmem:[#allocation5 + $0x7fc] ss:$48 sps:$4 sm:$0xff]  }
 0x142   :  { %3375 = vmatpush1.bf16.msra.mxu1 %v11983_v44  ;;  %2989 = vmatpush1.bf16.msra.mxu0 %v11986_v45  ;;  %v12066_v44 = vld [vmem:[#allocation5 + $0x7f4] ss:$48 sps:$4 sm:$0xff]   ;;  %v12612_v45 = vld [vmem:[#allocation2 + $0x30] ss:$12 sps:$4 sm:$0xff]  }
 0x143   :  { %3376 = vmatprep.subr.bf16.mxu1 %v11992_v46  ;;  %2990 = vmatprep.subr.bf16.mxu0 %v11995_v47  ;;  %v12613_v46 = vld [vmem:[#allocation2 + $0x4c] ss:$12 sps:$4 sm:$0xff]  }
 0x144   :  { %2474 = vmatmul.mubr.bf16.gmra.mrb[20].mxu0 %v11954_v48  ;;  %2860 = vmatmul.mubr.bf16.gmra.mrb[20].mxu1 %v11954_v48  ;;  %v12061_v47 = vld [vmem:[#allocation5 + $0x7f8] ss:$48 sps:$4 sm:$0xff]   ;;  %v12064_v48 = vld [vmem:[#allocation5 + $0x7f0] ss:$48 sps:$4 sm:$0xff]  }
 0x145   :  { %2483 = vmatprep.mubr.bf16.mxu0 %v14850_v2  ;;  %2869 = vmatprep.mubr.bf16.mxu1 %v14850_v2 }
 0x146   :  { %3377 = vmatpush1.bf16.msra.mxu1 %v11990_v49  ;;  %2991 = vmatpush1.bf16.msra.mxu0 %v11993_v50  ;;  %v12069_v49 = vld [vmem:[#allocation5 + $0x85c] ss:$48 sps:$4 sm:$0xff]   ;;  %v12072_v50 = vld [vmem:[#allocation5 + $0x854] ss:$48 sps:$4 sm:$0xff]  }
 0x147   :  { %3378 = vmatprep.subr.bf16.mxu1 %v11999_v51  ;;  %2992 = vmatprep.subr.bf16.mxu0 %v12002_v52  ;;  %v12067_v51 = vld [vmem:[#allocation5 + $0x858] ss:$48 sps:$4 sm:$0xff]   ;;  %v12070_v52 = vld [vmem:[#allocation5 + $0x850] ss:$48 sps:$4 sm:$0xff]  }
 0x14a   :  { %3379 = vmatpush1.bf16.msra.mxu1 %v11997_v53  ;;  %2993 = vmatpush1.bf16.msra.mxu0 %v12000_v54  ;;  %v12075_v53 = vld [vmem:[#allocation5 + $0x8bc] ss:$48 sps:$4 sm:$0xff]   ;;  %v12078_v54 = vld [vmem:[#allocation5 + $0x8b4] ss:$48 sps:$4 sm:$0xff]  }
 0x14b   :  { %3380 = vmatprep.subr.bf16.mxu1 %v12006_v55  ;;  %2994 = vmatprep.subr.bf16.mxu0 %v12009_v56  ;;  %v12614_v55 = vld [vmem:[#allocation2 + $0x48] ss:$12 sps:$4 sm:$0xff]   ;;  %v12615_v56 = vld [vmem:[#allocation2 + $0x64] ss:$12 sps:$4 sm:$0xff]  }
 0x14c   :  { %2484 = vmatmul.mubr.bf16.gmra.mrb[24].mxu0 %v11961_v57  ;;  %2870 = vmatmul.mubr.bf16.gmra.mrb[24].mxu1 %v11961_v57  ;;  %v12073_v57 = vld [vmem:[#allocation5 + $0x8b8] ss:$48 sps:$4 sm:$0xff]  }
 0x14d   :  { %2493 = vmatprep.mubr.bf16.mxu0 %v14850_v2  ;;  %2879 = vmatprep.mubr.bf16.mxu1 %v14850_v2 }
 0x14e   :  { %3381 = vmatpush1.bf16.msra.mxu1 %v12004_v58  ;;  %2995 = vmatpush1.bf16.msra.mxu0 %v12007_v59  ;;  %v12076_v58 = vld [vmem:[#allocation5 + $0x8b0] ss:$48 sps:$4 sm:$0xff]   ;;  %v12081_v59 = vld [vmem:[#allocation5 + $0x2c] ss:$48 sps:$4 sm:$0xff]  }
 0x14f   :  { %3382 = vmatprep.subr.bf16.mxu1 %v12013_v60  ;;  %2996 = vmatprep.subr.bf16.mxu0 %v12016_v61  ;;  %v12084_v60 = vld [vmem:[#allocation5 + $0x24] ss:$48 sps:$4 sm:$0xff]   ;;  %v12616_v61 = vld [vmem:[#allocation2 + $0x60] ss:$12 sps:$4 sm:$0xff]  }
 0x152   :  { %3383 = vmatpush1.bf16.msra.mxu1 %v12011_v62  ;;  %2997 = vmatpush1.bf16.msra.mxu0 %v12014_v63  ;;  %v12617_v62 = vld [vmem:[#allocation2 + $0x7c] ss:$12 sps:$4 sm:$0xff]   ;;  %v12618_v63 = vld [vmem:[#allocation2 + $0x78] ss:$12 sps:$4 sm:$0xff]  }
 0x153   :  { %3384 = vmatprep.subr.bf16.mxu1 %v12020_v0  ;;  %2998 = vmatprep.subr.bf16.mxu0 %v12023_v1  ;;  %v12619_v0 = vld [vmem:[#allocation2 + $0x94] ss:$12 sps:$4 sm:$0xff]   ;;  %v12620_v1 = vld [vmem:[#allocation2 + $0x90] ss:$12 sps:$4 sm:$0xff]  }
 0x154   :  { %2494 = vmatmul.mubr.bf16.gmra.mrb[28].mxu0 %v11968_v3  ;;  %2880 = vmatmul.mubr.bf16.gmra.mrb[28].mxu1 %v11968_v3  ;;  %v12621_v3 = vld [vmem:[#allocation2 + $0xac] ss:$12 sps:$4 sm:$0xff]  }
 0x155   :  { %2503 = vmatprep.mubr.bf16.mxu0 %v14850_v2  ;;  %2889 = vmatprep.mubr.bf16.mxu1 %v14850_v2 }
 0x156   :  { %3385 = vmatpush1.bf16.msra.mxu1 %v12018_v4  ;;  %2999 = vmatpush1.bf16.msra.mxu0 %v12021_v5  ;;  %v12622_v4 = vld [vmem:[#allocation2 + $0xa8] ss:$12 sps:$4 sm:$0xff]   ;;  %v12623_v5 = vld [vmem:[#allocation2 + $0xc4] ss:$12 sps:$4 sm:$0xff]  }
 0x157   :  { %3386 = vmatprep.subr.bf16.mxu1 %v12027_v6  ;;  %3000 = vmatprep.subr.bf16.mxu0 %v12030_v7  ;;  %v12624_v6 = vld [vmem:[#allocation2 + $0xc0] ss:$12 sps:$4 sm:$0xff]   ;;  %v12625_v7 = vld [vmem:[#allocation2 + $0xdc] ss:$12 sps:$4 sm:$0xff]  }
 0x15a   :  { %3387 = vmatpush1.bf16.msra.mxu1 %v12025_v8  ;;  %3001 = vmatpush1.bf16.msra.mxu0 %v12028_v9  ;;  %v442_v8 = vlaneseq  ;;  %v12626_v9 = vld [vmem:[#allocation2 + $0xd8] ss:$12 sps:$4 sm:$0xff]  }
 0x15b   :  { %3549 = vmatprep.subr.bf16.mxu1 %v12033_v10  ;;  %3163 = vmatprep.subr.bf16.mxu0 %v12036_v11  ;;  %v12627_v11 = vld [vmem:[#allocation2 + $0xf4] ss:$12 sps:$4 sm:$0xff]  }
 0x15c   :  { %2504 = vmatmul.mubr.bf16.gmra.mrb[32].mxu0 %v11975_v12  ;;  %2890 = vmatmul.mubr.bf16.gmra.mrb[32].mxu1 %v11975_v12  ;;  %v12980_v10 = vshrl.u32 %v442_v8, 7 }
 0x15d   :  { %2513 = vmatprep.mubr.bf16.mxu0 %v14850_v2  ;;  %2899 = vmatprep.mubr.bf16.mxu1 %v14850_v2 }
 0x15e   :  { %v12983_v12 = vsub.s32 0, %v12980_v10 }
 0x160   :  { %14996 = vst [vmem:[#allocation16_spill] sm:$0xff] %v12983_v12 }
 0x164   :  { %2514 = vmatmul.mubr.bf16.gmra.mrb[36].mxu0 %v11982_v13  ;;  %2900 = vmatmul.mubr.bf16.gmra.mrb[36].mxu1 %v11982_v13  ;;  %v12986_v13 = vsub.s32 2, %v12980_v10 }
 0x165   :  { %2523 = vmatprep.mubr.bf16.mxu0 %v14850_v2  ;;  %2909 = vmatprep.mubr.bf16.mxu1 %v14850_v2 }
 0x16c   :  { %2524 = vmatmul.mubr.bf16.gmra.mrb[40].mxu0 %v11989_v14  ;;  %2910 = vmatmul.mubr.bf16.gmra.mrb[40].mxu1 %v11989_v14  ;;  %v438_v14 = vld [vmem:[#allocation7] sm:$0xff] }
 0x16d   :  { %2533 = vmatprep.mubr.bf16.mxu0 %v14850_v2  ;;  %2919 = vmatprep.mubr.bf16.mxu1 %v14850_v2 }
 0x174   :  { %2534 = vmatmul.mubr.bf16.gmra.mrb[44].mxu0 %v11996_v15  ;;  %2920 = vmatmul.mubr.bf16.gmra.mrb[44].mxu1 %v11996_v15  ;;  %v12989_v15 = vsub.s32 1, %v12980_v10 }
 0x175   :  { %2543 = vmatprep.mubr.bf16.mxu0 %v14850_v2  ;;  %2929 = vmatprep.mubr.bf16.mxu1 %v14850_v2 }
 0x176   :  { %14997 = vst [vmem:[#allocation17_spill] sm:$0xff] %v12989_v15 }
 0x17c   :  { %2544 = vmatmul.mubr.bf16.gmra.mrb[48].mxu0 %v12003_v16  ;;  %2930 = vmatmul.mubr.bf16.gmra.mrb[48].mxu1 %v12003_v16  ;;  %v14849_v16 = vsub.s32 3, %v12980_v10 }
 0x17d   :  { %2553 = vmatprep.mubr.bf16.mxu0 %v14850_v2  ;;  %2939 = vmatprep.mubr.bf16.mxu1 %v14850_v2 }
 0x184   :  { %2554 = vmatmul.mubr.bf16.gmra.mrb[52].mxu0 %v12010_v17  ;;  %2940 = vmatmul.mubr.bf16.gmra.mrb[52].mxu1 %v12010_v17  ;;  %v12628_v17 = vld [vmem:[#allocation2 + $0xf0] ss:$12 sps:$4 sm:$0xff]  }
 0x185   :  { %2563 = vmatprep.mubr.bf16.mxu0 %v14850_v2  ;;  %2949 = vmatprep.mubr.bf16.mxu1 %v14850_v2 }
 0x18c   :  { %2564 = vmatmul.mubr.bf16.gmra.mrb[56].mxu0 %v12017_v18  ;;  %2950 = vmatmul.mubr.bf16.gmra.mrb[56].mxu1 %v12017_v18  ;;  %v12993_v18 = vrot.slane %v438_v14, %v12983_v12 }
 0x18d   :  { %2573 = vmatprep.mubr.bf16.mxu0 %v14850_v2  ;;  %2959 = vmatprep.mubr.bf16.mxu1 %v14850_v2 }
 0x194   :  { %2574 = vmatmul.mubr.bf16.gmra.mrb[60].mxu0 %v12024_v19  ;;  %2960 = vmatmul.mubr.bf16.gmra.mrb[60].mxu1 %v12024_v19  ;;  %v12996_v19 = vrot.slane %v438_v14, %v12986_v13 }
 0x195   :  { %3002 = vmatprep.mubr.bf16.mxu0 %v12607_v20  ;;  %3388 = vmatprep.mubr.bf16.mxu1 %v12607_v20  ;;  %v12999_v20 = vrot.slane %v438_v14, %v12989_v15 }
 0x19c   :  { %3003 = vmatmul.mubr.bf16.vlgmr.msra.gmra.mrb[64].mxu0 %v12608_v27  ;;  %3389 = vmatmul.mubr.bf16.vlgmr.msra.gmra.mrb[64].mxu1 %v12608_v27 }
 0x19d   :  { %3550 = vmatpush1.bf16.msra.mxu1 %v12031_v21  ;;  %3164 = vmatpush1.bf16.msra.mxu0 %v12034_v22  ;;  %v13003_v21 = vrot.slane %v438_v14, %v14849_v16  ;;  %v12629_v22 = vld [vmem:[#allocation2 + $0x10c] ss:$12 sps:$4 sm:$0xff]  }
 0x19e   :  { %3012 = vmatprep.mubr.bf16.mxu0 %v12609_v30  ;;  %3398 = vmatprep.mubr.bf16.mxu1 %v12609_v30 }
 0x19f   :  { %3551 = vmatprep.subr.bf16.mxu1 %v12039_v23  ;;  %3165 = vmatprep.subr.bf16.mxu0 %v12042_v24 }
 0x1a1   :  { %3552 = vmatpush1.bf16.msra.mxu1 %v12037_v25  ;;  %3166 = vmatpush1.bf16.msra.mxu0 %v12040_v26 }
 0x1a2   :  { %3553 = vmatprep.subr.bf16.mxu1 %v12045_v28  ;;  %3167 = vmatprep.subr.bf16.mxu0 %v12048_v29 }
 0x1a4   :  { %3013 = vmatmul.mubr.bf16.gmra.mrb[68].mxu0 %v12610_v35  ;;  %3399 = vmatmul.mubr.bf16.gmra.mrb[68].mxu1 %v12610_v35 }
 0x1a5   :  { %3022 = vmatprep.mubr.bf16.mxu0 %v12611_v36  ;;  %3408 = vmatprep.mubr.bf16.mxu1 %v12611_v36 }
 0x1a6   :  { %3554 = vmatpush1.bf16.msra.mxu1 %v12043_v31  ;;  %3168 = vmatpush1.bf16.msra.mxu0 %v12046_v32 }
 0x1a7   :  { %3555 = vmatprep.subr.bf16.mxu1 %v12051_v33  ;;  %3169 = vmatprep.subr.bf16.mxu0 %v12054_v34 }
 0x1aa   :  { %3556 = vmatpush1.bf16.msra.mxu1 %v12049_v37  ;;  %3170 = vmatpush1.bf16.msra.mxu0 %v12052_v38 }
 0x1ab   :  { %3557 = vmatprep.subr.bf16.mxu1 %v12057_v39  ;;  %3171 = vmatprep.subr.bf16.mxu0 %v12060_v40 }
 0x1ac   :  { %3023 = vmatmul.mubr.bf16.gmra.mrb[72].mxu0 %v12612_v45  ;;  %3409 = vmatmul.mubr.bf16.gmra.mrb[72].mxu1 %v12612_v45 }
 0x1ad   :  { %3032 = vmatprep.mubr.bf16.mxu0 %v12613_v46  ;;  %3418 = vmatprep.mubr.bf16.mxu1 %v12613_v46 }
 0x1ae   :  { %3558 = vmatpush1.bf16.msra.mxu1 %v12055_v41  ;;  %3172 = vmatpush1.bf16.msra.mxu0 %v12058_v42 }
 0x1af   :  { %3559 = vmatprep.subr.bf16.mxu1 %v12063_v43  ;;  %3173 = vmatprep.subr.bf16.mxu0 %v12066_v44  ;;  %v12630_v43 = vld [vmem:[#allocation2 + $0x108] ss:$12 sps:$4 sm:$0xff]  }
 0x1b2   :  { %3560 = vmatpush1.bf16.msra.mxu1 %v12061_v47  ;;  %3174 = vmatpush1.bf16.msra.mxu0 %v12064_v48  ;;  %v12631_v48 = vld [vmem:[#allocation2 + $0x124] ss:$12 sps:$4 sm:$0xff]  }
 0x1b3   :  { %3561 = vmatprep.subr.bf16.mxu1 %v12069_v49  ;;  %3175 = vmatprep.subr.bf16.mxu0 %v12072_v50 }
 0x1b4   :  { %3033 = vmatmul.mubr.bf16.gmra.mrb[76].mxu0 %v12614_v55  ;;  %3419 = vmatmul.mubr.bf16.gmra.mrb[76].mxu1 %v12614_v55 }
 0x1b5   :  { %3042 = vmatprep.mubr.bf16.mxu0 %v12615_v56  ;;  %3428 = vmatprep.mubr.bf16.mxu1 %v12615_v56 }
 0x1b6   :  { %3562 = vmatpush1.bf16.msra.mxu1 %v12067_v51  ;;  %3176 = vmatpush1.bf16.msra.mxu0 %v12070_v52 }
 0x1b7   :  { %3563 = vmatprep.subr.bf16.mxu1 %v12075_v53  ;;  %3177 = vmatprep.subr.bf16.mxu0 %v12078_v54 }
 0x1ba   :  { %3564 = vmatpush1.bf16.msra.mxu1 %v12073_v57  ;;  %3178 = vmatpush1.bf16.msra.mxu0 %v12076_v58 }
 0x1bb   :  { %4128 = vmatprep.subr.bf16.mxu1 %v12081_v59  ;;  %3742 = vmatprep.subr.bf16.mxu0 %v12084_v60 }
 0x1bc   :  { %3043 = vmatmul.mubr.bf16.gmra.mrb[80].mxu0 %v12616_v61  ;;  %3429 = vmatmul.mubr.bf16.gmra.mrb[80].mxu1 %v12616_v61 }
 0x1bd   :  { %3052 = vmatprep.mubr.bf16.mxu0 %v12617_v62  ;;  %3438 = vmatprep.mubr.bf16.mxu1 %v12617_v62 }
 0x1c4   :  { %3053 = vmatmul.mubr.bf16.gmra.mrb[84].mxu0 %v12618_v63  ;;  %3439 = vmatmul.mubr.bf16.gmra.mrb[84].mxu1 %v12618_v63 }
 0x1c5   :  { %3062 = vmatprep.mubr.bf16.mxu0 %v12619_v0  ;;  %3448 = vmatprep.mubr.bf16.mxu1 %v12619_v0 }
 0x1cc   :  { %3063 = vmatmul.mubr.bf16.gmra.mrb[88].mxu0 %v12620_v1  ;;  %3449 = vmatmul.mubr.bf16.gmra.mrb[88].mxu1 %v12620_v1 }
 0x1cd   :  { %3072 = vmatprep.mubr.bf16.mxu0 %v12621_v3  ;;  %3458 = vmatprep.mubr.bf16.mxu1 %v12621_v3 }
 0x1d4   :  { %3073 = vmatmul.mubr.bf16.gmra.mrb[92].mxu0 %v12622_v4  ;;  %3459 = vmatmul.mubr.bf16.gmra.mrb[92].mxu1 %v12622_v4 }
 0x1d5   :  { %3082 = vmatprep.mubr.bf16.mxu0 %v12623_v5  ;;  %3468 = vmatprep.mubr.bf16.mxu1 %v12623_v5 }
 0x1dc   :  { %3083 = vmatmul.mubr.bf16.gmra.mrb[96].mxu0 %v12624_v6  ;;  %3469 = vmatmul.mubr.bf16.gmra.mrb[96].mxu1 %v12624_v6 }
 0x1dd   :  { %3092 = vmatprep.mubr.bf16.mxu0 %v12625_v7  ;;  %3478 = vmatprep.mubr.bf16.mxu1 %v12625_v7 }
 0x1e4   :  { %3093 = vmatmul.mubr.bf16.gmra.mrb[100].mxu0 %v12626_v9  ;;  %3479 = vmatmul.mubr.bf16.gmra.mrb[100].mxu1 %v12626_v9 }
 0x1e5   :  { %3102 = vmatprep.mubr.bf16.mxu0 %v12627_v11  ;;  %3488 = vmatprep.mubr.bf16.mxu1 %v12627_v11  ;;  %v12632_v11 = vld [vmem:[#allocation2 + $0x120] ss:$12 sps:$4 sm:$0xff]  }
 0x1ec   :  { %3103 = vmatmul.mubr.bf16.gmra.mrb[104].mxu0 %v12628_v17  ;;  %3489 = vmatmul.mubr.bf16.gmra.mrb[104].mxu1 %v12628_v17 }
 0x1ed   :  { %3112 = vmatprep.mubr.bf16.mxu0 %v12629_v22  ;;  %3498 = vmatprep.mubr.bf16.mxu1 %v12629_v22 }
 0x1ef   :  { %v2425_v23 = vpop.f32.mrb[0].mxu0  ;;  %v2811_v24 = vpop.f32.mrb[0].mxu1 }
 0x1f0   :  { %v10562_v25 = vadd.f32 %v2425_v23, %v12993_v18  ;;  %v10626_v26 = vadd.f32 %v2811_v24, %v12996_v19  ;;  %v2427_v27 = vpop.f32.mrb[1].mxu0  ;;  %v2813_v28 = vpop.f32.mrb[1].mxu1  ;;  %v12633_v24 = vld [vmem:[#allocation2 + $0x13c] ss:$12 sps:$4 sm:$0xff]  }
 0x1f1   :  { %v10563_v29 = vadd.f32 %v2427_v27, %v12999_v20  ;;  %v10627_v30 = vadd.f32 %v2813_v28, %v13003_v21  ;;  %v2429_v31 = vpop.f32.mrb[2].mxu0  ;;  %v2815_v32 = vpop.f32.mrb[2].mxu1 }
 0x1f2   :  { %v10564_v33 = vadd.f32 %v2429_v31, %v12993_v18  ;;  %v10628_v34 = vadd.f32 %v2815_v32, %v12996_v19  ;;  %v2431_v35 = vpop.f32.mrb[3].mxu0  ;;  %v2817_v36 = vpop.f32.mrb[3].mxu1  ;;  %v4514_v39 = vmax.f32 %v10562_v25, 0.0  ;;  %v4516_v40 = vmax.f32 %v10626_v26, 0.0 }
 0x1f3   :  { %v10565_v37 = vadd.f32 %v2431_v35, %v12999_v20  ;;  %v10629_v38 = vadd.f32 %v2817_v36, %v13003_v21  ;;  %v4515_v44 = vmax.f32 %v10563_v29, 0.0  ;;  %v4517_v45 = vmax.f32 %v10627_v30, 0.0 }
 0x1f4   :  { %v4526_v41 = vmax.f32 %v10564_v33, 0.0  ;;  %v4528_v42 = vmax.f32 %v10628_v34, 0.0  ;;  %3113 = vmatmul.mubr.bf16.gmra.mrb[108].mxu0 %v12630_v43  ;;  %3499 = vmatmul.mubr.bf16.gmra.mrb[108].mxu1 %v12630_v43 }
 0x1f5   :  { %v4527_v46 = vmax.f32 %v10565_v37, 0.0  ;;  %v4529_v47 = vmax.f32 %v10629_v38, 0.0  ;;  %3122 = vmatprep.mubr.bf16.mxu0 %v12631_v48  ;;  %3508 = vmatprep.mubr.bf16.mxu1 %v12631_v48 }
 0x1f6   :  { %v13013_v49 = vpack.c.bf16 %v4526_v41, %v4514_v39  ;;  %v13015_v50 = vpack.c.bf16 %v4528_v42, %v4516_v40 }
 0x1f7   :  { %v13017_v51 = vpack.c.bf16 %v4527_v46, %v4515_v44  ;;  %v2435_v52 = vpop.f32.mrb[4].mxu0  ;;  %v2821_v53 = vpop.f32.mrb[4].mxu1  ;;  %v13019_v54 = vpack.c.bf16 %v4529_v47, %v4517_v45 }
 0x1f8   :  { %14998 = vst [vmem:[#allocation18_spill] sm:$0xff] %v13015_v50  ;;  %v10566_v55 = vadd.f32 %v2435_v52, %v12993_v18  ;;  %v10630_v56 = vadd.f32 %v2821_v53, %v12996_v19  ;;  %v2437_v57 = vpop.f32.mrb[5].mxu0  ;;  %v2823_v58 = vpop.f32.mrb[5].mxu1  ;;  %v12634_v52 = vld [vmem:[#allocation2 + $0x138] ss:$12 sps:$4 sm:$0xff]  }
 0x1f9   :  { %14999 = vst [vmem:[#allocation19_spill] sm:$0xff] %v13019_v54  ;;  %v10567_v59 = vadd.f32 %v2437_v57, %v12999_v20  ;;  %v10631_v60 = vadd.f32 %v2823_v58, %v13003_v21  ;;  %v2439_v61 = vpop.f32.mrb[6].mxu0  ;;  %v2825_v62 = vpop.f32.mrb[6].mxu1  ;;  %v12635_v58 = vld [vmem:[#allocation2 + $0x154] ss:$12 sps:$4 sm:$0xff]  }
 0x1fa   :  { %v10568_v63 = vadd.f32 %v2439_v61, %v12993_v18  ;;  %v10632_v0 = vadd.f32 %v2825_v62, %v12996_v19  ;;  %v2441_v1 = vpop.f32.mrb[7].mxu0  ;;  %v2827_v3 = vpop.f32.mrb[7].mxu1  ;;  %v4538_v6 = vmax.f32 %v10566_v55, 0.0  ;;  %v4540_v7 = vmax.f32 %v10630_v56, 0.0 }
 0x1fb   :  { %v10569_v4 = vadd.f32 %v2441_v1, %v12999_v20  ;;  %v10633_v5 = vadd.f32 %v2827_v3, %v13003_v21  ;;  %v4539_v14 = vmax.f32 %v10567_v59, 0.0  ;;  %v4541_v17 = vmax.f32 %v10631_v60, 0.0 }
 0x1fc   :  { %v4550_v8 = vmax.f32 %v10568_v63, 0.0  ;;  %v4552_v9 = vmax.f32 %v10632_v0, 0.0  ;;  %3123 = vmatmul.mubr.bf16.gmra.mrb[112].mxu0 %v12632_v11  ;;  %3509 = vmatmul.mubr.bf16.gmra.mrb[112].mxu1 %v12632_v11 }
 0x1fd   :  { %v4551_v22 = vmax.f32 %v10569_v4, 0.0  ;;  %v4553_v23 = vmax.f32 %v10633_v5, 0.0  ;;  %3132 = vmatprep.mubr.bf16.mxu0 %v12633_v24  ;;  %3518 = vmatprep.mubr.bf16.mxu1 %v12633_v24 }
 0x1fe   :  { %v13029_v25 = vpack.c.bf16 %v4550_v8, %v4538_v6  ;;  %v13031_v26 = vpack.c.bf16 %v4552_v9, %v4540_v7 }
 0x1ff   :  { %v13033_v27 = vpack.c.bf16 %v4551_v22, %v4539_v14  ;;  %v2445_v28 = vpop.f32.mrb[8].mxu0  ;;  %v2831_v29 = vpop.f32.mrb[8].mxu1  ;;  %v13035_v30 = vpack.c.bf16 %v4553_v23, %v4541_v17 }
 0x200   :  { %15000 = vst [vmem:[#allocation20_spill] sm:$0xff] %v13031_v26  ;;  %v10570_v31 = vadd.f32 %v2445_v28, %v12993_v18  ;;  %v10634_v32 = vadd.f32 %v2831_v29, %v12996_v19  ;;  %v2447_v33 = vpop.f32.mrb[9].mxu0  ;;  %v2833_v34 = vpop.f32.mrb[9].mxu1 }
 0x201   :  { %15001 = vst [vmem:[#allocation21_spill] sm:$0xff] %v13035_v30  ;;  %v10571_v35 = vadd.f32 %v2447_v33, %v12999_v20  ;;  %v10635_v36 = vadd.f32 %v2833_v34, %v13003_v21  ;;  %v2449_v37 = vpop.f32.mrb[10].mxu0  ;;  %v2835_v38 = vpop.f32.mrb[10].mxu1  ;;  %v12636_v33 = vld [vmem:[#allocation2 + $0x150] ss:$12 sps:$4 sm:$0xff]  }
 0x202   :  { %v10572_v39 = vadd.f32 %v2449_v37, %v12993_v18  ;;  %v10636_v40 = vadd.f32 %v2835_v38, %v12996_v19  ;;  %v2451_v41 = vpop.f32.mrb[11].mxu0  ;;  %v2837_v42 = vpop.f32.mrb[11].mxu1  ;;  %v4562_v45 = vmax.f32 %v10570_v31, 0.0  ;;  %v4564_v46 = vmax.f32 %v10634_v32, 0.0  ;;  %v12637_v38 = vld [vmem:[#allocation2 + $0x16c] ss:$12 sps:$4 sm:$0xff]  }
 0x203   :  { %v10573_v43 = vadd.f32 %v2451_v41, %v12999_v20  ;;  %v10637_v44 = vadd.f32 %v2837_v42, %v13003_v21  ;;  %v4563_v53 = vmax.f32 %v10571_v35, 0.0  ;;  %v4565_v55 = vmax.f32 %v10635_v36, 0.0 }
 0x204   :  { %v4574_v47 = vmax.f32 %v10572_v39, 0.0  ;;  %v4576_v48 = vmax.f32 %v10636_v40, 0.0  ;;  %3133 = vmatmul.mubr.bf16.gmra.mrb[116].mxu0 %v12634_v52  ;;  %3519 = vmatmul.mubr.bf16.gmra.mrb[116].mxu1 %v12634_v52 }
 0x205   :  { %v4575_v56 = vmax.f32 %v10573_v43, 0.0  ;;  %v4577_v57 = vmax.f32 %v10637_v44, 0.0  ;;  %3142 = vmatprep.mubr.bf16.mxu0 %v12635_v58  ;;  %3528 = vmatprep.mubr.bf16.mxu1 %v12635_v58 }
 0x206   :  { %v13045_v59 = vpack.c.bf16 %v4574_v47, %v4562_v45  ;;  %v13047_v60 = vpack.c.bf16 %v4576_v48, %v4564_v46 }
 0x207   :  { %v13049_v61 = vpack.c.bf16 %v4575_v56, %v4563_v53  ;;  %v2455_v62 = vpop.f32.mrb[12].mxu0  ;;  %v2841_v63 = vpop.f32.mrb[12].mxu1  ;;  %v13051_v0 = vpack.c.bf16 %v4577_v57, %v4565_v55 }
 0x208   :  { %15002 = vst [vmem:[#allocation22_spill] sm:$0xff] %v13047_v60  ;;  %v10574_v1 = vadd.f32 %v2455_v62, %v12993_v18  ;;  %v10638_v3 = vadd.f32 %v2841_v63, %v12996_v19  ;;  %v2457_v4 = vpop.f32.mrb[13].mxu0  ;;  %v2843_v5 = vpop.f32.mrb[13].mxu1 }
 0x209   :  { %15003 = vst [vmem:[#allocation23_spill] sm:$0xff] %v13051_v0  ;;  %v10575_v6 = vadd.f32 %v2457_v4, %v12999_v20  ;;  %v10639_v7 = vadd.f32 %v2843_v5, %v13003_v21  ;;  %v2459_v8 = vpop.f32.mrb[14].mxu0  ;;  %v2845_v9 = vpop.f32.mrb[14].mxu1 }
 0x20a   :  { %v10576_v11 = vadd.f32 %v2459_v8, %v12993_v18  ;;  %v10640_v14 = vadd.f32 %v2845_v9, %v12996_v19  ;;  %v2461_v17 = vpop.f32.mrb[15].mxu0  ;;  %v2847_v22 = vpop.f32.mrb[15].mxu1  ;;  %v4586_v28 = vmax.f32 %v10574_v1, 0.0  ;;  %v4588_v29 = vmax.f32 %v10638_v3, 0.0  ;;  %v12638_v8 = vld [vmem:[#allocation2 + $0x168] ss:$12 sps:$4 sm:$0xff]  }
 0x20b   :  { %v10577_v23 = vadd.f32 %v2461_v17, %v12999_v20  ;;  %v10641_v24 = vadd.f32 %v2847_v22, %v13003_v21  ;;  %v4587_v34 = vmax.f32 %v10575_v6, 0.0  ;;  %v4589_v35 = vmax.f32 %v10639_v7, 0.0 }
 0x20c   :  { %v4598_v31 = vmax.f32 %v10576_v11, 0.0  ;;  %v4600_v32 = vmax.f32 %v10640_v14, 0.0  ;;  %3143 = vmatmul.mubr.bf16.gmra.mrb[120].mxu0 %v12636_v33  ;;  %3529 = vmatmul.mubr.bf16.gmra.mrb[120].mxu1 %v12636_v33 }
 0x20d   :  { %v4599_v36 = vmax.f32 %v10577_v23, 0.0  ;;  %v4601_v37 = vmax.f32 %v10641_v24, 0.0  ;;  %3152 = vmatprep.mubr.bf16.mxu0 %v12637_v38  ;;  %3538 = vmatprep.mubr.bf16.mxu1 %v12637_v38 }
 0x20e   :  { %v13061_v39 = vpack.c.bf16 %v4598_v31, %v4586_v28  ;;  %v13063_v40 = vpack.c.bf16 %v4600_v32, %v4588_v29 }
 0x20f   :  { %v13065_v41 = vpack.c.bf16 %v4599_v36, %v4587_v34  ;;  %v2465_v42 = vpop.f32.mrb[16].mxu0  ;;  %v2851_v43 = vpop.f32.mrb[16].mxu1  ;;  %v13067_v44 = vpack.c.bf16 %v4601_v37, %v4589_v35 }
 0x210   :  { %15004 = vst [vmem:[#allocation24_spill] sm:$0xff] %v13063_v40  ;;  %v10578_v45 = vadd.f32 %v2465_v42, %v12993_v18  ;;  %v10642_v46 = vadd.f32 %v2851_v43, %v12996_v19  ;;  %v2467_v47 = vpop.f32.mrb[17].mxu0  ;;  %v2853_v48 = vpop.f32.mrb[17].mxu1  ;;  %v12079_v43 = vld [vmem:[#allocation5 + $0x28] ss:$48 sps:$4 sm:$0xff]  }
 0x211   :  { %15005 = vst [vmem:[#allocation25_spill] sm:$0xff] %v13067_v44  ;;  %v10579_v52 = vadd.f32 %v2467_v47, %v12999_v20  ;;  %v10643_v53 = vadd.f32 %v2853_v48, %v13003_v21  ;;  %v2469_v55 = vpop.f32.mrb[18].mxu0  ;;  %v2855_v56 = vpop.f32.mrb[18].mxu1  ;;  %v12646_v40 = vld [vmem:[#allocation2 + $0xb0] ss:$12 sps:$4 sm:$0xff]  }
 0x212   :  { %v10580_v57 = vadd.f32 %v2469_v55, %v12993_v18  ;;  %v10644_v58 = vadd.f32 %v2855_v56, %v12996_v19  ;;  %v2471_v62 = vpop.f32.mrb[19].mxu0  ;;  %v2857_v63 = vpop.f32.mrb[19].mxu1  ;;  %v4610_v4 = vmax.f32 %v10578_v45, 0.0  ;;  %v4612_v5 = vmax.f32 %v10642_v46, 0.0  ;;  %v12082_v45 = vld [vmem:[#allocation5 + $0x20] ss:$48 sps:$4 sm:$0xff]  }
 0x213   :  { %v10581_v1 = vadd.f32 %v2471_v62, %v12999_v20  ;;  %v10645_v3 = vadd.f32 %v2857_v63, %v13003_v21  ;;  %v4611_v9 = vmax.f32 %v10579_v52, 0.0  ;;  %v4613_v11 = vmax.f32 %v10643_v53, 0.0  ;;  %v12087_v56 = vld [vmem:[#allocation5 + $0x8c] ss:$48 sps:$4 sm:$0xff]  }
 0x214   :  { %v4622_v6 = vmax.f32 %v10580_v57, 0.0  ;;  %v4624_v7 = vmax.f32 %v10644_v58, 0.0  ;;  %3153 = vmatmul.mubr.bf16.gmra.mrb[124].mxu0 %v12638_v8  ;;  %3539 = vmatmul.mubr.bf16.gmra.mrb[124].mxu1 %v12638_v8  ;;  %v12090_v57 = vld [vmem:[#allocation5 + $0x84] ss:$48 sps:$4 sm:$0xff]  }
 0x215   :  { %v4623_v14 = vmax.f32 %v10581_v1, 0.0  ;;  %v4625_v17 = vmax.f32 %v10645_v3, 0.0  ;;  %3195 = vmatprep.mubr.bf16.mxu0 %v14850_v2  ;;  %3581 = vmatprep.mubr.bf16.mxu1 %v14850_v2  ;;  %v12639_v3 = vld [vmem:[#allocation2 + $0x8] ss:$12 sps:$4 sm:$0xff]  }
 0x216   :  { %v13079_v22 = vpack.c.bf16 %v4622_v6, %v4610_v4  ;;  %v13081_v23 = vpack.c.bf16 %v4624_v7, %v4612_v5  ;;  %v12085_v4 = vld [vmem:[#allocation5 + $0x88] ss:$48 sps:$4 sm:$0xff]  }
 0x217   :  { %v13083_v24 = vpack.c.bf16 %v4623_v14, %v4611_v9  ;;  %v2475_v28 = vpop.f32.mrb[20].mxu0  ;;  %v2861_v29 = vpop.f32.mrb[20].mxu1  ;;  %v13085_v31 = vpack.c.bf16 %v4625_v17, %v4613_v11  ;;  %v12088_v9 = vld [vmem:[#allocation5 + $0x80] ss:$48 sps:$4 sm:$0xff]   ;;  %v12093_v14 = vld [vmem:[#allocation5 + $0xec] ss:$48 sps:$4 sm:$0xff]  }
 0x218   :  { %15006 = vst [vmem:[#allocation26_spill] sm:$0xff] %v13081_v23  ;;  %v10582_v32 = vadd.f32 %v2475_v28, %v12993_v18  ;;  %v10646_v33 = vadd.f32 %v2861_v29, %v12996_v19  ;;  %v2477_v34 = vpop.f32.mrb[21].mxu0  ;;  %v2863_v35 = vpop.f32.mrb[21].mxu1  ;;  %v12096_v17 = vld [vmem:[#allocation5 + $0xe4] ss:$48 sps:$4 sm:$0xff]  }
 0x219   :  { %15007 = vst [vmem:[#allocation27_spill] sm:$0xff] %v13085_v31  ;;  %v10583_v36 = vadd.f32 %v2477_v34, %v12999_v20  ;;  %v10647_v37 = vadd.f32 %v2863_v35, %v13003_v21  ;;  %v2479_v38 = vpop.f32.mrb[22].mxu0  ;;  %v2865_v42 = vpop.f32.mrb[22].mxu1  ;;  %v12645_v23 = vld [vmem:[#allocation2 + $0x98] ss:$12 sps:$4 sm:$0xff]  }
 0x21a   :  { %v10584_v46 = vadd.f32 %v2479_v38, %v12993_v18  ;;  %v10648_v47 = vadd.f32 %v2865_v42, %v12996_v19  ;;  %v2481_v48 = vpop.f32.mrb[23].mxu0  ;;  %v2867_v52 = vpop.f32.mrb[23].mxu1  ;;  %v4634_v58 = vmax.f32 %v10582_v32, 0.0  ;;  %v4636_v62 = vmax.f32 %v10646_v33, 0.0 }
 0x21b   :  { %v10585_v53 = vadd.f32 %v2481_v48, %v12999_v20  ;;  %v10649_v55 = vadd.f32 %v2867_v52, %v13003_v21  ;;  %v4635_v5 = vmax.f32 %v10583_v36, 0.0  ;;  %v4637_v6 = vmax.f32 %v10647_v37, 0.0 }
 0x21c   :  { %v4646_v63 = vmax.f32 %v10584_v46, 0.0  ;;  %v4648_v1 = vmax.f32 %v10648_v47, 0.0  ;;  %3196 = vmatmul.mubr.bf16.vlgmr.msra.gmra.mrb[64].mxu0 %v12639_v3  ;;  %3582 = vmatmul.mubr.bf16.vlgmr.msra.gmra.mrb[64].mxu1 %v12639_v3 }
 0x21d   :  { %v4647_v7 = vmax.f32 %v10585_v53, 0.0  ;;  %v4649_v8 = vmax.f32 %v10649_v55, 0.0  ;;  %4129 = vmatpush1.bf16.msra.mxu1 %v12079_v43  ;;  %3743 = vmatpush1.bf16.msra.mxu0 %v12082_v45  ;;  %v12091_v55 = vld [vmem:[#allocation5 + $0xe8] ss:$48 sps:$4 sm:$0xff]  }
 0x21e   :  { %v13095_v11 = vpack.c.bf16 %v4646_v63, %v4634_v58  ;;  %3205 = vmatprep.mubr.bf16.mxu0 %v14850_v2  ;;  %3591 = vmatprep.mubr.bf16.mxu1 %v14850_v2  ;;  %v13099_v28 = vpack.c.bf16 %v4648_v1, %v4636_v62  ;;  %v12099_v62 = vld [vmem:[#allocation5 + $0x14c] ss:$48 sps:$4 sm:$0xff]   ;;  %v12102_v63 = vld [vmem:[#allocation5 + $0x144] ss:$48 sps:$4 sm:$0xff]  }
 0x21f   :  { %v13101_v29 = vpack.c.bf16 %v4647_v7, %v4635_v5  ;;  %v2485_v32 = vpop.f32.mrb[24].mxu0  ;;  %v2871_v33 = vpop.f32.mrb[24].mxu1  ;;  %4130 = vmatprep.subr.bf16.mxu1 %v12087_v56  ;;  %3744 = vmatprep.subr.bf16.mxu0 %v12090_v57  ;;  %v13103_v34 = vpack.c.bf16 %v4649_v8, %v4637_v6  ;;  %v12094_v56 = vld [vmem:[#allocation5 + $0xe0] ss:$48 sps:$4 sm:$0xff]  }
 0x220   :  { %15008 = vst [vmem:[#allocation28_spill] sm:$0xff] %v13099_v28  ;;  %v10586_v35 = vadd.f32 %v2485_v32, %v12993_v18  ;;  %v10650_v36 = vadd.f32 %v2871_v33, %v12996_v19  ;;  %v2487_v37 = vpop.f32.mrb[25].mxu0  ;;  %v2873_v38 = vpop.f32.mrb[25].mxu1  ;;  %v12640_v6 = vld [vmem:[#allocation2 + $0x20] ss:$12 sps:$4 sm:$0xff]  }
 0x221   :  { %15009 = vst [vmem:[#allocation29_spill] sm:$0xff] %v13103_v34  ;;  %v10587_v42 = vadd.f32 %v2487_v37, %v12999_v20  ;;  %v10651_v43 = vadd.f32 %v2873_v38, %v13003_v21  ;;  %v2489_v45 = vpop.f32.mrb[26].mxu0  ;;  %v2875_v46 = vpop.f32.mrb[26].mxu1  ;;  %4131 = vmatpush1.bf16.msra.mxu1 %v12085_v4  ;;  %3745 = vmatpush1.bf16.msra.mxu0 %v12088_v9  ;;  %v12100_v33 = vld [vmem:[#allocation5 + $0x140] ss:$48 sps:$4 sm:$0xff]  }
 0x222   :  { %v10588_v47 = vadd.f32 %v2489_v45, %v12993_v18  ;;  %v10652_v48 = vadd.f32 %v2875_v46, %v12996_v19  ;;  %v2491_v52 = vpop.f32.mrb[27].mxu0  ;;  %v2877_v53 = vpop.f32.mrb[27].mxu1  ;;  %4132 = vmatprep.subr.bf16.mxu1 %v12093_v14  ;;  %3746 = vmatprep.subr.bf16.mxu0 %v12096_v17  ;;  %v4658_v1 = vmax.f32 %v10586_v35, 0.0  ;;  %v4660_v3 = vmax.f32 %v10650_v36, 0.0  ;;  %v12097_v17 = vld [vmem:[#allocation5 + $0x148] ss:$48 sps:$4 sm:$0xff]  }
 0x223   :  { %v10589_v57 = vadd.f32 %v2491_v52, %v12999_v20  ;;  %v10653_v58 = vadd.f32 %v2877_v53, %v13003_v21  ;;  %v4659_v7 = vmax.f32 %v10587_v42, 0.0  ;;  %v4661_v8 = vmax.f32 %v10651_v43, 0.0  ;;  %v12105_v42 = vld [vmem:[#allocation5 + $0x1ac] ss:$48 sps:$4 sm:$0xff]   ;;  %v12108_v43 = vld [vmem:[#allocation5 + $0x1a4] ss:$48 sps:$4 sm:$0xff]  }
 0x224   :  { %v4670_v4 = vmax.f32 %v10588_v47, 0.0  ;;  %v4672_v5 = vmax.f32 %v10652_v48, 0.0  ;;  %3206 = vmatmul.mubr.bf16.gmra.mrb[68].mxu0 %v12640_v6  ;;  %3592 = vmatmul.mubr.bf16.gmra.mrb[68].mxu1 %v12640_v6  ;;  %v12644_v28 = vld [vmem:[#allocation2 + $0x80] ss:$12 sps:$4 sm:$0xff]  }
 0x225   :  { %v4671_v9 = vmax.f32 %v10589_v57, 0.0  ;;  %v4673_v32 = vmax.f32 %v10653_v58, 0.0  ;;  %3215 = vmatprep.mubr.bf16.mxu0 %v14850_v2  ;;  %3601 = vmatprep.mubr.bf16.mxu1 %v14850_v2 }
 0x226   :  { %v13115_v14 = vpack.c.bf16 %v4670_v4, %v4658_v1  ;;  %4133 = vmatpush1.bf16.msra.mxu1 %v12091_v55  ;;  %3747 = vmatpush1.bf16.msra.mxu0 %v12094_v56  ;;  %v13117_v35 = vpack.c.bf16 %v4672_v5, %v4660_v3  ;;  %v12103_v3 = vld [vmem:[#allocation5 + $0x1a8] ss:$48 sps:$4 sm:$0xff]   ;;  %v12106_v4 = vld [vmem:[#allocation5 + $0x1a0] ss:$48 sps:$4 sm:$0xff]  }
 0x227   :  { %v13119_v36 = vpack.c.bf16 %v4671_v9, %v4659_v7  ;;  %v2495_v37 = vpop.f32.mrb[28].mxu0  ;;  %v2881_v38 = vpop.f32.mrb[28].mxu1  ;;  %4134 = vmatprep.subr.bf16.mxu1 %v12099_v62  ;;  %3748 = vmatprep.subr.bf16.mxu0 %v12102_v63  ;;  %v13121_v45 = vpack.c.bf16 %v4673_v32, %v4661_v8  ;;  %v12111_v7 = vld [vmem:[#allocation5 + $0x20c] ss:$48 sps:$4 sm:$0xff]   ;;  %v12114_v8 = vld [vmem:[#allocation5 + $0x204] ss:$48 sps:$4 sm:$0xff]  }
 0x228   :  { %15010 = vst [vmem:[#allocation30_spill] sm:$0xff] %v13117_v35  ;;  %v10590_v46 = vadd.f32 %v2495_v37, %v12993_v18  ;;  %v10654_v47 = vadd.f32 %v2881_v38, %v12996_v19  ;;  %v2497_v48 = vpop.f32.mrb[29].mxu0  ;;  %v2883_v52 = vpop.f32.mrb[29].mxu1  ;;  %v12643_v35 = vld [vmem:[#allocation2 + $0x68] ss:$12 sps:$4 sm:$0xff]  }
 0x229   :  { %15011 = vst [vmem:[#allocation31_spill] sm:$0xff] %v13121_v45  ;;  %v10591_v53 = vadd.f32 %v2497_v48, %v12999_v20  ;;  %v10655_v55 = vadd.f32 %v2883_v52, %v13003_v21  ;;  %v2499_v56 = vpop.f32.mrb[30].mxu0  ;;  %v2885_v57 = vpop.f32.mrb[30].mxu1  ;;  %v12641_v48 = vld [vmem:[#allocation2 + $0x38] ss:$12 sps:$4 sm:$0xff]  }
 0x22a   :  { %v10592_v58 = vadd.f32 %v2499_v56, %v12993_v18  ;;  %v10656_v62 = vadd.f32 %v2885_v57, %v12996_v19  ;;  %v2501_v63 = vpop.f32.mrb[31].mxu0  ;;  %v2887_v1 = vpop.f32.mrb[31].mxu1  ;;  %4135 = vmatpush1.bf16.msra.mxu1 %v12097_v17  ;;  %3749 = vmatpush1.bf16.msra.mxu0 %v12100_v33  ;;  %v4682_v9 = vmax.f32 %v10590_v46, 0.0  ;;  %v4684_v32 = vmax.f32 %v10654_v47, 0.0 }
 0x22b   :  { %v10593_v5 = vadd.f32 %v2501_v63, %v12999_v20  ;;  %v10657_v6 = vadd.f32 %v2887_v1, %v13003_v21  ;;  %4136 = vmatprep.subr.bf16.mxu1 %v12105_v42  ;;  %3750 = vmatprep.subr.bf16.mxu0 %v12108_v43  ;;  %v4683_v52 = vmax.f32 %v10591_v53, 0.0  ;;  %v4685_v17 = vmax.f32 %v10655_v55, 0.0  ;;  %v12109_v42 = vld [vmem:[#allocation5 + $0x208] ss:$48 sps:$4 sm:$0xff]   ;;  %v12112_v43 = vld [vmem:[#allocation5 + $0x200] ss:$48 sps:$4 sm:$0xff]  }
 0x22c   :  { %v4694_v37 = vmax.f32 %v10592_v58, 0.0  ;;  %v4696_v38 = vmax.f32 %v10656_v62, 0.0  ;;  %3216 = vmatmul.mubr.bf16.gmra.mrb[72].mxu0 %v12641_v48  ;;  %3602 = vmatmul.mubr.bf16.gmra.mrb[72].mxu1 %v12641_v48  ;;  %v12117_v53 = vld [vmem:[#allocation5 + $0x26c] ss:$48 sps:$4 sm:$0xff]   ;;  %v12120_v55 = vld [vmem:[#allocation5 + $0x264] ss:$48 sps:$4 sm:$0xff]  }
 0x22d   :  { %v4695_v33 = vmax.f32 %v10593_v5, 0.0  ;;  %v4697_v56 = vmax.f32 %v10657_v6, 0.0  ;;  %3225 = vmatprep.mubr.bf16.mxu0 %v14850_v2  ;;  %3611 = vmatprep.mubr.bf16.mxu1 %v14850_v2  ;;  %v12642_v2 = vld [vmem:[#allocation2 + $0x50] ss:$12 sps:$4 sm:$0xff]  }
 0x22e   :  { %v13133_v57 = vpack.c.bf16 %v4694_v37, %v4682_v9  ;;  %4137 = vmatpush1.bf16.msra.mxu1 %v12103_v3  ;;  %3751 = vmatpush1.bf16.msra.mxu0 %v12106_v4  ;;  %v13135_v46 = vpack.c.bf16 %v4696_v38, %v4684_v32 }
 0x22f   :  { %v13137_v47 = vpack.c.bf16 %v4695_v33, %v4683_v52  ;;  %v2505_v58 = vpop.f32.mrb[32].mxu0  ;;  %v2891_v62 = vpop.f32.mrb[32].mxu1  ;;  %4138 = vmatprep.subr.bf16.mxu1 %v12111_v7  ;;  %3752 = vmatprep.subr.bf16.mxu0 %v12114_v8  ;;  %v13139_v63 = vpack.c.bf16 %v4697_v56, %v4685_v17  ;;  %v12115_v52 = vld [vmem:[#allocation5 + $0x268] ss:$48 sps:$4 sm:$0xff]   ;;  %v12118_v17 = vld [vmem:[#allocation5 + $0x260] ss:$48 sps:$4 sm:$0xff]  }
 0x230   :  { %15012 = vst [vmem:[#allocation32_spill] sm:$0xff] %v13135_v46  ;;  %v10594_v1 = vadd.f32 %v2505_v58, %v12993_v18  ;;  %v10658_v5 = vadd.f32 %v2891_v62, %v12996_v19  ;;  %v2507_v3 = vpop.f32.mrb[33].mxu0  ;;  %v2893_v4 = vpop.f32.mrb[33].mxu1  ;;  %v12123_v58 = vld [vmem:[#allocation5 + $0x2cc] ss:$48 sps:$4 sm:$0xff]  }
 0x231   :  { %15013 = vst [vmem:[#allocation33_spill] sm:$0xff] %v13139_v63  ;;  %v10595_v6 = vadd.f32 %v2507_v3, %v12999_v20  ;;  %v10659_v9 = vadd.f32 %v2893_v4, %v13003_v21  ;;  %v2509_v32 = vpop.f32.mrb[34].mxu0  ;;  %v2895_v37 = vpop.f32.mrb[34].mxu1  ;;  %v12126_v62 = vld [vmem:[#allocation5 + $0x2c4] ss:$48 sps:$4 sm:$0xff]   ;;  %v15014_v63 = vmov 0  }
 0x232   :  { %v10596_v38 = vadd.f32 %v2509_v32, %v12993_v18  ;;  %v10660_v7 = vadd.f32 %v2895_v37, %v12996_v19  ;;  %v2511_v8 = vpop.f32.mrb[35].mxu0  ;;  %v2897_v48 = vpop.f32.mrb[35].mxu1  ;;  %4139 = vmatpush1.bf16.msra.mxu1 %v12109_v42  ;;  %3753 = vmatpush1.bf16.msra.mxu0 %v12112_v43  ;;  %v4706_v3 = vmax.f32 %v10594_v1, 0.0  ;;  %v4708_v4 = vmax.f32 %v10658_v5, 0.0 }
 0x233   :  { %v10597_v33 = vadd.f32 %v2511_v8, %v12999_v20  ;;  %v10661_v56 = vadd.f32 %v2897_v48, %v13003_v21  ;;  %4140 = vmatprep.subr.bf16.mxu1 %v12117_v53  ;;  %3754 = vmatprep.subr.bf16.mxu0 %v12120_v55  ;;  %v4707_v37 = vmax.f32 %v10595_v6, 0.0  ;;  %v4709_v42 = vmax.f32 %v10659_v9, 0.0  ;;  %v12121_v53 = vld [vmem:[#allocation5 + $0x2c8] ss:$48 sps:$4 sm:$0xff]   ;;  %v12124_v55 = vld [vmem:[#allocation5 + $0x2c0] ss:$48 sps:$4 sm:$0xff]  }
 0x234   :  { %v4718_v16 = vmax.f32 %v10596_v38, 0.0  ;;  %v4720_v32 = vmax.f32 %v10660_v7, 0.0  ;;  %3226 = vmatmul.mubr.bf16.gmra.mrb[76].mxu0 %v12642_v2  ;;  %3612 = vmatmul.mubr.bf16.gmra.mrb[76].mxu1 %v12642_v2  ;;  %v12129_v6 = vld [vmem:[#allocation5 + $0x32c] ss:$48 sps:$4 sm:$0xff]   ;;  %v12132_v9 = vld [vmem:[#allocation5 + $0x324] ss:$48 sps:$4 sm:$0xff]  }
 0x235   :  { %v4719_v43 = vmax.f32 %v10597_v33, 0.0  ;;  %v4721_v46 = vmax.f32 %v10661_v56, 0.0  ;;  %3235 = vmatprep.mubr.bf16.mxu0 %v15014_v63  ;;  %3621 = vmatprep.mubr.bf16.mxu1 %v15014_v63 }
 0x236   :  { %v13151_v8 = vpack.c.bf16 %v4718_v16, %v4706_v3  ;;  %4141 = vmatpush1.bf16.msra.mxu1 %v12115_v52  ;;  %3755 = vmatpush1.bf16.msra.mxu0 %v12118_v17  ;;  %v13153_v1 = vpack.c.bf16 %v4720_v32, %v4708_v4 }
 0x237   :  { %v13155_v5 = vpack.c.bf16 %v4719_v43, %v4707_v37  ;;  %v2515_v38 = vpop.f32.mrb[36].mxu0  ;;  %v2901_v2 = vpop.f32.mrb[36].mxu1  ;;  %4142 = vmatprep.subr.bf16.mxu1 %v12123_v58  ;;  %3756 = vmatprep.subr.bf16.mxu0 %v12126_v62  ;;  %v13157_v7 = vpack.c.bf16 %v4721_v46, %v4709_v42  ;;  %v12127_v46 = vld [vmem:[#allocation5 + $0x328] ss:$48 sps:$4 sm:$0xff]   ;;  %v12130_v42 = vld [vmem:[#allocation5 + $0x320] ss:$48 sps:$4 sm:$0xff]  }
 0x238   :  { %15015 = vst [vmem:[#allocation34_spill] sm:$0xff] %v13153_v1  ;;  %v10598_v48 = vadd.f32 %v2515_v38, %v12993_v18  ;;  %v10662_v16 = vadd.f32 %v2901_v2, %v12996_v19  ;;  %v2517_v52 = vpop.f32.mrb[37].mxu0  ;;  %v2903_v17 = vpop.f32.mrb[37].mxu1  ;;  %v12135_v2 = vld [vmem:[#allocation5 + $0x38c] ss:$48 sps:$4 sm:$0xff]  }
 0x239   :  { %15016 = vst [vmem:[#allocation35_spill] sm:$0xff] %v13157_v7  ;;  %v10599_v33 = vadd.f32 %v2517_v52, %v12999_v20  ;;  %v10663_v56 = vadd.f32 %v2903_v17, %v13003_v21  ;;  %v2519_v3 = vpop.f32.mrb[38].mxu0  ;;  %v2905_v4 = vpop.f32.mrb[38].mxu1  ;;  %v12138_v52 = vld [vmem:[#allocation5 + $0x384] ss:$48 sps:$4 sm:$0xff]  }
 0x23a   :  { %v10600_v32 = vadd.f32 %v2519_v3, %v12993_v18  ;;  %v10664_v58 = vadd.f32 %v2905_v4, %v12996_v19  ;;  %v2521_v62 = vpop.f32.mrb[39].mxu0  ;;  %v2907_v37 = vpop.f32.mrb[39].mxu1  ;;  %4143 = vmatpush1.bf16.msra.mxu1 %v12121_v53  ;;  %3757 = vmatpush1.bf16.msra.mxu0 %v12124_v55  ;;  %v4730_v17 = vmax.f32 %v10598_v48, 0.0  ;;  %v4732_v1 = vmax.f32 %v10662_v16, 0.0 }
 0x23b   :  { %v10601_v43 = vadd.f32 %v2521_v62, %v12999_v20  ;;  %v10665_v38 = vadd.f32 %v2907_v37, %v13003_v21  ;;  %4144 = vmatprep.subr.bf16.mxu1 %v12129_v6  ;;  %3758 = vmatprep.subr.bf16.mxu0 %v12132_v9  ;;  %v4731_v4 = vmax.f32 %v10599_v33, 0.0  ;;  %v4733_v53 = vmax.f32 %v10663_v56, 0.0  ;;  %v12133_v6 = vld [vmem:[#allocation5 + $0x388] ss:$48 sps:$4 sm:$0xff]   ;;  %v12136_v9 = vld [vmem:[#allocation5 + $0x380] ss:$48 sps:$4 sm:$0xff]  }
 0x23c   :  { %v4742_v7 = vmax.f32 %v10600_v32, 0.0  ;;  %v4744_v3 = vmax.f32 %v10664_v58, 0.0  ;;  %3236 = vmatmul.mubr.bf16.gmra.mrb[80].mxu0 %v12643_v35  ;;  %3622 = vmatmul.mubr.bf16.gmra.mrb[80].mxu1 %v12643_v35  ;;  %v12141_v33 = vld [vmem:[#allocation5 + $0x3ec] ss:$48 sps:$4 sm:$0xff]   ;;  %v12144_v56 = vld [vmem:[#allocation5 + $0x3e4] ss:$48 sps:$4 sm:$0xff]  }
 0x23d   :  { %v4743_v55 = vmax.f32 %v10601_v43, 0.0  ;;  %v4745_v45 = vmax.f32 %v10665_v38, 0.0  ;;  %3245 = vmatprep.mubr.bf16.mxu0 %v15014_v63  ;;  %3631 = vmatprep.mubr.bf16.mxu1 %v15014_v63 }
 0x23e   :  { %v13169_v62 = vpack.c.bf16 %v4742_v7, %v4730_v17  ;;  %4145 = vmatpush1.bf16.msra.mxu1 %v12127_v46  ;;  %3759 = vmatpush1.bf16.msra.mxu0 %v12130_v42  ;;  %v13171_v48 = vpack.c.bf16 %v4744_v3, %v4732_v1 }
 0x23f   :  { %v13173_v16 = vpack.c.bf16 %v4743_v55, %v4731_v4  ;;  %v2525_v32 = vpop.f32.mrb[40].mxu0  ;;  %v2911_v35 = vpop.f32.mrb[40].mxu1  ;;  %4146 = vmatprep.subr.bf16.mxu1 %v12135_v2  ;;  %3760 = vmatprep.subr.bf16.mxu0 %v12138_v52  ;;  %v13175_v58 = vpack.c.bf16 %v4745_v45, %v4733_v53  ;;  %v12139_v45 = vld [vmem:[#allocation5 + $0x3e8] ss:$48 sps:$4 sm:$0xff]   ;;  %v12142_v53 = vld [vmem:[#allocation5 + $0x3e0] ss:$48 sps:$4 sm:$0xff]  }
 0x240   :  { %15017 = vst [vmem:[#allocation36_spill] sm:$0xff] %v13171_v48  ;;  %v10602_v37 = vadd.f32 %v2525_v32, %v12993_v18  ;;  %v10666_v7 = vadd.f32 %v2911_v35, %v12996_v19  ;;  %v2527_v46 = vpop.f32.mrb[41].mxu0  ;;  %v2913_v42 = vpop.f32.mrb[41].mxu1  ;;  %v12147_v35 = vld [vmem:[#allocation5 + $0x44c] ss:$48 sps:$4 sm:$0xff]  }
 0x241   :  { %15018 = vst [vmem:[#allocation37_spill] sm:$0xff] %v13175_v58  ;;  %v10603_v43 = vadd.f32 %v2527_v46, %v12999_v20  ;;  %v10667_v1 = vadd.f32 %v2913_v42, %v13003_v21  ;;  %v2529_v38 = vpop.f32.mrb[42].mxu0  ;;  %v2915_v17 = vpop.f32.mrb[42].mxu1  ;;  %v12150_v46 = vld [vmem:[#allocation5 + $0x444] ss:$48 sps:$4 sm:$0xff]  }
 0x242   :  { %v10604_v3 = vadd.f32 %v2529_v38, %v12993_v18  ;;  %v10668_v2 = vadd.f32 %v2915_v17, %v12996_v19  ;;  %v2531_v52 = vpop.f32.mrb[43].mxu0  ;;  %v2917_v4 = vpop.f32.mrb[43].mxu1  ;;  %4147 = vmatpush1.bf16.msra.mxu1 %v12133_v6  ;;  %3761 = vmatpush1.bf16.msra.mxu0 %v12136_v9  ;;  %v4754_v42 = vmax.f32 %v10602_v37, 0.0  ;;  %v4756_v48 = vmax.f32 %v10666_v7, 0.0 }
 0x243   :  { %v10605_v55 = vadd.f32 %v2531_v52, %v12999_v20  ;;  %v10669_v32 = vadd.f32 %v2917_v4, %v13003_v21  ;;  %4148 = vmatprep.subr.bf16.mxu1 %v12141_v33  ;;  %3762 = vmatprep.subr.bf16.mxu0 %v12144_v56  ;;  %v4755_v17 = vmax.f32 %v10603_v43, 0.0  ;;  %v4757_v6 = vmax.f32 %v10667_v1, 0.0  ;;  %v12145_v33 = vld [vmem:[#allocation5 + $0x448] ss:$48 sps:$4 sm:$0xff]   ;;  %v12148_v56 = vld [vmem:[#allocation5 + $0x440] ss:$48 sps:$4 sm:$0xff]  }
 0x244   :  { %v4766_v58 = vmax.f32 %v10604_v3, 0.0  ;;  %v4768_v38 = vmax.f32 %v10668_v2, 0.0  ;;  %3246 = vmatmul.mubr.bf16.gmra.mrb[84].mxu0 %v12644_v28  ;;  %3632 = vmatmul.mubr.bf16.gmra.mrb[84].mxu1 %v12644_v28  ;;  %v12153_v43 = vld [vmem:[#allocation5 + $0x4ac] ss:$48 sps:$4 sm:$0xff]   ;;  %v12156_v1 = vld [vmem:[#allocation5 + $0x4a4] ss:$48 sps:$4 sm:$0xff]  }
 0x245   :  { %v4767_v9 = vmax.f32 %v10605_v55, 0.0  ;;  %v4769_v34 = vmax.f32 %v10669_v32, 0.0  ;;  %3255 = vmatprep.mubr.bf16.mxu0 %v15014_v63  ;;  %3641 = vmatprep.mubr.bf16.mxu1 %v15014_v63 }
 0x246   :  { %v13187_v52 = vpack.c.bf16 %v4766_v58, %v4754_v42  ;;  %4149 = vmatpush1.bf16.msra.mxu1 %v12139_v45  ;;  %3763 = vmatpush1.bf16.msra.mxu0 %v12142_v53  ;;  %v13189_v37 = vpack.c.bf16 %v4768_v38, %v4756_v48 }
 0x247   :  { %v13191_v7 = vpack.c.bf16 %v4767_v9, %v4755_v17  ;;  %v2535_v3 = vpop.f32.mrb[44].mxu0  ;;  %v2921_v28 = vpop.f32.mrb[44].mxu1  ;;  %4150 = vmatprep.subr.bf16.mxu1 %v12147_v35  ;;  %3764 = vmatprep.subr.bf16.mxu0 %v12150_v46  ;;  %v13193_v2 = vpack.c.bf16 %v4769_v34, %v4757_v6  ;;  %v12151_v34 = vld [vmem:[#allocation5 + $0x4a8] ss:$48 sps:$4 sm:$0xff]   ;;  %v12154_v6 = vld [vmem:[#allocation5 + $0x4a0] ss:$48 sps:$4 sm:$0xff]  }
 0x248   :  { %15019 = vst [vmem:[#allocation38_spill] sm:$0xff] %v13189_v37  ;;  %v10606_v4 = vadd.f32 %v2535_v3, %v12993_v18  ;;  %v10670_v58 = vadd.f32 %v2921_v28, %v12996_v19  ;;  %v2537_v45 = vpop.f32.mrb[45].mxu0  ;;  %v2923_v53 = vpop.f32.mrb[45].mxu1  ;;  %v12159_v28 = vld [vmem:[#allocation5 + $0x50c] ss:$48 sps:$4 sm:$0xff]  }
 0x249   :  { %15020 = vst [vmem:[#allocation39_spill] sm:$0xff] %v13193_v2  ;;  %v10607_v55 = vadd.f32 %v2537_v45, %v12999_v20  ;;  %v10671_v48 = vadd.f32 %v2923_v53, %v13003_v21  ;;  %v2539_v32 = vpop.f32.mrb[46].mxu0  ;;  %v2925_v42 = vpop.f32.mrb[46].mxu1  ;;  %v12162_v45 = vld [vmem:[#allocation5 + $0x504] ss:$48 sps:$4 sm:$0xff]  }
 0x24a   :  { %v10608_v38 = vadd.f32 %v2539_v32, %v12993_v18  ;;  %v10672_v35 = vadd.f32 %v2925_v42, %v12996_v19  ;;  %v2541_v46 = vpop.f32.mrb[47].mxu0  ;;  %v2927_v17 = vpop.f32.mrb[47].mxu1  ;;  %4151 = vmatpush1.bf16.msra.mxu1 %v12145_v33  ;;  %3765 = vmatpush1.bf16.msra.mxu0 %v12148_v56  ;;  %v4778_v53 = vmax.f32 %v10606_v4, 0.0  ;;  %v4780_v37 = vmax.f32 %v10670_v58, 0.0 }
 0x24b   :  { %v10609_v9 = vadd.f32 %v2541_v46, %v12999_v20  ;;  %v10673_v3 = vadd.f32 %v2927_v17, %v13003_v21  ;;  %4152 = vmatprep.subr.bf16.mxu1 %v12153_v43  ;;  %3766 = vmatprep.subr.bf16.mxu0 %v12156_v1  ;;  %v4779_v42 = vmax.f32 %v10607_v55, 0.0  ;;  %v4781_v33 = vmax.f32 %v10671_v48, 0.0  ;;  %v12157_v43 = vld [vmem:[#allocation5 + $0x508] ss:$48 sps:$4 sm:$0xff]   ;;  %v12160_v1 = vld [vmem:[#allocation5 + $0x500] ss:$48 sps:$4 sm:$0xff]  }
 0x24c   :  { %v4790_v2 = vmax.f32 %v10608_v38, 0.0  ;;  %v4792_v32 = vmax.f32 %v10672_v35, 0.0  ;;  %3256 = vmatmul.mubr.bf16.gmra.mrb[88].mxu0 %v12645_v23  ;;  %3642 = vmatmul.mubr.bf16.gmra.mrb[88].mxu1 %v12645_v23  ;;  %v12165_v55 = vld [vmem:[#allocation5 + $0x56c] ss:$48 sps:$4 sm:$0xff]   ;;  %v12168_v48 = vld [vmem:[#allocation5 + $0x564] ss:$48 sps:$4 sm:$0xff]  }
 0x24d   :  { %v4791_v56 = vmax.f32 %v10609_v9, 0.0  ;;  %v4793_v31 = vmax.f32 %v10673_v3, 0.0  ;;  %3265 = vmatprep.mubr.bf16.mxu0 %v15014_v63  ;;  %3651 = vmatprep.mubr.bf16.mxu1 %v15014_v63 }
 0x24e   :  { %v13205_v46 = vpack.c.bf16 %v4790_v2, %v4778_v53  ;;  %4153 = vmatpush1.bf16.msra.mxu1 %v12151_v34  ;;  %3767 = vmatpush1.bf16.msra.mxu0 %v12154_v6  ;;  %v13207_v4 = vpack.c.bf16 %v4792_v32, %v4780_v37 }
 0x24f   :  { %v13209_v58 = vpack.c.bf16 %v4791_v56, %v4779_v42  ;;  %v2545_v38 = vpop.f32.mrb[48].mxu0  ;;  %v2931_v23 = vpop.f32.mrb[48].mxu1  ;;  %4154 = vmatprep.subr.bf16.mxu1 %v12159_v28  ;;  %3768 = vmatprep.subr.bf16.mxu0 %v12162_v45  ;;  %v13211_v35 = vpack.c.bf16 %v4793_v31, %v4781_v33  ;;  %v12163_v31 = vld [vmem:[#allocation5 + $0x568] ss:$48 sps:$4 sm:$0xff]   ;;  %v12166_v33 = vld [vmem:[#allocation5 + $0x560] ss:$48 sps:$4 sm:$0xff]  }
 0x250   :  { %15021 = vst [vmem:[#allocation40_spill] sm:$0xff] %v13207_v4  ;;  %v10610_v17 = vadd.f32 %v2545_v38, %v12993_v18  ;;  %v10674_v2 = vadd.f32 %v2931_v23, %v12996_v19  ;;  %v2547_v34 = vpop.f32.mrb[49].mxu0  ;;  %v2933_v6 = vpop.f32.mrb[49].mxu1  ;;  %v12171_v23 = vld [vmem:[#allocation5 + $0x5cc] ss:$48 sps:$4 sm:$0xff]  }
 0x251   :  { %15022 = vst [vmem:[#allocation41_spill] sm:$0xff] %v13211_v35  ;;  %v10611_v9 = vadd.f32 %v2547_v34, %v12999_v20  ;;  %v10675_v37 = vadd.f32 %v2933_v6, %v13003_v21  ;;  %v2549_v3 = vpop.f32.mrb[50].mxu0  ;;  %v2935_v53 = vpop.f32.mrb[50].mxu1  ;;  %v12174_v34 = vld [vmem:[#allocation5 + $0x5c4] ss:$48 sps:$4 sm:$0xff]  }
 0x252   :  { %v10612_v32 = vadd.f32 %v2549_v3, %v12993_v18  ;;  %v10676_v28 = vadd.f32 %v2935_v53, %v12996_v19  ;;  %v2551_v45 = vpop.f32.mrb[51].mxu0  ;;  %v2937_v42 = vpop.f32.mrb[51].mxu1  ;;  %4155 = vmatpush1.bf16.msra.mxu1 %v12157_v43  ;;  %3769 = vmatpush1.bf16.msra.mxu0 %v12160_v1  ;;  %v4802_v6 = vmax.f32 %v10610_v17, 0.0  ;;  %v4804_v4 = vmax.f32 %v10674_v2, 0.0 }
 0x253   :  { %v10613_v56 = vadd.f32 %v2551_v45, %v12999_v20  ;;  %v10677_v38 = vadd.f32 %v2937_v42, %v13003_v21  ;;  %4156 = vmatprep.subr.bf16.mxu1 %v12165_v55  ;;  %3770 = vmatprep.subr.bf16.mxu0 %v12168_v48  ;;  %v4803_v53 = vmax.f32 %v10611_v9, 0.0  ;;  %v4805_v43 = vmax.f32 %v10675_v37, 0.0  ;;  %v12169_v55 = vld [vmem:[#allocation5 + $0x5c8] ss:$48 sps:$4 sm:$0xff]   ;;  %v12172_v48 = vld [vmem:[#allocation5 + $0x5c0] ss:$48 sps:$4 sm:$0xff]  }
 0x254   :  { %v4814_v35 = vmax.f32 %v10612_v32, 0.0  ;;  %v4816_v3 = vmax.f32 %v10676_v28, 0.0  ;;  %3266 = vmatmul.mubr.bf16.gmra.mrb[92].mxu0 %v12646_v40  ;;  %3652 = vmatmul.mubr.bf16.gmra.mrb[92].mxu1 %v12646_v40  ;;  %v12177_v9 = vld [vmem:[#allocation5 + $0x62c] ss:$48 sps:$4 sm:$0xff]   ;;  %v12180_v37 = vld [vmem:[#allocation5 + $0x624] ss:$48 sps:$4 sm:$0xff]  }
 0x255   :  { %v4815_v1 = vmax.f32 %v10613_v56, 0.0  ;;  %v4817_v44 = vmax.f32 %v10677_v38, 0.0  ;;  %3275 = vmatprep.mubr.bf16.mxu0 %v15014_v63  ;;  %3661 = vmatprep.mubr.bf16.mxu1 %v15014_v63 }
 0x256   :  { %v13223_v45 = vpack.c.bf16 %v4814_v35, %v4802_v6  ;;  %4157 = vmatpush1.bf16.msra.mxu1 %v12163_v31  ;;  %3771 = vmatpush1.bf16.msra.mxu0 %v12166_v33  ;;  %v13225_v17 = vpack.c.bf16 %v4816_v3, %v4804_v4 }
 0x257   :  { %v13227_v2 = vpack.c.bf16 %v4815_v1, %v4803_v53  ;;  %v2555_v32 = vpop.f32.mrb[52].mxu0  ;;  %v2941_v40 = vpop.f32.mrb[52].mxu1  ;;  %4158 = vmatprep.subr.bf16.mxu1 %v12171_v23  ;;  %3772 = vmatprep.subr.bf16.mxu0 %v12174_v34  ;;  %v13229_v28 = vpack.c.bf16 %v4817_v44, %v4805_v43 }
 0x258   :  { %15023 = vst [vmem:[#allocation42_spill] sm:$0xff] %v13225_v17  ;;  %v10614_v42 = vadd.f32 %v2555_v32, %v12993_v18  ;;  %v10678_v35 = vadd.f32 %v2941_v40, %v12996_v19  ;;  %v2557_v31 = vpop.f32.mrb[53].mxu0  ;;  %v2943_v33 = vpop.f32.mrb[53].mxu1 }
 0x259   :  { %15024 = vst [vmem:[#allocation43_spill] sm:$0xff] %v13229_v28  ;;  %v10615_v56 = vadd.f32 %v2557_v31, %v12999_v20  ;;  %v10679_v4 = vadd.f32 %v2943_v33, %v13003_v21  ;;  %v2559_v38 = vpop.f32.mrb[54].mxu0  ;;  %v2945_v6 = vpop.f32.mrb[54].mxu1  ;;  %v12647_v33 = vld [vmem:[#allocation2 + $0xc8] ss:$12 sps:$4 sm:$0xff]  }
 0x25a   :  { %v10616_v3 = vadd.f32 %v2559_v38, %v12993_v18  ;;  %v10680_v23 = vadd.f32 %v2945_v6, %v12996_v19  ;;  %v2561_v34 = vpop.f32.mrb[55].mxu0  ;;  %v2947_v53 = vpop.f32.mrb[55].mxu1  ;;  %4159 = vmatpush1.bf16.msra.mxu1 %v12169_v55  ;;  %3773 = vmatpush1.bf16.msra.mxu0 %v12172_v48  ;;  %v4826_v1 = vmax.f32 %v10614_v42, 0.0  ;;  %v4828_v32 = vmax.f32 %v10678_v35, 0.0 }
 0x25b   :  { %v10617_v44 = vadd.f32 %v2561_v34, %v12999_v20  ;;  %v10681_v43 = vadd.f32 %v2947_v53, %v13003_v21  ;;  %4321 = vmatprep.subr.bf16.mxu1 %v12177_v9  ;;  %3935 = vmatprep.subr.bf16.mxu0 %v12180_v37  ;;  %v4827_v38 = vmax.f32 %v10615_v56, 0.0  ;;  %v4829_v17 = vmax.f32 %v10679_v4, 0.0 }
 0x25c   :  { %v4838_v40 = vmax.f32 %v10616_v3, 0.0  ;;  %v4840_v31 = vmax.f32 %v10680_v23, 0.0  ;;  %3276 = vmatmul.mubr.bf16.gmra.mrb[96].mxu0 %v12647_v33  ;;  %3662 = vmatmul.mubr.bf16.gmra.mrb[96].mxu1 %v12647_v33 }
 0x25d   :  { %v4839_v6 = vmax.f32 %v10617_v44, 0.0  ;;  %v4841_v28 = vmax.f32 %v10681_v43, 0.0  ;;  %3285 = vmatprep.mubr.bf16.mxu0 %v15014_v63  ;;  %3671 = vmatprep.mubr.bf16.mxu1 %v15014_v63 }
 0x25e   :  { %v13241_v55 = vpack.c.bf16 %v4838_v40, %v4826_v1  ;;  %v13243_v48 = vpack.c.bf16 %v4840_v31, %v4828_v32 }
 0x25f   :  { %v13245_v9 = vpack.c.bf16 %v4839_v6, %v4827_v38  ;;  %v2565_v37 = vpop.f32.mrb[56].mxu0  ;;  %v2951_v42 = vpop.f32.mrb[56].mxu1  ;;  %v13247_v35 = vpack.c.bf16 %v4841_v28, %v4829_v17 }
 0x260   :  { %15025 = vst [vmem:[#allocation44_spill] sm:$0xff] %v13243_v48  ;;  %v10618_v3 = vadd.f32 %v2565_v37, %v12993_v18  ;;  %v10682_v56 = vadd.f32 %v2951_v42, %v12996_v19  ;;  %v2567_v4 = vpop.f32.mrb[57].mxu0  ;;  %v2953_v23 = vpop.f32.mrb[57].mxu1  ;;  %v12648_v42 = vld [vmem:[#allocation2 + $0xe0] ss:$12 sps:$4 sm:$0xff]  }
 0x261   :  { %15026 = vst [vmem:[#allocation45_spill] sm:$0xff] %v13247_v35  ;;  %v10619_v34 = vadd.f32 %v2567_v4, %v12999_v20  ;;  %v10683_v53 = vadd.f32 %v2953_v23, %v13003_v21  ;;  %v2569_v44 = vpop.f32.mrb[58].mxu0  ;;  %v2955_v43 = vpop.f32.mrb[58].mxu1 }
 0x262   :  { %v10620_v1 = vadd.f32 %v2569_v44, %v12993_v18  ;;  %v10684_v32 = vadd.f32 %v2955_v43, %v12996_v19  ;;  %v2571_v40 = vpop.f32.mrb[59].mxu0  ;;  %v2957_v31 = vpop.f32.mrb[59].mxu1  ;;  %v4850_v33 = vmax.f32 %v10618_v3, 0.0  ;;  %v4852_v38 = vmax.f32 %v10682_v56, 0.0 }
 0x263   :  { %v10621_v17 = vadd.f32 %v2571_v40, %v12999_v20  ;;  %v10685_v28 = vadd.f32 %v2957_v31, %v13003_v21  ;;  %v4851_v4 = vmax.f32 %v10619_v34, 0.0  ;;  %v4853_v23 = vmax.f32 %v10683_v53, 0.0 }
 0x264   :  { %v4862_v6 = vmax.f32 %v10620_v1, 0.0  ;;  %v4864_v37 = vmax.f32 %v10684_v32, 0.0  ;;  %3286 = vmatmul.mubr.bf16.gmra.mrb[100].mxu0 %v12648_v42  ;;  %3672 = vmatmul.mubr.bf16.gmra.mrb[100].mxu1 %v12648_v42 }
 0x265   :  { %v4863_v48 = vmax.f32 %v10621_v17, 0.0  ;;  %v4865_v35 = vmax.f32 %v10685_v28, 0.0  ;;  %3295 = vmatprep.mubr.bf16.mxu0 %v15014_v63  ;;  %3681 = vmatprep.mubr.bf16.mxu1 %v15014_v63 }
 0x266   :  { %v13259_v44 = vpack.c.bf16 %v4862_v6, %v4850_v33  ;;  %v13261_v43 = vpack.c.bf16 %v4864_v37, %v4852_v38 }
 0x267   :  { %v13263_v40 = vpack.c.bf16 %v4863_v48, %v4851_v4  ;;  %v2575_v3 = vpop.f32.mrb[60].mxu0  ;;  %v2961_v56 = vpop.f32.mrb[60].mxu1  ;;  %v13265_v1 = vpack.c.bf16 %v4865_v35, %v4853_v23 }
 0x268   :  { %15027 = vst [vmem:[#allocation46_spill] sm:$0xff] %v13261_v43  ;;  %v10622_v32 = vadd.f32 %v2575_v3, %v12993_v18  ;;  %v10686_v34 = vadd.f32 %v2961_v56, %v12996_v19  ;;  %v2577_v53 = vpop.f32.mrb[61].mxu0  ;;  %v2963_v31 = vpop.f32.mrb[61].mxu1 }
 0x269   :  { %15028 = vst [vmem:[#allocation47_spill] sm:$0xff] %v13265_v1  ;;  %v10623_v17 = vadd.f32 %v2577_v53, %v12999_v20  ;;  %v10687_v28 = vadd.f32 %v2963_v31, %v13003_v21  ;;  %v2579_v33 = vpop.f32.mrb[62].mxu0  ;;  %v2965_v6 = vpop.f32.mrb[62].mxu1  ;;  %v12649_v1 = vld [vmem:[#allocation2 + $0xf8] ss:$12 sps:$4 sm:$0xff]  }
 0x26a   :  { %v10624_v38 = vadd.f32 %v2579_v33, %v12993_v18  ;;  %v10688_v48 = vadd.f32 %v2965_v6, %v12996_v19  ;;  %v2581_v37 = vpop.f32.mrb[63].mxu0  ;;  %v2967_v42 = vpop.f32.mrb[63].mxu1  ;;  %v4874_v23 = vmax.f32 %v10622_v32, 0.0  ;;  %v4876_v3 = vmax.f32 %v10686_v34, 0.0  ;;  %v12650_v32 = vld [vmem:[#allocation2 + $0x110] ss:$12 sps:$4 sm:$0xff]  }
 0x26b   :  { %v10625_v35 = vadd.f32 %v2581_v37, %v12999_v20  ;;  %v10689_v4 = vadd.f32 %v2967_v42, %v13003_v21  ;;  %v4875_v53 = vmax.f32 %v10623_v17, 0.0  ;;  %v4877_v31 = vmax.f32 %v10687_v28, 0.0  ;;  %v12655_v34 = vld [vmem:[#allocation2 + $0x4] ss:$12 sps:$4 sm:$0xff]   ;;  %v12175_v17 = vld [vmem:[#allocation5 + $0x628] ss:$48 sps:$4 sm:$0xff]  }
 0x26c   :  { %v4886_v56 = vmax.f32 %v10624_v38, 0.0  ;;  %v4888_v43 = vmax.f32 %v10688_v48, 0.0  ;;  %3296 = vmatmul.mubr.bf16.gmra.mrb[104].mxu0 %v12649_v1  ;;  %3682 = vmatmul.mubr.bf16.gmra.mrb[104].mxu1 %v12649_v1  ;;  %v12651_v1 = vld [vmem:[#allocation2 + $0x128] ss:$12 sps:$4 sm:$0xff]   ;;  %v12178_v28 = vld [vmem:[#allocation5 + $0x620] ss:$48 sps:$4 sm:$0xff]  }
 0x26d   :  { %v4887_v60 = vmax.f32 %v10625_v35, 0.0  ;;  %v4889_v0 = vmax.f32 %v10689_v4, 0.0  ;;  %3305 = vmatprep.mubr.bf16.mxu0 %v15014_v63  ;;  %3691 = vmatprep.mubr.bf16.mxu1 %v15014_v63  ;;  %v12183_v33 = vld [vmem:[#allocation5 + $0x68c] ss:$48 sps:$4 sm:$0xff]   ;;  %v12186_v6 = vld [vmem:[#allocation5 + $0x684] ss:$48 sps:$4 sm:$0xff]  }
 0x26e   :  { %v13277_v18 = vpack.c.bf16 %v4886_v56, %v4874_v23  ;;  %v13283_v21 = vpack.c.bf16 %v4888_v43, %v4876_v3  ;;  %v12654_v43 = vld [vmem:[#allocation2 + $0x170] ss:$12 sps:$4 sm:$0xff]   ;;  %v12656_v38 = vld [vmem:[#allocation2] ss:$12 sps:$4 sm:$0xff]   ;;  %v12181_v48 = vld [vmem:[#allocation5 + $0x688] ss:$48 sps:$4 sm:$0xff]  }
 0x26f   :  { %v13279_v19 = vpack.c.bf16 %v4887_v60, %v4875_v53  ;;  %v13281_v20 = vpack.c.bf16 %v4889_v0, %v4877_v31  ;;  %v12652_v60 = vld [vmem:[#allocation2 + $0x140] ss:$12 sps:$4 sm:$0xff]   ;;  %v12653_v0 = vld [vmem:[#allocation2 + $0x158] ss:$12 sps:$4 sm:$0xff]   ;;  %v12657_v42 = vld [vmem:[#allocation2 + $0x1c] ss:$12 sps:$4 sm:$0xff]  }
 0x270   :  { %15029 = vst [vmem:[#allocation48_spill] sm:$0xff] %v13277_v18  ;;  %15032 = vst [vmem:[#allocation51_spill] sm:$0xff] %v13283_v21  ;;  %v12184_v37 = vld [vmem:[#allocation5 + $0x680] ss:$48 sps:$4 sm:$0xff]   ;;  %v12189_v35 = vld [vmem:[#allocation5 + $0x6ec] ss:$48 sps:$4 sm:$0xff]  }
 0x271   :  { %15030 = vst [vmem:[#allocation49_spill] sm:$0xff] %v13279_v19  ;;  %15031 = vst [vmem:[#allocation50_spill] sm:$0xff] %v13281_v20  ;;  %v12192_v4 = vld [vmem:[#allocation5 + $0x6e4] ss:$48 sps:$4 sm:$0xff]   ;;  %v12187_v23 = vld [vmem:[#allocation5 + $0x6e8] ss:$48 sps:$4 sm:$0xff]  }
 0x272   :  { %v12190_v3 = vld [vmem:[#allocation5 + $0x6e0] ss:$48 sps:$4 sm:$0xff]   ;;  %v12195_v56 = vld [vmem:[#allocation5 + $0x74c] ss:$48 sps:$4 sm:$0xff]   ;;  %v12198_v53 = vld [vmem:[#allocation5 + $0x744] ss:$48 sps:$4 sm:$0xff]  }
 0x273   :  { %v12658_v31 = vld [vmem:[#allocation2 + $0x18] ss:$12 sps:$4 sm:$0xff]   ;;  %v12679_v20 = vld [vmem:[#allocation2 + $0x108] ss:$12 sps:$4 sm:$0xff]  }
 0x274   :  { %3306 = vmatmul.mubr.bf16.gmra.mrb[108].mxu0 %v12650_v32  ;;  %3692 = vmatmul.mubr.bf16.gmra.mrb[108].mxu1 %v12650_v32  ;;  %v12659_v32 = vld [vmem:[#allocation2 + $0x34] ss:$12 sps:$4 sm:$0xff]   ;;  %v12232_v19 = vld [vmem:[#allocation8 + $0x20] ss:$12 sps:$4 sm:$0xff]  }
 0x275   :  { %3315 = vmatprep.mubr.bf16.mxu0 %v15014_v63  ;;  %3701 = vmatprep.mubr.bf16.mxu1 %v15014_v63 }
 0x27c   :  { %3316 = vmatmul.mubr.bf16.gmra.mrb[112].mxu0 %v12651_v1  ;;  %3702 = vmatmul.mubr.bf16.gmra.mrb[112].mxu1 %v12651_v1  ;;  %v12193_v1 = vld [vmem:[#allocation5 + $0x748] ss:$48 sps:$4 sm:$0xff]  }
 0x27d   :  { %3325 = vmatprep.mubr.bf16.mxu0 %v15014_v63  ;;  %3711 = vmatprep.mubr.bf16.mxu1 %v15014_v63 }
 0x284   :  { %3326 = vmatmul.mubr.bf16.gmra.mrb[116].mxu0 %v12652_v60  ;;  %3712 = vmatmul.mubr.bf16.gmra.mrb[116].mxu1 %v12652_v60  ;;  %v12196_v60 = vld [vmem:[#allocation5 + $0x740] ss:$48 sps:$4 sm:$0xff]  }
 0x285   :  { %3335 = vmatprep.mubr.bf16.mxu0 %v15014_v63  ;;  %3721 = vmatprep.mubr.bf16.mxu1 %v15014_v63 }
 0x28c   :  { %3336 = vmatmul.mubr.bf16.gmra.mrb[120].mxu0 %v12653_v0  ;;  %3722 = vmatmul.mubr.bf16.gmra.mrb[120].mxu1 %v12653_v0  ;;  %v12201_v0 = vld [vmem:[#allocation5 + $0x7ac] ss:$48 sps:$4 sm:$0xff]  }
 0x28d   :  { %3345 = vmatprep.mubr.bf16.mxu0 %v15014_v63  ;;  %3731 = vmatprep.mubr.bf16.mxu1 %v15014_v63 }
 0x294   :  { %3346 = vmatmul.mubr.bf16.gmra.mrb[124].mxu0 %v12654_v43  ;;  %3732 = vmatmul.mubr.bf16.gmra.mrb[124].mxu1 %v12654_v43  ;;  %v12204_v43 = vld [vmem:[#allocation5 + $0x7a4] ss:$48 sps:$4 sm:$0xff]  }
 0x295   :  { %3774 = vmatprep.mubr.bf16.mxu0 %v12655_v34  ;;  %4160 = vmatprep.mubr.bf16.mxu1 %v12655_v34  ;;  %v12199_v34 = vld [vmem:[#allocation5 + $0x7a8] ss:$48 sps:$4 sm:$0xff]  }
 0x29c   :  { %3775 = vmatmul.mubr.bf16.vlgmr.msra.gmra.mrb[128].mxu0 %v12656_v38  ;;  %4161 = vmatmul.mubr.bf16.vlgmr.msra.gmra.mrb[128].mxu1 %v12656_v38  ;;  %v12661_v38 = vld [vmem:[#allocation2 + $0x4c] ss:$12 sps:$4 sm:$0xff]  }
 0x29d   :  { %4322 = vmatpush1.bf16.msra.mxu1 %v12175_v17  ;;  %3936 = vmatpush1.bf16.msra.mxu0 %v12178_v28  ;;  %v12202_v17 = vld [vmem:[#allocation5 + $0x7a0] ss:$48 sps:$4 sm:$0xff]   ;;  %v12207_v28 = vld [vmem:[#allocation5 + $0x80c] ss:$48 sps:$4 sm:$0xff]  }
 0x29e   :  { %3784 = vmatprep.mubr.bf16.mxu0 %v12657_v42  ;;  %4170 = vmatprep.mubr.bf16.mxu1 %v12657_v42  ;;  %v12213_v42 = vld [vmem:[#allocation5 + $0x86c] ss:$48 sps:$4 sm:$0xff]  }
 0x29f   :  { %4323 = vmatprep.subr.bf16.mxu1 %v12183_v33  ;;  %3937 = vmatprep.subr.bf16.mxu0 %v12186_v6  ;;  %v12210_v33 = vld [vmem:[#allocation5 + $0x804] ss:$48 sps:$4 sm:$0xff]   ;;  %v12660_v6 = vld [vmem:[#allocation2 + $0x30] ss:$12 sps:$4 sm:$0xff]  }
 0x2a1   :  { %4324 = vmatpush1.bf16.msra.mxu1 %v12181_v48  ;;  %3938 = vmatpush1.bf16.msra.mxu0 %v12184_v37  ;;  %v12205_v48 = vld [vmem:[#allocation5 + $0x808] ss:$48 sps:$4 sm:$0xff]   ;;  %v12208_v37 = vld [vmem:[#allocation5 + $0x800] ss:$48 sps:$4 sm:$0xff]  }
 0x2a2   :  { %4325 = vmatprep.subr.bf16.mxu1 %v12189_v35  ;;  %3939 = vmatprep.subr.bf16.mxu0 %v12192_v4  ;;  %v12216_v35 = vld [vmem:[#allocation5 + $0x864] ss:$48 sps:$4 sm:$0xff]   ;;  %v12211_v4 = vld [vmem:[#allocation5 + $0x868] ss:$48 sps:$4 sm:$0xff]  }
 0x2a4   :  { %3785 = vmatmul.mubr.bf16.gmra.mrb[132].mxu0 %v12658_v31  ;;  %4171 = vmatmul.mubr.bf16.gmra.mrb[132].mxu1 %v12658_v31  ;;  %v12663_v31 = vld [vmem:[#allocation2 + $0x64] ss:$12 sps:$4 sm:$0xff]  }
 0x2a5   :  { %3794 = vmatprep.mubr.bf16.mxu0 %v12659_v32  ;;  %4180 = vmatprep.mubr.bf16.mxu1 %v12659_v32  ;;  %v12217_v32 = vld [vmem:[#allocation5 + $0x8c8] ss:$48 sps:$4 sm:$0xff]  }
 0x2a6   :  { %4326 = vmatpush1.bf16.msra.mxu1 %v12187_v23  ;;  %3940 = vmatpush1.bf16.msra.mxu0 %v12190_v3  ;;  %v12214_v23 = vld [vmem:[#allocation5 + $0x860] ss:$48 sps:$4 sm:$0xff]   ;;  %v12219_v3 = vld [vmem:[#allocation5 + $0x8cc] ss:$48 sps:$4 sm:$0xff]  }
 0x2a7   :  { %4327 = vmatprep.subr.bf16.mxu1 %v12195_v56  ;;  %3941 = vmatprep.subr.bf16.mxu0 %v12198_v53  ;;  %v12222_v56 = vld [vmem:[#allocation5 + $0x8c4] ss:$48 sps:$4 sm:$0xff]  }
 0x2a8   :  { %v12662_v53 = vld [vmem:[#allocation2 + $0x48] ss:$12 sps:$4 sm:$0xff]  }
 0x2aa   :  { %4328 = vmatpush1.bf16.msra.mxu1 %v12193_v1  ;;  %3942 = vmatpush1.bf16.msra.mxu0 %v12196_v60  ;;  %v12220_v1 = vld [vmem:[#allocation5 + $0x8c0] ss:$48 sps:$4 sm:$0xff]  }
 0x2ab   :  { %4329 = vmatprep.subr.bf16.mxu1 %v12201_v0  ;;  %3943 = vmatprep.subr.bf16.mxu0 %v12204_v43  ;;  %v12223_v60 = vld [vmem:[#allocation8 + $0xc8] ss:$12 sps:$4 sm:$0xff]   ;;  %v12227_v0 = vld [vmem:[#allocation8 + $0x4] ss:$12 sps:$4 sm:$0xff]  }
 0x2ac   :  { %3795 = vmatmul.mubr.bf16.gmra.mrb[136].mxu0 %v12660_v6  ;;  %4181 = vmatmul.mubr.bf16.gmra.mrb[136].mxu1 %v12660_v6  ;;  %v12664_v43 = vld [vmem:[#allocation2 + $0x60] ss:$12 sps:$4 sm:$0xff]  }
 0x2ad   :  { %3804 = vmatprep.mubr.bf16.mxu0 %v12661_v38  ;;  %4190 = vmatprep.mubr.bf16.mxu1 %v12661_v38  ;;  %v12669_v6 = vld [vmem:[#allocation2 + $0xac] ss:$12 sps:$4 sm:$0xff]   ;;  %v12670_v38 = vld [vmem:[#allocation2 + $0xa8] ss:$12 sps:$4 sm:$0xff]  }
 0x2ae   :  { %4330 = vmatpush1.bf16.msra.mxu1 %v12199_v34  ;;  %3944 = vmatpush1.bf16.msra.mxu0 %v12202_v17  ;;  %v12665_v34 = vld [vmem:[#allocation2 + $0x7c] ss:$12 sps:$4 sm:$0xff]   ;;  %v12666_v17 = vld [vmem:[#allocation2 + $0x78] ss:$12 sps:$4 sm:$0xff]  }
 0x2af   :  { %4331 = vmatprep.subr.bf16.mxu1 %v12207_v28  ;;  %3945 = vmatprep.subr.bf16.mxu0 %v12210_v33  ;;  %v12667_v28 = vld [vmem:[#allocation2 + $0x94] ss:$12 sps:$4 sm:$0xff]   ;;  %v12668_v33 = vld [vmem:[#allocation2 + $0x90] ss:$12 sps:$4 sm:$0xff]  }
 0x2b2   :  { %4332 = vmatpush1.bf16.msra.mxu1 %v12205_v48  ;;  %3946 = vmatpush1.bf16.msra.mxu0 %v12208_v37  ;;  %v12671_v48 = vld [vmem:[#allocation2 + $0xc4] ss:$12 sps:$4 sm:$0xff]   ;;  %v12672_v37 = vld [vmem:[#allocation2 + $0xc0] ss:$12 sps:$4 sm:$0xff]  }
 0x2b3   :  { %4333 = vmatprep.subr.bf16.mxu1 %v12213_v42  ;;  %3947 = vmatprep.subr.bf16.mxu0 %v12216_v35  ;;  %v12673_v42 = vld [vmem:[#allocation2 + $0xdc] ss:$12 sps:$4 sm:$0xff]   ;;  %v12674_v35 = vld [vmem:[#allocation2 + $0xd8] ss:$12 sps:$4 sm:$0xff]  }
 0x2b4   :  { %3805 = vmatmul.mubr.bf16.gmra.mrb[140].mxu0 %v12662_v53  ;;  %4191 = vmatmul.mubr.bf16.gmra.mrb[140].mxu1 %v12662_v53  ;;  %v472_v53 = vsub.s32 7, %v12980_v10 }
 0x2b5   :  { %3814 = vmatprep.mubr.bf16.mxu0 %v12663_v31  ;;  %4200 = vmatprep.mubr.bf16.mxu1 %v12663_v31  ;;  %v12676_v31 = vld [vmem:[#allocation2 + $0xf0] ss:$12 sps:$4 sm:$0xff]  }
 0x2b6   :  { %4334 = vmatpush1.bf16.msra.mxu1 %v12211_v4  ;;  %3948 = vmatpush1.bf16.msra.mxu0 %v12214_v23  ;;  %v12675_v4 = vld [vmem:[#allocation2 + $0xf4] ss:$12 sps:$4 sm:$0xff]   ;;  %v460_v23 = vsub.s32 4, %v12980_v10 }
 0x2b7   :  { %4335 = vmatprep.subr.bf16.mxu1 %v12219_v3  ;;  %3949 = vmatprep.subr.bf16.mxu0 %v12222_v56  ;;  %v468_v3 = vsub.s32 6, %v12980_v10  ;;  %v464_v56 = vsub.s32 5, %v12980_v10 }
 0x2ba   :  { %4336 = vmatpush1.bf16.msra.mxu1 %v12217_v32  ;;  %3950 = vmatpush1.bf16.msra.mxu0 %v12220_v1  ;;  %v12677_v32 = vld [vmem:[#allocation7] sm:$0xff] }
 0x2bb   :  { %9890 = vmatprep.subr.bf16.mxu1 %v12223_v60  ;;  %7027 = vmatprep.subr.bf16.mxu0 %v12227_v0  ;;  %v13297_v1 = vrot.slane %v12677_v32, %v460_v23  ;;  %v13299_v60 = vrot.slane %v12677_v32, %v468_v3  ;;  %v13301_v0 = vrot.slane %v12677_v32, %v464_v56 }
 0x2bc   :  { %3815 = vmatmul.mubr.bf16.gmra.mrb[144].mxu0 %v12664_v43  ;;  %4201 = vmatmul.mubr.bf16.gmra.mrb[144].mxu1 %v12664_v43  ;;  %v13303_v43 = vrot.slane %v12677_v32, %v472_v53 }
 0x2bd   :  { %3824 = vmatprep.mubr.bf16.mxu0 %v12665_v34  ;;  %4210 = vmatprep.mubr.bf16.mxu1 %v12665_v34  ;;  %v12678_v34 = vld [vmem:[#allocation2 + $0x10c] ss:$12 sps:$4 sm:$0xff]  }
 0x2c4   :  { %3825 = vmatmul.mubr.bf16.gmra.mrb[148].mxu0 %v12666_v17  ;;  %4211 = vmatmul.mubr.bf16.gmra.mrb[148].mxu1 %v12666_v17 }
 0x2c5   :  { %3834 = vmatprep.mubr.bf16.mxu0 %v12667_v28  ;;  %4220 = vmatprep.mubr.bf16.mxu1 %v12667_v28 }
 0x2cc   :  { %3835 = vmatmul.mubr.bf16.gmra.mrb[152].mxu0 %v12668_v33  ;;  %4221 = vmatmul.mubr.bf16.gmra.mrb[152].mxu1 %v12668_v33 }
 0x2cd   :  { %3844 = vmatprep.mubr.bf16.mxu0 %v12669_v6  ;;  %4230 = vmatprep.mubr.bf16.mxu1 %v12669_v6 }
 0x2d4   :  { %3845 = vmatmul.mubr.bf16.gmra.mrb[156].mxu0 %v12670_v38  ;;  %4231 = vmatmul.mubr.bf16.gmra.mrb[156].mxu1 %v12670_v38 }
 0x2d5   :  { %3854 = vmatprep.mubr.bf16.mxu0 %v12671_v48  ;;  %4240 = vmatprep.mubr.bf16.mxu1 %v12671_v48 }
 0x2dc   :  { %3855 = vmatmul.mubr.bf16.gmra.mrb[160].mxu0 %v12672_v37  ;;  %4241 = vmatmul.mubr.bf16.gmra.mrb[160].mxu1 %v12672_v37 }
 0x2dd   :  { %3864 = vmatprep.mubr.bf16.mxu0 %v12673_v42  ;;  %4250 = vmatprep.mubr.bf16.mxu1 %v12673_v42 }
 0x2e4   :  { %3865 = vmatmul.mubr.bf16.gmra.mrb[164].mxu0 %v12674_v35  ;;  %4251 = vmatmul.mubr.bf16.gmra.mrb[164].mxu1 %v12674_v35 }
 0x2e5   :  { %3874 = vmatprep.mubr.bf16.mxu0 %v12675_v4  ;;  %4260 = vmatprep.mubr.bf16.mxu1 %v12675_v4 }
 0x2ec   :  { %3875 = vmatmul.mubr.bf16.gmra.mrb[168].mxu0 %v12676_v31  ;;  %4261 = vmatmul.mubr.bf16.gmra.mrb[168].mxu1 %v12676_v31 }
 0x2ed   :  { %3884 = vmatprep.mubr.bf16.mxu0 %v12678_v34  ;;  %4270 = vmatprep.mubr.bf16.mxu1 %v12678_v34 }
 0x2ef   :  { %v3197_v17 = vpop.f32.mrb[64].mxu0  ;;  %v3583_v28 = vpop.f32.mrb[64].mxu1 }
 0x2f0   :  { %v10690_v33 = vadd.f32 %v3197_v17, %v13297_v1  ;;  %v10754_v6 = vadd.f32 %v3583_v28, %v13299_v60  ;;  %v3199_v38 = vpop.f32.mrb[65].mxu0  ;;  %v3585_v48 = vpop.f32.mrb[65].mxu1 }
 0x2f1   :  { %v10691_v37 = vadd.f32 %v3199_v38, %v13301_v0  ;;  %v10755_v42 = vadd.f32 %v3585_v48, %v13303_v43  ;;  %v3201_v35 = vpop.f32.mrb[66].mxu0  ;;  %v3587_v4 = vpop.f32.mrb[66].mxu1 }
 0x2f2   :  { %v10692_v23 = vadd.f32 %v3201_v35, %v13297_v1  ;;  %v10756_v3 = vadd.f32 %v3587_v4, %v13299_v60  ;;  %v3203_v56 = vpop.f32.mrb[67].mxu0  ;;  %v3589_v53 = vpop.f32.mrb[67].mxu1  ;;  %v4518_v34 = vmax.f32 %v10690_v33, 0.0  ;;  %v4520_v17 = vmax.f32 %v10754_v6, 0.0  ;;  %v12680_v35 = vld [vmem:[#allocation2 + $0x124] ss:$12 sps:$4 sm:$0xff]  }
 0x2f3   :  { %v10693_v31 = vadd.f32 %v3203_v56, %v13301_v0  ;;  %v10757_v32 = vadd.f32 %v3589_v53, %v13303_v43  ;;  %v4519_v38 = vmax.f32 %v10691_v37, 0.0  ;;  %v4521_v48 = vmax.f32 %v10755_v42, 0.0 }
 0x2f4   :  { %v4530_v28 = vmax.f32 %v10692_v23, 0.0  ;;  %v4532_v21 = vmax.f32 %v10756_v3, 0.0  ;;  %3885 = vmatmul.mubr.bf16.gmra.mrb[172].mxu0 %v12679_v20  ;;  %4271 = vmatmul.mubr.bf16.gmra.mrb[172].mxu1 %v12679_v20 }
 0x2f5   :  { %v4531_v26 = vmax.f32 %v10693_v31, 0.0  ;;  %v4533_v30 = vmax.f32 %v10757_v32, 0.0  ;;  %3894 = vmatprep.mubr.bf16.mxu0 %v12680_v35  ;;  %4280 = vmatprep.mubr.bf16.mxu1 %v12680_v35 }
 0x2f6   :  { %v13313_v4 = vpack.c.bf16 %v4530_v28, %v4518_v34  ;;  %v13315_v50 = vpack.c.bf16 %v4532_v21, %v4520_v17 }
 0x2f7   :  { %v13317_v56 = vpack.c.bf16 %v4531_v26, %v4519_v38  ;;  %v3207_v33 = vpop.f32.mrb[68].mxu0  ;;  %v3593_v6 = vpop.f32.mrb[68].mxu1  ;;  %v13319_v23 = vpack.c.bf16 %v4533_v30, %v4521_v48 }
 0x2f8   :  { %15033 = vst [vmem:[#allocation52_spill] sm:$0xff] %v13313_v4  ;;  %15034 = vst [vmem:[#allocation53_spill] sm:$0xff] %v13315_v50  ;;  %v10694_v3 = vadd.f32 %v3207_v33, %v13297_v1  ;;  %v10758_v20 = vadd.f32 %v3593_v6, %v13299_v60  ;;  %v3209_v37 = vpop.f32.mrb[69].mxu0  ;;  %v3595_v42 = vpop.f32.mrb[69].mxu1  ;;  %v12681_v50 = vld [vmem:[#allocation2 + $0x120] ss:$12 sps:$4 sm:$0xff]  }
 0x2f9   :  { %15035 = vst [vmem:[#allocation54_spill] sm:$0xff] %v13317_v56  ;;  %15036 = vst [vmem:[#allocation55_spill] sm:$0xff] %v13319_v23  ;;  %v10695_v53 = vadd.f32 %v3209_v37, %v13301_v0  ;;  %v10759_v31 = vadd.f32 %v3595_v42, %v13303_v43  ;;  %v3211_v32 = vpop.f32.mrb[70].mxu0  ;;  %v3597_v34 = vpop.f32.mrb[70].mxu1 }
 0x2fa   :  { %v10696_v21 = vadd.f32 %v3211_v32, %v13297_v1  ;;  %v10760_v26 = vadd.f32 %v3597_v34, %v13299_v60  ;;  %v3213_v17 = vpop.f32.mrb[71].mxu0  ;;  %v3599_v28 = vpop.f32.mrb[71].mxu1  ;;  %v4542_v48 = vmax.f32 %v10694_v3, 0.0  ;;  %v4544_v35 = vmax.f32 %v10758_v20, 0.0  ;;  %v12682_v32 = vld [vmem:[#allocation2 + $0x13c] ss:$12 sps:$4 sm:$0xff]  }
 0x2fb   :  { %v10697_v30 = vadd.f32 %v3213_v17, %v13301_v0  ;;  %v10761_v38 = vadd.f32 %v3599_v28, %v13303_v43  ;;  %v4543_v37 = vmax.f32 %v10695_v53, 0.0  ;;  %v4545_v42 = vmax.f32 %v10759_v31, 0.0 }
 0x2fc   :  { %v4554_v33 = vmax.f32 %v10696_v21, 0.0  ;;  %v4556_v6 = vmax.f32 %v10760_v26, 0.0  ;;  %3895 = vmatmul.mubr.bf16.gmra.mrb[176].mxu0 %v12681_v50  ;;  %4281 = vmatmul.mubr.bf16.gmra.mrb[176].mxu1 %v12681_v50 }
 0x2fd   :  { %v4555_v23 = vmax.f32 %v10697_v30, 0.0  ;;  %v4557_v4 = vmax.f32 %v10761_v38, 0.0  ;;  %3904 = vmatprep.mubr.bf16.mxu0 %v12682_v32  ;;  %4290 = vmatprep.mubr.bf16.mxu1 %v12682_v32 }
 0x2fe   :  { %v13329_v34 = vpack.c.bf16 %v4554_v33, %v4542_v48  ;;  %v13331_v56 = vpack.c.bf16 %v4556_v6, %v4544_v35 }
 0x2ff   :  { %v13333_v17 = vpack.c.bf16 %v4555_v23, %v4543_v37  ;;  %v3217_v3 = vpop.f32.mrb[72].mxu0  ;;  %v3603_v20 = vpop.f32.mrb[72].mxu1  ;;  %v13335_v21 = vpack.c.bf16 %v4557_v4, %v4545_v42 }
 0x300   :  { %15037 = vst [vmem:[#allocation56_spill] sm:$0xff] %v13329_v34  ;;  %15038 = vst [vmem:[#allocation57_spill] sm:$0xff] %v13331_v56  ;;  %v10698_v26 = vadd.f32 %v3217_v3, %v13297_v1  ;;  %v10762_v50 = vadd.f32 %v3603_v20, %v13299_v60  ;;  %v3219_v53 = vpop.f32.mrb[73].mxu0  ;;  %v3605_v31 = vpop.f32.mrb[73].mxu1  ;;  %v12683_v56 = vld [vmem:[#allocation2 + $0x138] ss:$12 sps:$4 sm:$0xff]  }
 0x301   :  { %15039 = vst [vmem:[#allocation58_spill] sm:$0xff] %v13333_v17  ;;  %15040 = vst [vmem:[#allocation59_spill] sm:$0xff] %v13335_v21  ;;  %v10699_v28 = vadd.f32 %v3219_v53, %v13301_v0  ;;  %v10763_v30 = vadd.f32 %v3605_v31, %v13303_v43  ;;  %v3221_v38 = vpop.f32.mrb[74].mxu0  ;;  %v3607_v48 = vpop.f32.mrb[74].mxu1 }
 0x302   :  { %v10700_v35 = vadd.f32 %v3221_v38, %v13297_v1  ;;  %v10764_v23 = vadd.f32 %v3607_v48, %v13299_v60  ;;  %v3223_v33 = vpop.f32.mrb[75].mxu0  ;;  %v3609_v6 = vpop.f32.mrb[75].mxu1  ;;  %v4566_v42 = vmax.f32 %v10698_v26, 0.0  ;;  %v4568_v32 = vmax.f32 %v10762_v50, 0.0  ;;  %v12684_v38 = vld [vmem:[#allocation2 + $0x154] ss:$12 sps:$4 sm:$0xff]  }
 0x303   :  { %v10701_v4 = vadd.f32 %v3223_v33, %v13301_v0  ;;  %v10765_v37 = vadd.f32 %v3609_v6, %v13303_v43  ;;  %v4567_v53 = vmax.f32 %v10699_v28, 0.0  ;;  %v4569_v31 = vmax.f32 %v10763_v30, 0.0 }
 0x304   :  { %v4578_v3 = vmax.f32 %v10700_v35, 0.0  ;;  %v4580_v20 = vmax.f32 %v10764_v23, 0.0  ;;  %3905 = vmatmul.mubr.bf16.gmra.mrb[180].mxu0 %v12683_v56  ;;  %4291 = vmatmul.mubr.bf16.gmra.mrb[180].mxu1 %v12683_v56 }
 0x305   :  { %v4579_v21 = vmax.f32 %v10701_v4, 0.0  ;;  %v4581_v34 = vmax.f32 %v10765_v37, 0.0  ;;  %3914 = vmatprep.mubr.bf16.mxu0 %v12684_v38  ;;  %4300 = vmatprep.mubr.bf16.mxu1 %v12684_v38 }
 0x306   :  { %v13345_v48 = vpack.c.bf16 %v4578_v3, %v4566_v42  ;;  %v13347_v17 = vpack.c.bf16 %v4580_v20, %v4568_v32 }
 0x307   :  { %v13349_v33 = vpack.c.bf16 %v4579_v21, %v4567_v53  ;;  %v3227_v26 = vpop.f32.mrb[76].mxu0  ;;  %v3613_v50 = vpop.f32.mrb[76].mxu1  ;;  %v13351_v35 = vpack.c.bf16 %v4581_v34, %v4569_v31 }
 0x308   :  { %15041 = vst [vmem:[#allocation60_spill] sm:$0xff] %v13345_v48  ;;  %15042 = vst [vmem:[#allocation61_spill] sm:$0xff] %v13347_v17  ;;  %v10702_v23 = vadd.f32 %v3227_v26, %v13297_v1  ;;  %v10766_v56 = vadd.f32 %v3613_v50, %v13299_v60  ;;  %v3229_v28 = vpop.f32.mrb[77].mxu0  ;;  %v3615_v30 = vpop.f32.mrb[77].mxu1  ;;  %v12685_v17 = vld [vmem:[#allocation2 + $0x150] ss:$12 sps:$4 sm:$0xff]  }
 0x309   :  { %15043 = vst [vmem:[#allocation62_spill] sm:$0xff] %v13349_v33  ;;  %15044 = vst [vmem:[#allocation63_spill] sm:$0xff] %v13351_v35  ;;  %v10703_v6 = vadd.f32 %v3229_v28, %v13301_v0  ;;  %v10767_v4 = vadd.f32 %v3615_v30, %v13303_v43  ;;  %v3231_v37 = vpop.f32.mrb[78].mxu0  ;;  %v3617_v42 = vpop.f32.mrb[78].mxu1 }
 0x30a   :  { %v10704_v32 = vadd.f32 %v3231_v37, %v13297_v1  ;;  %v10768_v21 = vadd.f32 %v3617_v42, %v13299_v60  ;;  %v3233_v3 = vpop.f32.mrb[79].mxu0  ;;  %v3619_v20 = vpop.f32.mrb[79].mxu1  ;;  %v4590_v31 = vmax.f32 %v10702_v23, 0.0  ;;  %v4592_v38 = vmax.f32 %v10766_v56, 0.0  ;;  %v12686_v37 = vld [vmem:[#allocation2 + $0x16c] ss:$12 sps:$4 sm:$0xff]  }
 0x30b   :  { %v10705_v34 = vadd.f32 %v3233_v3, %v13301_v0  ;;  %v10769_v53 = vadd.f32 %v3619_v20, %v13303_v43  ;;  %v4591_v28 = vmax.f32 %v10703_v6, 0.0  ;;  %v4593_v30 = vmax.f32 %v10767_v4, 0.0 }
 0x30c   :  { %v4602_v26 = vmax.f32 %v10704_v32, 0.0  ;;  %v4604_v50 = vmax.f32 %v10768_v21, 0.0  ;;  %3915 = vmatmul.mubr.bf16.gmra.mrb[184].mxu0 %v12685_v17  ;;  %4301 = vmatmul.mubr.bf16.gmra.mrb[184].mxu1 %v12685_v17 }
 0x30d   :  { %v4603_v35 = vmax.f32 %v10705_v34, 0.0  ;;  %v4605_v48 = vmax.f32 %v10769_v53, 0.0  ;;  %3924 = vmatprep.mubr.bf16.mxu0 %v12686_v37  ;;  %4310 = vmatprep.mubr.bf16.mxu1 %v12686_v37 }
 0x30e   :  { %v13361_v42 = vpack.c.bf16 %v4602_v26, %v4590_v31  ;;  %v13363_v33 = vpack.c.bf16 %v4604_v50, %v4592_v38 }
 0x30f   :  { %v13365_v3 = vpack.c.bf16 %v4603_v35, %v4591_v28  ;;  %v3237_v23 = vpop.f32.mrb[80].mxu0  ;;  %v3623_v56 = vpop.f32.mrb[80].mxu1  ;;  %v13367_v32 = vpack.c.bf16 %v4605_v48, %v4593_v30 }
 0x310   :  { %15045 = vst [vmem:[#allocation64_spill] sm:$0xff] %v13361_v42  ;;  %15046 = vst [vmem:[#allocation65_spill] sm:$0xff] %v13363_v33  ;;  %v10706_v21 = vadd.f32 %v3237_v23, %v13297_v1  ;;  %v10770_v17 = vadd.f32 %v3623_v56, %v13299_v60  ;;  %v3239_v6 = vpop.f32.mrb[81].mxu0  ;;  %v3625_v4 = vpop.f32.mrb[81].mxu1  ;;  %v12687_v33 = vld [vmem:[#allocation2 + $0x168] ss:$12 sps:$4 sm:$0xff]  }
 0x311   :  { %15047 = vst [vmem:[#allocation66_spill] sm:$0xff] %v13365_v3  ;;  %15048 = vst [vmem:[#allocation67_spill] sm:$0xff] %v13367_v32  ;;  %v10707_v20 = vadd.f32 %v3239_v6, %v13301_v0  ;;  %v10771_v34 = vadd.f32 %v3625_v4, %v13303_v43  ;;  %v3241_v53 = vpop.f32.mrb[82].mxu0  ;;  %v3627_v31 = vpop.f32.mrb[82].mxu1  ;;  %v12228_v3 = vld [vmem:[#allocation8 + $0x18] ss:$12 sps:$4 sm:$0xff]  }
 0x312   :  { %v10708_v38 = vadd.f32 %v3241_v53, %v13297_v1  ;;  %v10772_v35 = vadd.f32 %v3627_v31, %v13299_v60  ;;  %v3243_v26 = vpop.f32.mrb[83].mxu0  ;;  %v3629_v50 = vpop.f32.mrb[83].mxu1  ;;  %v4614_v30 = vmax.f32 %v10706_v21, 0.0  ;;  %v4616_v37 = vmax.f32 %v10770_v17, 0.0 }
 0x313   :  { %v10709_v48 = vadd.f32 %v3243_v26, %v13301_v0  ;;  %v10773_v28 = vadd.f32 %v3629_v50, %v13303_v43  ;;  %v4615_v6 = vmax.f32 %v10707_v20, 0.0  ;;  %v4617_v4 = vmax.f32 %v10771_v34, 0.0 }
 0x314   :  { %v4626_v23 = vmax.f32 %v10708_v38, 0.0  ;;  %v4628_v56 = vmax.f32 %v10772_v35, 0.0  ;;  %3925 = vmatmul.mubr.bf16.gmra.mrb[188].mxu0 %v12687_v33  ;;  %4311 = vmatmul.mubr.bf16.gmra.mrb[188].mxu1 %v12687_v33 }
 0x315   :  { %v4627_v32 = vmax.f32 %v10709_v48, 0.0  ;;  %v4629_v42 = vmax.f32 %v10773_v28, 0.0  ;;  %3967 = vmatprep.mubr.bf16.mxu0 %v15014_v63  ;;  %4353 = vmatprep.mubr.bf16.mxu1 %v15014_v63 }
 0x316   :  { %v13379_v53 = vpack.c.bf16 %v4626_v23, %v4614_v30  ;;  %v13381_v31 = vpack.c.bf16 %v4628_v56, %v4616_v37  ;;  %v12224_v37 = vld [vmem:[#allocation8 + $0x8] ss:$12 sps:$4 sm:$0xff]   ;;  %v12225_v23 = vld [vmem:[#allocation8] ss:$12 sps:$4 sm:$0xff]  }
 0x317   :  { %v13383_v26 = vpack.c.bf16 %v4627_v32, %v4615_v6  ;;  %v3247_v21 = vpop.f32.mrb[84].mxu0  ;;  %v3633_v17 = vpop.f32.mrb[84].mxu1  ;;  %v13385_v38 = vpack.c.bf16 %v4629_v42, %v4617_v4 }
 0x318   :  { %15049 = vst [vmem:[#allocation68_spill] sm:$0xff] %v13379_v53  ;;  %15050 = vst [vmem:[#allocation69_spill] sm:$0xff] %v13381_v31  ;;  %v10710_v33 = vadd.f32 %v3247_v21, %v13297_v1  ;;  %v10774_v20 = vadd.f32 %v3633_v17, %v13299_v60  ;;  %v3249_v34 = vpop.f32.mrb[85].mxu0  ;;  %v3635_v35 = vpop.f32.mrb[85].mxu1  ;;  %v12230_v17 = vld [vmem:[#allocation8 + $0x1c] ss:$12 sps:$4 sm:$0xff]  }
 0x319   :  { %15051 = vst [vmem:[#allocation70_spill] sm:$0xff] %v13383_v26  ;;  %15052 = vst [vmem:[#allocation71_spill] sm:$0xff] %v13385_v38  ;;  %v10711_v50 = vadd.f32 %v3249_v34, %v13301_v0  ;;  %v10775_v48 = vadd.f32 %v3635_v35, %v13303_v43  ;;  %v3251_v28 = vpop.f32.mrb[86].mxu0  ;;  %v3637_v30 = vpop.f32.mrb[86].mxu1  ;;  %v12231_v31 = vld [vmem:[#allocation8 + $0xe0] ss:$12 sps:$4 sm:$0xff]  }
 0x31a   :  { %v10712_v32 = vadd.f32 %v3251_v28, %v13297_v1  ;;  %v10776_v56 = vadd.f32 %v3637_v30, %v13299_v60  ;;  %v3253_v42 = vpop.f32.mrb[87].mxu0  ;;  %v3639_v6 = vpop.f32.mrb[87].mxu1  ;;  %v4638_v38 = vmax.f32 %v10710_v33, 0.0  ;;  %v4640_v34 = vmax.f32 %v10774_v20, 0.0  ;;  %v12688_v26 = vld [vmem:[#allocation2 + $0x8] ss:$12 sps:$4 sm:$0xff]  }
 0x31b   :  { %v10713_v4 = vadd.f32 %v3253_v42, %v13301_v0  ;;  %v10777_v21 = vadd.f32 %v3639_v6, %v13303_v43  ;;  %v4639_v54 = vmax.f32 %v10711_v50, 0.0  ;;  %v4641_v28 = vmax.f32 %v10775_v48, 0.0  ;;  %v12235_v33 = vld [vmem:[#allocation8 + $0x34] ss:$12 sps:$4 sm:$0xff]   ;;  %v12239_v20 = vld [vmem:[#allocation8 + $0xf8] ss:$12 sps:$4 sm:$0xff]  }
 0x31c   :  { %v4650_v53 = vmax.f32 %v10712_v32, 0.0  ;;  %v4652_v35 = vmax.f32 %v10776_v56, 0.0  ;;  %3968 = vmatmul.mubr.bf16.vlgmr.msra.gmra.mrb[128].mxu0 %v12688_v26  ;;  %4354 = vmatmul.mubr.bf16.vlgmr.msra.gmra.mrb[128].mxu1 %v12688_v26 }
 0x31d   :  { %v4651_v18 = vmax.f32 %v10713_v4, 0.0  ;;  %v4653_v30 = vmax.f32 %v10777_v21, 0.0  ;;  %9891 = vmatpush3.bf16.msra.mxu1 %v12224_v37  ;;  %7028 = vmatpush1.bf16.msra.mxu0 %v12225_v23 }
 0x31e   :  { %v13395_v42 = vpack.c.bf16 %v4650_v53, %v4638_v38  ;;  %3977 = vmatprep.mubr.bf16.mxu0 %v15014_v63  ;;  %4363 = vmatprep.mubr.bf16.mxu1 %v15014_v63  ;;  %v13399_v32 = vpack.c.bf16 %v4652_v35, %v4640_v34  ;;  %v12233_v35 = vld [vmem:[#allocation8 + $0x30] ss:$12 sps:$4 sm:$0xff]  }
 0x31f   :  { %v13401_v56 = vpack.c.bf16 %v4651_v18, %v4639_v54  ;;  %v3257_v26 = vpop.f32.mrb[88].mxu0  ;;  %v3643_v50 = vpop.f32.mrb[88].mxu1  ;;  %7029 = vmatprep.subr.bf16.mxu0 %v12230_v17  ;;  %9892 = vmatprep.subr.bf16.mxu1 %v12231_v31  ;;  %v13403_v48 = vpack.c.bf16 %v4653_v30, %v4641_v28  ;;  %v12240_v28 = vld [vmem:[#allocation8 + $0x38] ss:$12 sps:$4 sm:$0xff]  }
 0x320   :  { %15053 = vst [vmem:[#allocation72_spill] sm:$0xff] %v13395_v42  ;;  %15054 = vst [vmem:[#allocation73_spill] sm:$0xff] %v13399_v32  ;;  %v10714_v37 = vadd.f32 %v3257_v26, %v13297_v1  ;;  %v10778_v53 = vadd.f32 %v3643_v50, %v13299_v60  ;;  %v3259_v38 = vpop.f32.mrb[89].mxu0  ;;  %v3645_v23 = vpop.f32.mrb[89].mxu1  ;;  %v12238_v50 = vld [vmem:[#allocation8 + $0x4c] ss:$12 sps:$4 sm:$0xff]  }
 0x321   :  { %15055 = vst [vmem:[#allocation74_spill] sm:$0xff] %v13401_v56  ;;  %15056 = vst [vmem:[#allocation75_spill] sm:$0xff] %v13403_v48  ;;  %v10715_v6 = vadd.f32 %v3259_v38, %v13301_v0  ;;  %v10779_v4 = vadd.f32 %v3645_v23, %v13303_v43  ;;  %v3261_v21 = vpop.f32.mrb[90].mxu0  ;;  %v3647_v34 = vpop.f32.mrb[90].mxu1  ;;  %7030 = vmatpush1.bf16.msra.mxu0 %v12228_v3  ;;  %9893 = vmatpush3.bf16.msra.mxu1 %v12232_v19  ;;  %v12247_v38 = vld [vmem:[#allocation8 + $0x110] ss:$12 sps:$4 sm:$0xff]  }
 0x322   :  { %v10716_v54 = vadd.f32 %v3261_v21, %v13297_v1  ;;  %v10780_v18 = vadd.f32 %v3647_v34, %v13299_v60  ;;  %v3263_v31 = vpop.f32.mrb[91].mxu0  ;;  %v3649_v17 = vpop.f32.mrb[91].mxu1  ;;  %7031 = vmatprep.subr.bf16.mxu0 %v12235_v33  ;;  %9894 = vmatprep.subr.bf16.mxu1 %v12239_v20  ;;  %v4662_v23 = vmax.f32 %v10714_v37, 0.0  ;;  %v4664_v32 = vmax.f32 %v10778_v53, 0.0  ;;  %v12689_v48 = vld [vmem:[#allocation2 + $0x20] ss:$12 sps:$4 sm:$0xff]  }
 0x323   :  { %v10717_v30 = vadd.f32 %v3263_v31, %v13301_v0  ;;  %v10781_v26 = vadd.f32 %v3649_v17, %v13303_v43  ;;  %v4663_v21 = vmax.f32 %v10715_v6, 0.0  ;;  %v4665_v34 = vmax.f32 %v10779_v4, 0.0  ;;  %v12236_v20 = vld [vmem:[#allocation8 + $0x48] ss:$12 sps:$4 sm:$0xff]   ;;  %v12248_v37 = vld [vmem:[#allocation8 + $0x50] ss:$12 sps:$4 sm:$0xff]  }
 0x324   :  { %v4674_v3 = vmax.f32 %v10716_v54, 0.0  ;;  %v4676_v19 = vmax.f32 %v10780_v18, 0.0  ;;  %3978 = vmatmul.mubr.bf16.gmra.mrb[132].mxu0 %v12689_v48  ;;  %4364 = vmatmul.mubr.bf16.gmra.mrb[132].mxu1 %v12689_v48  ;;  %v12243_v6 = vld [vmem:[#allocation8 + $0x64] ss:$12 sps:$4 sm:$0xff]   ;;  %v12255_v4 = vld [vmem:[#allocation8 + $0x128] ss:$12 sps:$4 sm:$0xff]  }
 0x325   :  { %v4675_v42 = vmax.f32 %v10717_v30, 0.0  ;;  %v4677_v56 = vmax.f32 %v10781_v26, 0.0  ;;  %3987 = vmatprep.mubr.bf16.mxu0 %v15014_v63  ;;  %4373 = vmatprep.mubr.bf16.mxu1 %v15014_v63 }
 0x326   :  { %v13415_v33 = vpack.c.bf16 %v4674_v3, %v4662_v23  ;;  %7032 = vmatpush1.bf16.msra.mxu0 %v12233_v35  ;;  %9895 = vmatpush3.bf16.msra.mxu1 %v12240_v28  ;;  %v13417_v53 = vpack.c.bf16 %v4676_v19, %v4664_v32 }
 0x327   :  { %v13419_v54 = vpack.c.bf16 %v4675_v42, %v4663_v21  ;;  %v3267_v18 = vpop.f32.mrb[92].mxu0  ;;  %v3653_v48 = vpop.f32.mrb[92].mxu1  ;;  %7033 = vmatprep.subr.bf16.mxu0 %v12238_v50  ;;  %9896 = vmatprep.subr.bf16.mxu1 %v12247_v38  ;;  %v13421_v31 = vpack.c.bf16 %v4677_v56, %v4665_v34  ;;  %v12241_v56 = vld [vmem:[#allocation8 + $0x60] ss:$12 sps:$4 sm:$0xff]   ;;  %v12256_v21 = vld [vmem:[#allocation8 + $0x68] ss:$12 sps:$4 sm:$0xff]  }
 0x328   :  { %15057 = vst [vmem:[#allocation76_spill] sm:$0xff] %v13415_v33  ;;  %15058 = vst [vmem:[#allocation77_spill] sm:$0xff] %v13417_v53  ;;  %v10718_v17 = vadd.f32 %v3267_v18, %v13297_v1  ;;  %v10782_v30 = vadd.f32 %v3653_v48, %v13299_v60  ;;  %v3269_v35 = vpop.f32.mrb[93].mxu0  ;;  %v3655_v26 = vpop.f32.mrb[93].mxu1  ;;  %v12246_v48 = vld [vmem:[#allocation8 + $0x7c] ss:$12 sps:$4 sm:$0xff]  }
 0x329   :  { %15059 = vst [vmem:[#allocation78_spill] sm:$0xff] %v13419_v54  ;;  %15060 = vst [vmem:[#allocation79_spill] sm:$0xff] %v13421_v31  ;;  %v10719_v28 = vadd.f32 %v3269_v35, %v13301_v0  ;;  %v10783_v32 = vadd.f32 %v3655_v26, %v13303_v43  ;;  %v3271_v42 = vpop.f32.mrb[94].mxu0  ;;  %v3657_v23 = vpop.f32.mrb[94].mxu1  ;;  %v12263_v35 = vld [vmem:[#allocation8 + $0x140] ss:$12 sps:$4 sm:$0xff]  }
 0x32a   :  { %v10720_v3 = vadd.f32 %v3271_v42, %v13297_v1  ;;  %v10784_v50 = vadd.f32 %v3657_v23, %v13299_v60  ;;  %v3273_v38 = vpop.f32.mrb[95].mxu0  ;;  %v3659_v19 = vpop.f32.mrb[95].mxu1  ;;  %7034 = vmatpush1.bf16.msra.mxu0 %v12236_v20  ;;  %9897 = vmatpush3.bf16.msra.mxu1 %v12248_v37  ;;  %v4686_v26 = vmax.f32 %v10718_v17, 0.0  ;;  %v4688_v53 = vmax.f32 %v10782_v30, 0.0  ;;  %v12690_v33 = vld [vmem:[#allocation2 + $0x38] ss:$12 sps:$4 sm:$0xff]  }
 0x32b   :  { %v10721_v34 = vadd.f32 %v3273_v38, %v13301_v0  ;;  %v10785_v18 = vadd.f32 %v3659_v19, %v13303_v43  ;;  %7035 = vmatprep.subr.bf16.mxu0 %v12243_v6  ;;  %9898 = vmatprep.subr.bf16.mxu1 %v12255_v4  ;;  %v4687_v23 = vmax.f32 %v10719_v28, 0.0  ;;  %v4689_v20 = vmax.f32 %v10783_v32, 0.0  ;;  %v12244_v6 = vld [vmem:[#allocation8 + $0x78] ss:$12 sps:$4 sm:$0xff]   ;;  %v12264_v4 = vld [vmem:[#allocation8 + $0x80] ss:$12 sps:$4 sm:$0xff]  }
 0x32c   :  { %v4698_v31 = vmax.f32 %v10720_v3, 0.0  ;;  %v4700_v42 = vmax.f32 %v10784_v50, 0.0  ;;  %3988 = vmatmul.mubr.bf16.gmra.mrb[136].mxu0 %v12690_v33  ;;  %4374 = vmatmul.mubr.bf16.gmra.mrb[136].mxu1 %v12690_v33  ;;  %v12251_v28 = vld [vmem:[#allocation8 + $0x94] ss:$12 sps:$4 sm:$0xff]   ;;  %v12271_v32 = vld [vmem:[#allocation8 + $0x158] ss:$12 sps:$4 sm:$0xff]  }
 0x32d   :  { %v4699_v54 = vmax.f32 %v10721_v34, 0.0  ;;  %v4701_v37 = vmax.f32 %v10785_v18, 0.0  ;;  %3997 = vmatprep.mubr.bf16.mxu0 %v15014_v63  ;;  %4383 = vmatprep.mubr.bf16.mxu1 %v15014_v63 }
 0x32e   :  { %v13433_v38 = vpack.c.bf16 %v4698_v31, %v4686_v26  ;;  %7036 = vmatpush1.bf16.msra.mxu0 %v12241_v56  ;;  %9899 = vmatpush3.bf16.msra.mxu1 %v12256_v21  ;;  %v13435_v17 = vpack.c.bf16 %v4700_v42, %v4688_v53 }
 0x32f   :  { %v13437_v30 = vpack.c.bf16 %v4699_v54, %v4687_v23  ;;  %v3277_v3 = vpop.f32.mrb[96].mxu0  ;;  %v3663_v33 = vpop.f32.mrb[96].mxu1  ;;  %7037 = vmatprep.subr.bf16.mxu0 %v12246_v48  ;;  %9900 = vmatprep.subr.bf16.mxu1 %v12263_v35  ;;  %v13439_v50 = vpack.c.bf16 %v4701_v37, %v4689_v20  ;;  %v12249_v23 = vld [vmem:[#allocation8 + $0x90] ss:$12 sps:$4 sm:$0xff]   ;;  %v12272_v20 = vld [vmem:[#allocation8 + $0x98] ss:$12 sps:$4 sm:$0xff]  }
 0x330   :  { %15061 = vst [vmem:[#allocation80_spill] sm:$0xff] %v13433_v38  ;;  %15062 = vst [vmem:[#allocation81_spill] sm:$0xff] %v13435_v17  ;;  %v10722_v19 = vadd.f32 %v3277_v3, %v13297_v1  ;;  %v10786_v31 = vadd.f32 %v3663_v33, %v13299_v60  ;;  %v3279_v56 = vpop.f32.mrb[97].mxu0  ;;  %v3665_v34 = vpop.f32.mrb[97].mxu1  ;;  %v12254_v33 = vld [vmem:[#allocation8 + $0xac] ss:$12 sps:$4 sm:$0xff]  }
 0x331   :  { %15063 = vst [vmem:[#allocation82_spill] sm:$0xff] %v13437_v30  ;;  %15064 = vst [vmem:[#allocation83_spill] sm:$0xff] %v13439_v50  ;;  %v10723_v21 = vadd.f32 %v3279_v56, %v13301_v0  ;;  %v10787_v53 = vadd.f32 %v3665_v34, %v13303_v43  ;;  %v3281_v54 = vpop.f32.mrb[98].mxu0  ;;  %v3667_v18 = vpop.f32.mrb[98].mxu1  ;;  %v12279_v56 = vld [vmem:[#allocation8 + $0x170] ss:$12 sps:$4 sm:$0xff]  }
 0x332   :  { %v10724_v26 = vadd.f32 %v3281_v54, %v13297_v1  ;;  %v10788_v48 = vadd.f32 %v3667_v18, %v13299_v60  ;;  %v3283_v35 = vpop.f32.mrb[99].mxu0  ;;  %v3669_v42 = vpop.f32.mrb[99].mxu1  ;;  %7038 = vmatpush1.bf16.msra.mxu0 %v12244_v6  ;;  %9901 = vmatpush3.bf16.msra.mxu1 %v12264_v4  ;;  %v4710_v34 = vmax.f32 %v10722_v19, 0.0  ;;  %v4712_v17 = vmax.f32 %v10786_v31, 0.0  ;;  %v12691_v38 = vld [vmem:[#allocation2 + $0x50] ss:$12 sps:$4 sm:$0xff]  }
 0x333   :  { %v10725_v37 = vadd.f32 %v3283_v35, %v13301_v0  ;;  %v10789_v3 = vadd.f32 %v3669_v42, %v13303_v43  ;;  %7039 = vmatprep.subr.bf16.mxu0 %v12251_v28  ;;  %9902 = vmatprep.subr.bf16.mxu1 %v12271_v32  ;;  %v4711_v18 = vmax.f32 %v10723_v21, 0.0  ;;  %v4713_v6 = vmax.f32 %v10787_v53, 0.0  ;;  %v12252_v28 = vld [vmem:[#allocation8 + $0xa8] ss:$12 sps:$4 sm:$0xff]   ;;  %v12280_v32 = vld [vmem:[#allocation8 + $0xb0] ss:$12 sps:$4 sm:$0xff]  }
 0x334   :  { %v4722_v50 = vmax.f32 %v10724_v26, 0.0  ;;  %v4724_v54 = vmax.f32 %v10788_v48, 0.0  ;;  %3998 = vmatmul.mubr.bf16.gmra.mrb[140].mxu0 %v12691_v38  ;;  %4384 = vmatmul.mubr.bf16.gmra.mrb[140].mxu1 %v12691_v38  ;;  %v12259_v21 = vld [vmem:[#allocation8 + $0xc4] ss:$12 sps:$4 sm:$0xff]   ;;  %v12287_v53 = vld [vmem:[#allocation8 + $0x248] ss:$12 sps:$4 sm:$0xff]  }
 0x335   :  { %v4723_v30 = vmax.f32 %v10725_v37, 0.0  ;;  %v4725_v4 = vmax.f32 %v10789_v3, 0.0  ;;  %4007 = vmatprep.mubr.bf16.mxu0 %v15014_v63  ;;  %4393 = vmatprep.mubr.bf16.mxu1 %v15014_v63 }
 0x336   :  { %v13451_v35 = vpack.c.bf16 %v4722_v50, %v4710_v34  ;;  %7040 = vmatpush1.bf16.msra.mxu0 %v12249_v23  ;;  %9903 = vmatpush3.bf16.msra.mxu1 %v12272_v20  ;;  %v13453_v19 = vpack.c.bf16 %v4724_v54, %v4712_v17 }
 0x337   :  { %v13455_v31 = vpack.c.bf16 %v4723_v30, %v4711_v18  ;;  %v3287_v26 = vpop.f32.mrb[100].mxu0  ;;  %v3673_v38 = vpop.f32.mrb[100].mxu1  ;;  %7041 = vmatprep.subr.bf16.mxu0 %v12254_v33  ;;  %9904 = vmatprep.subr.bf16.mxu1 %v12279_v56  ;;  %v13457_v48 = vpack.c.bf16 %v4725_v4, %v4713_v6  ;;  %v12257_v18 = vld [vmem:[#allocation8 + $0xc0] ss:$12 sps:$4 sm:$0xff]  }
 0x338   :  { %15065 = vst [vmem:[#allocation84_spill] sm:$0xff] %v13451_v35  ;;  %15066 = vst [vmem:[#allocation85_spill] sm:$0xff] %v13453_v19  ;;  %v10726_v42 = vadd.f32 %v3287_v26, %v13297_v1  ;;  %v10790_v50 = vadd.f32 %v3673_v38, %v13299_v60  ;;  %v3289_v23 = vpop.f32.mrb[101].mxu0  ;;  %v3675_v37 = vpop.f32.mrb[101].mxu1  ;;  %v12262_v26 = vld [vmem:[#allocation8 + $0xdc] ss:$12 sps:$4 sm:$0xff]  }
 0x339   :  { %15067 = vst [vmem:[#allocation86_spill] sm:$0xff] %v13457_v48  ;;  %v10727_v20 = vadd.f32 %v3289_v23, %v13301_v0  ;;  %v10791_v17 = vadd.f32 %v3675_v37, %v13303_v43  ;;  %v3291_v30 = vpop.f32.mrb[102].mxu0  ;;  %v3677_v3 = vpop.f32.mrb[102].mxu1  ;;  %v12692_v48 = vld [vmem:[#allocation2 + $0x68] ss:$12 sps:$4 sm:$0xff]  }
 0x33a   :  { %v10728_v34 = vadd.f32 %v3291_v30, %v13297_v1  ;;  %v10792_v33 = vadd.f32 %v3677_v3, %v13299_v60  ;;  %v3293_v56 = vpop.f32.mrb[103].mxu0  ;;  %v3679_v54 = vpop.f32.mrb[103].mxu1  ;;  %7042 = vmatpush1.bf16.msra.mxu0 %v12252_v28  ;;  %9905 = vmatpush3.bf16.msra.mxu1 %v12280_v32  ;;  %v4734_v38 = vmax.f32 %v10726_v42, 0.0  ;;  %v4736_v23 = vmax.f32 %v10790_v50, 0.0 }
 0x33b   :  { %v10729_v6 = vadd.f32 %v3293_v56, %v13301_v0  ;;  %v10793_v4 = vadd.f32 %v3679_v54, %v13303_v43  ;;  %7043 = vmatprep.subr.bf16.mxu0 %v12259_v21  ;;  %10002 = vmatprep.subr.bf16.mxu1 %v12287_v53  ;;  %v4735_v30 = vmax.f32 %v10727_v20, 0.0  ;;  %v4737_v3 = vmax.f32 %v10791_v17, 0.0  ;;  %v12260_v21 = vld [vmem:[#allocation8 + $0xd8] ss:$12 sps:$4 sm:$0xff]  }
 0x33c   :  { %v4746_v37 = vmax.f32 %v10728_v34, 0.0  ;;  %v4748_v19 = vmax.f32 %v10792_v33, 0.0  ;;  %4008 = vmatmul.mubr.bf16.gmra.mrb[144].mxu0 %v12692_v48  ;;  %4394 = vmatmul.mubr.bf16.gmra.mrb[144].mxu1 %v12692_v48  ;;  %v12267_v48 = vld [vmem:[#allocation8 + $0xf4] ss:$12 sps:$4 sm:$0xff]  }
 0x33d   :  { %v4747_v35 = vmax.f32 %v10729_v6, 0.0  ;;  %v4749_v28 = vmax.f32 %v10793_v4, 0.0  ;;  %4017 = vmatprep.mubr.bf16.mxu0 %v15014_v63  ;;  %4403 = vmatprep.mubr.bf16.mxu1 %v15014_v63 }
 0x33e   :  { %v13469_v32 = vpack.c.bf16 %v4746_v37, %v4734_v38  ;;  %7044 = vmatpush1.bf16.msra.mxu0 %v12257_v18  ;;  %v13471_v53 = vpack.c.bf16 %v4748_v19, %v4736_v23  ;;  %v12265_v37 = vld [vmem:[#allocation8 + $0xf0] ss:$12 sps:$4 sm:$0xff]  }
 0x33f   :  { %v13473_v42 = vpack.c.bf16 %v4747_v35, %v4735_v30  ;;  %v3297_v50 = vpop.f32.mrb[104].mxu0  ;;  %v3683_v34 = vpop.f32.mrb[104].mxu1  ;;  %7045 = vmatprep.subr.bf16.mxu0 %v12262_v26  ;;  %v13475_v20 = vpack.c.bf16 %v4749_v28, %v4737_v3  ;;  %v12270_v28 = vld [vmem:[#allocation8 + $0x10c] ss:$12 sps:$4 sm:$0xff]  }
 0x340   :  { %15068 = vst [vmem:[#allocation87_spill] sm:$0xff] %v13469_v32  ;;  %15069 = vst [vmem:[#allocation88_spill] sm:$0xff] %v13471_v53  ;;  %v10730_v17 = vadd.f32 %v3297_v50, %v13297_v1  ;;  %v10794_v33 = vadd.f32 %v3683_v34, %v13299_v60  ;;  %v3299_v56 = vpop.f32.mrb[105].mxu0  ;;  %v3685_v54 = vpop.f32.mrb[105].mxu1  ;;  %v12693_v53 = vld [vmem:[#allocation2 + $0x80] ss:$12 sps:$4 sm:$0xff]  }
 0x341   :  { %15070 = vst [vmem:[#allocation89_spill] sm:$0xff] %v13475_v20  ;;  %v10731_v6 = vadd.f32 %v3299_v56, %v13301_v0  ;;  %v10795_v18 = vadd.f32 %v3685_v54, %v13303_v43  ;;  %v3301_v19 = vpop.f32.mrb[106].mxu0  ;;  %v3687_v4 = vpop.f32.mrb[106].mxu1 }
 0x342   :  { %v10732_v35 = vadd.f32 %v3301_v19, %v13297_v1  ;;  %v10796_v38 = vadd.f32 %v3687_v4, %v13299_v60  ;;  %v3303_v26 = vpop.f32.mrb[107].mxu0  ;;  %v3689_v23 = vpop.f32.mrb[107].mxu1  ;;  %7046 = vmatpush1.bf16.msra.mxu0 %v12260_v21  ;;  %v4758_v50 = vmax.f32 %v10730_v17, 0.0  ;;  %v4760_v34 = vmax.f32 %v10794_v33, 0.0 }
 0x343   :  { %v10733_v30 = vadd.f32 %v3303_v26, %v13301_v0  ;;  %v10797_v3 = vadd.f32 %v3689_v23, %v13303_v43  ;;  %7047 = vmatprep.subr.bf16.mxu0 %v12267_v48  ;;  %v4759_v19 = vmax.f32 %v10731_v6, 0.0  ;;  %v4761_v20 = vmax.f32 %v10795_v18, 0.0  ;;  %v12268_v48 = vld [vmem:[#allocation8 + $0x108] ss:$12 sps:$4 sm:$0xff]  }
 0x344   :  { %v4770_v56 = vmax.f32 %v10732_v35, 0.0  ;;  %v4772_v54 = vmax.f32 %v10796_v38, 0.0  ;;  %4018 = vmatmul.mubr.bf16.gmra.mrb[148].mxu0 %v12693_v53  ;;  %4404 = vmatmul.mubr.bf16.gmra.mrb[148].mxu1 %v12693_v53  ;;  %v12275_v53 = vld [vmem:[#allocation8 + $0x124] ss:$12 sps:$4 sm:$0xff]  }
 0x345   :  { %v4771_v4 = vmax.f32 %v10733_v30, 0.0  ;;  %v4773_v32 = vmax.f32 %v10797_v3, 0.0  ;;  %4027 = vmatprep.mubr.bf16.mxu0 %v15014_v63  ;;  %4413 = vmatprep.mubr.bf16.mxu1 %v15014_v63 }
 0x346   :  { %v13487_v21 = vpack.c.bf16 %v4770_v56, %v4758_v50  ;;  %7048 = vmatpush1.bf16.msra.mxu0 %v12265_v37  ;;  %v13489_v26 = vpack.c.bf16 %v4772_v54, %v4760_v34 }
 0x347   :  { %v13491_v17 = vpack.c.bf16 %v4771_v4, %v4759_v19  ;;  %v3307_v33 = vpop.f32.mrb[108].mxu0  ;;  %v3693_v35 = vpop.f32.mrb[108].mxu1  ;;  %7049 = vmatprep.subr.bf16.mxu0 %v12270_v28  ;;  %v13493_v6 = vpack.c.bf16 %v4773_v32, %v4761_v20  ;;  %v12273_v32 = vld [vmem:[#allocation8 + $0x120] ss:$12 sps:$4 sm:$0xff]  }
 0x348   :  { %15071 = vst [vmem:[#allocation90_spill] sm:$0xff] %v13487_v21  ;;  %15072 = vst [vmem:[#allocation91_spill] sm:$0xff] %v13489_v26  ;;  %v10734_v18 = vadd.f32 %v3307_v33, %v13297_v1  ;;  %v10798_v38 = vadd.f32 %v3693_v35, %v13299_v60  ;;  %v3309_v23 = vpop.f32.mrb[109].mxu0  ;;  %v3695_v30 = vpop.f32.mrb[109].mxu1  ;;  %v12278_v33 = vld [vmem:[#allocation8 + $0x13c] ss:$12 sps:$4 sm:$0xff]  }
 0x349   :  { %15073 = vst [vmem:[#allocation92_spill] sm:$0xff] %v13491_v17  ;;  %15074 = vst [vmem:[#allocation93_spill] sm:$0xff] %v13493_v6  ;;  %v10735_v3 = vadd.f32 %v3309_v23, %v13301_v0  ;;  %v10799_v37 = vadd.f32 %v3695_v30, %v13303_v43  ;;  %v3311_v50 = vpop.f32.mrb[110].mxu0  ;;  %v3697_v34 = vpop.f32.mrb[110].mxu1  ;;  %v12694_v6 = vld [vmem:[#allocation2 + $0x98] ss:$12 sps:$4 sm:$0xff]  }
 0x34a   :  { %v10736_v56 = vadd.f32 %v3311_v50, %v13297_v1  ;;  %v10800_v54 = vadd.f32 %v3697_v34, %v13299_v60  ;;  %v3313_v28 = vpop.f32.mrb[111].mxu0  ;;  %v3699_v19 = vpop.f32.mrb[111].mxu1  ;;  %7050 = vmatpush1.bf16.msra.mxu0 %v12268_v48  ;;  %v4782_v35 = vmax.f32 %v10734_v18, 0.0  ;;  %v4784_v23 = vmax.f32 %v10798_v38, 0.0 }
 0x34b   :  { %v10737_v20 = vadd.f32 %v3313_v28, %v13301_v0  ;;  %v10801_v4 = vadd.f32 %v3699_v19, %v13303_v43  ;;  %7051 = vmatprep.subr.bf16.mxu0 %v12275_v53  ;;  %v4783_v50 = vmax.f32 %v10735_v3, 0.0  ;;  %v4785_v21 = vmax.f32 %v10799_v37, 0.0  ;;  %v12276_v53 = vld [vmem:[#allocation8 + $0x138] ss:$12 sps:$4 sm:$0xff]  }
 0x34c   :  { %v4794_v26 = vmax.f32 %v10736_v56, 0.0  ;;  %v4796_v30 = vmax.f32 %v10800_v54, 0.0  ;;  %4028 = vmatmul.mubr.bf16.gmra.mrb[152].mxu0 %v12694_v6  ;;  %4414 = vmatmul.mubr.bf16.gmra.mrb[152].mxu1 %v12694_v6  ;;  %v12283_v6 = vld [vmem:[#allocation8 + $0x154] ss:$12 sps:$4 sm:$0xff]  }
 0x34d   :  { %v4795_v34 = vmax.f32 %v10737_v20, 0.0  ;;  %v4797_v17 = vmax.f32 %v10801_v4, 0.0  ;;  %4037 = vmatprep.mubr.bf16.mxu0 %v15014_v63  ;;  %4423 = vmatprep.mubr.bf16.mxu1 %v15014_v63 }
 0x34e   :  { %v13505_v48 = vpack.c.bf16 %v4794_v26, %v4782_v35  ;;  %7052 = vmatpush1.bf16.msra.mxu0 %v12273_v32  ;;  %v13507_v28 = vpack.c.bf16 %v4796_v30, %v4784_v23 }
 0x34f   :  { %v13509_v18 = vpack.c.bf16 %v4795_v34, %v4783_v50  ;;  %v3317_v38 = vpop.f32.mrb[112].mxu0  ;;  %v3703_v56 = vpop.f32.mrb[112].mxu1  ;;  %7053 = vmatprep.subr.bf16.mxu0 %v12278_v33  ;;  %v13511_v3 = vpack.c.bf16 %v4797_v17, %v4785_v21  ;;  %v12281_v21 = vld [vmem:[#allocation8 + $0x150] ss:$12 sps:$4 sm:$0xff]  }
 0x350   :  { %15075 = vst [vmem:[#allocation94_spill] sm:$0xff] %v13505_v48  ;;  %15076 = vst [vmem:[#allocation95_spill] sm:$0xff] %v13507_v28  ;;  %v10738_v37 = vadd.f32 %v3317_v38, %v13297_v1  ;;  %v10802_v54 = vadd.f32 %v3703_v56, %v13299_v60  ;;  %v3319_v19 = vpop.f32.mrb[113].mxu0  ;;  %v3705_v20 = vpop.f32.mrb[113].mxu1  ;;  %v12286_v38 = vld [vmem:[#allocation8 + $0x16c] ss:$12 sps:$4 sm:$0xff]  }
 0x351   :  { %15077 = vst [vmem:[#allocation96_spill] sm:$0xff] %v13509_v18  ;;  %15078 = vst [vmem:[#allocation97_spill] sm:$0xff] %v13511_v3  ;;  %v10739_v26 = vadd.f32 %v3319_v19, %v13301_v0  ;;  %v10803_v32 = vadd.f32 %v3705_v20, %v13303_v43  ;;  %v3321_v4 = vpop.f32.mrb[114].mxu0  ;;  %v3707_v35 = vpop.f32.mrb[114].mxu1  ;;  %v12695_v3 = vld [vmem:[#allocation2 + $0xb0] ss:$12 sps:$4 sm:$0xff]  }
 0x352   :  { %v10740_v23 = vadd.f32 %v3321_v4, %v13297_v1  ;;  %v10804_v30 = vadd.f32 %v3707_v35, %v13299_v60  ;;  %v3323_v33 = vpop.f32.mrb[115].mxu0  ;;  %v3709_v50 = vpop.f32.mrb[115].mxu1  ;;  %7054 = vmatpush1.bf16.msra.mxu0 %v12276_v53  ;;  %v4806_v56 = vmax.f32 %v10738_v37, 0.0  ;;  %v4808_v19 = vmax.f32 %v10802_v54, 0.0 }
 0x353   :  { %v10741_v17 = vadd.f32 %v3323_v33, %v13301_v0  ;;  %v10805_v34 = vadd.f32 %v3709_v50, %v13303_v43  ;;  %7055 = vmatprep.subr.bf16.mxu0 %v12283_v6  ;;  %v4807_v4 = vmax.f32 %v10739_v26, 0.0  ;;  %v4809_v48 = vmax.f32 %v10803_v32, 0.0  ;;  %v12284_v6 = vld [vmem:[#allocation8 + $0x168] ss:$12 sps:$4 sm:$0xff]  }
 0x354   :  { %v4818_v28 = vmax.f32 %v10740_v23, 0.0  ;;  %v4820_v20 = vmax.f32 %v10804_v30, 0.0  ;;  %4038 = vmatmul.mubr.bf16.gmra.mrb[156].mxu0 %v12695_v3  ;;  %4424 = vmatmul.mubr.bf16.gmra.mrb[156].mxu1 %v12695_v3  ;;  %v12291_v3 = vld [vmem:[#allocation8 + $0x184] ss:$12 sps:$4 sm:$0xff]  }
 0x355   :  { %v4819_v35 = vmax.f32 %v10741_v17, 0.0  ;;  %v4821_v18 = vmax.f32 %v10805_v34, 0.0  ;;  %4047 = vmatprep.mubr.bf16.mxu0 %v15014_v63  ;;  %4433 = vmatprep.mubr.bf16.mxu1 %v15014_v63 }
 0x356   :  { %v13523_v53 = vpack.c.bf16 %v4818_v28, %v4806_v56  ;;  %7056 = vmatpush1.bf16.msra.mxu0 %v12281_v21  ;;  %v13525_v33 = vpack.c.bf16 %v4820_v20, %v4808_v19 }
 0x357   :  { %v13527_v37 = vpack.c.bf16 %v4819_v35, %v4807_v4  ;;  %v3327_v54 = vpop.f32.mrb[116].mxu0  ;;  %v3713_v23 = vpop.f32.mrb[116].mxu1  ;;  %7057 = vmatprep.subr.bf16.mxu0 %v12286_v38  ;;  %v13529_v26 = vpack.c.bf16 %v4821_v18, %v4809_v48 }
 0x358   :  { %15079 = vst [vmem:[#allocation98_spill] sm:$0xff] %v13523_v53  ;;  %15080 = vst [vmem:[#allocation99_spill] sm:$0xff] %v13525_v33  ;;  %v10742_v32 = vadd.f32 %v3327_v54, %v13297_v1  ;;  %v10806_v30 = vadd.f32 %v3713_v23, %v13299_v60  ;;  %v3329_v50 = vpop.f32.mrb[117].mxu0  ;;  %v3715_v17 = vpop.f32.mrb[117].mxu1  ;;  %v12696_v33 = vld [vmem:[#allocation2 + $0xc8] ss:$12 sps:$4 sm:$0xff]  }
 0x359   :  { %15081 = vst [vmem:[#allocation100_spill] sm:$0xff] %v13529_v26  ;;  %v10743_v28 = vadd.f32 %v3329_v50, %v13301_v0  ;;  %v10807_v21 = vadd.f32 %v3715_v17, %v13303_v43  ;;  %v3331_v34 = vpop.f32.mrb[118].mxu0  ;;  %v3717_v56 = vpop.f32.mrb[118].mxu1 }
 0x35a   :  { %v10744_v19 = vadd.f32 %v3331_v34, %v13297_v1  ;;  %v10808_v20 = vadd.f32 %v3717_v56, %v13299_v60  ;;  %v3333_v38 = vpop.f32.mrb[119].mxu0  ;;  %v3719_v4 = vpop.f32.mrb[119].mxu1  ;;  %7058 = vmatpush1.bf16.msra.mxu0 %v12284_v6  ;;  %v4830_v35 = vmax.f32 %v10742_v32, 0.0  ;;  %v4832_v54 = vmax.f32 %v10806_v30, 0.0 }
 0x35b   :  { %v10745_v48 = vadd.f32 %v3333_v38, %v13301_v0  ;;  %v10809_v18 = vadd.f32 %v3719_v4, %v13303_v43  ;;  %7220 = vmatprep.subr.bf16.mxu0 %v12291_v3  ;;  %v4831_v17 = vmax.f32 %v10743_v28, 0.0  ;;  %v4833_v26 = vmax.f32 %v10807_v21, 0.0 }
 0x35c   :  { %v4842_v23 = vmax.f32 %v10744_v19, 0.0  ;;  %v4844_v50 = vmax.f32 %v10808_v20, 0.0  ;;  %4048 = vmatmul.mubr.bf16.gmra.mrb[160].mxu0 %v12696_v33  ;;  %4434 = vmatmul.mubr.bf16.gmra.mrb[160].mxu1 %v12696_v33 }
 0x35d   :  { %v4843_v34 = vmax.f32 %v10745_v48, 0.0  ;;  %v4845_v53 = vmax.f32 %v10809_v18, 0.0  ;;  %4057 = vmatprep.mubr.bf16.mxu0 %v15014_v63  ;;  %4443 = vmatprep.mubr.bf16.mxu1 %v15014_v63 }
 0x35e   :  { %v13541_v6 = vpack.c.bf16 %v4842_v23, %v4830_v35  ;;  %v13543_v56 = vpack.c.bf16 %v4844_v50, %v4832_v54 }
 0x35f   :  { %v13545_v3 = vpack.c.bf16 %v4843_v34, %v4831_v17  ;;  %v3337_v32 = vpop.f32.mrb[120].mxu0  ;;  %v3723_v30 = vpop.f32.mrb[120].mxu1  ;;  %v13547_v19 = vpack.c.bf16 %v4845_v53, %v4833_v26 }
 0x360   :  { %15082 = vst [vmem:[#allocation101_spill] sm:$0xff] %v13541_v6  ;;  %15083 = vst [vmem:[#allocation102_spill] sm:$0xff] %v13543_v56  ;;  %v10746_v33 = vadd.f32 %v3337_v32, %v13297_v1  ;;  %v10810_v28 = vadd.f32 %v3723_v30, %v13299_v60  ;;  %v3339_v21 = vpop.f32.mrb[121].mxu0  ;;  %v3725_v20 = vpop.f32.mrb[121].mxu1  ;;  %v12697_v56 = vld [vmem:[#allocation2 + $0xe0] ss:$12 sps:$4 sm:$0xff]  }
 0x361   :  { %15084 = vst [vmem:[#allocation103_spill] sm:$0xff] %v13547_v19  ;;  %v10747_v38 = vadd.f32 %v3339_v21, %v13301_v0  ;;  %v10811_v4 = vadd.f32 %v3725_v20, %v13303_v43  ;;  %v3341_v48 = vpop.f32.mrb[122].mxu0  ;;  %v3727_v18 = vpop.f32.mrb[122].mxu1 }
 0x362   :  { %v10748_v35 = vadd.f32 %v3341_v48, %v13297_v1  ;;  %v10812_v54 = vadd.f32 %v3727_v18, %v13299_v60  ;;  %v3343_v23 = vpop.f32.mrb[123].mxu0  ;;  %v3729_v50 = vpop.f32.mrb[123].mxu1  ;;  %v4854_v17 = vmax.f32 %v10746_v33, 0.0  ;;  %v4856_v34 = vmax.f32 %v10810_v28, 0.0 }
 0x363   :  { %v10749_v53 = vadd.f32 %v3343_v23, %v13301_v0  ;;  %v10813_v26 = vadd.f32 %v3729_v50, %v13303_v43  ;;  %v4855_v21 = vmax.f32 %v10747_v38, 0.0  ;;  %v4857_v20 = vmax.f32 %v10811_v4, 0.0 }
 0x364   :  { %v4866_v32 = vmax.f32 %v10748_v35, 0.0  ;;  %v4868_v30 = vmax.f32 %v10812_v54, 0.0  ;;  %4058 = vmatmul.mubr.bf16.gmra.mrb[164].mxu0 %v12697_v56  ;;  %4444 = vmatmul.mubr.bf16.gmra.mrb[164].mxu1 %v12697_v56 }
 0x365   :  { %v4867_v19 = vmax.f32 %v10749_v53, 0.0  ;;  %v4869_v6 = vmax.f32 %v10813_v26, 0.0  ;;  %4067 = vmatprep.mubr.bf16.mxu0 %v15014_v63  ;;  %4453 = vmatprep.mubr.bf16.mxu1 %v15014_v63 }
 0x366   :  { %v13559_v48 = vpack.c.bf16 %v4866_v32, %v4854_v17  ;;  %v13561_v18 = vpack.c.bf16 %v4868_v30, %v4856_v34 }
 0x367   :  { %v13563_v23 = vpack.c.bf16 %v4867_v19, %v4855_v21  ;;  %v3347_v33 = vpop.f32.mrb[124].mxu0  ;;  %v3733_v28 = vpop.f32.mrb[124].mxu1  ;;  %v13565_v35 = vpack.c.bf16 %v4869_v6, %v4857_v20 }
 0x368   :  { %15085 = vst [vmem:[#allocation104_spill] sm:$0xff] %v13559_v48  ;;  %15086 = vst [vmem:[#allocation105_spill] sm:$0xff] %v13561_v18  ;;  %v10750_v56 = vadd.f32 %v3347_v33, %v13297_v1  ;;  %v10814_v38 = vadd.f32 %v3733_v28, %v13299_v60  ;;  %v3349_v4 = vpop.f32.mrb[125].mxu0  ;;  %v3735_v54 = vpop.f32.mrb[125].mxu1 }
 0x369   :  { %15087 = vst [vmem:[#allocation106_spill] sm:$0xff] %v13565_v35  ;;  %v10751_v50 = vadd.f32 %v3349_v4, %v13301_v0  ;;  %v3351_v53 = vpop.f32.mrb[126].mxu0  ;;  %v3737_v26 = vpop.f32.mrb[126].mxu1  ;;  %v10815_v17 = vadd.f32 %v3735_v54, %v13303_v43  ;;  %v12698_v35 = vld [vmem:[#allocation2 + $0xf8] ss:$12 sps:$4 sm:$0xff]  }
 0x36a   :  { %v10752_v34 = vadd.f32 %v3351_v53, %v13297_v1  ;;  %v10816_v19 = vadd.f32 %v3737_v26, %v13299_v60  ;;  %v3353_v32 = vpop.f32.mrb[127].mxu0  ;;  %v3739_v30 = vpop.f32.mrb[127].mxu1  ;;  %v4878_v20 = vmax.f32 %v10750_v56, 0.0  ;;  %v4880_v33 = vmax.f32 %v10814_v38, 0.0  ;;  %v12699_v38 = vld [vmem:[#allocation2 + $0x110] ss:$12 sps:$4 sm:$0xff]  }
 0x36b   :  { %v10753_v6 = vadd.f32 %v3353_v32, %v13301_v0  ;;  %v10817_v21 = vadd.f32 %v3739_v30, %v13303_v43  ;;  %v4879_v4 = vmax.f32 %v10751_v50, 0.0  ;;  %v4881_v1 = vmax.f32 %v10815_v17, 0.0  ;;  %v12703_v50 = vld [vmem:[#allocation2 + $0x170] ss:$12 sps:$4 sm:$0xff]   ;;  %v12288_v53 = vld [vmem:[#allocation8 + $0x188] ss:$12 sps:$4 sm:$0xff]  }
 0x36c   :  { %v4890_v28 = vmax.f32 %v10752_v34, 0.0  ;;  %v4892_v18 = vmax.f32 %v10816_v19, 0.0  ;;  %4068 = vmatmul.mubr.bf16.gmra.mrb[168].mxu0 %v12698_v35  ;;  %4454 = vmatmul.mubr.bf16.gmra.mrb[168].mxu1 %v12698_v35  ;;  %v12700_v35 = vld [vmem:[#allocation2 + $0x128] ss:$12 sps:$4 sm:$0xff]   ;;  %v12289_v26 = vld [vmem:[#allocation8 + $0x180] ss:$12 sps:$4 sm:$0xff]  }
 0x36d   :  { %v4891_v48 = vmax.f32 %v10753_v6, 0.0  ;;  %v4893_v54 = vmax.f32 %v10817_v21, 0.0  ;;  %4077 = vmatprep.mubr.bf16.mxu0 %v15014_v63  ;;  %4463 = vmatprep.mubr.bf16.mxu1 %v15014_v63  ;;  %v12294_v17 = vld [vmem:[#allocation8 + $0x19c] ss:$12 sps:$4 sm:$0xff]   ;;  %v12295_v34 = vld [vmem:[#allocation8 + $0x260] ss:$12 sps:$4 sm:$0xff]  }
 0x36e   :  { %v13577_v60 = vpack.c.bf16 %v4890_v28, %v4878_v20  ;;  %v13579_v0 = vpack.c.bf16 %v4892_v18, %v4880_v33  ;;  %v12701_v18 = vld [vmem:[#allocation2 + $0x140] ss:$12 sps:$4 sm:$0xff]   ;;  %v12297_v30 = vld [vmem:[#allocation8 + $0x1b0] ss:$12 sps:$4 sm:$0xff]   ;;  %v12304_v6 = vld [vmem:[#allocation8 + $0x1b8] ss:$12 sps:$4 sm:$0xff]  }
 0x36f   :  { %v13581_v43 = vpack.c.bf16 %v4891_v48, %v4879_v4  ;;  %v13583_v56 = vpack.c.bf16 %v4893_v54, %v4881_v1  ;;  %v12702_v48 = vld [vmem:[#allocation2 + $0x158] ss:$12 sps:$4 sm:$0xff]   ;;  %v12299_v32 = vld [vmem:[#allocation8 + $0x1b4] ss:$12 sps:$4 sm:$0xff]   ;;  %v12312_v20 = vld [vmem:[#allocation8 + $0x1d0] ss:$12 sps:$4 sm:$0xff]  }
 0x370   :  { %v12296_v19 = vld [vmem:[#allocation8 + $0x1a0] ss:$12 sps:$4 sm:$0xff]   ;;  %v12307_v33 = vld [vmem:[#allocation8 + $0x1e4] ss:$12 sps:$4 sm:$0xff]   ;;  %v12319_v28 = vld [vmem:[#allocation8 + $0x2a8] ss:$12 sps:$4 sm:$0xff]  }
 0x371   :  { %v12302_v21 = vld [vmem:[#allocation8 + $0x1cc] ss:$12 sps:$4 sm:$0xff]   ;;  %v12320_v54 = vld [vmem:[#allocation8 + $0x1e8] ss:$12 sps:$4 sm:$0xff]  }
 0x372   :  { %v12305_v4 = vld [vmem:[#allocation8 + $0x1e0] ss:$12 sps:$4 sm:$0xff]   ;;  %v12310_v1 = vld [vmem:[#allocation8 + $0x1fc] ss:$12 sps:$4 sm:$0xff]  }
 0x374   :  { %4078 = vmatmul.mubr.bf16.gmra.mrb[172].mxu0 %v12699_v38  ;;  %4464 = vmatmul.mubr.bf16.gmra.mrb[172].mxu1 %v12699_v38  ;;  %v12328_v38 = vld [vmem:[#allocation8 + $0x200] ss:$12 sps:$4 sm:$0xff]  }
 0x375   :  { %4087 = vmatprep.mubr.bf16.mxu0 %v15014_v63  ;;  %4473 = vmatprep.mubr.bf16.mxu1 %v15014_v63 }
 0x37c   :  { %4088 = vmatmul.mubr.bf16.gmra.mrb[176].mxu0 %v12700_v35  ;;  %4474 = vmatmul.mubr.bf16.gmra.mrb[176].mxu1 %v12700_v35  ;;  %v12315_v35 = vld [vmem:[#allocation8 + $0x214] ss:$12 sps:$4 sm:$0xff]  }
 0x37d   :  { %4097 = vmatprep.mubr.bf16.mxu0 %v15014_v63  ;;  %4483 = vmatprep.mubr.bf16.mxu1 %v15014_v63 }
 0x384   :  { %4098 = vmatmul.mubr.bf16.gmra.mrb[180].mxu0 %v12701_v18  ;;  %4484 = vmatmul.mubr.bf16.gmra.mrb[180].mxu1 %v12701_v18  ;;  %v12335_v18 = vld [vmem:[#allocation8 + $0x2d8] ss:$12 sps:$4 sm:$0xff]  }
 0x385   :  { %4107 = vmatprep.mubr.bf16.mxu0 %v15014_v63  ;;  %4493 = vmatprep.mubr.bf16.mxu1 %v15014_v63 }
 0x38c   :  { %4108 = vmatmul.mubr.bf16.gmra.mrb[184].mxu0 %v12702_v48  ;;  %4494 = vmatmul.mubr.bf16.gmra.mrb[184].mxu1 %v12702_v48  ;;  %v12313_v48 = vld [vmem:[#allocation8 + $0x210] ss:$12 sps:$4 sm:$0xff]  }
 0x38d   :  { %4117 = vmatprep.mubr.bf16.mxu0 %v15014_v63  ;;  %4503 = vmatprep.mubr.bf16.mxu1 %v15014_v63  ;;  %v12292_v63 = vld [vmem:[#allocation8 + $0x198] ss:$12 sps:$4 sm:$0xff]  }
 0x394   :  { %4118 = vmatmul.mubr.bf16.gmra.mrb[188].mxu0 %v12703_v50  ;;  %4504 = vmatmul.mubr.bf16.gmra.mrb[188].mxu1 %v12703_v50  ;;  %v12336_v50 = vld [vmem:[#allocation8 + $0x218] ss:$12 sps:$4 sm:$0xff]  }
 0x395   :  { %7059 = vmatprep.mubr.bf16.mxu0 %v13017_v51  ;;  %8217 = vmatprep.mubr.bf16.mxu1 %v13017_v51  ;;  %v12303_v51 = vld [vmem:[#allocation8 + $0x278] ss:$12 sps:$4 sm:$0xff]  }
 0x39c   :  { %7060 = vmatmul.mubr.bf16.vlgmr.msra.gmra.mrb[192].mxu0 %v13013_v49  ;;  %8218 = vmatmul.mubr.bf16.vlgmr.msra.gmra.mrb[192].mxu1 %v13013_v49  ;;  %v12311_v49 = vld [vmem:[#allocation8 + $0x290] ss:$12 sps:$4 sm:$0xff]  }
 0x39d   :  { %7069 = vmatprep.mubr.bf16.mxu0 %v13033_v27  ;;  %8225 = vmatprep.mubr.bf16.mxu1 %v13033_v27  ;;  %v12300_v27 = vld [vmem:[#allocation8 + $0x1c8] ss:$12 sps:$4 sm:$0xff]  }
 0x39e   :  { %10003 = vmatpush3.bf16.msra.mxu1 %v12288_v53  ;;  %7221 = vmatpush1.bf16.msra.mxu0 %v12289_v26  ;;  %v12318_v53 = vld [vmem:[#allocation8 + $0x22c] ss:$12 sps:$4 sm:$0xff]   ;;  %v12344_v26 = vld [vmem:[#allocation8 + $0x230] ss:$12 sps:$4 sm:$0xff]  }
 0x39f   :  { %7222 = vmatprep.subr.bf16.mxu0 %v12294_v17  ;;  %10004 = vmatprep.subr.bf16.mxu1 %v12295_v34  ;;  %v12323_v17 = vld [vmem:[#allocation8 + $0x244] ss:$12 sps:$4 sm:$0xff]   ;;  %v12351_v34 = vld [vmem:[#allocation8 + $0x3c8] ss:$12 sps:$4 sm:$0xff]  }
 0x3a2   :  { %7223 = vmatpush1.bf16.msra.mxu0 %v12292_v63  ;;  %10005 = vmatpush3.bf16.msra.mxu1 %v12296_v19  ;;  %v12321_v63 = vld [vmem:[#allocation8 + $0x240] ss:$12 sps:$4 sm:$0xff]   ;;  %v12326_v19 = vld [vmem:[#allocation8 + $0x25c] ss:$12 sps:$4 sm:$0xff]  }
 0x3a3   :  { %7224 = vmatprep.subr.bf16.mxu0 %v12299_v32  ;;  %10006 = vmatprep.subr.bf16.mxu1 %v12303_v51  ;;  %v12329_v32 = vld [vmem:[#allocation8 + $0x270] ss:$12 sps:$4 sm:$0xff]   ;;  %v12334_v51 = vld [vmem:[#allocation8 + $0x28c] ss:$12 sps:$4 sm:$0xff]  }
 0x3a4   :  { %7070 = vmatmul.mubr.bf16.gmra.mrb[196].mxu0 %v13029_v25  ;;  %8226 = vmatmul.mubr.bf16.gmra.mrb[196].mxu1 %v13029_v25  ;;  %v12327_v25 = vld [vmem:[#allocation8 + $0x2c0] ss:$12 sps:$4 sm:$0xff]  }
 0x3a5   :  { %7079 = vmatprep.mubr.bf16.mxu0 %v13049_v61  ;;  %8233 = vmatprep.mubr.bf16.mxu1 %v13049_v61  ;;  %v12308_v61 = vld [vmem:[#allocation8 + $0x1f8] ss:$12 sps:$4 sm:$0xff]  }
 0x3a6   :  { %7225 = vmatpush1.bf16.msra.mxu0 %v12297_v30  ;;  %10007 = vmatpush3.bf16.msra.mxu1 %v12304_v6  ;;  %v12337_v30 = vld [vmem:[#allocation8 + $0x2a0] ss:$12 sps:$4 sm:$0xff]   ;;  %v12342_v6 = vld [vmem:[#allocation8 + $0x2bc] ss:$12 sps:$4 sm:$0xff]  }
 0x3a7   :  { %7226 = vmatprep.subr.bf16.mxu0 %v12302_v21  ;;  %10008 = vmatprep.subr.bf16.mxu1 %v12311_v49  ;;  %v12345_v21 = vld [vmem:[#allocation8 + $0x2d0] ss:$12 sps:$4 sm:$0xff]   ;;  %v12350_v49 = vld [vmem:[#allocation8 + $0x2ec] ss:$12 sps:$4 sm:$0xff]  }
 0x3aa   :  { %7227 = vmatpush1.bf16.msra.mxu0 %v12300_v27  ;;  %10009 = vmatpush3.bf16.msra.mxu1 %v12312_v20 }
 0x3ab   :  { %7228 = vmatprep.subr.bf16.mxu0 %v12307_v33  ;;  %10010 = vmatprep.subr.bf16.mxu1 %v12319_v28 }
 0x3ac   :  { %7080 = vmatmul.mubr.bf16.gmra.mrb[200].mxu0 %v13045_v59  ;;  %8234 = vmatmul.mubr.bf16.gmra.mrb[200].mxu1 %v13045_v59  ;;  %v12343_v59 = vld [vmem:[#allocation8 + $0x2f0] ss:$12 sps:$4 sm:$0xff]  }
 0x3ad   :  { %7089 = vmatprep.mubr.bf16.mxu0 %v13065_v41  ;;  %8241 = vmatprep.mubr.bf16.mxu1 %v13065_v41  ;;  %v12316_v41 = vld [vmem:[#allocation8 + $0x228] ss:$12 sps:$4 sm:$0xff]  }
 0x3ae   :  { %7229 = vmatpush1.bf16.msra.mxu0 %v12305_v4  ;;  %10011 = vmatpush3.bf16.msra.mxu1 %v12320_v54 }
 0x3af   :  { %7230 = vmatprep.subr.bf16.mxu0 %v12310_v1  ;;  %10012 = vmatprep.subr.bf16.mxu1 %v12327_v25 }
 0x3b2   :  { %7231 = vmatpush1.bf16.msra.mxu0 %v12308_v61  ;;  %10013 = vmatpush3.bf16.msra.mxu1 %v12328_v38 }
 0x3b3   :  { %7232 = vmatprep.subr.bf16.mxu0 %v12315_v35  ;;  %10014 = vmatprep.subr.bf16.mxu1 %v12335_v18 }
 0x3b4   :  { %7090 = vmatmul.mubr.bf16.gmra.mrb[204].mxu0 %v13061_v39  ;;  %8242 = vmatmul.mubr.bf16.gmra.mrb[204].mxu1 %v13061_v39  ;;  %v12324_v39 = vld [vmem:[#allocation8 + $0x258] ss:$12 sps:$4 sm:$0xff]  }
 0x3b5   :  { %7099 = vmatprep.mubr.bf16.mxu0 %v13083_v24  ;;  %8249 = vmatprep.mubr.bf16.mxu1 %v13083_v24  ;;  %v12331_v24 = vld [vmem:[#allocation8 + $0x274] ss:$12 sps:$4 sm:$0xff]  }
 0x3b6   :  { %7233 = vmatpush1.bf16.msra.mxu0 %v12313_v48  ;;  %10015 = vmatpush3.bf16.msra.mxu1 %v12336_v50 }
 0x3b7   :  { %7234 = vmatprep.subr.bf16.mxu0 %v12318_v53  ;;  %10016 = vmatprep.subr.bf16.mxu1 %v12343_v59 }
 0x3ba   :  { %7235 = vmatpush1.bf16.msra.mxu0 %v12316_v41  ;;  %10017 = vmatpush3.bf16.msra.mxu1 %v12344_v26 }
 0x3bb   :  { %7236 = vmatprep.subr.bf16.mxu0 %v12323_v17  ;;  %10114 = vmatprep.subr.bf16.mxu1 %v12351_v34 }
 0x3bc   :  { %7100 = vmatmul.mubr.bf16.gmra.mrb[208].mxu0 %v13079_v22  ;;  %8250 = vmatmul.mubr.bf16.gmra.mrb[208].mxu1 %v13079_v22  ;;  %v12332_v22 = vld [vmem:[#allocation8 + $0x288] ss:$12 sps:$4 sm:$0xff]  }
 0x3bd   :  { %7109 = vmatprep.mubr.bf16.mxu0 %v13101_v29  ;;  %8257 = vmatprep.mubr.bf16.mxu1 %v13101_v29  ;;  %v12339_v29 = vld [vmem:[#allocation8 + $0x2a4] ss:$12 sps:$4 sm:$0xff]  }
 0x3be   :  { %7237 = vmatpush1.bf16.msra.mxu0 %v12321_v63 }
 0x3bf   :  { %7238 = vmatprep.subr.bf16.mxu0 %v12326_v19 }
 0x3c2   :  { %7239 = vmatpush1.bf16.msra.mxu0 %v12324_v39 }
 0x3c3   :  { %7240 = vmatprep.subr.bf16.mxu0 %v12331_v24 }
 0x3c4   :  { %7110 = vmatmul.mubr.bf16.gmra.mrb[212].mxu0 %v13095_v11  ;;  %8258 = vmatmul.mubr.bf16.gmra.mrb[212].mxu1 %v13095_v11  ;;  %v12340_v11 = vld [vmem:[#allocation8 + $0x2b8] ss:$12 sps:$4 sm:$0xff]  }
 0x3c5   :  { %7119 = vmatprep.mubr.bf16.mxu0 %v13119_v36  ;;  %8265 = vmatprep.mubr.bf16.mxu1 %v13119_v36  ;;  %v12347_v36 = vld [vmem:[#allocation8 + $0x2d4] ss:$12 sps:$4 sm:$0xff]  }
 0x3c6   :  { %7241 = vmatpush1.bf16.msra.mxu0 %v12329_v32 }
 0x3c7   :  { %7242 = vmatprep.subr.bf16.mxu0 %v12334_v51 }
 0x3ca   :  { %7243 = vmatpush1.bf16.msra.mxu0 %v12332_v22 }
 0x3cb   :  { %7244 = vmatprep.subr.bf16.mxu0 %v12339_v29 }
 0x3cc   :  { %7120 = vmatmul.mubr.bf16.gmra.mrb[216].mxu0 %v13115_v14  ;;  %8266 = vmatmul.mubr.bf16.gmra.mrb[216].mxu1 %v13115_v14  ;;  %v12348_v14 = vld [vmem:[#allocation8 + $0x2e8] ss:$12 sps:$4 sm:$0xff]  }
 0x3cd   :  { %7129 = vmatprep.mubr.bf16.mxu0 %v13137_v47  ;;  %8273 = vmatprep.mubr.bf16.mxu1 %v13137_v47  ;;  %v12355_v47 = vld [vmem:[#allocation8 + $0x304] ss:$12 sps:$4 sm:$0xff]  }
 0x3ce   :  { %7245 = vmatpush1.bf16.msra.mxu0 %v12337_v30 }
 0x3cf   :  { %7246 = vmatprep.subr.bf16.mxu0 %v12342_v6 }
 0x3d2   :  { %7247 = vmatpush1.bf16.msra.mxu0 %v12340_v11 }
 0x3d3   :  { %7248 = vmatprep.subr.bf16.mxu0 %v12347_v36 }
 0x3d4   :  { %7130 = vmatmul.mubr.bf16.gmra.mrb[220].mxu0 %v13133_v57  ;;  %8274 = vmatmul.mubr.bf16.gmra.mrb[220].mxu1 %v13133_v57  ;;  %v439_v57 = vld [vmem:[#allocation7 + $0x8] sm:$0xf] }
 0x3d5   :  { %7139 = vmatprep.mubr.bf16.mxu0 %v13155_v5  ;;  %8281 = vmatprep.mubr.bf16.mxu1 %v13155_v5  ;;  %v13638_v5 = vrot.slane %v439_v57, %v12983_v12  ;;  %v15108_v12 = vld [vmem:[#allocation23_spill] sm:$0xff] }
 0x3d6   :  { %7249 = vmatpush1.bf16.msra.mxu0 %v12345_v21 }
 0x3d7   :  { %7250 = vmatprep.subr.bf16.mxu0 %v12350_v49 }
 0x3da   :  { %7251 = vmatpush1.bf16.msra.mxu0 %v12348_v14 }
 0x3db   :  { %7413 = vmatprep.subr.bf16.mxu0 %v12355_v47 }
 0x3dc   :  { %7140 = vmatmul.mubr.bf16.gmra.mrb[224].mxu0 %v13151_v8  ;;  %8282 = vmatmul.mubr.bf16.gmra.mrb[224].mxu1 %v13151_v8  ;;  %v13641_v8 = vrot.slane %v439_v57, %v12986_v13 }
 0x3dd   :  { %7149 = vmatprep.mubr.bf16.mxu0 %v13173_v16  ;;  %8289 = vmatprep.mubr.bf16.mxu1 %v13173_v16  ;;  %v15088_v16 = vsub.s32 3, %v12980_v10 }
 0x3e4   :  { %7150 = vmatmul.mubr.bf16.gmra.mrb[228].mxu0 %v13169_v62  ;;  %8290 = vmatmul.mubr.bf16.gmra.mrb[228].mxu1 %v13169_v62  ;;  %v13646_v62 = vrot.slane %v439_v57, %v12989_v15 }
 0x3e5   :  { %7159 = vmatprep.mubr.bf16.mxu0 %v13191_v7  ;;  %8297 = vmatprep.mubr.bf16.mxu1 %v13191_v7  ;;  %v13650_v7 = vrot.slane %v439_v57, %v15088_v16 }
 0x3ec   :  { %7160 = vmatmul.mubr.bf16.gmra.mrb[232].mxu0 %v13187_v52  ;;  %8298 = vmatmul.mubr.bf16.gmra.mrb[232].mxu1 %v13187_v52 }
 0x3ed   :  { %7169 = vmatprep.mubr.bf16.mxu0 %v13209_v58  ;;  %8305 = vmatprep.mubr.bf16.mxu1 %v13209_v58 }
 0x3ef   :  { %v3969_v27 = vpop.f32.mrb[128].mxu0  ;;  %v4355_v20 = vpop.f32.mrb[128].mxu1 }
 0x3f0   :  { %v10818_v52 = vadd.f32 %v3969_v27, %v13638_v5  ;;  %v10882_v33 = vadd.f32 %v4355_v20, %v13641_v8  ;;  %v3971_v28 = vpop.f32.mrb[129].mxu0  ;;  %v4357_v4 = vpop.f32.mrb[129].mxu1 }
 0x3f1   :  { %v10819_v54 = vadd.f32 %v3971_v28, %v13646_v62  ;;  %v10883_v1 = vadd.f32 %v4357_v4, %v13650_v7  ;;  %v3973_v58 = vpop.f32.mrb[130].mxu0  ;;  %v4359_v25 = vpop.f32.mrb[130].mxu1 }
 0x3f2   :  { %v10820_v61 = vadd.f32 %v3973_v58, %v13638_v5  ;;  %v10884_v10 = vadd.f32 %v4359_v25, %v13641_v8  ;;  %v3975_v38 = vpop.f32.mrb[131].mxu0  ;;  %v4361_v35 = vpop.f32.mrb[131].mxu1  ;;  %v4522_v50 = vmax.f32 %v10818_v52, 0.0  ;;  %v4524_v53 = vmax.f32 %v10882_v33, 0.0 }
 0x3f3   :  { %v10821_v18 = vadd.f32 %v3975_v38, %v13646_v62  ;;  %v10885_v48 = vadd.f32 %v4361_v35, %v13650_v7  ;;  %v4523_v26 = vmax.f32 %v10819_v54, 0.0  ;;  %v4525_v17 = vmax.f32 %v10883_v1, 0.0 }
 0x3f4   :  { %v4534_v59 = vmax.f32 %v10820_v61, 0.0  ;;  %v4536_v41 = vmax.f32 %v10884_v10, 0.0  ;;  %7170 = vmatmul.mubr.bf16.gmra.mrb[236].mxu0 %v13205_v46  ;;  %8306 = vmatmul.mubr.bf16.gmra.mrb[236].mxu1 %v13205_v46 }
 0x3f5   :  { %v4535_v34 = vmax.f32 %v10821_v18, 0.0  ;;  %v4537_v63 = vmax.f32 %v10885_v48, 0.0  ;;  %7179 = vmatprep.mubr.bf16.mxu0 %v13227_v2  ;;  %8313 = vmatprep.mubr.bf16.mxu1 %v13227_v2 }
 0x3f6   :  { %v13664_v19 = vpack.c.bf16 %v4534_v59, %v4522_v50  ;;  %v13666_v39 = vpack.c.bf16 %v4536_v41, %v4524_v53 }
 0x3f7   :  { %v13668_v24 = vpack.c.bf16 %v4535_v34, %v4523_v26  ;;  %v3979_v32 = vpop.f32.mrb[132].mxu0  ;;  %v4365_v51 = vpop.f32.mrb[132].mxu1  ;;  %v13670_v22 = vpack.c.bf16 %v4537_v63, %v4525_v17 }
 0x3f8   :  { %15089 = vst [vmem:[#allocation107_spill] sm:$0xff] %v13666_v39  ;;  %v10822_v46 = vadd.f32 %v3979_v32, %v13638_v5  ;;  %v10886_v29 = vadd.f32 %v4365_v51, %v13641_v8  ;;  %v3981_v30 = vpop.f32.mrb[133].mxu0  ;;  %v4367_v6 = vpop.f32.mrb[133].mxu1  ;;  %v15156_v39 = vld [vmem:[#allocation39_spill] sm:$0xff] }
 0x3f9   :  { %15090 = vst [vmem:[#allocation108_spill] sm:$0xff] %v13670_v22  ;;  %v10823_v11 = vadd.f32 %v3981_v30, %v13646_v62  ;;  %v10887_v2 = vadd.f32 %v4367_v6, %v13650_v7  ;;  %v3983_v36 = vpop.f32.mrb[134].mxu0  ;;  %v4369_v21 = vpop.f32.mrb[134].mxu1 }
 0x3fa   :  { %v10824_v49 = vadd.f32 %v3983_v36, %v13638_v5  ;;  %v10888_v14 = vadd.f32 %v4369_v21, %v13641_v8  ;;  %v3985_v47 = vpop.f32.mrb[135].mxu0  ;;  %v4371_v57 = vpop.f32.mrb[135].mxu1  ;;  %v4546_v20 = vmax.f32 %v10822_v46, 0.0  ;;  %v4548_v52 = vmax.f32 %v10886_v29, 0.0 }
 0x3fb   :  { %v10825_v16 = vadd.f32 %v3985_v47, %v13646_v62  ;;  %v10889_v27 = vadd.f32 %v4371_v57, %v13650_v7  ;;  %v4547_v4 = vmax.f32 %v10823_v11, 0.0  ;;  %v4549_v54 = vmax.f32 %v10887_v2, 0.0 }
 0x3fc   :  { %v4558_v33 = vmax.f32 %v10824_v49, 0.0  ;;  %v4560_v28 = vmax.f32 %v10888_v14, 0.0  ;;  %7180 = vmatmul.mubr.bf16.gmra.mrb[240].mxu0 %v13223_v45  ;;  %8314 = vmatmul.mubr.bf16.gmra.mrb[240].mxu1 %v13223_v45 }
 0x3fd   :  { %v4559_v1 = vmax.f32 %v10825_v16, 0.0  ;;  %v4561_v58 = vmax.f32 %v10889_v27, 0.0  ;;  %7189 = vmatprep.mubr.bf16.mxu0 %v13245_v9  ;;  %8321 = vmatprep.mubr.bf16.mxu1 %v13245_v9 }
 0x3fe   :  { %v13684_v25 = vpack.c.bf16 %v4558_v33, %v4546_v20  ;;  %v13686_v61 = vpack.c.bf16 %v4560_v28, %v4548_v52 }
 0x3ff   :  { %v13688_v10 = vpack.c.bf16 %v4559_v1, %v4547_v4  ;;  %v3989_v38 = vpop.f32.mrb[136].mxu0  ;;  %v4375_v35 = vpop.f32.mrb[136].mxu1  ;;  %v13690_v18 = vpack.c.bf16 %v4561_v58, %v4549_v54 }
 0x400   :  { %15091 = vst [vmem:[#allocation109_spill] sm:$0xff] %v13686_v61  ;;  %v10826_v45 = vadd.f32 %v3989_v38, %v13638_v5  ;;  %v10890_v48 = vadd.f32 %v4375_v35, %v13641_v8  ;;  %v3991_v50 = vpop.f32.mrb[137].mxu0  ;;  %v4377_v53 = vpop.f32.mrb[137].mxu1 }
 0x401   :  { %15092 = vst [vmem:[#allocation110_spill] sm:$0xff] %v13690_v18  ;;  %v10827_v59 = vadd.f32 %v3991_v50, %v13646_v62  ;;  %v10891_v9 = vadd.f32 %v4377_v53, %v13650_v7  ;;  %v3993_v41 = vpop.f32.mrb[138].mxu0  ;;  %v4379_v26 = vpop.f32.mrb[138].mxu1  ;;  %v15150_v18 = vld [vmem:[#allocation37_spill] sm:$0xff] }
 0x402   :  { %v10828_v17 = vadd.f32 %v3993_v41, %v13638_v5  ;;  %v10892_v34 = vadd.f32 %v4379_v26, %v13641_v8  ;;  %v3995_v63 = vpop.f32.mrb[139].mxu0  ;;  %v4381_v32 = vpop.f32.mrb[139].mxu1  ;;  %v4570_v29 = vmax.f32 %v10826_v45, 0.0  ;;  %v4572_v30 = vmax.f32 %v10890_v48, 0.0 }
 0x403   :  { %v10829_v51 = vadd.f32 %v3995_v63, %v13646_v62  ;;  %v10893_v46 = vadd.f32 %v4381_v32, %v13650_v7  ;;  %v4571_v2 = vmax.f32 %v10827_v59, 0.0  ;;  %v4573_v36 = vmax.f32 %v10891_v9, 0.0  ;;  %v15095_v32 = vld [vmem:[#allocation49_spill] sm:$0xff] }
 0x404   :  { %v4582_v6 = vmax.f32 %v10828_v17, 0.0  ;;  %v4584_v11 = vmax.f32 %v10892_v34, 0.0  ;;  %7190 = vmatmul.mubr.bf16.gmra.mrb[244].mxu0 %v13241_v55  ;;  %8322 = vmatmul.mubr.bf16.gmra.mrb[244].mxu1 %v13241_v55 }
 0x405   :  { %v4583_v21 = vmax.f32 %v10829_v51, 0.0  ;;  %v4585_v49 = vmax.f32 %v10893_v46, 0.0  ;;  %7199 = vmatprep.mubr.bf16.mxu0 %v13263_v40  ;;  %8329 = vmatprep.mubr.bf16.mxu1 %v13263_v40 }
 0x406   :  { %v13704_v14 = vpack.c.bf16 %v4582_v6, %v4570_v29  ;;  %v13706_v47 = vpack.c.bf16 %v4584_v11, %v4572_v30 }
 0x407   :  { %v13708_v57 = vpack.c.bf16 %v4583_v21, %v4571_v2  ;;  %v3999_v16 = vpop.f32.mrb[140].mxu0  ;;  %v4385_v27 = vpop.f32.mrb[140].mxu1  ;;  %v13710_v20 = vpack.c.bf16 %v4585_v49, %v4573_v36 }
 0x408   :  { %15093 = vst [vmem:[#allocation111_spill] sm:$0xff] %v13706_v47  ;;  %v10830_v55 = vadd.f32 %v3999_v16, %v13638_v5  ;;  %v10894_v52 = vadd.f32 %v4385_v27, %v13641_v8  ;;  %v4001_v33 = vpop.f32.mrb[141].mxu0  ;;  %v4387_v28 = vpop.f32.mrb[141].mxu1 }
 0x409   :  { %15094 = vst [vmem:[#allocation112_spill] sm:$0xff] %v13710_v20  ;;  %v10831_v4 = vadd.f32 %v4001_v33, %v13646_v62  ;;  %v10895_v40 = vadd.f32 %v4387_v28, %v13650_v7  ;;  %v4003_v54 = vpop.f32.mrb[142].mxu0  ;;  %v4389_v1 = vpop.f32.mrb[142].mxu1 }
 0x40a   :  { %v10832_v58 = vadd.f32 %v4003_v54, %v13638_v5  ;;  %v10896_v38 = vadd.f32 %v4389_v1, %v13641_v8  ;;  %v4005_v35 = vpop.f32.mrb[143].mxu0  ;;  %v4391_v45 = vpop.f32.mrb[143].mxu1  ;;  %v4594_v53 = vmax.f32 %v10830_v55, 0.0  ;;  %v4596_v59 = vmax.f32 %v10894_v52, 0.0 }
 0x40b   :  { %v10833_v48 = vadd.f32 %v4005_v35, %v13646_v62  ;;  %v10897_v50 = vadd.f32 %v4391_v45, %v13650_v7  ;;  %v4595_v26 = vmax.f32 %v10831_v4, 0.0  ;;  %v4597_v17 = vmax.f32 %v10895_v40, 0.0  ;;  %v15098_v45 = vld [vmem:[#allocation48_spill] sm:$0xff] }
 0x40c   :  { %v4606_v9 = vmax.f32 %v10832_v58, 0.0  ;;  %v4608_v41 = vmax.f32 %v10896_v38, 0.0  ;;  %7200 = vmatmul.mubr.bf16.gmra.mrb[248].mxu0 %v13259_v44  ;;  %8330 = vmatmul.mubr.bf16.gmra.mrb[248].mxu1 %v13259_v44 }
 0x40d   :  { %v4607_v34 = vmax.f32 %v10833_v48, 0.0  ;;  %v4609_v63 = vmax.f32 %v10897_v50, 0.0  ;;  %7209 = vmatprep.mubr.bf16.mxu0 %v15095_v32  ;;  %8337 = vmatprep.mubr.bf16.mxu1 %v15095_v32 }
 0x40e   :  { %v13724_v51 = vpack.c.bf16 %v4606_v9, %v4594_v53  ;;  %v13726_v46 = vpack.c.bf16 %v4608_v41, %v4596_v59  ;;  %v15099_v9 = vld [vmem:[#allocation19_spill] sm:$0xff] }
 0x40f   :  { %v13728_v29 = vpack.c.bf16 %v4607_v34, %v4595_v26  ;;  %v4009_v30 = vpop.f32.mrb[144].mxu0  ;;  %v4395_v6 = vpop.f32.mrb[144].mxu1  ;;  %v13730_v11 = vpack.c.bf16 %v4609_v63, %v4597_v17 }
 0x410   :  { %15096 = vst [vmem:[#allocation49_spill] sm:$0xff] %v13726_v46  ;;  %v10834_v44 = vadd.f32 %v4009_v30, %v13638_v5  ;;  %v10898_v2 = vadd.f32 %v4395_v6, %v13641_v8  ;;  %v4011_v36 = vpop.f32.mrb[145].mxu0  ;;  %v4397_v21 = vpop.f32.mrb[145].mxu1 }
 0x411   :  { %15097 = vst [vmem:[#allocation113_spill] sm:$0xff] %v13730_v11  ;;  %v10835_v49 = vadd.f32 %v4011_v36, %v13646_v62  ;;  %v10899_v16 = vadd.f32 %v4397_v21, %v13650_v7  ;;  %v4013_v27 = vpop.f32.mrb[146].mxu0  ;;  %v4399_v55 = vpop.f32.mrb[146].mxu1 }
 0x412   :  { %v10836_v52 = vadd.f32 %v4013_v27, %v13638_v5  ;;  %v10900_v33 = vadd.f32 %v4399_v55, %v13641_v8  ;;  %v4015_v28 = vpop.f32.mrb[147].mxu0  ;;  %v4401_v4 = vpop.f32.mrb[147].mxu1  ;;  %v4618_v1 = vmax.f32 %v10834_v44, 0.0  ;;  %v4620_v58 = vmax.f32 %v10898_v2, 0.0 }
 0x413   :  { %v10837_v40 = vadd.f32 %v4015_v28, %v13646_v62  ;;  %v10901_v54 = vadd.f32 %v4401_v4, %v13650_v7  ;;  %v4619_v48 = vmax.f32 %v10835_v49, 0.0  ;;  %v4621_v50 = vmax.f32 %v10899_v16, 0.0  ;;  %v12352_v28 = vld [vmem:[#allocation8 + $0x308] ss:$12 sps:$4 sm:$0xff]   ;;  %v12353_v4 = vld [vmem:[#allocation8 + $0x300] ss:$12 sps:$4 sm:$0xff]  }
 0x414   :  { %v4630_v38 = vmax.f32 %v10836_v52, 0.0  ;;  %v4632_v35 = vmax.f32 %v10900_v33, 0.0  ;;  %7210 = vmatmul.mubr.bf16.gmra.mrb[252].mxu0 %v15098_v45  ;;  %8338 = vmatmul.mubr.bf16.gmra.mrb[252].mxu1 %v15098_v45 }
 0x415   :  { %v4631_v53 = vmax.f32 %v10837_v40, 0.0  ;;  %v4633_v59 = vmax.f32 %v10901_v54, 0.0  ;;  %7252 = vmatprep.mubr.bf16.mxu0 %v15099_v9  ;;  %8378 = vmatprep.mubr.bf16.mxu1 %v15099_v9 }
 0x416   :  { %v13744_v41 = vpack.c.bf16 %v4630_v38, %v4618_v1  ;;  %v13746_v26 = vpack.c.bf16 %v4632_v35, %v4620_v58  ;;  %v12358_v1 = vld [vmem:[#allocation8 + $0x31c] ss:$12 sps:$4 sm:$0xff]   ;;  %v12359_v58 = vld [vmem:[#allocation8 + $0x3e0] ss:$12 sps:$4 sm:$0xff]  }
 0x417   :  { %v13748_v17 = vpack.c.bf16 %v4631_v53, %v4619_v48  ;;  %v4019_v34 = vpop.f32.mrb[148].mxu0  ;;  %v4405_v63 = vpop.f32.mrb[148].mxu1  ;;  %v13750_v32 = vpack.c.bf16 %v4633_v59, %v4621_v50  ;;  %v15102_v50 = vld [vmem:[#allocation18_spill] sm:$0xff] }
 0x418   :  { %15100 = vst [vmem:[#allocation48_spill] sm:$0xff] %v13746_v26  ;;  %v10838_v30 = vadd.f32 %v4019_v34, %v13638_v5  ;;  %v10902_v6 = vadd.f32 %v4405_v63, %v13641_v8  ;;  %v4021_v44 = vpop.f32.mrb[149].mxu0  ;;  %v4407_v2 = vpop.f32.mrb[149].mxu1  ;;  %v15103_v63 = vld [vmem:[#allocation21_spill] sm:$0xff] }
 0x419   :  { %15101 = vst [vmem:[#allocation19_spill] sm:$0xff] %v13750_v32  ;;  %v10839_v36 = vadd.f32 %v4021_v44, %v13646_v62  ;;  %v10903_v21 = vadd.f32 %v4407_v2, %v13650_v7  ;;  %v4023_v49 = vpop.f32.mrb[150].mxu0  ;;  %v4409_v16 = vpop.f32.mrb[150].mxu1  ;;  %v15120_v32 = vld [vmem:[#allocation27_spill] sm:$0xff] }
 0x41a   :  { %v10840_v27 = vadd.f32 %v4023_v49, %v13638_v5  ;;  %v10904_v55 = vadd.f32 %v4409_v16, %v13641_v8  ;;  %v4025_v52 = vpop.f32.mrb[151].mxu0  ;;  %v4411_v33 = vpop.f32.mrb[151].mxu1  ;;  %v4642_v38 = vmax.f32 %v10838_v30, 0.0  ;;  %v4644_v35 = vmax.f32 %v10902_v6, 0.0  ;;  %v12356_v30 = vld [vmem:[#allocation8 + $0x318] ss:$12 sps:$4 sm:$0xff]  }
 0x41b   :  { %v10841_v40 = vadd.f32 %v4025_v52, %v13646_v62  ;;  %v10905_v54 = vadd.f32 %v4411_v33, %v13650_v7  ;;  %v4643_v53 = vmax.f32 %v10839_v36, 0.0  ;;  %v4645_v59 = vmax.f32 %v10903_v21, 0.0  ;;  %v12360_v6 = vld [vmem:[#allocation8 + $0x320] ss:$12 sps:$4 sm:$0xff]   ;;  %v12367_v21 = vld [vmem:[#allocation8 + $0x3f8] ss:$12 sps:$4 sm:$0xff]  }
 0x41c   :  { %v4654_v45 = vmax.f32 %v10840_v27, 0.0  ;;  %v4656_v48 = vmax.f32 %v10904_v55, 0.0  ;;  %7253 = vmatmul.mubr.bf16.vlgmr.msra.gmra.mrb[192].mxu0 %v15102_v50  ;;  %8379 = vmatmul.mubr.bf16.vlgmr.msra.gmra.mrb[0].mxu1 %v15102_v50  ;;  %v12363_v36 = vld [vmem:[#allocation8 + $0x334] ss:$12 sps:$4 sm:$0xff]   ;;  %v12361_v50 = vld [vmem:[#allocation8 + $0x330] ss:$12 sps:$4 sm:$0xff]  }
 0x41d   :  { %v4655_v9 = vmax.f32 %v10841_v40, 0.0  ;;  %v4657_v34 = vmax.f32 %v10905_v54, 0.0  ;;  %7262 = vmatprep.mubr.bf16.mxu0 %v15103_v63  ;;  %8386 = vmatprep.mubr.bf16.mxu1 %v15103_v63  ;;  %v12375_v63 = vld [vmem:[#allocation8 + $0x410] ss:$12 sps:$4 sm:$0xff]  }
 0x41e   :  { %v13764_v44 = vpack.c.bf16 %v4654_v45, %v4642_v38  ;;  %10115 = vmatpush3.bf16.msra.mxu1 %v12352_v28  ;;  %7414 = vmatpush1.bf16.msra.mxu0 %v12353_v4  ;;  %v13766_v2 = vpack.c.bf16 %v4656_v48, %v4644_v35 }
 0x41f   :  { %v13768_v49 = vpack.c.bf16 %v4655_v9, %v4643_v53  ;;  %v4029_v16 = vpop.f32.mrb[152].mxu0  ;;  %v4415_v27 = vpop.f32.mrb[152].mxu1  ;;  %7415 = vmatprep.subr.bf16.mxu0 %v12358_v1  ;;  %10116 = vmatprep.subr.bf16.mxu1 %v12359_v58  ;;  %v13770_v55 = vpack.c.bf16 %v4657_v34, %v4645_v59  ;;  %v12368_v53 = vld [vmem:[#allocation8 + $0x338] ss:$12 sps:$4 sm:$0xff]  }
 0x420   :  { %15104 = vst [vmem:[#allocation18_spill] sm:$0xff] %v13764_v44  ;;  %15105 = vst [vmem:[#allocation21_spill] sm:$0xff] %v13766_v2  ;;  %v10842_v52 = vadd.f32 %v4029_v16, %v13638_v5  ;;  %v10906_v33 = vadd.f32 %v4415_v27, %v13641_v8  ;;  %v4031_v28 = vpop.f32.mrb[153].mxu0  ;;  %v4417_v4 = vpop.f32.mrb[153].mxu1  ;;  %v12366_v34 = vld [vmem:[#allocation8 + $0x34c] ss:$12 sps:$4 sm:$0xff]  }
 0x421   :  { %15106 = vst [vmem:[#allocation114_spill] sm:$0xff] %v13770_v55  ;;  %v10843_v40 = vadd.f32 %v4031_v28, %v13646_v62  ;;  %v10907_v54 = vadd.f32 %v4417_v4, %v13650_v7  ;;  %v4033_v38 = vpop.f32.mrb[154].mxu0  ;;  %v4419_v35 = vpop.f32.mrb[154].mxu1  ;;  %v15114_v55 = vld [vmem:[#allocation25_spill] sm:$0xff] }
 0x422   :  { %v10844_v45 = vadd.f32 %v4033_v38, %v13638_v5  ;;  %v10908_v1 = vadd.f32 %v4419_v35, %v13641_v8  ;;  %v4035_v58 = vpop.f32.mrb[155].mxu0  ;;  %v4421_v48 = vpop.f32.mrb[155].mxu1  ;;  %7416 = vmatpush1.bf16.msra.mxu0 %v12356_v30  ;;  %10117 = vmatpush3.bf16.msra.mxu1 %v12360_v6  ;;  %v4666_v16 = vmax.f32 %v10842_v52, 0.0  ;;  %v4668_v27 = vmax.f32 %v10906_v33, 0.0  ;;  %v15107_v38 = vld [vmem:[#allocation20_spill] sm:$0xff]  ;;  %v15204_v44 = vld [vmem:[#allocation57_spill] sm:$0xff] }
 0x423   :  { %v10845_v59 = vadd.f32 %v4035_v58, %v13646_v62  ;;  %v10909_v9 = vadd.f32 %v4421_v48, %v13650_v7  ;;  %7417 = vmatprep.subr.bf16.mxu0 %v12363_v36  ;;  %10118 = vmatprep.subr.bf16.mxu1 %v12367_v21  ;;  %v4667_v30 = vmax.f32 %v10843_v40, 0.0  ;;  %v4669_v6 = vmax.f32 %v10907_v54, 0.0  ;;  %v12364_v21 = vld [vmem:[#allocation8 + $0x348] ss:$12 sps:$4 sm:$0xff]   ;;  %v12376_v52 = vld [vmem:[#allocation8 + $0x350] ss:$12 sps:$4 sm:$0xff]  }
 0x424   :  { %v4678_v28 = vmax.f32 %v10844_v45, 0.0  ;;  %v4680_v4 = vmax.f32 %v10908_v1, 0.0  ;;  %7263 = vmatmul.mubr.bf16.gmra.mrb[196].mxu0 %v15107_v38  ;;  %8387 = vmatmul.mubr.bf16.gmra.mrb[4].mxu1 %v15107_v38  ;;  %v12371_v40 = vld [vmem:[#allocation8 + $0x364] ss:$12 sps:$4 sm:$0xff]   ;;  %v12383_v54 = vld [vmem:[#allocation8 + $0x428] ss:$12 sps:$4 sm:$0xff]  }
 0x425   :  { %v4679_v35 = vmax.f32 %v10845_v59, 0.0  ;;  %v4681_v15 = vmax.f32 %v10909_v9, 0.0  ;;  %7272 = vmatprep.mubr.bf16.mxu0 %v15108_v12  ;;  %8394 = vmatprep.mubr.bf16.mxu1 %v15108_v12 }
 0x426   :  { %v13784_v36 = vpack.c.bf16 %v4678_v28, %v4666_v16  ;;  %7418 = vmatpush1.bf16.msra.mxu0 %v12361_v50  ;;  %10119 = vmatpush3.bf16.msra.mxu1 %v12368_v53  ;;  %v13786_v33 = vpack.c.bf16 %v4680_v4, %v4668_v27 }
 0x427   :  { %v13788_v45 = vpack.c.bf16 %v4679_v35, %v4667_v30  ;;  %v4039_v1 = vpop.f32.mrb[156].mxu0  ;;  %v4425_v58 = vpop.f32.mrb[156].mxu1  ;;  %7419 = vmatprep.subr.bf16.mxu0 %v12366_v34  ;;  %10120 = vmatprep.subr.bf16.mxu1 %v12375_v63  ;;  %v13790_v48 = vpack.c.bf16 %v4681_v15, %v4669_v6  ;;  %v12369_v15 = vld [vmem:[#allocation8 + $0x360] ss:$12 sps:$4 sm:$0xff]   ;;  %v12384_v30 = vld [vmem:[#allocation8 + $0x368] ss:$12 sps:$4 sm:$0xff]  }
 0x428   :  { %15109 = vst [vmem:[#allocation20_spill] sm:$0xff] %v13784_v36  ;;  %15110 = vst [vmem:[#allocation23_spill] sm:$0xff] %v13786_v33  ;;  %v10846_v12 = vadd.f32 %v4039_v1, %v13638_v5  ;;  %v10910_v59 = vadd.f32 %v4425_v58, %v13641_v8  ;;  %v4041_v50 = vpop.f32.mrb[157].mxu0  ;;  %v4427_v9 = vpop.f32.mrb[157].mxu1  ;;  %v12374_v1 = vld [vmem:[#allocation8 + $0x37c] ss:$12 sps:$4 sm:$0xff]  }
 0x429   :  { %15111 = vst [vmem:[#allocation115_spill] sm:$0xff] %v13788_v45  ;;  %15112 = vst [vmem:[#allocation116_spill] sm:$0xff] %v13790_v48  ;;  %v10847_v53 = vadd.f32 %v4041_v50, %v13646_v62  ;;  %v10911_v16 = vadd.f32 %v4427_v9, %v13650_v7  ;;  %v4043_v27 = vpop.f32.mrb[158].mxu0  ;;  %v4429_v28 = vpop.f32.mrb[158].mxu1  ;;  %v12391_v58 = vld [vmem:[#allocation8 + $0x440] ss:$12 sps:$4 sm:$0xff]  }
 0x42a   :  { %v10848_v4 = vadd.f32 %v4043_v27, %v13638_v5  ;;  %v10912_v34 = vadd.f32 %v4429_v28, %v13641_v8  ;;  %v4045_v63 = vpop.f32.mrb[159].mxu0  ;;  %v4431_v38 = vpop.f32.mrb[159].mxu1  ;;  %7420 = vmatpush1.bf16.msra.mxu0 %v12364_v21  ;;  %10121 = vmatpush3.bf16.msra.mxu1 %v12376_v52  ;;  %v4690_v50 = vmax.f32 %v10846_v12, 0.0  ;;  %v4692_v9 = vmax.f32 %v10910_v59, 0.0  ;;  %v15113_v48 = vld [vmem:[#allocation22_spill] sm:$0xff] }
 0x42b   :  { %v10849_v6 = vadd.f32 %v4045_v63, %v13646_v62  ;;  %v10913_v35 = vadd.f32 %v4431_v38, %v13650_v7  ;;  %7421 = vmatprep.subr.bf16.mxu0 %v12371_v40  ;;  %10122 = vmatprep.subr.bf16.mxu1 %v12383_v54  ;;  %v4691_v21 = vmax.f32 %v10847_v53, 0.0  ;;  %v4693_v28 = vmax.f32 %v10911_v16, 0.0  ;;  %v12372_v54 = vld [vmem:[#allocation8 + $0x378] ss:$12 sps:$4 sm:$0xff]   ;;  %v12392_v12 = vld [vmem:[#allocation8 + $0x380] ss:$12 sps:$4 sm:$0xff]  }
 0x42c   :  { %v4702_v33 = vmax.f32 %v10848_v4, 0.0  ;;  %v4704_v27 = vmax.f32 %v10912_v34, 0.0  ;;  %7273 = vmatmul.mubr.bf16.gmra.mrb[200].mxu0 %v15113_v48  ;;  %8395 = vmatmul.mubr.bf16.gmra.mrb[8].mxu1 %v15113_v48  ;;  %v12379_v53 = vld [vmem:[#allocation8 + $0x394] ss:$12 sps:$4 sm:$0xff]   ;;  %v12399_v16 = vld [vmem:[#allocation8 + $0x458] ss:$12 sps:$4 sm:$0xff]  }
 0x42d   :  { %v4703_v52 = vmax.f32 %v10849_v6, 0.0  ;;  %v4705_v2 = vmax.f32 %v10913_v35, 0.0  ;;  %7282 = vmatprep.mubr.bf16.mxu0 %v15114_v55  ;;  %8402 = vmatprep.mubr.bf16.mxu1 %v15114_v55 }
 0x42e   :  { %v13804_v40 = vpack.c.bf16 %v4702_v33, %v4690_v50  ;;  %7422 = vmatpush1.bf16.msra.mxu0 %v12369_v15  ;;  %10123 = vmatpush3.bf16.msra.mxu1 %v12384_v30  ;;  %v13806_v59 = vpack.c.bf16 %v4704_v27, %v4692_v9 }
 0x42f   :  { %v13808_v4 = vpack.c.bf16 %v4703_v52, %v4691_v21  ;;  %v4049_v34 = vpop.f32.mrb[160].mxu0  ;;  %v4435_v48 = vpop.f32.mrb[160].mxu1  ;;  %7423 = vmatprep.subr.bf16.mxu0 %v12374_v1  ;;  %10124 = vmatprep.subr.bf16.mxu1 %v12391_v58  ;;  %v13810_v63 = vpack.c.bf16 %v4705_v2, %v4693_v28  ;;  %v12377_v2 = vld [vmem:[#allocation8 + $0x390] ss:$12 sps:$4 sm:$0xff]   ;;  %v12400_v21 = vld [vmem:[#allocation8 + $0x398] ss:$12 sps:$4 sm:$0xff]  }
 0x430   :  { %15115 = vst [vmem:[#allocation22_spill] sm:$0xff] %v13804_v40  ;;  %15116 = vst [vmem:[#allocation25_spill] sm:$0xff] %v13806_v59  ;;  %v10850_v55 = vadd.f32 %v4049_v34, %v13638_v5  ;;  %v10914_v33 = vadd.f32 %v4435_v48, %v13641_v8  ;;  %v4051_v38 = vpop.f32.mrb[161].mxu0  ;;  %v4437_v15 = vpop.f32.mrb[161].mxu1  ;;  %v12382_v34 = vld [vmem:[#allocation8 + $0x3ac] ss:$12 sps:$4 sm:$0xff]  }
 0x431   :  { %15117 = vst [vmem:[#allocation117_spill] sm:$0xff] %v13808_v4  ;;  %15118 = vst [vmem:[#allocation118_spill] sm:$0xff] %v13810_v63  ;;  %v10851_v30 = vadd.f32 %v4051_v38, %v13646_v62  ;;  %v10915_v6 = vadd.f32 %v4437_v15, %v13650_v7  ;;  %v4053_v35 = vpop.f32.mrb[162].mxu0  ;;  %v4439_v50 = vpop.f32.mrb[162].mxu1  ;;  %v12407_v48 = vld [vmem:[#allocation8 + $0x470] ss:$12 sps:$4 sm:$0xff]  }
 0x432   :  { %v10852_v9 = vadd.f32 %v4053_v35, %v13638_v5  ;;  %v10916_v1 = vadd.f32 %v4439_v50, %v13641_v8  ;;  %v4055_v58 = vpop.f32.mrb[163].mxu0  ;;  %v4441_v27 = vpop.f32.mrb[163].mxu1  ;;  %7424 = vmatpush1.bf16.msra.mxu0 %v12372_v54  ;;  %10125 = vmatpush3.bf16.msra.mxu1 %v12392_v12  ;;  %v4714_v38 = vmax.f32 %v10850_v55, 0.0  ;;  %v4716_v15 = vmax.f32 %v10914_v33, 0.0  ;;  %v15119_v63 = vld [vmem:[#allocation24_spill] sm:$0xff]  ;;  %v15195_v4 = vld [vmem:[#allocation90_spill] sm:$0xff] }
 0x433   :  { %v10853_v28 = vadd.f32 %v4055_v58, %v13646_v62  ;;  %v10917_v52 = vadd.f32 %v4441_v27, %v13650_v7  ;;  %7425 = vmatprep.subr.bf16.mxu0 %v12379_v53  ;;  %10126 = vmatprep.subr.bf16.mxu1 %v12399_v16  ;;  %v4715_v54 = vmax.f32 %v10851_v30, 0.0  ;;  %v4717_v50 = vmax.f32 %v10915_v6, 0.0  ;;  %v12380_v16 = vld [vmem:[#allocation8 + $0x3a8] ss:$12 sps:$4 sm:$0xff]   ;;  %v12408_v55 = vld [vmem:[#allocation8 + $0x3b0] ss:$12 sps:$4 sm:$0xff]  }
 0x434   :  { %v4726_v59 = vmax.f32 %v10852_v9, 0.0  ;;  %v4728_v35 = vmax.f32 %v10916_v1, 0.0  ;;  %7283 = vmatmul.mubr.bf16.gmra.mrb[204].mxu0 %v15119_v63  ;;  %8403 = vmatmul.mubr.bf16.gmra.mrb[12].mxu1 %v15119_v63  ;;  %v12387_v30 = vld [vmem:[#allocation8 + $0x3c4] ss:$12 sps:$4 sm:$0xff]   ;;  %v12415_v6 = vld [vmem:[#allocation8 + $0x548] ss:$12 sps:$4 sm:$0xff]  }
 0x435   :  { %v4727_v12 = vmax.f32 %v10853_v28, 0.0  ;;  %v4729_v26 = vmax.f32 %v10917_v52, 0.0  ;;  %7292 = vmatprep.mubr.bf16.mxu0 %v15120_v32  ;;  %8410 = vmatprep.mubr.bf16.mxu1 %v15120_v32  ;;  %v5474_v40 = vld [vmem:[#allocation10] sm:$0x7] }
 0x436   :  { %v13824_v53 = vpack.c.bf16 %v4726_v59, %v4714_v38  ;;  %7426 = vmatpush1.bf16.msra.mxu0 %v12377_v2  ;;  %10127 = vmatpush3.bf16.msra.mxu1 %v12400_v21  ;;  %v13826_v33 = vpack.c.bf16 %v4728_v35, %v4716_v15 }
 0x437   :  { %v13828_v9 = vpack.c.bf16 %v4727_v12, %v4715_v54  ;;  %v4059_v1 = vpop.f32.mrb[164].mxu0  ;;  %v4445_v63 = vpop.f32.mrb[164].mxu1  ;;  %7427 = vmatprep.subr.bf16.mxu0 %v12382_v34  ;;  %10128 = vmatprep.subr.bf16.mxu1 %v12407_v48  ;;  %v13830_v58 = vpack.c.bf16 %v4729_v26, %v4717_v50  ;;  %v12385_v26 = vld [vmem:[#allocation8 + $0x3c0] ss:$12 sps:$4 sm:$0xff]   ;;  %v12390_v12 = vld [vmem:[#allocation8 + $0x3dc] ss:$12 sps:$4 sm:$0xff]  }
 0x438   :  { %15121 = vst [vmem:[#allocation24_spill] sm:$0xff] %v13824_v53  ;;  %15122 = vst [vmem:[#allocation27_spill] sm:$0xff] %v13826_v33  ;;  %v10854_v32 = vadd.f32 %v4059_v1, %v13638_v5  ;;  %v10918_v59 = vadd.f32 %v4445_v63, %v13641_v8  ;;  %v4061_v27 = vpop.f32.mrb[165].mxu0  ;;  %v4447_v2 = vpop.f32.mrb[165].mxu1  ;;  %v15125_v33 = vld [vmem:[#allocation26_spill] sm:$0xff] }
 0x439   :  { %15123 = vst [vmem:[#allocation119_spill] sm:$0xff] %v13828_v9  ;;  %15124 = vst [vmem:[#allocation120_spill] sm:$0xff] %v13830_v58  ;;  %v10855_v21 = vadd.f32 %v4061_v27, %v13646_v62  ;;  %v10919_v28 = vadd.f32 %v4447_v2, %v13650_v7  ;;  %v4063_v52 = vpop.f32.mrb[166].mxu0  ;;  %v4449_v38 = vpop.f32.mrb[166].mxu1  ;;  %v15191_v9 = vld [vmem:[#allocation80_spill] sm:$0xff] }
 0x43a   :  { %v10856_v15 = vadd.f32 %v4063_v52, %v13638_v5  ;;  %v10920_v34 = vadd.f32 %v4449_v38, %v13641_v8  ;;  %v4065_v48 = vpop.f32.mrb[167].mxu0  ;;  %v4451_v35 = vpop.f32.mrb[167].mxu1  ;;  %7428 = vmatpush1.bf16.msra.mxu0 %v12380_v16  ;;  %10129 = vmatpush3.bf16.msra.mxu1 %v12408_v55  ;;  %v4738_v1 = vmax.f32 %v10854_v32, 0.0  ;;  %v4740_v63 = vmax.f32 %v10918_v59, 0.0  ;;  %v15126_v55 = vld [vmem:[#allocation29_spill] sm:$0xff] }
 0x43b   :  { %v10857_v54 = vadd.f32 %v4065_v48, %v13646_v62  ;;  %v10921_v50 = vadd.f32 %v4451_v35, %v13650_v7  ;;  %7429 = vmatprep.subr.bf16.mxu0 %v12387_v30  ;;  %10226 = vmatprep.subr.bf16.mxu1 %v12415_v6  ;;  %v4739_v52 = vmax.f32 %v10855_v21, 0.0  ;;  %v4741_v38 = vmax.f32 %v10919_v28, 0.0  ;;  %v12388_v30 = vld [vmem:[#allocation8 + $0x3d8] ss:$12 sps:$4 sm:$0xff]  }
 0x43c   :  { %v4750_v27 = vmax.f32 %v10856_v15, 0.0  ;;  %v4752_v2 = vmax.f32 %v10920_v34, 0.0  ;;  %7293 = vmatmul.mubr.bf16.gmra.mrb[208].mxu0 %v15125_v33  ;;  %8411 = vmatmul.mubr.bf16.gmra.mrb[16].mxu1 %v15125_v33  ;;  %v12395_v33 = vld [vmem:[#allocation8 + $0x3f4] ss:$12 sps:$4 sm:$0xff]  }
 0x43d   :  { %v4751_v16 = vmax.f32 %v10857_v54, 0.0  ;;  %v4753_v58 = vmax.f32 %v10921_v50, 0.0  ;;  %7302 = vmatprep.mubr.bf16.mxu0 %v15126_v55  ;;  %8418 = vmatprep.mubr.bf16.mxu1 %v15126_v55  ;;  %v12398_v55 = vld [vmem:[#allocation8 + $0x40c] ss:$12 sps:$4 sm:$0xff]  }
 0x43e   :  { %v13844_v48 = vpack.c.bf16 %v4750_v27, %v4738_v1  ;;  %7430 = vmatpush1.bf16.msra.mxu0 %v12385_v26  ;;  %v13846_v6 = vpack.c.bf16 %v4752_v2, %v4740_v63 }
 0x43f   :  { %v13848_v32 = vpack.c.bf16 %v4751_v16, %v4739_v52  ;;  %v4069_v59 = vpop.f32.mrb[168].mxu0  ;;  %v4455_v15 = vpop.f32.mrb[168].mxu1  ;;  %7431 = vmatprep.subr.bf16.mxu0 %v12390_v12  ;;  %v13850_v21 = vpack.c.bf16 %v4753_v58, %v4741_v38  ;;  %v12393_v58 = vld [vmem:[#allocation8 + $0x3f0] ss:$12 sps:$4 sm:$0xff]  }
 0x440   :  { %15127 = vst [vmem:[#allocation26_spill] sm:$0xff] %v13844_v48  ;;  %15128 = vst [vmem:[#allocation29_spill] sm:$0xff] %v13846_v6  ;;  %v10858_v28 = vadd.f32 %v4069_v59, %v13638_v5  ;;  %v10922_v34 = vadd.f32 %v4455_v15, %v13641_v8  ;;  %v4071_v35 = vpop.f32.mrb[169].mxu0  ;;  %v4457_v54 = vpop.f32.mrb[169].mxu1  ;;  %v15131_v6 = vld [vmem:[#allocation28_spill] sm:$0xff] }
 0x441   :  { %15129 = vst [vmem:[#allocation121_spill] sm:$0xff] %v13848_v32  ;;  %15130 = vst [vmem:[#allocation122_spill] sm:$0xff] %v13850_v21  ;;  %v10859_v50 = vadd.f32 %v4071_v35, %v13646_v62  ;;  %v10923_v26 = vadd.f32 %v4457_v54, %v13650_v7  ;;  %v4073_v1 = vpop.f32.mrb[170].mxu0  ;;  %v4459_v63 = vpop.f32.mrb[170].mxu1  ;;  %v15189_v32 = vld [vmem:[#allocation76_spill] sm:$0xff] }
 0x442   :  { %v10860_v27 = vadd.f32 %v4073_v1, %v13638_v5  ;;  %v10924_v2 = vadd.f32 %v4459_v63, %v13641_v8  ;;  %v4075_v12 = vpop.f32.mrb[171].mxu0  ;;  %v4461_v52 = vpop.f32.mrb[171].mxu1  ;;  %7432 = vmatpush1.bf16.msra.mxu0 %v12388_v30  ;;  %v4762_v59 = vmax.f32 %v10858_v28, 0.0  ;;  %v4764_v15 = vmax.f32 %v10922_v34, 0.0  ;;  %v15132_v30 = vld [vmem:[#allocation31_spill] sm:$0xff] }
 0x443   :  { %v10861_v38 = vadd.f32 %v4075_v12, %v13646_v62  ;;  %v10925_v16 = vadd.f32 %v4461_v52, %v13650_v7  ;;  %7433 = vmatprep.subr.bf16.mxu0 %v12395_v33  ;;  %v4763_v1 = vmax.f32 %v10859_v50, 0.0  ;;  %v4765_v63 = vmax.f32 %v10923_v26, 0.0  ;;  %v12396_v33 = vld [vmem:[#allocation8 + $0x408] ss:$12 sps:$4 sm:$0xff]  }
 0x444   :  { %v4774_v35 = vmax.f32 %v10860_v27, 0.0  ;;  %v4776_v54 = vmax.f32 %v10924_v2, 0.0  ;;  %7303 = vmatmul.mubr.bf16.gmra.mrb[212].mxu0 %v15131_v6  ;;  %8419 = vmatmul.mubr.bf16.gmra.mrb[20].mxu1 %v15131_v6  ;;  %v12403_v6 = vld [vmem:[#allocation8 + $0x424] ss:$12 sps:$4 sm:$0xff]  }
 0x445   :  { %v4775_v21 = vmax.f32 %v10861_v38, 0.0  ;;  %v4777_v46 = vmax.f32 %v10925_v16, 0.0  ;;  %7312 = vmatprep.mubr.bf16.mxu0 %v15132_v30  ;;  %8426 = vmatprep.mubr.bf16.mxu1 %v15132_v30 }
 0x446   :  { %v13864_v12 = vpack.c.bf16 %v4774_v35, %v4762_v59  ;;  %7434 = vmatpush1.bf16.msra.mxu0 %v12393_v58  ;;  %v13866_v28 = vpack.c.bf16 %v4776_v54, %v4764_v15 }
 0x447   :  { %v13868_v34 = vpack.c.bf16 %v4775_v21, %v4763_v1  ;;  %v4079_v27 = vpop.f32.mrb[172].mxu0  ;;  %v4465_v2 = vpop.f32.mrb[172].mxu1  ;;  %7435 = vmatprep.subr.bf16.mxu0 %v12398_v55  ;;  %v13870_v50 = vpack.c.bf16 %v4777_v46, %v4765_v63  ;;  %v12401_v46 = vld [vmem:[#allocation8 + $0x420] ss:$12 sps:$4 sm:$0xff]  }
 0x448   :  { %15133 = vst [vmem:[#allocation28_spill] sm:$0xff] %v13864_v12  ;;  %15134 = vst [vmem:[#allocation31_spill] sm:$0xff] %v13866_v28  ;;  %v10862_v26 = vadd.f32 %v4079_v27, %v13638_v5  ;;  %v10926_v52 = vadd.f32 %v4465_v2, %v13641_v8  ;;  %v4081_v38 = vpop.f32.mrb[173].mxu0  ;;  %v4467_v16 = vpop.f32.mrb[173].mxu1  ;;  %v12406_v27 = vld [vmem:[#allocation8 + $0x43c] ss:$12 sps:$4 sm:$0xff]  }
 0x449   :  { %15135 = vst [vmem:[#allocation123_spill] sm:$0xff] %v13868_v34  ;;  %15136 = vst [vmem:[#allocation124_spill] sm:$0xff] %v13870_v50  ;;  %v10863_v59 = vadd.f32 %v4081_v38, %v13646_v62  ;;  %v10927_v58 = vadd.f32 %v4467_v16, %v13650_v7  ;;  %v4083_v15 = vpop.f32.mrb[174].mxu0  ;;  %v4469_v35 = vpop.f32.mrb[174].mxu1  ;;  %v15137_v50 = vld [vmem:[#allocation30_spill] sm:$0xff] }
 0x44a   :  { %v10864_v21 = vadd.f32 %v4083_v15, %v13638_v5  ;;  %v10928_v54 = vadd.f32 %v4469_v35, %v13641_v8  ;;  %v4085_v55 = vpop.f32.mrb[175].mxu0  ;;  %v4471_v1 = vpop.f32.mrb[175].mxu1  ;;  %7436 = vmatpush1.bf16.msra.mxu0 %v12396_v33  ;;  %v4786_v2 = vmax.f32 %v10862_v26, 0.0  ;;  %v4788_v38 = vmax.f32 %v10926_v52, 0.0  ;;  %v15138_v33 = vld [vmem:[#allocation33_spill] sm:$0xff] }
 0x44b   :  { %v10865_v63 = vadd.f32 %v4085_v55, %v13646_v62  ;;  %v10929_v30 = vadd.f32 %v4471_v1, %v13650_v7  ;;  %7437 = vmatprep.subr.bf16.mxu0 %v12403_v6  ;;  %v4787_v15 = vmax.f32 %v10863_v59, 0.0  ;;  %v4789_v35 = vmax.f32 %v10927_v58, 0.0  ;;  %v12404_v6 = vld [vmem:[#allocation8 + $0x438] ss:$12 sps:$4 sm:$0xff]  }
 0x44c   :  { %v4798_v28 = vmax.f32 %v10864_v21, 0.0  ;;  %v4800_v16 = vmax.f32 %v10928_v54, 0.0  ;;  %7313 = vmatmul.mubr.bf16.gmra.mrb[216].mxu0 %v15137_v50  ;;  %8427 = vmatmul.mubr.bf16.gmra.mrb[24].mxu1 %v15137_v50  ;;  %v12411_v50 = vld [vmem:[#allocation8 + $0x454] ss:$12 sps:$4 sm:$0xff]  }
 0x44d   :  { %v4799_v11 = vmax.f32 %v10865_v63, 0.0  ;;  %v4801_v47 = vmax.f32 %v10929_v30, 0.0  ;;  %7322 = vmatprep.mubr.bf16.mxu0 %v15138_v33  ;;  %8434 = vmatprep.mubr.bf16.mxu1 %v15138_v33 }
 0x44e   :  { %v13884_v55 = vpack.c.bf16 %v4798_v28, %v4786_v2  ;;  %7438 = vmatpush1.bf16.msra.mxu0 %v12401_v46  ;;  %v13886_v26 = vpack.c.bf16 %v4800_v16, %v4788_v38 }
 0x44f   :  { %v13888_v52 = vpack.c.bf16 %v4799_v11, %v4787_v15  ;;  %v4089_v21 = vpop.f32.mrb[176].mxu0  ;;  %v4475_v54 = vpop.f32.mrb[176].mxu1  ;;  %7439 = vmatprep.subr.bf16.mxu0 %v12406_v27  ;;  %v13890_v59 = vpack.c.bf16 %v4801_v47, %v4789_v35  ;;  %v12409_v47 = vld [vmem:[#allocation8 + $0x450] ss:$12 sps:$4 sm:$0xff]  }
 0x450   :  { %15139 = vst [vmem:[#allocation30_spill] sm:$0xff] %v13884_v55  ;;  %15140 = vst [vmem:[#allocation33_spill] sm:$0xff] %v13886_v26  ;;  %v10866_v58 = vadd.f32 %v4089_v21, %v13638_v5  ;;  %v10930_v1 = vadd.f32 %v4475_v54, %v13641_v8  ;;  %v4091_v63 = vpop.f32.mrb[177].mxu0  ;;  %v4477_v30 = vpop.f32.mrb[177].mxu1  ;;  %v12414_v21 = vld [vmem:[#allocation8 + $0x46c] ss:$12 sps:$4 sm:$0xff]  }
 0x451   :  { %15141 = vst [vmem:[#allocation125_spill] sm:$0xff] %v13888_v52  ;;  %15142 = vst [vmem:[#allocation126_spill] sm:$0xff] %v13890_v59  ;;  %v10867_v28 = vadd.f32 %v4091_v63, %v13646_v62  ;;  %v10931_v46 = vadd.f32 %v4477_v30, %v13650_v7  ;;  %v4093_v2 = vpop.f32.mrb[178].mxu0  ;;  %v4479_v38 = vpop.f32.mrb[178].mxu1  ;;  %v15143_v59 = vld [vmem:[#allocation32_spill] sm:$0xff] }
 0x452   :  { %v10868_v11 = vadd.f32 %v4093_v2, %v13638_v5  ;;  %v10932_v16 = vadd.f32 %v4479_v38, %v13641_v8  ;;  %v4095_v27 = vpop.f32.mrb[179].mxu0  ;;  %v4481_v15 = vpop.f32.mrb[179].mxu1  ;;  %7440 = vmatpush1.bf16.msra.mxu0 %v12404_v6  ;;  %v4810_v54 = vmax.f32 %v10866_v58, 0.0  ;;  %v4812_v63 = vmax.f32 %v10930_v1, 0.0  ;;  %v15144_v6 = vld [vmem:[#allocation35_spill] sm:$0xff] }
 0x453   :  { %v10869_v35 = vadd.f32 %v4095_v27, %v13646_v62  ;;  %v10933_v33 = vadd.f32 %v4481_v15, %v13650_v7  ;;  %7441 = vmatprep.subr.bf16.mxu0 %v12411_v50  ;;  %v4811_v2 = vmax.f32 %v10867_v28, 0.0  ;;  %v4813_v38 = vmax.f32 %v10931_v46, 0.0  ;;  %v12412_v50 = vld [vmem:[#allocation8 + $0x468] ss:$12 sps:$4 sm:$0xff]   ;;  %v12464_v52 = vld [vmem:[#allocation8 + $0x518] ss:$12 sps:$4 sm:$0xff]  }
 0x454   :  { %v4822_v26 = vmax.f32 %v10868_v11, 0.0  ;;  %v4824_v30 = vmax.f32 %v10932_v16, 0.0  ;;  %7323 = vmatmul.mubr.bf16.gmra.mrb[220].mxu0 %v15143_v59  ;;  %8435 = vmatmul.mubr.bf16.gmra.mrb[28].mxu1 %v15143_v59  ;;  %v12419_v59 = vld [vmem:[#allocation8 + $0x484] ss:$12 sps:$4 sm:$0xff]  }
 0x455   :  { %v4823_v20 = vmax.f32 %v10869_v35, 0.0  ;;  %v4825_v61 = vmax.f32 %v10933_v33, 0.0  ;;  %7332 = vmatprep.mubr.bf16.mxu0 %v15144_v6  ;;  %8442 = vmatprep.mubr.bf16.mxu1 %v15144_v6 }
 0x456   :  { %v13904_v27 = vpack.c.bf16 %v4822_v26, %v4810_v54  ;;  %7442 = vmatpush1.bf16.msra.mxu0 %v12409_v47  ;;  %v13906_v58 = vpack.c.bf16 %v4824_v30, %v4812_v63 }
 0x457   :  { %v13908_v1 = vpack.c.bf16 %v4823_v20, %v4811_v2  ;;  %v4099_v11 = vpop.f32.mrb[180].mxu0  ;;  %v4485_v16 = vpop.f32.mrb[180].mxu1  ;;  %7443 = vmatprep.subr.bf16.mxu0 %v12414_v21  ;;  %v13910_v28 = vpack.c.bf16 %v4825_v61, %v4813_v38 }
 0x458   :  { %15145 = vst [vmem:[#allocation32_spill] sm:$0xff] %v13904_v27  ;;  %15146 = vst [vmem:[#allocation35_spill] sm:$0xff] %v13906_v58  ;;  %v10870_v46 = vadd.f32 %v4099_v11, %v13638_v5  ;;  %v10934_v15 = vadd.f32 %v4485_v16, %v13641_v8  ;;  %v4101_v35 = vpop.f32.mrb[181].mxu0  ;;  %v4487_v33 = vpop.f32.mrb[181].mxu1  ;;  %v15149_v58 = vld [vmem:[#allocation34_spill] sm:$0xff] }
 0x459   :  { %15147 = vst [vmem:[#allocation127_spill] sm:$0xff] %v13908_v1  ;;  %15148 = vst [vmem:[#allocation128_spill] sm:$0xff] %v13910_v28  ;;  %v10871_v26 = vadd.f32 %v4101_v35, %v13646_v62  ;;  %v10935_v47 = vadd.f32 %v4487_v33, %v13650_v7  ;;  %v4103_v54 = vpop.f32.mrb[182].mxu0  ;;  %v4489_v63 = vpop.f32.mrb[182].mxu1  ;;  %v12448_v1 = vld [vmem:[#allocation8 + $0x4e8] ss:$12 sps:$4 sm:$0xff]  }
 0x45a   :  { %v10872_v20 = vadd.f32 %v4103_v54, %v13638_v5  ;;  %v10936_v30 = vadd.f32 %v4489_v63, %v13641_v8  ;;  %v4105_v21 = vpop.f32.mrb[183].mxu0  ;;  %v4491_v2 = vpop.f32.mrb[183].mxu1  ;;  %7444 = vmatpush1.bf16.msra.mxu0 %v12412_v50  ;;  %v4834_v6 = vmax.f32 %v10870_v46, 0.0  ;;  %v4836_v11 = vmax.f32 %v10934_v15, 0.0 }
 0x45b   :  { %v10873_v61 = vadd.f32 %v4105_v21, %v13646_v62  ;;  %v10937_v38 = vadd.f32 %v4491_v2, %v13650_v7  ;;  %7606 = vmatprep.subr.bf16.mxu0 %v12419_v59  ;;  %v4835_v33 = vmax.f32 %v10871_v26, 0.0  ;;  %v4837_v54 = vmax.f32 %v10935_v47, 0.0 }
 0x45c   :  { %v4846_v16 = vmax.f32 %v10872_v20, 0.0  ;;  %v4848_v35 = vmax.f32 %v10936_v30, 0.0  ;;  %7333 = vmatmul.mubr.bf16.gmra.mrb[224].mxu0 %v15149_v58  ;;  %8443 = vmatmul.mubr.bf16.gmra.mrb[32].mxu1 %v15149_v58 }
 0x45d   :  { %v4847_v28 = vmax.f32 %v10873_v61, 0.0  ;;  %v4849_v63 = vmax.f32 %v10937_v38, 0.0  ;;  %7342 = vmatprep.mubr.bf16.mxu0 %v15150_v18  ;;  %8450 = vmatprep.mubr.bf16.mxu1 %v15150_v18 }
 0x45e   :  { %v13924_v50 = vpack.c.bf16 %v4846_v16, %v4834_v6  ;;  %v13926_v21 = vpack.c.bf16 %v4848_v35, %v4836_v11 }
 0x45f   :  { %v13928_v59 = vpack.c.bf16 %v4847_v28, %v4835_v33  ;;  %v4109_v46 = vpop.f32.mrb[184].mxu0  ;;  %v4495_v15 = vpop.f32.mrb[184].mxu1  ;;  %v13930_v20 = vpack.c.bf16 %v4849_v63, %v4837_v54 }
 0x460   :  { %15151 = vst [vmem:[#allocation34_spill] sm:$0xff] %v13924_v50  ;;  %15152 = vst [vmem:[#allocation37_spill] sm:$0xff] %v13926_v21  ;;  %v10874_v58 = vadd.f32 %v4109_v46, %v13638_v5  ;;  %v10938_v26 = vadd.f32 %v4495_v15, %v13641_v8  ;;  %v4111_v47 = vpop.f32.mrb[185].mxu0  ;;  %v4497_v30 = vpop.f32.mrb[185].mxu1  ;;  %v15155_v21 = vld [vmem:[#allocation36_spill] sm:$0xff] }
 0x461   :  { %15153 = vst [vmem:[#allocation129_spill] sm:$0xff] %v13928_v59  ;;  %15154 = vst [vmem:[#allocation130_spill] sm:$0xff] %v13930_v20  ;;  %v10875_v2 = vadd.f32 %v4111_v47, %v13646_v62  ;;  %v10939_v18 = vadd.f32 %v4497_v30, %v13650_v7  ;;  %v4113_v61 = vpop.f32.mrb[186].mxu0  ;;  %v4499_v38 = vpop.f32.mrb[186].mxu1  ;;  %v12432_v59 = vld [vmem:[#allocation8 + $0x4b8] ss:$12 sps:$4 sm:$0xff]  }
 0x462   :  { %v10876_v6 = vadd.f32 %v4113_v61, %v13638_v5  ;;  %v10940_v28 = vadd.f32 %v4499_v38, %v13641_v8  ;;  %v4115_v11 = vpop.f32.mrb[187].mxu0  ;;  %v4501_v16 = vpop.f32.mrb[187].mxu1  ;;  %v4858_v54 = vmax.f32 %v10874_v58, 0.0  ;;  %v4860_v63 = vmax.f32 %v10938_v26, 0.0 }
 0x463   :  { %v10877_v35 = vadd.f32 %v4115_v11, %v13646_v62  ;;  %v10941_v33 = vadd.f32 %v4501_v16, %v13650_v7  ;;  %v4859_v47 = vmax.f32 %v10875_v2, 0.0  ;;  %v4861_v30 = vmax.f32 %v10939_v18, 0.0 }
 0x464   :  { %v4870_v46 = vmax.f32 %v10876_v6, 0.0  ;;  %v4872_v15 = vmax.f32 %v10940_v28, 0.0  ;;  %7343 = vmatmul.mubr.bf16.gmra.mrb[228].mxu0 %v15155_v21  ;;  %8451 = vmatmul.mubr.bf16.gmra.mrb[36].mxu1 %v15155_v21 }
 0x465   :  { %v4871_v20 = vmax.f32 %v10877_v35, 0.0  ;;  %v4873_v61 = vmax.f32 %v10941_v33, 0.0  ;;  %7352 = vmatprep.mubr.bf16.mxu0 %v15156_v39  ;;  %8458 = vmatprep.mubr.bf16.mxu1 %v15156_v39 }
 0x466   :  { %v13944_v38 = vpack.c.bf16 %v4870_v46, %v4858_v54  ;;  %v13946_v11 = vpack.c.bf16 %v4872_v15, %v4860_v63 }
 0x467   :  { %v13948_v58 = vpack.c.bf16 %v4871_v20, %v4859_v47  ;;  %v4119_v26 = vpop.f32.mrb[188].mxu0  ;;  %v4505_v6 = vpop.f32.mrb[188].mxu1  ;;  %v13950_v28 = vpack.c.bf16 %v4873_v61, %v4861_v30 }
 0x468   :  { %15157 = vst [vmem:[#allocation36_spill] sm:$0xff] %v13944_v38  ;;  %15158 = vst [vmem:[#allocation39_spill] sm:$0xff] %v13946_v11  ;;  %v10878_v21 = vadd.f32 %v4119_v26, %v13638_v5  ;;  %v10942_v2 = vadd.f32 %v4505_v6, %v13641_v8  ;;  %v4121_v18 = vpop.f32.mrb[189].mxu0  ;;  %v4507_v16 = vpop.f32.mrb[189].mxu1 }
 0x469   :  { %15159 = vst [vmem:[#allocation131_spill] sm:$0xff] %v13948_v58  ;;  %15160 = vst [vmem:[#allocation132_spill] sm:$0xff] %v13950_v28  ;;  %v10879_v35 = vadd.f32 %v4121_v18, %v13646_v62  ;;  %v10943_v39 = vadd.f32 %v4507_v16, %v13650_v7  ;;  %v4123_v33 = vpop.f32.mrb[190].mxu0  ;;  %v4509_v54 = vpop.f32.mrb[190].mxu1  ;;  %v15161_v28 = vld [vmem:[#allocation38_spill] sm:$0xff] }
 0x46a   :  { %v10880_v63 = vadd.f32 %v4123_v33, %v13638_v5  ;;  %v10944_v20 = vadd.f32 %v4509_v54, %v13641_v8  ;;  %v4125_v46 = vpop.f32.mrb[191].mxu0  ;;  %v4511_v15 = vpop.f32.mrb[191].mxu1  ;;  %v4882_v61 = vmax.f32 %v10878_v21, 0.0  ;;  %v4884_v26 = vmax.f32 %v10942_v2, 0.0  ;;  %v15162_v33 = vld [vmem:[#allocation41_spill] sm:$0xff] }
 0x46b   :  { %v10881_v47 = vadd.f32 %v4125_v46, %v13646_v62  ;;  %v10945_v30 = vadd.f32 %v4511_v15, %v13650_v7  ;;  %v4883_v18 = vmax.f32 %v10879_v35, 0.0  ;;  %v4885_v16 = vmax.f32 %v10943_v39, 0.0  ;;  %v15168_v46 = vld [vmem:[#allocation43_spill] sm:$0xff] }
 0x46c   :  { %v4894_v6 = vmax.f32 %v10880_v63, 0.0  ;;  %v4896_v11 = vmax.f32 %v10944_v20, 0.0  ;;  %7353 = vmatmul.mubr.bf16.gmra.mrb[232].mxu0 %v15161_v28  ;;  %8459 = vmatmul.mubr.bf16.gmra.mrb[40].mxu1 %v15161_v28  ;;  %v15167_v20 = vld [vmem:[#allocation40_spill] sm:$0xff] }
 0x46d   :  { %v4895_v22 = vmax.f32 %v10881_v47, 0.0  ;;  %v4897_v5 = vmax.f32 %v10945_v30, 0.0  ;;  %7362 = vmatprep.mubr.bf16.mxu0 %v15162_v33  ;;  %8466 = vmatprep.mubr.bf16.mxu1 %v15162_v33 }
 0x46e   :  { %v13964_v8 = vpack.c.bf16 %v4894_v6, %v4882_v61  ;;  %v13966_v62 = vpack.c.bf16 %v4896_v11, %v4884_v26  ;;  %v15169_v26 = vld [vmem:[#allocation42_spill] sm:$0xff]  ;;  %v15170_v6 = vld [vmem:[#allocation45_spill] sm:$0xff] }
 0x46f   :  { %v13968_v7 = vpack.c.bf16 %v4895_v22, %v4883_v18  ;;  %v9906_v21 = vpop.f32.mrb[192].mxu1  ;;  %v13970_v2 = vpack.c.bf16 %v4897_v5, %v4885_v16 }
 0x470   :  { %15163 = vst [vmem:[#allocation38_spill] sm:$0xff] %v13964_v8  ;;  %15164 = vst [vmem:[#allocation41_spill] sm:$0xff] %v13966_v62  ;;  %v9907_v54 = vpop.f32.mrb[193].mxu1  ;;  %v15177_v8 = vld [vmem:[#allocation52_spill] sm:$0xff] }
 0x471   :  { %15165 = vst [vmem:[#allocation133_spill] sm:$0xff] %v13968_v7  ;;  %15166 = vst [vmem:[#allocation134_spill] sm:$0xff] %v13970_v2  ;;  %v13972_v63 = vadd.f32 %v9907_v54, %v9906_v21  ;;  %v9909_v28 = vpop.f32.mrb[194].mxu1  ;;  %v12427_v7 = vld [vmem:[#allocation8 + $0x4b4] ss:$12 sps:$4 sm:$0xff]  }
 0x472   :  { %v9910_v35 = vpop.f32.mrb[195].mxu1 }
 0x473   :  { %v13974_v39 = vadd.f32 %v9910_v35, %v9909_v28  ;;  %v15171_v28 = vld [vmem:[#allocation44_spill] sm:$0xff]  ;;  %v15172_v35 = vld [vmem:[#allocation47_spill] sm:$0xff] }
 0x474   :  { %7363 = vmatmul.mubr.bf16.gmra.mrb[236].mxu0 %v15167_v20  ;;  %8467 = vmatmul.mubr.bf16.gmra.mrb[44].mxu1 %v15167_v20 }
 0x475   :  { %7372 = vmatprep.mubr.bf16.mxu0 %v15168_v46  ;;  %8474 = vmatprep.mubr.bf16.mxu1 %v15168_v46 }
 0x477   :  { %v9912_v22 = vpop.f32.mrb[196].mxu1 }
 0x478   :  { %v9913_v11 = vpop.f32.mrb[197].mxu1 }
 0x479   :  { %v13980_v15 = vadd.f32 %v9913_v11, %v9912_v22  ;;  %v9915_v47 = vpop.f32.mrb[198].mxu1 }
 0x47a   :  { %v9916_v30 = vpop.f32.mrb[199].mxu1 }
 0x47b   :  { %v13982_v61 = vadd.f32 %v9916_v30, %v9915_v47 }
 0x47c   :  { %7373 = vmatmul.mubr.bf16.gmra.mrb[240].mxu0 %v15169_v26  ;;  %8475 = vmatmul.mubr.bf16.gmra.mrb[48].mxu1 %v15169_v26  ;;  %v15173_v26 = vld [vmem:[#allocation46_spill] sm:$0xff] }
 0x47d   :  { %7382 = vmatprep.mubr.bf16.mxu0 %v15170_v6  ;;  %8482 = vmatprep.mubr.bf16.mxu1 %v15170_v6  ;;  %v15174_v6 = vld [vmem:[#allocation50_spill] sm:$0xff] }
 0x47f   :  { %v9918_v18 = vpop.f32.mrb[200].mxu1 }
 0x480   :  { %v9919_v16 = vpop.f32.mrb[201].mxu1 }
 0x481   :  { %v13988_v5 = vadd.f32 %v9919_v16, %v9918_v18  ;;  %v9921_v33 = vpop.f32.mrb[202].mxu1 }
 0x482   :  { %v9922_v21 = vpop.f32.mrb[203].mxu1 }
 0x483   :  { %v13990_v54 = vadd.f32 %v9922_v21, %v9921_v33 }
 0x484   :  { %7383 = vmatmul.mubr.bf16.gmra.mrb[244].mxu0 %v15171_v28  ;;  %8483 = vmatmul.mubr.bf16.gmra.mrb[52].mxu1 %v15171_v28 }
 0x485   :  { %7392 = vmatprep.mubr.bf16.mxu0 %v15172_v35  ;;  %8490 = vmatprep.mubr.bf16.mxu1 %v15172_v35 }
 0x487   :  { %v9924_v20 = vpop.f32.mrb[204].mxu1 }
 0x488   :  { %v9925_v46 = vpop.f32.mrb[205].mxu1 }
 0x489   :  { %v13996_v22 = vadd.f32 %v9925_v46, %v9924_v20  ;;  %v9927_v11 = vpop.f32.mrb[206].mxu1  ;;  %v15175_v20 = vld [vmem:[#allocation51_spill] sm:$0xff]  ;;  %v15176_v46 = vld [vmem:[#allocation54_spill] sm:$0xff] }
 0x48a   :  { %v9928_v47 = vpop.f32.mrb[207].mxu1 }
 0x48b   :  { %v13998_v30 = vadd.f32 %v9928_v47, %v9927_v11 }
 0x48c   :  { %7393 = vmatmul.mubr.bf16.gmra.mrb[248].mxu0 %v15173_v26  ;;  %8491 = vmatmul.mubr.bf16.gmra.mrb[56].mxu1 %v15173_v26 }
 0x48d   :  { %7402 = vmatprep.mubr.bf16.mxu0 %v15174_v6  ;;  %8498 = vmatprep.mubr.bf16.mxu1 %v15174_v6 }
 0x48f   :  { %v9930_v18 = vpop.f32.mrb[208].mxu1 }
 0x490   :  { %v9931_v16 = vpop.f32.mrb[209].mxu1 }
 0x491   :  { %v14004_v33 = vadd.f32 %v9931_v16, %v9930_v18  ;;  %v9933_v21 = vpop.f32.mrb[210].mxu1  ;;  %v12416_v18 = vld [vmem:[#allocation8 + $0x488] ss:$12 sps:$4 sm:$0xff]   ;;  %v12417_v16 = vld [vmem:[#allocation8 + $0x480] ss:$12 sps:$4 sm:$0xff]  }
 0x492   :  { %v9934_v28 = vpop.f32.mrb[211].mxu1 }
 0x493   :  { %v14006_v35 = vadd.f32 %v9934_v28, %v9933_v21  ;;  %v12422_v21 = vld [vmem:[#allocation8 + $0x49c] ss:$12 sps:$4 sm:$0xff]   ;;  %v12423_v28 = vld [vmem:[#allocation8 + $0x560] ss:$12 sps:$4 sm:$0xff]  }
 0x494   :  { %7403 = vmatmul.mubr.bf16.gmra.mrb[252].mxu0 %v15175_v20  ;;  %8499 = vmatmul.mubr.bf16.gmra.mrb[60].mxu1 %v15175_v20  ;;  %v15178_v20 = vld [vmem:[#allocation58_spill] sm:$0xff] }
 0x495   :  { %7445 = vmatprep.mubr.bf16.mxu0 %v15176_v46  ;;  %8539 = vmatprep.mubr.bf16.mxu1 %v15176_v46  ;;  %v12420_v46 = vld [vmem:[#allocation8 + $0x498] ss:$12 sps:$4 sm:$0xff]  }
 0x497   :  { %v9936_v11 = vpop.f32.mrb[212].mxu1 }
 0x498   :  { %v9937_v47 = vpop.f32.mrb[213].mxu1 }
 0x499   :  { %v14012_v26 = vadd.f32 %v9937_v47, %v9936_v11  ;;  %v9939_v6 = vpop.f32.mrb[214].mxu1  ;;  %v12424_v11 = vld [vmem:[#allocation8 + $0x4a0] ss:$12 sps:$4 sm:$0xff]  }
 0x49a   :  { %v9940_v62 = vpop.f32.mrb[215].mxu1 }
 0x49b   :  { %v14014_v2 = vadd.f32 %v9940_v62, %v9939_v6  ;;  %v12431_v62 = vld [vmem:[#allocation8 + $0x578] ss:$12 sps:$4 sm:$0xff]  }
 0x49c   :  { %7446 = vmatmul.mubr.bf16.vlgmr.msra.gmra.mrb[192].mxu0 %v15177_v8  ;;  %8540 = vmatmul.mubr.bf16.vlgmr.msra.gmra.mrb[64].mxu1 %v15177_v8  ;;  %v12425_v8 = vld [vmem:[#allocation8 + $0x4b0] ss:$12 sps:$4 sm:$0xff]  }
 0x49d   :  { %7455 = vmatprep.mubr.bf16.mxu0 %v15178_v20  ;;  %8547 = vmatprep.mubr.bf16.mxu1 %v15178_v20  ;;  %v15179_v20 = vld [vmem:[#allocation56_spill] sm:$0xff] }
 0x49e   :  { %10227 = vmatpush3.bf16.msra.mxu1 %v12416_v18  ;;  %7607 = vmatpush1.bf16.msra.mxu0 %v12417_v16  ;;  %v12430_v18 = vld [vmem:[#allocation8 + $0x4cc] ss:$12 sps:$4 sm:$0xff]   ;;  %v12439_v16 = vld [vmem:[#allocation8 + $0x590] ss:$12 sps:$4 sm:$0xff]  }
 0x49f   :  { %v9942_v47 = vpop.f32.mrb[216].mxu1  ;;  %7608 = vmatprep.subr.bf16.mxu0 %v12422_v21  ;;  %10228 = vmatprep.subr.bf16.mxu1 %v12423_v28  ;;  %v15180_v21 = vld [vmem:[#allocation62_spill] sm:$0xff] }
 0x4a0   :  { %v9943_v6 = vpop.f32.mrb[217].mxu1  ;;  %v12428_v28 = vld [vmem:[#allocation8 + $0x4c8] ss:$12 sps:$4 sm:$0xff]  }
 0x4a1   :  { %v14020_v38 = vadd.f32 %v9943_v6, %v9942_v47  ;;  %v9945_v58 = vpop.f32.mrb[218].mxu1 }
 0x4a2   :  { %v9946_v50 = vpop.f32.mrb[219].mxu1  ;;  %7609 = vmatpush1.bf16.msra.mxu0 %v12420_v46  ;;  %10229 = vmatpush3.bf16.msra.mxu1 %v12424_v11  ;;  %v12440_v46 = vld [vmem:[#allocation8 + $0x4d0] ss:$12 sps:$4 sm:$0xff]  }
 0x4a3   :  { %v14022_v27 = vadd.f32 %v9946_v50, %v9945_v58  ;;  %7610 = vmatprep.subr.bf16.mxu0 %v12427_v7  ;;  %10230 = vmatprep.subr.bf16.mxu1 %v12431_v62  ;;  %v12435_v50 = vld [vmem:[#allocation8 + $0x4e4] ss:$12 sps:$4 sm:$0xff]   ;;  %v12447_v58 = vld [vmem:[#allocation8 + $0x5a8] ss:$12 sps:$4 sm:$0xff]  }
 0x4a4   :  { %7456 = vmatmul.mubr.bf16.gmra.mrb[196].mxu0 %v15179_v20  ;;  %8548 = vmatmul.mubr.bf16.gmra.mrb[68].mxu1 %v15179_v20  ;;  %v12433_v20 = vld [vmem:[#allocation8 + $0x4e0] ss:$12 sps:$4 sm:$0xff]  }
 0x4a5   :  { %7465 = vmatprep.mubr.bf16.mxu0 %v15180_v21  ;;  %8555 = vmatprep.mubr.bf16.mxu1 %v15180_v21  ;;  %v15181_v21 = vld [vmem:[#allocation60_spill] sm:$0xff] }
 0x4a6   :  { %7611 = vmatpush1.bf16.msra.mxu0 %v12425_v8  ;;  %10231 = vmatpush3.bf16.msra.mxu1 %v12432_v59  ;;  %v12438_v8 = vld [vmem:[#allocation8 + $0x4fc] ss:$12 sps:$4 sm:$0xff]   ;;  %v12455_v59 = vld [vmem:[#allocation8 + $0x5c0] ss:$12 sps:$4 sm:$0xff]  }
 0x4a7   :  { %v9948_v11 = vpop.f32.mrb[220].mxu1  ;;  %7612 = vmatprep.subr.bf16.mxu0 %v12430_v18  ;;  %10232 = vmatprep.subr.bf16.mxu1 %v12439_v16  ;;  %v15182_v18 = vld [vmem:[#allocation66_spill] sm:$0xff] }
 0x4a8   :  { %v9949_v7 = vpop.f32.mrb[221].mxu1  ;;  %v12436_v16 = vld [vmem:[#allocation8 + $0x4f8] ss:$12 sps:$4 sm:$0xff]  }
 0x4a9   :  { %v14028_v47 = vadd.f32 %v9949_v7, %v9948_v11  ;;  %v9951_v62 = vpop.f32.mrb[222].mxu1  ;;  %v12443_v11 = vld [vmem:[#allocation8 + $0x514] ss:$12 sps:$4 sm:$0xff]  }
 0x4aa   :  { %v9952_v6 = vpop.f32.mrb[223].mxu1  ;;  %7613 = vmatpush1.bf16.msra.mxu0 %v12428_v28  ;;  %10233 = vmatpush3.bf16.msra.mxu1 %v12440_v46  ;;  %v12456_v28 = vld [vmem:[#allocation8 + $0x500] ss:$12 sps:$4 sm:$0xff]  }
 0x4ab   :  { %v14030_v55 = vadd.f32 %v9952_v6, %v9951_v62  ;;  %7614 = vmatprep.subr.bf16.mxu0 %v12435_v50  ;;  %10234 = vmatprep.subr.bf16.mxu1 %v12447_v58  ;;  %v12463_v50 = vld [vmem:[#allocation8 + $0x5d8] ss:$12 sps:$4 sm:$0xff]  }
 0x4ac   :  { %7466 = vmatmul.mubr.bf16.gmra.mrb[200].mxu0 %v15181_v21  ;;  %8556 = vmatmul.mubr.bf16.gmra.mrb[72].mxu1 %v15181_v21  ;;  %v12441_v21 = vld [vmem:[#allocation8 + $0x510] ss:$12 sps:$4 sm:$0xff]  }
 0x4ad   :  { %7475 = vmatprep.mubr.bf16.mxu0 %v15182_v18  ;;  %8563 = vmatprep.mubr.bf16.mxu1 %v15182_v18  ;;  %v15183_v18 = vld [vmem:[#allocation64_spill] sm:$0xff] }
 0x4ae   :  { %7615 = vmatpush1.bf16.msra.mxu0 %v12433_v20  ;;  %10235 = vmatpush3.bf16.msra.mxu1 %v12448_v1  ;;  %v12446_v20 = vld [vmem:[#allocation8 + $0x52c] ss:$12 sps:$4 sm:$0xff]   ;;  %v12471_v1 = vld [vmem:[#allocation8 + $0x5f0] ss:$12 sps:$4 sm:$0xff]  }
 0x4af   :  { %v9954_v46 = vpop.f32.mrb[224].mxu1  ;;  %7616 = vmatprep.subr.bf16.mxu0 %v12438_v8  ;;  %10236 = vmatprep.subr.bf16.mxu1 %v12455_v59  ;;  %v15184_v8 = vld [vmem:[#allocation70_spill] sm:$0xff] }
 0x4b0   :  { %v9955_v7 = vpop.f32.mrb[225].mxu1  ;;  %v12444_v59 = vld [vmem:[#allocation8 + $0x528] ss:$12 sps:$4 sm:$0xff]  }
 0x4b1   :  { %v14036_v58 = vadd.f32 %v9955_v7, %v9954_v46  ;;  %v9957_v62 = vpop.f32.mrb[226].mxu1  ;;  %v12451_v46 = vld [vmem:[#allocation8 + $0x544] ss:$12 sps:$4 sm:$0xff]  }
 0x4b2   :  { %v9958_v6 = vpop.f32.mrb[227].mxu1  ;;  %7617 = vmatpush1.bf16.msra.mxu0 %v12436_v16  ;;  %10237 = vmatpush3.bf16.msra.mxu1 %v12456_v28  ;;  %v12472_v16 = vld [vmem:[#allocation8 + $0x530] ss:$12 sps:$4 sm:$0xff]  }
 0x4b3   :  { %v14038_v12 = vadd.f32 %v9958_v6, %v9957_v62  ;;  %7618 = vmatprep.subr.bf16.mxu0 %v12443_v11  ;;  %10238 = vmatprep.subr.bf16.mxu1 %v12463_v50  ;;  %v12479_v11 = vld [vmem:[#allocation8 + $0x6c8] ss:$12 sps:$4 sm:$0xff]  }
 0x4b4   :  { %7476 = vmatmul.mubr.bf16.gmra.mrb[204].mxu0 %v15183_v18  ;;  %8564 = vmatmul.mubr.bf16.gmra.mrb[76].mxu1 %v15183_v18  ;;  %v12449_v18 = vld [vmem:[#allocation8 + $0x540] ss:$12 sps:$4 sm:$0xff]  }
 0x4b5   :  { %7485 = vmatprep.mubr.bf16.mxu0 %v15184_v8  ;;  %8571 = vmatprep.mubr.bf16.mxu1 %v15184_v8 }
 0x4b6   :  { %7619 = vmatpush1.bf16.msra.mxu0 %v12441_v21  ;;  %10239 = vmatpush3.bf16.msra.mxu1 %v12464_v52  ;;  %v12454_v21 = vld [vmem:[#allocation8 + $0x55c] ss:$12 sps:$4 sm:$0xff]  }
 0x4b7   :  { %v9960_v28 = vpop.f32.mrb[228].mxu1  ;;  %7620 = vmatprep.subr.bf16.mxu0 %v12446_v20  ;;  %10240 = vmatprep.subr.bf16.mxu1 %v12471_v1  ;;  %v15185_v52 = vld [vmem:[#allocation68_spill] sm:$0xff]  ;;  %v15186_v20 = vld [vmem:[#allocation74_spill] sm:$0xff] }
 0x4b8   :  { %v9961_v7 = vpop.f32.mrb[229].mxu1  ;;  %v12452_v1 = vld [vmem:[#allocation8 + $0x558] ss:$12 sps:$4 sm:$0xff]  }
 0x4b9   :  { %v14044_v50 = vadd.f32 %v9961_v7, %v9960_v28  ;;  %v9963_v62 = vpop.f32.mrb[230].mxu1 }
 0x4ba   :  { %v9964_v6 = vpop.f32.mrb[231].mxu1  ;;  %7621 = vmatpush1.bf16.msra.mxu0 %v12444_v59  ;;  %10241 = vmatpush3.bf16.msra.mxu1 %v12472_v16  ;;  %v12459_v59 = vld [vmem:[#allocation8 + $0x574] ss:$12 sps:$4 sm:$0xff]  }
 0x4bb   :  { %v14046_v34 = vadd.f32 %v9964_v6, %v9963_v62  ;;  %7622 = vmatprep.subr.bf16.mxu0 %v12451_v46  ;;  %10338 = vmatprep.subr.bf16.mxu1 %v12479_v11  ;;  %v12457_v11 = vld [vmem:[#allocation8 + $0x570] ss:$12 sps:$4 sm:$0xff]   ;;  %v12462_v6 = vld [vmem:[#allocation8 + $0x58c] ss:$12 sps:$4 sm:$0xff]  }
 0x4bc   :  { %7486 = vmatmul.mubr.bf16.gmra.mrb[208].mxu0 %v15185_v52  ;;  %8572 = vmatmul.mubr.bf16.gmra.mrb[80].mxu1 %v15185_v52  ;;  %v15187_v52 = vld [vmem:[#allocation72_spill] sm:$0xff] }
 0x4bd   :  { %7495 = vmatprep.mubr.bf16.mxu0 %v15186_v20  ;;  %8579 = vmatprep.mubr.bf16.mxu1 %v15186_v20 }
 0x4be   :  { %7623 = vmatpush1.bf16.msra.mxu0 %v12449_v18  ;;  %v15188_v18 = vld [vmem:[#allocation78_spill] sm:$0xff] }
 0x4bf   :  { %v9966_v8 = vpop.f32.mrb[232].mxu1  ;;  %7624 = vmatprep.subr.bf16.mxu0 %v12454_v21  ;;  %v12460_v21 = vld [vmem:[#allocation8 + $0x588] ss:$12 sps:$4 sm:$0xff]  }
 0x4c0   :  { %v9967_v28 = vpop.f32.mrb[233].mxu1 }
 0x4c1   :  { %v14052_v16 = vadd.f32 %v9967_v28, %v9966_v8  ;;  %v9969_v7 = vpop.f32.mrb[234].mxu1  ;;  %v12467_v8 = vld [vmem:[#allocation8 + $0x5a4] ss:$12 sps:$4 sm:$0xff]  }
 0x4c2   :  { %v9970_v46 = vpop.f32.mrb[235].mxu1  ;;  %7625 = vmatpush1.bf16.msra.mxu0 %v12452_v1 }
 0x4c3   :  { %v14054_v62 = vadd.f32 %v9970_v46, %v9969_v7  ;;  %7626 = vmatprep.subr.bf16.mxu0 %v12459_v59  ;;  %v12465_v59 = vld [vmem:[#allocation8 + $0x5a0] ss:$12 sps:$4 sm:$0xff]  }
 0x4c4   :  { %7496 = vmatmul.mubr.bf16.gmra.mrb[212].mxu0 %v15187_v52  ;;  %8580 = vmatmul.mubr.bf16.gmra.mrb[84].mxu1 %v15187_v52  ;;  %v12470_v52 = vld [vmem:[#allocation8 + $0x5bc] ss:$12 sps:$4 sm:$0xff]  }
 0x4c5   :  { %7505 = vmatprep.mubr.bf16.mxu0 %v15188_v18  ;;  %8587 = vmatprep.mubr.bf16.mxu1 %v15188_v18 }
 0x4c6   :  { %7627 = vmatpush1.bf16.msra.mxu0 %v12457_v11  ;;  %v15190_v11 = vld [vmem:[#allocation82_spill] sm:$0xff] }
 0x4c7   :  { %v9972_v20 = vpop.f32.mrb[236].mxu1  ;;  %7628 = vmatprep.subr.bf16.mxu0 %v12462_v6  ;;  %v12468_v6 = vld [vmem:[#allocation8 + $0x5b8] ss:$12 sps:$4 sm:$0xff]  }
 0x4c8   :  { %v9973_v28 = vpop.f32.mrb[237].mxu1 }
 0x4c9   :  { %v14060_v1 = vadd.f32 %v9973_v28, %v9972_v20  ;;  %v9975_v7 = vpop.f32.mrb[238].mxu1  ;;  %v12475_v20 = vld [vmem:[#allocation8 + $0x5d4] ss:$12 sps:$4 sm:$0xff]  }
 0x4ca   :  { %v9976_v46 = vpop.f32.mrb[239].mxu1  ;;  %7629 = vmatpush1.bf16.msra.mxu0 %v12460_v21 }
 0x4cb   :  { %v14062_v48 = vadd.f32 %v9976_v46, %v9975_v7  ;;  %7630 = vmatprep.subr.bf16.mxu0 %v12467_v8  ;;  %v12473_v8 = vld [vmem:[#allocation8 + $0x5d0] ss:$12 sps:$4 sm:$0xff]  }
 0x4cc   :  { %7506 = vmatmul.mubr.bf16.gmra.mrb[216].mxu0 %v15189_v32  ;;  %8588 = vmatmul.mubr.bf16.gmra.mrb[88].mxu1 %v15189_v32  ;;  %v12478_v32 = vld [vmem:[#allocation8 + $0x5ec] ss:$12 sps:$4 sm:$0xff]  }
 0x4cd   :  { %7515 = vmatprep.mubr.bf16.mxu0 %v15190_v11  ;;  %8595 = vmatprep.mubr.bf16.mxu1 %v15190_v11  ;;  %v12483_v11 = vld [vmem:[#allocation8 + $0x604] ss:$12 sps:$4 sm:$0xff]  }
 0x4ce   :  { %7631 = vmatpush1.bf16.msra.mxu0 %v12465_v59  ;;  %v12476_v59 = vld [vmem:[#allocation8 + $0x5e8] ss:$12 sps:$4 sm:$0xff]  }
 0x4cf   :  { %v9978_v18 = vpop.f32.mrb[240].mxu1  ;;  %7632 = vmatprep.subr.bf16.mxu0 %v12470_v52 }
 0x4d0   :  { %v9979_v28 = vpop.f32.mrb[241].mxu1 }
 0x4d1   :  { %v14068_v21 = vadd.f32 %v9979_v28, %v9978_v18  ;;  %v9981_v7 = vpop.f32.mrb[242].mxu1 }
 0x4d2   :  { %v9982_v46 = vpop.f32.mrb[243].mxu1  ;;  %7633 = vmatpush1.bf16.msra.mxu0 %v12468_v6 }
 0x4d3   :  { %v14070_v53 = vadd.f32 %v9982_v46, %v9981_v7  ;;  %7634 = vmatprep.subr.bf16.mxu0 %v12475_v20  ;;  %v15192_v46 = vld [vmem:[#allocation84_spill] sm:$0xff] }
 0x4d4   :  { %7516 = vmatmul.mubr.bf16.gmra.mrb[220].mxu0 %v15191_v9  ;;  %8596 = vmatmul.mubr.bf16.gmra.mrb[92].mxu1 %v15191_v9 }
 0x4d5   :  { %7525 = vmatprep.mubr.bf16.mxu0 %v13455_v31  ;;  %8603 = vmatprep.mubr.bf16.mxu1 %v13455_v31 }
 0x4d6   :  { %7635 = vmatpush1.bf16.msra.mxu0 %v12473_v8 }
 0x4d7   :  { %v9984_v52 = vpop.f32.mrb[244].mxu1  ;;  %7636 = vmatprep.subr.bf16.mxu0 %v12478_v32 }
 0x4d8   :  { %v9985_v18 = vpop.f32.mrb[245].mxu1 }
 0x4d9   :  { %v14076_v6 = vadd.f32 %v9985_v18, %v9984_v52  ;;  %v9987_v28 = vpop.f32.mrb[246].mxu1 }
 0x4da   :  { %v9988_v7 = vpop.f32.mrb[247].mxu1  ;;  %7637 = vmatpush1.bf16.msra.mxu0 %v12476_v59  ;;  %v15193_v59 = vld [vmem:[#allocation87_spill] sm:$0xff] }
 0x4db   :  { %v14078_v20 = vadd.f32 %v9988_v7, %v9987_v28  ;;  %7799 = vmatprep.subr.bf16.mxu0 %v12483_v11  ;;  %v15194_v11 = vld [vmem:[#allocation92_spill] sm:$0xff] }
 0x4dc   :  { %7526 = vmatmul.mubr.bf16.gmra.mrb[224].mxu0 %v15192_v46  ;;  %8604 = vmatmul.mubr.bf16.gmra.mrb[96].mxu1 %v15192_v46 }
 0x4dd   :  { %7535 = vmatprep.mubr.bf16.mxu0 %v13473_v42  ;;  %8611 = vmatprep.mubr.bf16.mxu1 %v13473_v42 }
 0x4df   :  { %v9990_v31 = vpop.f32.mrb[248].mxu1 }
 0x4e0   :  { %v9991_v9 = vpop.f32.mrb[249].mxu1 }
 0x4e1   :  { %v14084_v8 = vadd.f32 %v9991_v9, %v9990_v31  ;;  %v9993_v32 = vpop.f32.mrb[250].mxu1 }
 0x4e2   :  { %v9994_v52 = vpop.f32.mrb[251].mxu1 }
 0x4e3   :  { %v14086_v18 = vadd.f32 %v9994_v52, %v9993_v32  ;;  %v14099_v32 = vrot.slane %v5474_v40, %v12986_v13  ;;  %v15196_v52 = vld [vmem:[#allocation96_spill] sm:$0xff]  ;;  %v15197_v13 = vld [vmem:[#allocation94_spill] sm:$0xff] }
 0x4e4   :  { %7536 = vmatmul.mubr.bf16.gmra.mrb[228].mxu0 %v15193_v59  ;;  %8612 = vmatmul.mubr.bf16.gmra.mrb[100].mxu1 %v15193_v59 }
 0x4e5   :  { %7545 = vmatprep.mubr.bf16.mxu0 %v15194_v11  ;;  %8619 = vmatprep.mubr.bf16.mxu1 %v15194_v11 }
 0x4e7   :  { %v9996_v28 = vpop.f32.mrb[252].mxu1 }
 0x4e8   :  { %v9997_v7 = vpop.f32.mrb[253].mxu1 }
 0x4e9   :  { %v14092_v46 = vadd.f32 %v9997_v7, %v9996_v28  ;;  %v9999_v42 = vpop.f32.mrb[254].mxu1  ;;  %v8220_v28 = vadd.f32 %v13972_v63, %v14099_v32 }
 0x4ea   :  { %v10000_v31 = vpop.f32.mrb[255].mxu1 }
 0x4eb   :  { %v14094_v9 = vadd.f32 %v10000_v31, %v9999_v42  ;;  %v8223_v31 = vadd.f32 %v13974_v39, %v14099_v32 }
 0x4ec   :  { %7546 = vmatmul.mubr.bf16.gmra.mrb[232].mxu0 %v15195_v4  ;;  %8620 = vmatmul.mubr.bf16.gmra.mrb[104].mxu1 %v15195_v4 }
 0x4ed   :  { %7555 = vmatprep.mubr.bf16.mxu0 %v15196_v52  ;;  %8627 = vmatprep.mubr.bf16.mxu1 %v15196_v52 }
 0x4ef   :  { %v10018_v59 = vpop.f32.mrb[0].mxu1 }
 0x4f0   :  { %v10019_v11 = vpop.f32.mrb[1].mxu1 }
 0x4f1   :  { %v10020_v7 = vadd.f32 %v10019_v11, %v10018_v59  ;;  %v10021_v36 = vpop.f32.mrb[2].mxu1  ;;  %v8228_v59 = vadd.f32 %v13980_v15, %v14099_v32 }
 0x4f2   :  { %v10022_v42 = vpop.f32.mrb[3].mxu1 }
 0x4f3   :  { %v10023_v45 = vadd.f32 %v10022_v42, %v10021_v36  ;;  %v14107_v4 = vadd.f32 %v10020_v7, %v8220_v28  ;;  %v8231_v28 = vadd.f32 %v13982_v61, %v14099_v32 }
 0x4f4   :  { %7556 = vmatmul.mubr.bf16.gmra.mrb[236].mxu0 %v15197_v13  ;;  %8628 = vmatmul.mubr.bf16.gmra.mrb[108].mxu1 %v15197_v13  ;;  %v15198_v13 = vld [vmem:[#allocation98_spill] sm:$0xff] }
 0x4f5   :  { %7565 = vmatprep.mubr.bf16.mxu0 %v13527_v37  ;;  %8635 = vmatprep.mubr.bf16.mxu1 %v13527_v37  ;;  %v14113_v40 = vadd.f32 %v10023_v45, %v8223_v31  ;;  %v8236_v31 = vadd.f32 %v13988_v5, %v14099_v32 }
 0x4f7   :  { %v10024_v63 = vpop.f32.mrb[4].mxu1 }
 0x4f8   :  { %v10025_v52 = vpop.f32.mrb[5].mxu1 }
 0x4f9   :  { %v10026_v11 = vadd.f32 %v10025_v52, %v10024_v63  ;;  %v10027_v39 = vpop.f32.mrb[6].mxu1 }
 0x4fa   :  { %v10028_v36 = vpop.f32.mrb[7].mxu1 }
 0x4fb   :  { %v10029_v7 = vadd.f32 %v10028_v36, %v10027_v39  ;;  %v14119_v42 = vadd.f32 %v10026_v11, %v8228_v59  ;;  %v8239_v59 = vadd.f32 %v13990_v54, %v14099_v32  ;;  %v15199_v36 = vld [vmem:[#allocation101_spill] sm:$0xff] }
 0x4fc   :  { %7566 = vmatmul.mubr.bf16.gmra.mrb[240].mxu0 %v15198_v13  ;;  %8636 = vmatmul.mubr.bf16.gmra.mrb[112].mxu1 %v15198_v13 }
 0x4fd   :  { %7575 = vmatprep.mubr.bf16.mxu0 %v13545_v3  ;;  %8643 = vmatprep.mubr.bf16.mxu1 %v13545_v3  ;;  %v14125_v37 = vadd.f32 %v10029_v7, %v8231_v28  ;;  %v8244_v7 = vadd.f32 %v13996_v22, %v14099_v32 }
 0x4ff   :  { %v10030_v45 = vpop.f32.mrb[8].mxu1 }
 0x500   :  { %v10031_v15 = vpop.f32.mrb[9].mxu1 }
 0x501   :  { %v10032_v63 = vadd.f32 %v10031_v15, %v10030_v45  ;;  %v10033_v61 = vpop.f32.mrb[10].mxu1  ;;  %v8247_v15 = vadd.f32 %v13998_v30, %v14099_v32 }
 0x502   :  { %v10034_v52 = vpop.f32.mrb[11].mxu1 }
 0x503   :  { %v10035_v11 = vadd.f32 %v10034_v52, %v10033_v61  ;;  %v14131_v39 = vadd.f32 %v10032_v63, %v8236_v31  ;;  %v15200_v61 = vld [vmem:[#allocation104_spill] sm:$0xff] }
 0x504   :  { %7576 = vmatmul.mubr.bf16.gmra.mrb[244].mxu0 %v15199_v36  ;;  %8644 = vmatmul.mubr.bf16.gmra.mrb[116].mxu1 %v15199_v36 }
 0x505   :  { %7585 = vmatprep.mubr.bf16.mxu0 %v13563_v23  ;;  %8651 = vmatprep.mubr.bf16.mxu1 %v13563_v23  ;;  %v14137_v3 = vadd.f32 %v10035_v11, %v8239_v59  ;;  %v8252_v59 = vadd.f32 %v14004_v33, %v14099_v32 }
 0x507   :  { %v10036_v5 = vpop.f32.mrb[12].mxu1 }
 0x508   :  { %v10037_v28 = vpop.f32.mrb[13].mxu1 }
 0x509   :  { %v10038_v13 = vadd.f32 %v10037_v28, %v10036_v5  ;;  %v10039_v54 = vpop.f32.mrb[14].mxu1  ;;  %v8255_v5 = vadd.f32 %v14006_v35, %v14099_v32 }
 0x50a   :  { %v10040_v45 = vpop.f32.mrb[15].mxu1 }
 0x50b   :  { %v10041_v31 = vadd.f32 %v10040_v45, %v10039_v54  ;;  %v14143_v63 = vadd.f32 %v10038_v13, %v8244_v7  ;;  %v8260_v45 = vadd.f32 %v14012_v26, %v14099_v32 }
 0x50c   :  { %7586 = vmatmul.mubr.bf16.gmra.mrb[248].mxu0 %v15200_v61  ;;  %8652 = vmatmul.mubr.bf16.gmra.mrb[120].mxu1 %v15200_v61  ;;  %v12480_v61 = vld [vmem:[#allocation8 + $0x608] ss:$12 sps:$4 sm:$0xff]  }
 0x50d   :  { %7595 = vmatprep.mubr.bf16.mxu0 %v13581_v43  ;;  %8659 = vmatprep.mubr.bf16.mxu1 %v13581_v43  ;;  %v14149_v23 = vadd.f32 %v10041_v31, %v8247_v15  ;;  %v15201_v43 = vld [vmem:[#allocation55_spill] sm:$0xff] }
 0x50f   :  { %v10042_v22 = vpop.f32.mrb[16].mxu1 }
 0x510   :  { %v10043_v52 = vpop.f32.mrb[17].mxu1 }
 0x511   :  { %v10044_v11 = vadd.f32 %v10043_v52, %v10042_v22  ;;  %v10045_v30 = vpop.f32.mrb[18].mxu1  ;;  %v12481_v22 = vld [vmem:[#allocation8 + $0x600] ss:$12 sps:$4 sm:$0xff]   ;;  %v8263_v52 = vadd.f32 %v14014_v2, %v14099_v32 }
 0x512   :  { %v10046_v36 = vpop.f32.mrb[19].mxu1 }
 0x513   :  { %v10047_v28 = vadd.f32 %v10046_v36, %v10045_v30  ;;  %v14155_v7 = vadd.f32 %v10044_v11, %v8252_v59  ;;  %v12486_v59 = vld [vmem:[#allocation8 + $0x61c] ss:$12 sps:$4 sm:$0xff]   ;;  %v12487_v11 = vld [vmem:[#allocation8 + $0x6e0] ss:$12 sps:$4 sm:$0xff]  }
 0x514   :  { %7596 = vmatmul.mubr.bf16.gmra.mrb[252].mxu0 %v13577_v60  ;;  %8660 = vmatmul.mubr.bf16.gmra.mrb[124].mxu1 %v13577_v60  ;;  %v15202_v36 = vld [vmem:[#allocation53_spill] sm:$0xff] }
 0x515   :  { %7638 = vmatprep.mubr.bf16.mxu0 %v15201_v43  ;;  %8700 = vmatprep.mubr.bf16.mxu1 %v15201_v43  ;;  %v14161_v13 = vadd.f32 %v10047_v28, %v8255_v5  ;;  %v15203_v5 = vld [vmem:[#allocation59_spill] sm:$0xff]  ;;  %v12484_v28 = vld [vmem:[#allocation8 + $0x618] ss:$12 sps:$4 sm:$0xff]  }
 0x516   :  { %v12488_v43 = vld [vmem:[#allocation8 + $0x620] ss:$12 sps:$4 sm:$0xff]  }
 0x517   :  { %v10048_v33 = vpop.f32.mrb[20].mxu1 }
 0x518   :  { %v10049_v54 = vpop.f32.mrb[21].mxu1 }
 0x519   :  { %v10050_v15 = vadd.f32 %v10049_v54, %v10048_v33  ;;  %v10051_v35 = vpop.f32.mrb[22].mxu1  ;;  %v12491_v33 = vld [vmem:[#allocation8 + $0x634] ss:$12 sps:$4 sm:$0xff]   ;;  %v12495_v54 = vld [vmem:[#allocation8 + $0x6f8] ss:$12 sps:$4 sm:$0xff]  }
 0x51a   :  { %v10052_v31 = vpop.f32.mrb[23].mxu1 }
 0x51b   :  { %v10053_v60 = vadd.f32 %v10052_v31, %v10051_v35  ;;  %v14167_v30 = vadd.f32 %v10050_v15, %v8260_v45  ;;  %v8268_v15 = vadd.f32 %v14020_v38, %v14099_v32  ;;  %v15205_v38 = vld [vmem:[#allocation63_spill] sm:$0xff] }
 0x51c   :  { %7639 = vmatmul.mubr.bf16.vlgmr.msra.gmra.mrb[192].mxu0 %v15202_v36  ;;  %8701 = vmatmul.mubr.bf16.vlgmr.msra.gmra.mrb[128].mxu1 %v15202_v36 }
 0x51d   :  { %7648 = vmatprep.mubr.bf16.mxu0 %v15203_v5  ;;  %8708 = vmatprep.mubr.bf16.mxu1 %v15203_v5  ;;  %v14173_v26 = vadd.f32 %v10053_v60, %v8263_v52  ;;  %v12489_v52 = vld [vmem:[#allocation8 + $0x630] ss:$12 sps:$4 sm:$0xff]   ;;  %v12496_v60 = vld [vmem:[#allocation8 + $0x638] ss:$12 sps:$4 sm:$0xff]  }
 0x51e   :  { %10339 = vmatpush3.bf16.msra.mxu1 %v12480_v61  ;;  %7800 = vmatpush1.bf16.msra.mxu0 %v12481_v22  ;;  %v8271_v61 = vadd.f32 %v14022_v27, %v14099_v32  ;;  %v12504_v27 = vld [vmem:[#allocation8 + $0x650] ss:$12 sps:$4 sm:$0xff]  }
 0x51f   :  { %v10054_v2 = vpop.f32.mrb[24].mxu1  ;;  %7801 = vmatprep.subr.bf16.mxu0 %v12486_v59  ;;  %10340 = vmatprep.subr.bf16.mxu1 %v12487_v11  ;;  %v12494_v59 = vld [vmem:[#allocation8 + $0x64c] ss:$12 sps:$4 sm:$0xff]   ;;  %v12503_v11 = vld [vmem:[#allocation8 + $0x710] ss:$12 sps:$4 sm:$0xff]  }
 0x520   :  { %v10055_v45 = vpop.f32.mrb[25].mxu1 }
 0x521   :  { %v10056_v35 = vadd.f32 %v10055_v45, %v10054_v2  ;;  %v10057_v31 = vpop.f32.mrb[26].mxu1 }
 0x522   :  { %v10058_v36 = vpop.f32.mrb[27].mxu1  ;;  %7802 = vmatpush1.bf16.msra.mxu0 %v12484_v28  ;;  %10341 = vmatpush3.bf16.msra.mxu1 %v12488_v43  ;;  %v12492_v43 = vld [vmem:[#allocation8 + $0x648] ss:$12 sps:$4 sm:$0xff]  }
 0x523   :  { %v10059_v22 = vadd.f32 %v10058_v36, %v10057_v31  ;;  %7803 = vmatprep.subr.bf16.mxu0 %v12491_v33  ;;  %10342 = vmatprep.subr.bf16.mxu1 %v12495_v54  ;;  %v14179_v5 = vadd.f32 %v10056_v35, %v8268_v15  ;;  %v12499_v33 = vld [vmem:[#allocation8 + $0x664] ss:$12 sps:$4 sm:$0xff]   ;;  %v12511_v54 = vld [vmem:[#allocation8 + $0x728] ss:$12 sps:$4 sm:$0xff]   ;;  %v8276_v15 = vadd.f32 %v14028_v47, %v14099_v32  ;;  %v12497_v36 = vld [vmem:[#allocation8 + $0x660] ss:$12 sps:$4 sm:$0xff]  }
 0x524   :  { %7649 = vmatmul.mubr.bf16.gmra.mrb[196].mxu0 %v15204_v44  ;;  %8709 = vmatmul.mubr.bf16.gmra.mrb[132].mxu1 %v15204_v44  ;;  %v15207_v47 = vld [vmem:[#allocation67_spill] sm:$0xff] }
 0x525   :  { %7658 = vmatprep.mubr.bf16.mxu0 %v15205_v38  ;;  %8716 = vmatprep.mubr.bf16.mxu1 %v15205_v38  ;;  %v14185_v28 = vadd.f32 %v10059_v22, %v8271_v61  ;;  %v12512_v61 = vld [vmem:[#allocation8 + $0x668] ss:$12 sps:$4 sm:$0xff]   ;;  %v15206_v38 = vld [vmem:[#allocation61_spill] sm:$0xff] }
 0x526   :  { %7804 = vmatpush1.bf16.msra.mxu0 %v12489_v52  ;;  %10343 = vmatpush3.bf16.msra.mxu1 %v12496_v60  ;;  %v8279_v52 = vadd.f32 %v14030_v55, %v14099_v32  ;;  %v12502_v22 = vld [vmem:[#allocation8 + $0x67c] ss:$12 sps:$4 sm:$0xff]   ;;  %v12520_v55 = vld [vmem:[#allocation8 + $0x680] ss:$12 sps:$4 sm:$0xff]  }
 0x527   :  { %v10060_v2 = vpop.f32.mrb[28].mxu1  ;;  %7805 = vmatprep.subr.bf16.mxu0 %v12494_v59  ;;  %10344 = vmatprep.subr.bf16.mxu1 %v12503_v11  ;;  %v12519_v59 = vld [vmem:[#allocation8 + $0x740] ss:$12 sps:$4 sm:$0xff]  }
 0x528   :  { %v10061_v45 = vpop.f32.mrb[29].mxu1 }
 0x529   :  { %v10062_v44 = vadd.f32 %v10061_v45, %v10060_v2  ;;  %v10063_v35 = vpop.f32.mrb[30].mxu1 }
 0x52a   :  { %v10064_v31 = vpop.f32.mrb[31].mxu1  ;;  %7806 = vmatpush1.bf16.msra.mxu0 %v12492_v43  ;;  %10345 = vmatpush3.bf16.msra.mxu1 %v12504_v27  ;;  %v12500_v27 = vld [vmem:[#allocation8 + $0x678] ss:$12 sps:$4 sm:$0xff]  }
 0x52b   :  { %v10065_v60 = vadd.f32 %v10064_v31, %v10063_v35  ;;  %7807 = vmatprep.subr.bf16.mxu0 %v12499_v33  ;;  %10346 = vmatprep.subr.bf16.mxu1 %v12511_v54  ;;  %v14191_v11 = vadd.f32 %v10062_v44, %v8276_v15  ;;  %v12507_v33 = vld [vmem:[#allocation8 + $0x694] ss:$12 sps:$4 sm:$0xff]   ;;  %v12527_v54 = vld [vmem:[#allocation8 + $0x758] ss:$12 sps:$4 sm:$0xff]   ;;  %v8284_v15 = vadd.f32 %v14036_v58, %v14099_v32 }
 0x52c   :  { %7659 = vmatmul.mubr.bf16.gmra.mrb[200].mxu0 %v15206_v38  ;;  %8717 = vmatmul.mubr.bf16.gmra.mrb[136].mxu1 %v15206_v38  ;;  %v12505_v38 = vld [vmem:[#allocation8 + $0x690] ss:$12 sps:$4 sm:$0xff]  }
 0x52d   :  { %7668 = vmatprep.mubr.bf16.mxu0 %v15207_v47  ;;  %8724 = vmatprep.mubr.bf16.mxu1 %v15207_v47  ;;  %v14197_v43 = vadd.f32 %v10065_v60, %v8279_v52  ;;  %v12528_v52 = vld [vmem:[#allocation8 + $0x698] ss:$12 sps:$4 sm:$0xff]   ;;  %v15208_v47 = vld [vmem:[#allocation65_spill] sm:$0xff]  ;;  %v15209_v58 = vld [vmem:[#allocation71_spill] sm:$0xff] }
 0x52e   :  { %7808 = vmatpush1.bf16.msra.mxu0 %v12497_v36  ;;  %10347 = vmatpush3.bf16.msra.mxu1 %v12512_v61  ;;  %v8287_v36 = vadd.f32 %v14038_v12, %v14099_v32  ;;  %v12510_v60 = vld [vmem:[#allocation8 + $0x6ac] ss:$12 sps:$4 sm:$0xff]   ;;  %v12536_v12 = vld [vmem:[#allocation8 + $0x6b0] ss:$12 sps:$4 sm:$0xff]  }
 0x52f   :  { %v10066_v2 = vpop.f32.mrb[32].mxu1  ;;  %7809 = vmatprep.subr.bf16.mxu0 %v12502_v22  ;;  %10348 = vmatprep.subr.bf16.mxu1 %v12519_v59  ;;  %v12535_v22 = vld [vmem:[#allocation8 + $0x770] ss:$12 sps:$4 sm:$0xff]  }
 0x530   :  { %v10067_v45 = vpop.f32.mrb[33].mxu1 }
 0x531   :  { %v10068_v44 = vadd.f32 %v10067_v45, %v10066_v2  ;;  %v10069_v35 = vpop.f32.mrb[34].mxu1 }
 0x532   :  { %v10070_v31 = vpop.f32.mrb[35].mxu1  ;;  %7810 = vmatpush1.bf16.msra.mxu0 %v12500_v27  ;;  %10349 = vmatpush3.bf16.msra.mxu1 %v12520_v55  ;;  %v12508_v55 = vld [vmem:[#allocation8 + $0x6a8] ss:$12 sps:$4 sm:$0xff]  }
 0x533   :  { %v10071_v61 = vadd.f32 %v10070_v31, %v10069_v35  ;;  %7811 = vmatprep.subr.bf16.mxu0 %v12507_v33  ;;  %10350 = vmatprep.subr.bf16.mxu1 %v12527_v54  ;;  %v14203_v59 = vadd.f32 %v10068_v44, %v8284_v15  ;;  %v12515_v33 = vld [vmem:[#allocation8 + $0x6c4] ss:$12 sps:$4 sm:$0xff]   ;;  %v12543_v54 = vld [vmem:[#allocation8 + $0x848] ss:$12 sps:$4 sm:$0xff]   ;;  %v8292_v15 = vadd.f32 %v14044_v50, %v14099_v32  ;;  %v15211_v50 = vld [vmem:[#allocation75_spill] sm:$0xff] }
 0x534   :  { %7669 = vmatmul.mubr.bf16.gmra.mrb[204].mxu0 %v15208_v47  ;;  %8725 = vmatmul.mubr.bf16.gmra.mrb[140].mxu1 %v15208_v47  ;;  %v12513_v47 = vld [vmem:[#allocation8 + $0x6c0] ss:$12 sps:$4 sm:$0xff]  }
 0x535   :  { %7678 = vmatprep.mubr.bf16.mxu0 %v15209_v58  ;;  %8732 = vmatprep.mubr.bf16.mxu1 %v15209_v58  ;;  %v14209_v27 = vadd.f32 %v10071_v61, %v8287_v36  ;;  %v12518_v36 = vld [vmem:[#allocation8 + $0x6dc] ss:$12 sps:$4 sm:$0xff]   ;;  %v12516_v58 = vld [vmem:[#allocation8 + $0x6d8] ss:$12 sps:$4 sm:$0xff]  }
 0x536   :  { %7812 = vmatpush1.bf16.msra.mxu0 %v12505_v38  ;;  %10351 = vmatpush3.bf16.msra.mxu1 %v12528_v52  ;;  %v8295_v38 = vadd.f32 %v14046_v34, %v14099_v32  ;;  %v12523_v34 = vld [vmem:[#allocation8 + $0x6f4] ss:$12 sps:$4 sm:$0xff]  }
 0x537   :  { %v10072_v2 = vpop.f32.mrb[36].mxu1  ;;  %7813 = vmatprep.subr.bf16.mxu0 %v12510_v60  ;;  %10352 = vmatprep.subr.bf16.mxu1 %v12535_v22  ;;  %v15210_v60 = vld [vmem:[#allocation69_spill] sm:$0xff] }
 0x538   :  { %v10073_v45 = vpop.f32.mrb[37].mxu1 }
 0x539   :  { %v10074_v44 = vadd.f32 %v10073_v45, %v10072_v2  ;;  %v10075_v35 = vpop.f32.mrb[38].mxu1  ;;  %v8300_v2 = vadd.f32 %v14052_v16, %v14099_v32 }
 0x53a   :  { %v10076_v31 = vpop.f32.mrb[39].mxu1  ;;  %7814 = vmatpush1.bf16.msra.mxu0 %v12508_v55  ;;  %10353 = vmatpush3.bf16.msra.mxu1 %v12536_v12 }
 0x53b   :  { %v10077_v52 = vadd.f32 %v10076_v31, %v10075_v35  ;;  %7815 = vmatprep.subr.bf16.mxu0 %v12515_v33  ;;  %10450 = vmatprep.subr.bf16.mxu1 %v12543_v54  ;;  %v14215_v61 = vadd.f32 %v10074_v44, %v8292_v15  ;;  %v12521_v15 = vld [vmem:[#allocation8 + $0x6f0] ss:$12 sps:$4 sm:$0xff]   ;;  %v8303_v44 = vadd.f32 %v14054_v62, %v14099_v32  ;;  %v12526_v31 = vld [vmem:[#allocation8 + $0x70c] ss:$12 sps:$4 sm:$0xff]  }
 0x53c   :  { %7679 = vmatmul.mubr.bf16.gmra.mrb[208].mxu0 %v15210_v60  ;;  %8733 = vmatmul.mubr.bf16.gmra.mrb[144].mxu1 %v15210_v60  ;;  %v12531_v62 = vld [vmem:[#allocation8 + $0x724] ss:$12 sps:$4 sm:$0xff]  }
 0x53d   :  { %7688 = vmatprep.mubr.bf16.mxu0 %v15211_v50  ;;  %8740 = vmatprep.mubr.bf16.mxu1 %v15211_v50  ;;  %v14221_v22 = vadd.f32 %v10077_v52, %v8295_v38  ;;  %v15212_v38 = vld [vmem:[#allocation73_spill] sm:$0xff]  ;;  %v15213_v52 = vld [vmem:[#allocation79_spill] sm:$0xff] }
 0x53e   :  { %7816 = vmatpush1.bf16.msra.mxu0 %v12513_v47 }
 0x53f   :  { %v10078_v55 = vpop.f32.mrb[40].mxu1  ;;  %7817 = vmatprep.subr.bf16.mxu0 %v12518_v36  ;;  %v12524_v36 = vld [vmem:[#allocation8 + $0x708] ss:$12 sps:$4 sm:$0xff]  }
 0x540   :  { %v10079_v12 = vpop.f32.mrb[41].mxu1 }
 0x541   :  { %v10080_v33 = vadd.f32 %v10079_v12, %v10078_v55  ;;  %v10081_v54 = vpop.f32.mrb[42].mxu1 }
 0x542   :  { %v10082_v45 = vpop.f32.mrb[43].mxu1  ;;  %7818 = vmatpush1.bf16.msra.mxu0 %v12516_v58  ;;  %v8308_v58 = vadd.f32 %v14060_v1, %v14099_v32 }
 0x543   :  { %v10083_v35 = vadd.f32 %v10082_v45, %v10081_v54  ;;  %7819 = vmatprep.subr.bf16.mxu0 %v12523_v34  ;;  %v14227_v47 = vadd.f32 %v10080_v33, %v8300_v2  ;;  %v12529_v2 = vld [vmem:[#allocation8 + $0x720] ss:$12 sps:$4 sm:$0xff]   ;;  %v8311_v33 = vadd.f32 %v14062_v48, %v14099_v32  ;;  %v12534_v45 = vld [vmem:[#allocation8 + $0x73c] ss:$12 sps:$4 sm:$0xff]  }
 0x544   :  { %7689 = vmatmul.mubr.bf16.gmra.mrb[212].mxu0 %v15212_v38  ;;  %8741 = vmatmul.mubr.bf16.gmra.mrb[148].mxu1 %v15212_v38  ;;  %v12539_v48 = vld [vmem:[#allocation8 + $0x754] ss:$12 sps:$4 sm:$0xff]  }
 0x545   :  { %7698 = vmatprep.mubr.bf16.mxu0 %v15213_v52  ;;  %8748 = vmatprep.mubr.bf16.mxu1 %v15213_v52  ;;  %v14233_v16 = vadd.f32 %v10083_v35, %v8303_v44  ;;  %v15214_v44 = vld [vmem:[#allocation77_spill] sm:$0xff]  ;;  %v15215_v35 = vld [vmem:[#allocation83_spill] sm:$0xff] }
 0x546   :  { %7820 = vmatpush1.bf16.msra.mxu0 %v12521_v15 }
 0x547   :  { %v10084_v60 = vpop.f32.mrb[44].mxu1  ;;  %7821 = vmatprep.subr.bf16.mxu0 %v12526_v31  ;;  %v12532_v31 = vld [vmem:[#allocation8 + $0x738] ss:$12 sps:$4 sm:$0xff]  }
 0x548   :  { %v10085_v50 = vpop.f32.mrb[45].mxu1 }
 0x549   :  { %v10086_v55 = vadd.f32 %v10085_v50, %v10084_v60  ;;  %v10087_v34 = vpop.f32.mrb[46].mxu1 }
 0x54a   :  { %v10088_v12 = vpop.f32.mrb[47].mxu1  ;;  %7822 = vmatpush1.bf16.msra.mxu0 %v12524_v36  ;;  %v8316_v36 = vadd.f32 %v14068_v21, %v14099_v32 }
 0x54b   :  { %v10089_v54 = vadd.f32 %v10088_v12, %v10087_v34  ;;  %7823 = vmatprep.subr.bf16.mxu0 %v12531_v62  ;;  %v14239_v15 = vadd.f32 %v10086_v55, %v8308_v58  ;;  %v12537_v58 = vld [vmem:[#allocation8 + $0x750] ss:$12 sps:$4 sm:$0xff]   ;;  %v8319_v55 = vadd.f32 %v14070_v53, %v14099_v32  ;;  %v12542_v12 = vld [vmem:[#allocation8 + $0x76c] ss:$12 sps:$4 sm:$0xff]  }
 0x54c   :  { %7699 = vmatmul.mubr.bf16.gmra.mrb[216].mxu0 %v15214_v44  ;;  %8749 = vmatmul.mubr.bf16.gmra.mrb[152].mxu1 %v15214_v44  ;;  %v12547_v53 = vld [vmem:[#allocation8 + $0x784] ss:$12 sps:$4 sm:$0xff]  }
 0x54d   :  { %7708 = vmatprep.mubr.bf16.mxu0 %v15215_v35  ;;  %8756 = vmatprep.mubr.bf16.mxu1 %v15215_v35  ;;  %v14245_v1 = vadd.f32 %v10089_v54, %v8311_v33  ;;  %v15216_v33 = vld [vmem:[#allocation81_spill] sm:$0xff]  ;;  %v15217_v54 = vld [vmem:[#allocation86_spill] sm:$0xff] }
 0x54e   :  { %7824 = vmatpush1.bf16.msra.mxu0 %v12529_v2 }
 0x54f   :  { %v10090_v38 = vpop.f32.mrb[48].mxu1  ;;  %7825 = vmatprep.subr.bf16.mxu0 %v12534_v45  ;;  %v12540_v45 = vld [vmem:[#allocation8 + $0x768] ss:$12 sps:$4 sm:$0xff]  }
 0x550   :  { %v10091_v52 = vpop.f32.mrb[49].mxu1 }
 0x551   :  { %v10092_v60 = vadd.f32 %v10091_v52, %v10090_v38  ;;  %v10093_v62 = vpop.f32.mrb[50].mxu1 }
 0x552   :  { %v10094_v50 = vpop.f32.mrb[51].mxu1  ;;  %7826 = vmatpush1.bf16.msra.mxu0 %v12532_v31  ;;  %v8324_v31 = vadd.f32 %v14076_v6, %v14099_v32 }
 0x553   :  { %v10095_v34 = vadd.f32 %v10094_v50, %v10093_v62  ;;  %7827 = vmatprep.subr.bf16.mxu0 %v12539_v48  ;;  %v14251_v2 = vadd.f32 %v10092_v60, %v8316_v36  ;;  %v8327_v36 = vadd.f32 %v14078_v20, %v14099_v32  ;;  %v15218_v50 = vld [vmem:[#allocation85_spill] sm:$0xff] }
 0x554   :  { %7709 = vmatmul.mubr.bf16.gmra.mrb[220].mxu0 %v15216_v33  ;;  %8757 = vmatmul.mubr.bf16.gmra.mrb[156].mxu1 %v15216_v33 }
 0x555   :  { %7718 = vmatprep.mubr.bf16.mxu0 %v15217_v54  ;;  %8764 = vmatprep.mubr.bf16.mxu1 %v15217_v54  ;;  %v14257_v21 = vadd.f32 %v10095_v34, %v8319_v55 }
 0x556   :  { %7828 = vmatpush1.bf16.msra.mxu0 %v12537_v58  ;;  %v15219_v58 = vld [vmem:[#allocation89_spill] sm:$0xff] }
 0x557   :  { %v10096_v44 = vpop.f32.mrb[52].mxu1  ;;  %7829 = vmatprep.subr.bf16.mxu0 %v12542_v12  ;;  %v8332_v12 = vadd.f32 %v14084_v8, %v14099_v32 }
 0x558   :  { %v10097_v35 = vpop.f32.mrb[53].mxu1 }
 0x559   :  { %v10098_v38 = vadd.f32 %v10097_v35, %v10096_v44  ;;  %v10099_v48 = vpop.f32.mrb[54].mxu1  ;;  %v15220_v35 = vld [vmem:[#allocation88_spill] sm:$0xff] }
 0x55a   :  { %v10100_v52 = vpop.f32.mrb[55].mxu1  ;;  %7830 = vmatpush1.bf16.msra.mxu0 %v12540_v45  ;;  %v8335_v45 = vadd.f32 %v14086_v18, %v14099_v32 }
 0x55b   :  { %v10101_v60 = vadd.f32 %v10100_v52, %v10099_v48  ;;  %7992 = vmatprep.subr.bf16.mxu0 %v12547_v53  ;;  %v14263_v62 = vadd.f32 %v10098_v38, %v8324_v31  ;;  %v15221_v31 = vld [vmem:[#allocation93_spill] sm:$0xff]  ;;  %v8340_v52 = vadd.f32 %v14092_v46, %v14099_v32 }
 0x55c   :  { %7719 = vmatmul.mubr.bf16.gmra.mrb[224].mxu0 %v15218_v50  ;;  %8765 = vmatmul.mubr.bf16.gmra.mrb[160].mxu1 %v15218_v50  ;;  %v8343_v50 = vadd.f32 %v14094_v9, %v14099_v32 }
 0x55d   :  { %7728 = vmatprep.mubr.bf16.mxu0 %v15219_v58  ;;  %8772 = vmatprep.mubr.bf16.mxu1 %v15219_v58  ;;  %v14269_v6 = vadd.f32 %v10101_v60, %v8327_v36 }
 0x55f   :  { %v10102_v55 = vpop.f32.mrb[56].mxu1 }
 0x560   :  { %v10103_v34 = vpop.f32.mrb[57].mxu1 }
 0x561   :  { %v10104_v20 = vadd.f32 %v10103_v34, %v10102_v55  ;;  %v10105_v33 = vpop.f32.mrb[58].mxu1  ;;  %v15222_v34 = vld [vmem:[#allocation91_spill] sm:$0xff] }
 0x562   :  { %v10106_v54 = vpop.f32.mrb[59].mxu1 }
 0x563   :  { %v10107_v44 = vadd.f32 %v10106_v54, %v10105_v33  ;;  %v14275_v53 = vadd.f32 %v10104_v20, %v8332_v12  ;;  %v15223_v12 = vld [vmem:[#allocation97_spill] sm:$0xff] }
 0x564   :  { %7729 = vmatmul.mubr.bf16.gmra.mrb[228].mxu0 %v15220_v35  ;;  %8773 = vmatmul.mubr.bf16.gmra.mrb[164].mxu1 %v15220_v35  ;;  %v15224_v35 = vld [vmem:[#allocation95_spill] sm:$0xff] }
 0x565   :  { %7738 = vmatprep.mubr.bf16.mxu0 %v15221_v31  ;;  %8780 = vmatprep.mubr.bf16.mxu1 %v15221_v31  ;;  %v14281_v38 = vadd.f32 %v10107_v44, %v8335_v45 }
 0x567   :  { %v10108_v8 = vpop.f32.mrb[60].mxu1 }
 0x568   :  { %v10109_v48 = vpop.f32.mrb[61].mxu1 }
 0x569   :  { %v10110_v36 = vadd.f32 %v10109_v48, %v10108_v8  ;;  %v10111_v18 = vpop.f32.mrb[62].mxu1  ;;  %v15225_v8 = vld [vmem:[#allocation100_spill] sm:$0xff] }
 0x56a   :  { %v10112_v60 = vpop.f32.mrb[63].mxu1 }
 0x56b   :  { %v10113_v58 = vadd.f32 %v10112_v60, %v10111_v18  ;;  %v14287_v55 = vadd.f32 %v10110_v36, %v8340_v52 }
 0x56c   :  { %7739 = vmatmul.mubr.bf16.gmra.mrb[232].mxu0 %v15222_v34  ;;  %8781 = vmatmul.mubr.bf16.gmra.mrb[168].mxu1 %v15222_v34  ;;  %v15227_v34 = vld [vmem:[#allocation103_spill] sm:$0xff] }
 0x56d   :  { %7748 = vmatprep.mubr.bf16.mxu0 %v15223_v12  ;;  %8788 = vmatprep.mubr.bf16.mxu1 %v15223_v12  ;;  %v14293_v20 = vadd.f32 %v10113_v58, %v8343_v50  ;;  %v15226_v58 = vld [vmem:[#allocation99_spill] sm:$0xff] }
 0x56f   :  { %v10130_v46 = vpop.f32.mrb[64].mxu1 }
 0x570   :  { %v10131_v33 = vpop.f32.mrb[65].mxu1 }
 0x571   :  { %v10132_v54 = vadd.f32 %v10131_v33, %v10130_v46  ;;  %v10133_v45 = vpop.f32.mrb[66].mxu1 }
 0x572   :  { %v10134_v44 = vpop.f32.mrb[67].mxu1 }
 0x573   :  { %v14296_v9 = vadd.f32 %v10132_v54, %v14107_v4  ;;  %v10135_v32 = vadd.f32 %v10134_v44, %v10133_v45 }
 0x574   :  { %7749 = vmatmul.mubr.bf16.gmra.mrb[236].mxu0 %v15224_v35  ;;  %8789 = vmatmul.mubr.bf16.gmra.mrb[172].mxu1 %v15224_v35  ;;  %v15229_v35 = vld [vmem:[#allocation106_spill] sm:$0xff] }
 0x575   :  { %v14301_v31 = vadd.f32 %v10135_v32, %v14113_v40  ;;  %7758 = vmatprep.mubr.bf16.mxu0 %v15225_v8  ;;  %8796 = vmatprep.mubr.bf16.mxu1 %v15225_v8  ;;  %v15228_v32 = vld [vmem:[#allocation102_spill] sm:$0xff] }
 0x577   :  { %v10136_v48 = vpop.f32.mrb[68].mxu1 }
 0x578   :  { %v10137_v52 = vpop.f32.mrb[69].mxu1 }
 0x579   :  { %v10138_v36 = vadd.f32 %v10137_v52, %v10136_v48  ;;  %v10139_v18 = vpop.f32.mrb[70].mxu1 }
 0x57a   :  { %v10140_v60 = vpop.f32.mrb[71].mxu1 }
 0x57b   :  { %v14306_v4 = vadd.f32 %v10138_v36, %v14119_v42  ;;  %v10141_v50 = vadd.f32 %v10140_v60, %v10139_v18 }
 0x57c   :  { %7759 = vmatmul.mubr.bf16.gmra.mrb[240].mxu0 %v15226_v58  ;;  %8797 = vmatmul.mubr.bf16.gmra.mrb[176].mxu1 %v15226_v58 }
 0x57d   :  { %v14311_v40 = vadd.f32 %v10141_v50, %v14125_v37  ;;  %7768 = vmatprep.mubr.bf16.mxu0 %v15227_v34  ;;  %8804 = vmatprep.mubr.bf16.mxu1 %v15227_v34  ;;  %v15230_v50 = vld [vmem:[#allocation105_spill] sm:$0xff] }
 0x57f   :  { %v10142_v12 = vpop.f32.mrb[72].mxu1 }
 0x580   :  { %v10143_v46 = vpop.f32.mrb[73].mxu1 }
 0x581   :  { %v10144_v33 = vadd.f32 %v10143_v46, %v10142_v12  ;;  %v10145_v54 = vpop.f32.mrb[74].mxu1 }
 0x582   :  { %v10146_v45 = vpop.f32.mrb[75].mxu1 }
 0x583   :  { %v14316_v42 = vadd.f32 %v10144_v33, %v14131_v39  ;;  %v10147_v44 = vadd.f32 %v10146_v45, %v10145_v54 }
 0x584   :  { %7769 = vmatmul.mubr.bf16.gmra.mrb[244].mxu0 %v15228_v32  ;;  %8805 = vmatmul.mubr.bf16.gmra.mrb[180].mxu1 %v15228_v32 }
 0x585   :  { %v14321_v37 = vadd.f32 %v10147_v44, %v14137_v3  ;;  %7778 = vmatprep.mubr.bf16.mxu0 %v15229_v35  ;;  %8812 = vmatprep.mubr.bf16.mxu1 %v15229_v35 }
 0x587   :  { %v10148_v8 = vpop.f32.mrb[76].mxu1 }
 0x588   :  { %v10149_v48 = vpop.f32.mrb[77].mxu1 }
 0x589   :  { %v10150_v52 = vadd.f32 %v10149_v48, %v10148_v8  ;;  %v10151_v36 = vpop.f32.mrb[78].mxu1  ;;  %v12544_v8 = vld [vmem:[#allocation8 + $0x788] ss:$12 sps:$4 sm:$0xff]  }
 0x58a   :  { %v10152_v18 = vpop.f32.mrb[79].mxu1 }
 0x58b   :  { %v14326_v39 = vadd.f32 %v10150_v52, %v14143_v63  ;;  %v10153_v60 = vadd.f32 %v10152_v18, %v10151_v36  ;;  %v12550_v36 = vld [vmem:[#allocation8 + $0x79c] ss:$12 sps:$4 sm:$0xff]   ;;  %v12552_v18 = vld [vmem:[#allocation8 + $0x7a0] ss:$12 sps:$4 sm:$0xff]  }
 0x58c   :  { %7779 = vmatmul.mubr.bf16.gmra.mrb[248].mxu0 %v15230_v50  ;;  %8813 = vmatmul.mubr.bf16.gmra.mrb[184].mxu1 %v15230_v50  ;;  %v12559_v50 = vld [vmem:[#allocation8 + $0x878] ss:$12 sps:$4 sm:$0xff]  }
 0x58d   :  { %v14331_v3 = vadd.f32 %v10153_v60, %v14149_v23  ;;  %7788 = vmatprep.mubr.bf16.mxu0 %v13583_v56  ;;  %8820 = vmatprep.mubr.bf16.mxu1 %v13583_v56  ;;  %v12555_v60 = vld [vmem:[#allocation8 + $0x7b4] ss:$12 sps:$4 sm:$0xff]  }
 0x58f   :  { %v10154_v58 = vpop.f32.mrb[80].mxu1 }
 0x590   :  { %v10155_v34 = vpop.f32.mrb[81].mxu1 }
 0x591   :  { %v10156_v12 = vadd.f32 %v10155_v34, %v10154_v58  ;;  %v10157_v46 = vpop.f32.mrb[82].mxu1 }
 0x592   :  { %v10158_v33 = vpop.f32.mrb[83].mxu1 }
 0x593   :  { %v14336_v63 = vadd.f32 %v10156_v12, %v14155_v7  ;;  %v10159_v54 = vadd.f32 %v10158_v33, %v10157_v46  ;;  %v12545_v7 = vld [vmem:[#allocation8 + $0x780] ss:$12 sps:$4 sm:$0xff]   ;;  %v12560_v46 = vld [vmem:[#allocation8 + $0x7b8] ss:$12 sps:$4 sm:$0xff]  }
 0x594   :  { %7789 = vmatmul.mubr.bf16.gmra.mrb[252].mxu0 %v13579_v0  ;;  %8821 = vmatmul.mubr.bf16.gmra.mrb[188].mxu1 %v13579_v0  ;;  %v12551_v0 = vld [vmem:[#allocation8 + $0x860] ss:$12 sps:$4 sm:$0xff]  }
 0x595   :  { %v14341_v23 = vadd.f32 %v10159_v54, %v14161_v13  ;;  %7831 = vmatprep.mubr.bf16.mxu0 %v13668_v24  ;;  %8861 = vmatprep.mubr.bf16.mxu1 %v13668_v24  ;;  %v12548_v24 = vld [vmem:[#allocation8 + $0x798] ss:$12 sps:$4 sm:$0xff]  }
 0x596   :  { %v12558_v54 = vld [vmem:[#allocation8 + $0x7cc] ss:$12 sps:$4 sm:$0xff]  }
 0x597   :  { %v10160_v56 = vpop.f32.mrb[84].mxu1 }
 0x598   :  { %v10161_v45 = vpop.f32.mrb[85].mxu1 }
 0x599   :  { %v10162_v44 = vadd.f32 %v10161_v45, %v10160_v56  ;;  %v10163_v32 = vpop.f32.mrb[86].mxu1  ;;  %v12567_v56 = vld [vmem:[#allocation8 + $0x890] ss:$12 sps:$4 sm:$0xff]  }
 0x59a   :  { %v10164_v35 = vpop.f32.mrb[87].mxu1 }
 0x59b   :  { %v14346_v48 = vadd.f32 %v10162_v44, %v14167_v30  ;;  %v10165_v52 = vadd.f32 %v10164_v35, %v10163_v32  ;;  %v12556_v44 = vld [vmem:[#allocation8 + $0x7c8] ss:$12 sps:$4 sm:$0xff]   ;;  %v12563_v35 = vld [vmem:[#allocation8 + $0x7e4] ss:$12 sps:$4 sm:$0xff]  }
 0x59c   :  { %7832 = vmatmul.mubr.bf16.vlgmr.msra.gmra.mrb[192].mxu0 %v13664_v19  ;;  %8862 = vmatmul.mubr.bf16.vlgmr.msra.gmra.mrb[192].mxu1 %v13664_v19 }
 0x59d   :  { %v14351_v13 = vadd.f32 %v10165_v52, %v14173_v26  ;;  %7841 = vmatprep.mubr.bf16.mxu0 %v13688_v10  ;;  %8869 = vmatprep.mubr.bf16.mxu1 %v13688_v10  ;;  %v12553_v26 = vld [vmem:[#allocation8 + $0x7b0] ss:$12 sps:$4 sm:$0xff]  }
 0x59e   :  { %10451 = vmatpush3.bf16.msra.mxu1 %v12544_v8  ;;  %7993 = vmatpush1.bf16.msra.mxu0 %v12545_v7  ;;  %v12575_v8 = vld [vmem:[#allocation8 + $0x8a8] ss:$12 sps:$4 sm:$0xff]  }
 0x59f   :  { %v10166_v30 = vpop.f32.mrb[88].mxu1  ;;  %7994 = vmatprep.subr.bf16.mxu0 %v12550_v36  ;;  %10452 = vmatprep.subr.bf16.mxu1 %v12551_v0  ;;  %v12576_v0 = vld [vmem:[#allocation8 + $0x7e8] ss:$12 sps:$4 sm:$0xff]  }
 0x5a0   :  { %v10167_v58 = vpop.f32.mrb[89].mxu1 }
 0x5a1   :  { %v10168_v34 = vadd.f32 %v10167_v58, %v10166_v30  ;;  %v10169_v12 = vpop.f32.mrb[90].mxu1  ;;  %v12583_v30 = vld [vmem:[#allocation8 + $0x8c0] ss:$12 sps:$4 sm:$0xff]  }
 0x5a2   :  { %v10170_v19 = vpop.f32.mrb[91].mxu1  ;;  %7995 = vmatpush1.bf16.msra.mxu0 %v12548_v24  ;;  %10453 = vmatpush3.bf16.msra.mxu1 %v12552_v18  ;;  %v12566_v18 = vld [vmem:[#allocation8 + $0x7fc] ss:$12 sps:$4 sm:$0xff]  }
 0x5a3   :  { %v14356_v33 = vadd.f32 %v10168_v34, %v14179_v5  ;;  %v10171_v10 = vadd.f32 %v10170_v19, %v10169_v12  ;;  %7996 = vmatprep.subr.bf16.mxu0 %v12555_v60  ;;  %10454 = vmatprep.subr.bf16.mxu1 %v12559_v50  ;;  %v12568_v5 = vld [vmem:[#allocation8 + $0x7d0] ss:$12 sps:$4 sm:$0xff]   ;;  %v12564_v50 = vld [vmem:[#allocation8 + $0x7f8] ss:$12 sps:$4 sm:$0xff]   ;;  %v12571_v34 = vld [vmem:[#allocation8 + $0x814] ss:$12 sps:$4 sm:$0xff]  }
 0x5a4   :  { %7842 = vmatmul.mubr.bf16.gmra.mrb[196].mxu0 %v13684_v25  ;;  %8870 = vmatmul.mubr.bf16.gmra.mrb[196].mxu1 %v13684_v25  ;;  %v12591_v12 = vld [vmem:[#allocation8 + $0x8d8] ss:$12 sps:$4 sm:$0xff]  }
 0x5a5   :  { %v14361_v45 = vadd.f32 %v10171_v10, %v14185_v28  ;;  %7851 = vmatprep.mubr.bf16.mxu0 %v13708_v57  ;;  %8877 = vmatprep.mubr.bf16.mxu1 %v13708_v57  ;;  %v12561_v28 = vld [vmem:[#allocation8 + $0x7e0] ss:$12 sps:$4 sm:$0xff]   ;;  %v12592_v10 = vld [vmem:[#allocation8 + $0x818] ss:$12 sps:$4 sm:$0xff]  }
 0x5a6   :  { %7997 = vmatpush1.bf16.msra.mxu0 %v12553_v26  ;;  %10455 = vmatpush3.bf16.msra.mxu1 %v12560_v46 }
 0x5a7   :  { %v10172_v32 = vpop.f32.mrb[92].mxu1  ;;  %7998 = vmatprep.subr.bf16.mxu0 %v12558_v54  ;;  %10456 = vmatprep.subr.bf16.mxu1 %v12567_v56  ;;  %v12574_v56 = vld [vmem:[#allocation8 + $0x82c] ss:$12 sps:$4 sm:$0xff]  }
 0x5a8   :  { %v10173_v7 = vpop.f32.mrb[93].mxu1 }
 0x5a9   :  { %v10174_v52 = vadd.f32 %v10173_v7, %v10172_v32  ;;  %v10175_v36 = vpop.f32.mrb[94].mxu1  ;;  %v12572_v32 = vld [vmem:[#allocation8 + $0x828] ss:$12 sps:$4 sm:$0xff]  }
 0x5aa   :  { %v10176_v25 = vpop.f32.mrb[95].mxu1  ;;  %7999 = vmatpush1.bf16.msra.mxu0 %v12556_v44  ;;  %10457 = vmatpush3.bf16.msra.mxu1 %v12568_v5  ;;  %v12599_v44 = vld [vmem:[#allocation8 + $0x8f0] ss:$12 sps:$4 sm:$0xff]  }
 0x5ab   :  { %v14366_v24 = vadd.f32 %v10174_v52, %v14191_v11  ;;  %v10177_v57 = vadd.f32 %v10176_v25, %v10175_v36  ;;  %8000 = vmatprep.subr.bf16.mxu0 %v12563_v35  ;;  %10458 = vmatprep.subr.bf16.mxu1 %v12575_v8  ;;  %v12584_v11 = vld [vmem:[#allocation8 + $0x800] ss:$12 sps:$4 sm:$0xff]   ;;  %v12579_v8 = vld [vmem:[#allocation8 + $0x844] ss:$12 sps:$4 sm:$0xff]  }
 0x5ac   :  { %7852 = vmatmul.mubr.bf16.gmra.mrb[200].mxu0 %v13704_v14  ;;  %8878 = vmatmul.mubr.bf16.gmra.mrb[200].mxu1 %v13704_v14 }
 0x5ad   :  { %v14371_v60 = vadd.f32 %v10177_v57, %v14197_v43  ;;  %7861 = vmatprep.mubr.bf16.mxu0 %v13728_v29  ;;  %8885 = vmatprep.mubr.bf16.mxu1 %v13728_v29  ;;  %v12569_v43 = vld [vmem:[#allocation8 + $0x810] ss:$12 sps:$4 sm:$0xff]   ;;  %v12580_v57 = vld [vmem:[#allocation8 + $0x858] ss:$12 sps:$4 sm:$0xff]  }
 0x5ae   :  { %8001 = vmatpush1.bf16.msra.mxu0 %v12561_v28  ;;  %10459 = vmatpush3.bf16.msra.mxu1 %v12576_v0 }
 0x5af   :  { %v10178_v58 = vpop.f32.mrb[96].mxu1  ;;  %8002 = vmatprep.subr.bf16.mxu0 %v12566_v18  ;;  %10460 = vmatprep.subr.bf16.mxu1 %v12583_v30 }
 0x5b0   :  { %v10179_v19 = vpop.f32.mrb[97].mxu1 }
 0x5b1   :  { %v10180_v26 = vadd.f32 %v10179_v19, %v10178_v58  ;;  %v10181_v46 = vpop.f32.mrb[98].mxu1  ;;  %v15231_v19 = vld [vmem:[#allocation18_spill] sm:$0xff] }
 0x5b2   :  { %v10182_v14 = vpop.f32.mrb[99].mxu1  ;;  %8003 = vmatpush1.bf16.msra.mxu0 %v12564_v50  ;;  %10461 = vmatpush3.bf16.msra.mxu1 %v12584_v11 }
 0x5b3   :  { %v14376_v54 = vadd.f32 %v10180_v26, %v14203_v59  ;;  %v10183_v29 = vadd.f32 %v10182_v14, %v10181_v46  ;;  %8004 = vmatprep.subr.bf16.mxu0 %v12571_v34  ;;  %10462 = vmatprep.subr.bf16.mxu1 %v12591_v12  ;;  %v12600_v59 = vld [vmem:[#allocation8 + $0x830] ss:$12 sps:$4 sm:$0xff]   ;;  %v12590_v12 = vld [vmem:[#allocation8 + $0x88c] ss:$12 sps:$4 sm:$0xff]   ;;  %v12588_v46 = vld [vmem:[#allocation8 + $0x888] ss:$12 sps:$4 sm:$0xff]  }
 0x5b4   :  { %7862 = vmatmul.mubr.bf16.gmra.mrb[204].mxu0 %v13724_v51  ;;  %8886 = vmatmul.mubr.bf16.gmra.mrb[204].mxu1 %v13724_v51  ;;  %v12577_v51 = vld [vmem:[#allocation8 + $0x840] ss:$12 sps:$4 sm:$0xff]   ;;  %v12585_v34 = vld [vmem:[#allocation8 + $0x870] ss:$12 sps:$4 sm:$0xff]  }
 0x5b5   :  { %v14381_v5 = vadd.f32 %v10183_v29, %v14209_v27  ;;  %7871 = vmatprep.mubr.bf16.mxu0 %v13748_v17  ;;  %8893 = vmatprep.mubr.bf16.mxu1 %v13748_v17  ;;  %v12582_v17 = vld [vmem:[#allocation8 + $0x85c] ss:$12 sps:$4 sm:$0xff]  }
 0x5b6   :  { %8005 = vmatpush1.bf16.msra.mxu0 %v12569_v43  ;;  %10463 = vmatpush3.bf16.msra.mxu1 %v12592_v10  ;;  %v15232_v26 = vld [vmem:[#allocation115_spill] sm:$0xff] }
 0x5b7   :  { %v10184_v35 = vpop.f32.mrb[100].mxu1  ;;  %8006 = vmatprep.subr.bf16.mxu0 %v12574_v56  ;;  %10464 = vmatprep.subr.bf16.mxu1 %v12599_v44  ;;  %v12593_v44 = vld [vmem:[#allocation8 + $0x8a0] ss:$12 sps:$4 sm:$0xff]  }
 0x5b8   :  { %v10185_v7 = vpop.f32.mrb[101].mxu1 }
 0x5b9   :  { %v10186_v52 = vadd.f32 %v10185_v7, %v10184_v35  ;;  %v10187_v36 = vpop.f32.mrb[102].mxu1  ;;  %v15233_v35 = vld [vmem:[#allocation20_spill] sm:$0xff]  ;;  %v15234_v7 = vld [vmem:[#allocation117_spill] sm:$0xff] }
 0x5ba   :  { %v10188_v25 = vpop.f32.mrb[103].mxu1  ;;  %8007 = vmatpush1.bf16.msra.mxu0 %v12572_v32  ;;  %10465 = vmatpush3.bf16.msra.mxu1 %v12600_v59  ;;  %v12598_v59 = vld [vmem:[#allocation8 + $0x8bc] ss:$12 sps:$4 sm:$0xff]  }
 0x5bb   :  { %v14386_v27 = vadd.f32 %v10186_v52, %v14215_v61  ;;  %v10189_v28 = vadd.f32 %v10188_v25, %v10187_v36  ;;  %8008 = vmatprep.subr.bf16.mxu0 %v12579_v8  ;;  %v12587_v61 = vld [vmem:[#allocation8 + $0x874] ss:$12 sps:$4 sm:$0xff]   ;;  %v12596_v52 = vld [vmem:[#allocation8 + $0x8b8] ss:$12 sps:$4 sm:$0xff]  }
 0x5bc   :  { %7872 = vmatmul.mubr.bf16.gmra.mrb[208].mxu0 %v13744_v41  ;;  %8894 = vmatmul.mubr.bf16.gmra.mrb[208].mxu1 %v13744_v41 }
 0x5bd   :  { %v14391_v0 = vadd.f32 %v10189_v28, %v14221_v22  ;;  %7881 = vmatprep.mubr.bf16.mxu0 %v13768_v49  ;;  %8901 = vmatprep.mubr.bf16.mxu1 %v13768_v49 }
 0x5be   :  { %8009 = vmatpush1.bf16.msra.mxu0 %v12577_v51 }
 0x5bf   :  { %v10190_v18 = vpop.f32.mrb[104].mxu1  ;;  %8010 = vmatprep.subr.bf16.mxu0 %v12582_v17 }
 0x5c0   :  { %v10191_v30 = vpop.f32.mrb[105].mxu1 }
 0x5c1   :  { %v10192_v50 = vadd.f32 %v10191_v30, %v10190_v18  ;;  %v10193_v11 = vpop.f32.mrb[106].mxu1  ;;  %v15235_v30 = vld [vmem:[#allocation22_spill] sm:$0xff] }
 0x5c2   :  { %v10194_v58 = vpop.f32.mrb[107].mxu1  ;;  %8011 = vmatpush1.bf16.msra.mxu0 %v12580_v57  ;;  %v12601_v57 = vld [vmem:[#allocation8 + $0x8d0] ss:$12 sps:$4 sm:$0xff]  }
 0x5c3   :  { %v14396_v41 = vadd.f32 %v10192_v50, %v14227_v47  ;;  %v10195_v22 = vadd.f32 %v10194_v58, %v10193_v11  ;;  %8012 = vmatprep.subr.bf16.mxu0 %v12587_v61  ;;  %v12595_v47 = vld [vmem:[#allocation8 + $0x8a4] ss:$12 sps:$4 sm:$0xff]   ;;  %v12606_v61 = vld [vmem:[#allocation8 + $0x8ec] ss:$12 sps:$4 sm:$0xff]   ;;  %v15236_v11 = vld [vmem:[#allocation119_spill] sm:$0xff] }
 0x5c4   :  { %7882 = vmatmul.mubr.bf16.gmra.mrb[212].mxu0 %v15231_v19  ;;  %8902 = vmatmul.mubr.bf16.gmra.mrb[212].mxu1 %v15231_v19  ;;  %v12604_v58 = vld [vmem:[#allocation8 + $0x8e8] ss:$12 sps:$4 sm:$0xff]  }
 0x5c5   :  { %v14401_v49 = vadd.f32 %v10195_v22, %v14233_v16  ;;  %7891 = vmatprep.mubr.bf16.mxu0 %v15232_v26  ;;  %8909 = vmatprep.mubr.bf16.mxu1 %v15232_v26 }
 0x5c6   :  { %8013 = vmatpush1.bf16.msra.mxu0 %v12585_v34 }
 0x5c7   :  { %v10196_v14 = vpop.f32.mrb[108].mxu1  ;;  %8014 = vmatprep.subr.bf16.mxu0 %v12590_v12 }
 0x5c8   :  { %v10197_v43 = vpop.f32.mrb[109].mxu1 }
 0x5c9   :  { %v10198_v10 = vadd.f32 %v10197_v43, %v10196_v14  ;;  %v10199_v29 = vpop.f32.mrb[110].mxu1  ;;  %v15237_v14 = vld [vmem:[#allocation24_spill] sm:$0xff] }
 0x5ca   :  { %v10200_v56 = vpop.f32.mrb[111].mxu1  ;;  %8015 = vmatpush1.bf16.msra.mxu0 %v12588_v46 }
 0x5cb   :  { %v14406_v32 = vadd.f32 %v10198_v10, %v14239_v15  ;;  %v10201_v16 = vadd.f32 %v10200_v56, %v10199_v29  ;;  %8016 = vmatprep.subr.bf16.mxu0 %v12595_v47  ;;  %v12603_v15 = vld [vmem:[#allocation8 + $0x8d4] ss:$12 sps:$4 sm:$0xff]   ;;  %v15238_v47 = vld [vmem:[#allocation121_spill] sm:$0xff] }
 0x5cc   :  { %7892 = vmatmul.mubr.bf16.gmra.mrb[216].mxu0 %v15233_v35  ;;  %8910 = vmatmul.mubr.bf16.gmra.mrb[216].mxu1 %v15233_v35  ;;  %v15240_v35 = vld [vmem:[#allocation123_spill] sm:$0xff] }
 0x5cd   :  { %v14411_v8 = vadd.f32 %v10201_v16, %v14245_v1  ;;  %7901 = vmatprep.mubr.bf16.mxu0 %v15234_v7  ;;  %8917 = vmatprep.mubr.bf16.mxu1 %v15234_v7 }
 0x5ce   :  { %8017 = vmatpush1.bf16.msra.mxu0 %v12593_v44 }
 0x5cf   :  { %v10202_v36 = vpop.f32.mrb[112].mxu1  ;;  %8018 = vmatprep.subr.bf16.mxu0 %v12598_v59  ;;  %v15239_v59 = vld [vmem:[#allocation26_spill] sm:$0xff] }
 0x5d0   :  { %v10203_v25 = vpop.f32.mrb[113].mxu1 }
 0x5d1   :  { %v10204_v51 = vadd.f32 %v10203_v25, %v10202_v36  ;;  %v10205_v28 = vpop.f32.mrb[114].mxu1 }
 0x5d2   :  { %v10206_v17 = vpop.f32.mrb[115].mxu1  ;;  %8019 = vmatpush1.bf16.msra.mxu0 %v12596_v52 }
 0x5d3   :  { %v14416_v18 = vadd.f32 %v10204_v51, %v14251_v2  ;;  %v10207_v1 = vadd.f32 %v10206_v17, %v10205_v28  ;;  %8020 = vmatprep.subr.bf16.mxu0 %v12603_v15  ;;  %v15241_v28 = vld [vmem:[#allocation28_spill] sm:$0xff]  ;;  %v15242_v17 = vld [vmem:[#allocation125_spill] sm:$0xff] }
 0x5d4   :  { %7902 = vmatmul.mubr.bf16.gmra.mrb[220].mxu0 %v15235_v30  ;;  %8918 = vmatmul.mubr.bf16.gmra.mrb[220].mxu1 %v15235_v30 }
 0x5d5   :  { %v14421_v50 = vadd.f32 %v10207_v1, %v14257_v21  ;;  %7911 = vmatprep.mubr.bf16.mxu0 %v15236_v11  ;;  %8925 = vmatprep.mubr.bf16.mxu1 %v15236_v11 }
 0x5d6   :  { %8021 = vmatpush1.bf16.msra.mxu0 %v12601_v57 }
 0x5d7   :  { %v10208_v34 = vpop.f32.mrb[116].mxu1  ;;  %8022 = vmatprep.subr.bf16.mxu0 %v12606_v61 }
 0x5d8   :  { %v10209_v2 = vpop.f32.mrb[117].mxu1 }
 0x5d9   :  { %v10210_v22 = vadd.f32 %v10209_v2, %v10208_v34  ;;  %v10211_v12 = vpop.f32.mrb[118].mxu1  ;;  %v15243_v34 = vld [vmem:[#allocation30_spill] sm:$0xff]  ;;  %v15244_v2 = vld [vmem:[#allocation127_spill] sm:$0xff] }
 0x5da   :  { %v10212_v19 = vpop.f32.mrb[119].mxu1  ;;  %8023 = vmatpush1.bf16.msra.mxu0 %v12604_v58 }
 0x5db   :  { %v14426_v26 = vadd.f32 %v10210_v22, %v14263_v62  ;;  %v10213_v46 = vadd.f32 %v10212_v19, %v10211_v12 }
 0x5dc   :  { %7912 = vmatmul.mubr.bf16.gmra.mrb[224].mxu0 %v15237_v14  ;;  %8926 = vmatmul.mubr.bf16.gmra.mrb[224].mxu1 %v15237_v14 }
 0x5dd   :  { %v14431_v21 = vadd.f32 %v10213_v46, %v14269_v6  ;;  %7921 = vmatprep.mubr.bf16.mxu0 %v15238_v47  ;;  %8933 = vmatprep.mubr.bf16.mxu1 %v15238_v47 }
 0x5df   :  { %v10214_v43 = vpop.f32.mrb[120].mxu1 }
 0x5e0   :  { %v10215_v10 = vpop.f32.mrb[121].mxu1 }
 0x5e1   :  { %v10216_v29 = vadd.f32 %v10215_v10, %v10214_v43  ;;  %v10217_v56 = vpop.f32.mrb[122].mxu1  ;;  %v15245_v43 = vld [vmem:[#allocation32_spill] sm:$0xff]  ;;  %v15246_v10 = vld [vmem:[#allocation129_spill] sm:$0xff] }
 0x5e2   :  { %v10218_v44 = vpop.f32.mrb[123].mxu1 }
 0x5e3   :  { %v14436_v62 = vadd.f32 %v10216_v29, %v14275_v53  ;;  %v10219_v16 = vadd.f32 %v10218_v44, %v10217_v56 }
 0x5e4   :  { %7922 = vmatmul.mubr.bf16.gmra.mrb[228].mxu0 %v15239_v59  ;;  %8934 = vmatmul.mubr.bf16.gmra.mrb[228].mxu1 %v15239_v59 }
 0x5e5   :  { %v14441_v6 = vadd.f32 %v10219_v16, %v14281_v38  ;;  %7931 = vmatprep.mubr.bf16.mxu0 %v15240_v35  ;;  %8941 = vmatprep.mubr.bf16.mxu1 %v15240_v35 }
 0x5e7   :  { %v10220_v7 = vpop.f32.mrb[124].mxu1 }
 0x5e8   :  { %v10221_v52 = vpop.f32.mrb[125].mxu1 }
 0x5e9   :  { %v10222_v36 = vadd.f32 %v10221_v52, %v10220_v7  ;;  %v10223_v15 = vpop.f32.mrb[126].mxu1  ;;  %v15247_v7 = vld [vmem:[#allocation34_spill] sm:$0xff]  ;;  %v15248_v52 = vld [vmem:[#allocation131_spill] sm:$0xff] }
 0x5ea   :  { %v10224_v25 = vpop.f32.mrb[127].mxu1 }
 0x5eb   :  { %v14446_v53 = vadd.f32 %v10222_v36, %v14287_v55  ;;  %v10225_v51 = vadd.f32 %v10224_v25, %v10223_v15 }
 0x5ec   :  { %7932 = vmatmul.mubr.bf16.gmra.mrb[232].mxu0 %v15241_v28  ;;  %8942 = vmatmul.mubr.bf16.gmra.mrb[232].mxu1 %v15241_v28 }
 0x5ed   :  { %v14451_v38 = vadd.f32 %v10225_v51, %v14293_v20  ;;  %7941 = vmatprep.mubr.bf16.mxu0 %v15242_v17  ;;  %8949 = vmatprep.mubr.bf16.mxu1 %v15242_v17 }
 0x5ef   :  { %v10242_v57 = vpop.f32.mrb[128].mxu1 }
 0x5f0   :  { %v10243_v1 = vpop.f32.mrb[129].mxu1 }
 0x5f1   :  { %v10244_v61 = vadd.f32 %v10243_v1, %v10242_v57  ;;  %v10245_v30 = vpop.f32.mrb[130].mxu1  ;;  %v15249_v57 = vld [vmem:[#allocation36_spill] sm:$0xff]  ;;  %v15250_v1 = vld [vmem:[#allocation133_spill] sm:$0xff] }
 0x5f2   :  { %v10246_v11 = vpop.f32.mrb[131].mxu1 }
 0x5f3   :  { %v14456_v55 = vadd.f32 %v10244_v61, %v14296_v9  ;;  %v10247_v58 = vadd.f32 %v10246_v11, %v10245_v30 }
 0x5f4   :  { %7942 = vmatmul.mubr.bf16.gmra.mrb[236].mxu0 %v15243_v34  ;;  %8950 = vmatmul.mubr.bf16.gmra.mrb[236].mxu1 %v15243_v34 }
 0x5f5   :  { %v14461_v20 = vadd.f32 %v10247_v58, %v14301_v31  ;;  %7951 = vmatprep.mubr.bf16.mxu0 %v15244_v2  ;;  %8957 = vmatprep.mubr.bf16.mxu1 %v15244_v2 }
 0x5f7   :  { %v10248_v22 = vpop.f32.mrb[132].mxu1 }
 0x5f8   :  { %v10249_v12 = vpop.f32.mrb[133].mxu1 }
 0x5f9   :  { %v10250_v19 = vadd.f32 %v10249_v12, %v10248_v22  ;;  %v10251_v46 = vpop.f32.mrb[134].mxu1  ;;  %v15251_v22 = vld [vmem:[#allocation38_spill] sm:$0xff]  ;;  %v15252_v12 = vld [vmem:[#allocation108_spill] sm:$0xff] }
 0x5fa   :  { %v10252_v14 = vpop.f32.mrb[135].mxu1 }
 0x5fb   :  { %v14466_v9 = vadd.f32 %v10250_v19, %v14306_v4  ;;  %v10253_v47 = vadd.f32 %v10252_v14, %v10251_v46 }
 0x5fc   :  { %7952 = vmatmul.mubr.bf16.gmra.mrb[240].mxu0 %v15245_v43  ;;  %8958 = vmatmul.mubr.bf16.gmra.mrb[240].mxu1 %v15245_v43 }
 0x5fd   :  { %v14471_v31 = vadd.f32 %v10253_v47, %v14311_v40  ;;  %7961 = vmatprep.mubr.bf16.mxu0 %v15246_v10  ;;  %8965 = vmatprep.mubr.bf16.mxu1 %v15246_v10 }
 0x5ff   :  { %v10254_v29 = vpop.f32.mrb[136].mxu1 }
 0x600   :  { %v10255_v56 = vpop.f32.mrb[137].mxu1 }
 0x601   :  { %v10256_v44 = vadd.f32 %v10255_v56, %v10254_v29  ;;  %v10257_v16 = vpop.f32.mrb[138].mxu1  ;;  %v15253_v29 = vld [vmem:[#allocation107_spill] sm:$0xff]  ;;  %v15254_v56 = vld [vmem:[#allocation110_spill] sm:$0xff] }
 0x602   :  { %v10258_v59 = vpop.f32.mrb[139].mxu1 }
 0x603   :  { %v14476_v4 = vadd.f32 %v10256_v44, %v14316_v42  ;;  %v10259_v35 = vadd.f32 %v10258_v59, %v10257_v16 }
 0x604   :  { %7962 = vmatmul.mubr.bf16.gmra.mrb[244].mxu0 %v15247_v7  ;;  %8966 = vmatmul.mubr.bf16.gmra.mrb[244].mxu1 %v15247_v7 }
 0x605   :  { %v14481_v40 = vadd.f32 %v10259_v35, %v14321_v37  ;;  %7971 = vmatprep.mubr.bf16.mxu0 %v15248_v52  ;;  %8973 = vmatprep.mubr.bf16.mxu1 %v15248_v52 }
 0x607   :  { %v10260_v36 = vpop.f32.mrb[140].mxu1 }
 0x608   :  { %v10261_v15 = vpop.f32.mrb[141].mxu1 }
 0x609   :  { %v10262_v25 = vadd.f32 %v10261_v15, %v10260_v36  ;;  %v10263_v51 = vpop.f32.mrb[142].mxu1  ;;  %v15255_v36 = vld [vmem:[#allocation109_spill] sm:$0xff]  ;;  %v15256_v15 = vld [vmem:[#allocation112_spill] sm:$0xff] }
 0x60a   :  { %v10264_v28 = vpop.f32.mrb[143].mxu1 }
 0x60b   :  { %v14486_v42 = vadd.f32 %v10262_v25, %v14326_v39  ;;  %v10265_v17 = vadd.f32 %v10264_v28, %v10263_v51 }
 0x60c   :  { %7972 = vmatmul.mubr.bf16.gmra.mrb[248].mxu0 %v15249_v57  ;;  %8974 = vmatmul.mubr.bf16.gmra.mrb[248].mxu1 %v15249_v57 }
 0x60d   :  { %v14491_v37 = vadd.f32 %v10265_v17, %v14331_v3  ;;  %7981 = vmatprep.mubr.bf16.mxu0 %v15250_v1  ;;  %8981 = vmatprep.mubr.bf16.mxu1 %v15250_v1 }
 0x60f   :  { %v10266_v61 = vpop.f32.mrb[144].mxu1 }
 0x610   :  { %v10267_v30 = vpop.f32.mrb[145].mxu1 }
 0x611   :  { %v10268_v11 = vadd.f32 %v10267_v30, %v10266_v61  ;;  %v10269_v58 = vpop.f32.mrb[146].mxu1  ;;  %v15257_v61 = vld [vmem:[#allocation111_spill] sm:$0xff]  ;;  %v15258_v30 = vld [vmem:[#allocation113_spill] sm:$0xff] }
 0x612   :  { %v10270_v34 = vpop.f32.mrb[147].mxu1 }
 0x613   :  { %v14496_v39 = vadd.f32 %v10268_v11, %v14336_v63  ;;  %v10271_v2 = vadd.f32 %v10270_v34, %v10269_v58 }
 0x614   :  { %7982 = vmatmul.mubr.bf16.gmra.mrb[252].mxu0 %v15251_v22  ;;  %8982 = vmatmul.mubr.bf16.gmra.mrb[252].mxu1 %v15251_v22 }
 0x615   :  { %v14501_v3 = vadd.f32 %v10271_v2, %v14341_v23  ;;  %8024 = vmatprep.mubr.bf16.mxu0 %v15252_v12  ;;  %9022 = vmatprep.mubr.bf16.mxu1 %v15252_v12 }
 0x617   :  { %v10272_v19 = vpop.f32.mrb[148].mxu1 }
 0x618   :  { %v10273_v46 = vpop.f32.mrb[149].mxu1 }
 0x619   :  { %v10274_v14 = vadd.f32 %v10273_v46, %v10272_v19  ;;  %v10275_v47 = vpop.f32.mrb[150].mxu1  ;;  %v15259_v19 = vld [vmem:[#allocation49_spill] sm:$0xff]  ;;  %v15260_v46 = vld [vmem:[#allocation19_spill] sm:$0xff] }
 0x61a   :  { %v10276_v43 = vpop.f32.mrb[151].mxu1 }
 0x61b   :  { %v14506_v63 = vadd.f32 %v10274_v14, %v14346_v48  ;;  %v10277_v10 = vadd.f32 %v10276_v43, %v10275_v47 }
 0x61c   :  { %8025 = vmatmul.mubr.bf16.vlgmr.msra.gmra.mrb[192].mxu0 %v15253_v29  ;;  %9023 = vmatmul.mubr.bf16.vlgmr.msra.gmra.mrb[0].mxu1 %v15253_v29 }
 0x61d   :  { %v14511_v23 = vadd.f32 %v10277_v10, %v14351_v13  ;;  %8034 = vmatprep.mubr.bf16.mxu0 %v15254_v56  ;;  %9030 = vmatprep.mubr.bf16.mxu1 %v15254_v56 }
 0x61f   :  { %v10278_v44 = vpop.f32.mrb[152].mxu1 }
 0x620   :  { %v10279_v16 = vpop.f32.mrb[153].mxu1 }
 0x621   :  { %v10280_v59 = vadd.f32 %v10279_v16, %v10278_v44  ;;  %v10281_v35 = vpop.f32.mrb[154].mxu1  ;;  %v15261_v44 = vld [vmem:[#allocation48_spill] sm:$0xff]  ;;  %v15262_v16 = vld [vmem:[#allocation114_spill] sm:$0xff] }
 0x622   :  { %v10282_v7 = vpop.f32.mrb[155].mxu1 }
 0x623   :  { %v14516_v48 = vadd.f32 %v10280_v59, %v14356_v33  ;;  %v10283_v52 = vadd.f32 %v10282_v7, %v10281_v35 }
 0x624   :  { %8035 = vmatmul.mubr.bf16.gmra.mrb[196].mxu0 %v15255_v36  ;;  %9031 = vmatmul.mubr.bf16.gmra.mrb[4].mxu1 %v15255_v36 }
 0x625   :  { %v14521_v13 = vadd.f32 %v10283_v52, %v14361_v45  ;;  %8044 = vmatprep.mubr.bf16.mxu0 %v15256_v15  ;;  %9038 = vmatprep.mubr.bf16.mxu1 %v15256_v15 }
 0x627   :  { %v10284_v25 = vpop.f32.mrb[156].mxu1 }
 0x628   :  { %v10285_v51 = vpop.f32.mrb[157].mxu1 }
 0x629   :  { %v10286_v28 = vadd.f32 %v10285_v51, %v10284_v25  ;;  %v10287_v17 = vpop.f32.mrb[158].mxu1  ;;  %v15263_v25 = vld [vmem:[#allocation21_spill] sm:$0xff]  ;;  %v15264_v51 = vld [vmem:[#allocation116_spill] sm:$0xff] }
 0x62a   :  { %v10288_v57 = vpop.f32.mrb[159].mxu1 }
 0x62b   :  { %v14526_v33 = vadd.f32 %v10286_v28, %v14366_v24  ;;  %v10289_v1 = vadd.f32 %v10288_v57, %v10287_v17 }
 0x62c   :  { %8045 = vmatmul.mubr.bf16.gmra.mrb[200].mxu0 %v15257_v61  ;;  %9039 = vmatmul.mubr.bf16.gmra.mrb[8].mxu1 %v15257_v61 }
 0x62d   :  { %v14531_v45 = vadd.f32 %v10289_v1, %v14371_v60  ;;  %8054 = vmatprep.mubr.bf16.mxu0 %v15258_v30  ;;  %9046 = vmatprep.mubr.bf16.mxu1 %v15258_v30 }
 0x62f   :  { %v10290_v11 = vpop.f32.mrb[160].mxu1 }
 0x630   :  { %v10291_v58 = vpop.f32.mrb[161].mxu1 }
 0x631   :  { %v10292_v34 = vadd.f32 %v10291_v58, %v10290_v11  ;;  %v10293_v2 = vpop.f32.mrb[162].mxu1  ;;  %v15265_v11 = vld [vmem:[#allocation23_spill] sm:$0xff]  ;;  %v15266_v58 = vld [vmem:[#allocation118_spill] sm:$0xff] }
 0x632   :  { %v10294_v22 = vpop.f32.mrb[163].mxu1 }
 0x633   :  { %v14536_v24 = vadd.f32 %v10292_v34, %v14376_v54  ;;  %v10295_v12 = vadd.f32 %v10294_v22, %v10293_v2 }
 0x634   :  { %8055 = vmatmul.mubr.bf16.gmra.mrb[204].mxu0 %v15259_v19  ;;  %9047 = vmatmul.mubr.bf16.gmra.mrb[12].mxu1 %v15259_v19 }
 0x635   :  { %v14541_v60 = vadd.f32 %v10295_v12, %v14381_v5  ;;  %8064 = vmatprep.mubr.bf16.mxu0 %v15260_v46  ;;  %9054 = vmatprep.mubr.bf16.mxu1 %v15260_v46 }
 0x637   :  { %v10296_v14 = vpop.f32.mrb[164].mxu1 }
 0x638   :  { %v10297_v47 = vpop.f32.mrb[165].mxu1 }
 0x639   :  { %v10298_v43 = vadd.f32 %v10297_v47, %v10296_v14  ;;  %v10299_v10 = vpop.f32.mrb[166].mxu1  ;;  %v15267_v14 = vld [vmem:[#allocation25_spill] sm:$0xff]  ;;  %v15268_v47 = vld [vmem:[#allocation120_spill] sm:$0xff] }
 0x63a   :  { %v10300_v29 = vpop.f32.mrb[167].mxu1 }
 0x63b   :  { %v14546_v54 = vadd.f32 %v10298_v43, %v14386_v27  ;;  %v10301_v56 = vadd.f32 %v10300_v29, %v10299_v10 }
 0x63c   :  { %8065 = vmatmul.mubr.bf16.gmra.mrb[208].mxu0 %v15261_v44  ;;  %9055 = vmatmul.mubr.bf16.gmra.mrb[16].mxu1 %v15261_v44 }
 0x63d   :  { %v14551_v5 = vadd.f32 %v10301_v56, %v14391_v0  ;;  %8074 = vmatprep.mubr.bf16.mxu0 %v15262_v16  ;;  %9062 = vmatprep.mubr.bf16.mxu1 %v15262_v16 }
 0x63f   :  { %v10302_v59 = vpop.f32.mrb[168].mxu1 }
 0x640   :  { %v10303_v35 = vpop.f32.mrb[169].mxu1 }
 0x641   :  { %v10304_v7 = vadd.f32 %v10303_v35, %v10302_v59  ;;  %v10305_v52 = vpop.f32.mrb[170].mxu1  ;;  %v15269_v59 = vld [vmem:[#allocation27_spill] sm:$0xff]  ;;  %v15270_v35 = vld [vmem:[#allocation122_spill] sm:$0xff] }
 0x642   :  { %v10306_v36 = vpop.f32.mrb[171].mxu1 }
 0x643   :  { %v14556_v27 = vadd.f32 %v10304_v7, %v14396_v41  ;;  %v10307_v15 = vadd.f32 %v10306_v36, %v10305_v52 }
 0x644   :  { %8075 = vmatmul.mubr.bf16.gmra.mrb[212].mxu0 %v15263_v25  ;;  %9063 = vmatmul.mubr.bf16.gmra.mrb[20].mxu1 %v15263_v25 }
 0x645   :  { %v14561_v0 = vadd.f32 %v10307_v15, %v14401_v49  ;;  %8084 = vmatprep.mubr.bf16.mxu0 %v15264_v51  ;;  %9070 = vmatprep.mubr.bf16.mxu1 %v15264_v51 }
 0x647   :  { %v10308_v28 = vpop.f32.mrb[172].mxu1 }
 0x648   :  { %v10309_v17 = vpop.f32.mrb[173].mxu1 }
 0x649   :  { %v10310_v57 = vadd.f32 %v10309_v17, %v10308_v28  ;;  %v10311_v1 = vpop.f32.mrb[174].mxu1  ;;  %v15271_v28 = vld [vmem:[#allocation29_spill] sm:$0xff]  ;;  %v15272_v17 = vld [vmem:[#allocation124_spill] sm:$0xff] }
 0x64a   :  { %v10312_v61 = vpop.f32.mrb[175].mxu1 }
 0x64b   :  { %v14566_v41 = vadd.f32 %v10310_v57, %v14406_v32  ;;  %v10313_v30 = vadd.f32 %v10312_v61, %v10311_v1 }
 0x64c   :  { %8085 = vmatmul.mubr.bf16.gmra.mrb[216].mxu0 %v15265_v11  ;;  %9071 = vmatmul.mubr.bf16.gmra.mrb[24].mxu1 %v15265_v11 }
 0x64d   :  { %v14571_v49 = vadd.f32 %v10313_v30, %v14411_v8  ;;  %8094 = vmatprep.mubr.bf16.mxu0 %v15266_v58  ;;  %9078 = vmatprep.mubr.bf16.mxu1 %v15266_v58 }
 0x64f   :  { %v10314_v34 = vpop.f32.mrb[176].mxu1 }
 0x650   :  { %v10315_v2 = vpop.f32.mrb[177].mxu1 }
 0x651   :  { %v10316_v22 = vadd.f32 %v10315_v2, %v10314_v34  ;;  %v10317_v12 = vpop.f32.mrb[178].mxu1  ;;  %v15273_v34 = vld [vmem:[#allocation31_spill] sm:$0xff]  ;;  %v15274_v2 = vld [vmem:[#allocation126_spill] sm:$0xff] }
 0x652   :  { %v10318_v19 = vpop.f32.mrb[179].mxu1 }
 0x653   :  { %v14576_v32 = vadd.f32 %v10316_v22, %v14416_v18  ;;  %v10319_v46 = vadd.f32 %v10318_v19, %v10317_v12 }
 0x654   :  { %8095 = vmatmul.mubr.bf16.gmra.mrb[220].mxu0 %v15267_v14  ;;  %9079 = vmatmul.mubr.bf16.gmra.mrb[28].mxu1 %v15267_v14 }
 0x655   :  { %v14581_v8 = vadd.f32 %v10319_v46, %v14421_v50  ;;  %8104 = vmatprep.mubr.bf16.mxu0 %v15268_v47  ;;  %9086 = vmatprep.mubr.bf16.mxu1 %v15268_v47 }
 0x657   :  { %v10320_v43 = vpop.f32.mrb[180].mxu1 }
 0x658   :  { %v10321_v10 = vpop.f32.mrb[181].mxu1 }
 0x659   :  { %v10322_v29 = vadd.f32 %v10321_v10, %v10320_v43  ;;  %v10323_v56 = vpop.f32.mrb[182].mxu1  ;;  %v15275_v43 = vld [vmem:[#allocation33_spill] sm:$0xff]  ;;  %v15276_v10 = vld [vmem:[#allocation128_spill] sm:$0xff] }
 0x65a   :  { %v10324_v44 = vpop.f32.mrb[183].mxu1 }
 0x65b   :  { %v14586_v18 = vadd.f32 %v10322_v29, %v14426_v26  ;;  %v10325_v16 = vadd.f32 %v10324_v44, %v10323_v56 }
 0x65c   :  { %8105 = vmatmul.mubr.bf16.gmra.mrb[224].mxu0 %v15269_v59  ;;  %9087 = vmatmul.mubr.bf16.gmra.mrb[32].mxu1 %v15269_v59 }
 0x65d   :  { %v14591_v50 = vadd.f32 %v10325_v16, %v14431_v21  ;;  %8114 = vmatprep.mubr.bf16.mxu0 %v15270_v35  ;;  %9094 = vmatprep.mubr.bf16.mxu1 %v15270_v35 }
 0x65f   :  { %v10326_v7 = vpop.f32.mrb[184].mxu1 }
 0x660   :  { %v10327_v52 = vpop.f32.mrb[185].mxu1 }
 0x661   :  { %v10328_v36 = vadd.f32 %v10327_v52, %v10326_v7  ;;  %v10329_v15 = vpop.f32.mrb[186].mxu1  ;;  %v15277_v7 = vld [vmem:[#allocation35_spill] sm:$0xff]  ;;  %v15278_v52 = vld [vmem:[#allocation130_spill] sm:$0xff] }
 0x662   :  { %v10330_v25 = vpop.f32.mrb[187].mxu1 }
 0x663   :  { %v14596_v26 = vadd.f32 %v10328_v36, %v14436_v62  ;;  %v10331_v51 = vadd.f32 %v10330_v25, %v10329_v15 }
 0x664   :  { %8115 = vmatmul.mubr.bf16.gmra.mrb[228].mxu0 %v15271_v28  ;;  %9095 = vmatmul.mubr.bf16.gmra.mrb[36].mxu1 %v15271_v28 }
 0x665   :  { %v14601_v21 = vadd.f32 %v10331_v51, %v14441_v6  ;;  %8124 = vmatprep.mubr.bf16.mxu0 %v15272_v17  ;;  %9102 = vmatprep.mubr.bf16.mxu1 %v15272_v17 }
 0x667   :  { %v10332_v57 = vpop.f32.mrb[188].mxu1 }
 0x668   :  { %v10333_v1 = vpop.f32.mrb[189].mxu1 }
 0x669   :  { %v10334_v61 = vadd.f32 %v10333_v1, %v10332_v57  ;;  %v10335_v30 = vpop.f32.mrb[190].mxu1  ;;  %v15279_v57 = vld [vmem:[#allocation37_spill] sm:$0xff]  ;;  %v15280_v1 = vld [vmem:[#allocation132_spill] sm:$0xff] }
 0x66a   :  { %v10336_v11 = vpop.f32.mrb[191].mxu1 }
 0x66b   :  { %v14606_v62 = vadd.f32 %v10334_v61, %v14446_v53  ;;  %v10337_v58 = vadd.f32 %v10336_v11, %v10335_v30 }
 0x66c   :  { %8125 = vmatmul.mubr.bf16.gmra.mrb[232].mxu0 %v15273_v34  ;;  %9103 = vmatmul.mubr.bf16.gmra.mrb[40].mxu1 %v15273_v34 }
 0x66d   :  { %v14611_v6 = vadd.f32 %v10337_v58, %v14451_v38  ;;  %8134 = vmatprep.mubr.bf16.mxu0 %v15274_v2  ;;  %9110 = vmatprep.mubr.bf16.mxu1 %v15274_v2 }
 0x66f   :  { %v10354_v22 = vpop.f32.mrb[192].mxu1 }
 0x670   :  { %v10355_v12 = vpop.f32.mrb[193].mxu1 }
 0x671   :  { %v10356_v19 = vadd.f32 %v10355_v12, %v10354_v22  ;;  %v10357_v46 = vpop.f32.mrb[194].mxu1  ;;  %v15281_v22 = vld [vmem:[#allocation39_spill] sm:$0xff]  ;;  %v15282_v12 = vld [vmem:[#allocation134_spill] sm:$0xff] }
 0x672   :  { %v10358_v14 = vpop.f32.mrb[195].mxu1 }
 0x673   :  { %v14616_v53 = vadd.f32 %v10356_v19, %v14456_v55  ;;  %v10359_v47 = vadd.f32 %v10358_v14, %v10357_v46 }
 0x674   :  { %8135 = vmatmul.mubr.bf16.gmra.mrb[236].mxu0 %v15275_v43  ;;  %9111 = vmatmul.mubr.bf16.gmra.mrb[44].mxu1 %v15275_v43 }
 0x675   :  { %v14621_v38 = vadd.f32 %v10359_v47, %v14461_v20  ;;  %8144 = vmatprep.mubr.bf16.mxu0 %v15276_v10  ;;  %9118 = vmatprep.mubr.bf16.mxu1 %v15276_v10 }
 0x677   :  { %v10360_v29 = vpop.f32.mrb[196].mxu1 }
 0x678   :  { %v10361_v56 = vpop.f32.mrb[197].mxu1 }
 0x679   :  { %v10362_v44 = vadd.f32 %v10361_v56, %v10360_v29  ;;  %v10363_v16 = vpop.f32.mrb[198].mxu1  ;;  %v15283_v29 = vld [vmem:[#allocation41_spill] sm:$0xff] }
 0x67a   :  { %v10364_v59 = vpop.f32.mrb[199].mxu1 }
 0x67b   :  { %v14626_v55 = vadd.f32 %v10362_v44, %v14466_v9  ;;  %v10365_v35 = vadd.f32 %v10364_v59, %v10363_v16 }
 0x67c   :  { %8145 = vmatmul.mubr.bf16.gmra.mrb[240].mxu0 %v15277_v7  ;;  %9119 = vmatmul.mubr.bf16.gmra.mrb[48].mxu1 %v15277_v7 }
 0x67d   :  { %v14631_v20 = vadd.f32 %v10365_v35, %v14471_v31  ;;  %8154 = vmatprep.mubr.bf16.mxu0 %v15278_v52  ;;  %9126 = vmatprep.mubr.bf16.mxu1 %v15278_v52 }
 0x67f   :  { %v10366_v36 = vpop.f32.mrb[200].mxu1 }
 0x680   :  { %v10367_v15 = vpop.f32.mrb[201].mxu1 }
 0x681   :  { %v10368_v25 = vadd.f32 %v10367_v15, %v10366_v36  ;;  %v10369_v51 = vpop.f32.mrb[202].mxu1 }
 0x682   :  { %v10370_v28 = vpop.f32.mrb[203].mxu1 }
 0x683   :  { %v14636_v9 = vadd.f32 %v10368_v25, %v14476_v4  ;;  %v10371_v17 = vadd.f32 %v10370_v28, %v10369_v51 }
 0x684   :  { %8155 = vmatmul.mubr.bf16.gmra.mrb[244].mxu0 %v15279_v57  ;;  %9127 = vmatmul.mubr.bf16.gmra.mrb[52].mxu1 %v15279_v57 }
 0x685   :  { %v14641_v31 = vadd.f32 %v10371_v17, %v14481_v40  ;;  %8164 = vmatprep.mubr.bf16.mxu0 %v15280_v1  ;;  %9134 = vmatprep.mubr.bf16.mxu1 %v15280_v1 }
 0x687   :  { %v10372_v61 = vpop.f32.mrb[204].mxu1 }
 0x688   :  { %v10373_v30 = vpop.f32.mrb[205].mxu1 }
 0x689   :  { %v10374_v11 = vadd.f32 %v10373_v30, %v10372_v61  ;;  %v10375_v58 = vpop.f32.mrb[206].mxu1 }
 0x68a   :  { %v10376_v34 = vpop.f32.mrb[207].mxu1 }
 0x68b   :  { %v14646_v4 = vadd.f32 %v10374_v11, %v14486_v42  ;;  %v10377_v2 = vadd.f32 %v10376_v34, %v10375_v58 }
 0x68c   :  { %8165 = vmatmul.mubr.bf16.gmra.mrb[248].mxu0 %v15281_v22  ;;  %9135 = vmatmul.mubr.bf16.gmra.mrb[56].mxu1 %v15281_v22 }
 0x68d   :  { %v14651_v40 = vadd.f32 %v10377_v2, %v14491_v37  ;;  %8174 = vmatprep.mubr.bf16.mxu0 %v15282_v12  ;;  %9142 = vmatprep.mubr.bf16.mxu1 %v15282_v12 }
 0x68f   :  { %v10378_v19 = vpop.f32.mrb[208].mxu1 }
 0x690   :  { %v10379_v46 = vpop.f32.mrb[209].mxu1 }
 0x691   :  { %v10380_v14 = vadd.f32 %v10379_v46, %v10378_v19  ;;  %v10381_v47 = vpop.f32.mrb[210].mxu1 }
 0x692   :  { %v10382_v43 = vpop.f32.mrb[211].mxu1 }
 0x693   :  { %v14656_v42 = vadd.f32 %v10380_v14, %v14496_v39  ;;  %v10383_v10 = vadd.f32 %v10382_v43, %v10381_v47 }
 0x694   :  { %8175 = vmatmul.mubr.bf16.gmra.mrb[252].mxu0 %v15283_v29  ;;  %9143 = vmatmul.mubr.bf16.gmra.mrb[60].mxu1 %v15283_v29 }
 0x695   :  { %v14661_v37 = vadd.f32 %v10383_v10, %v14501_v3 }
 0x697   :  { %v10384_v56 = vpop.f32.mrb[212].mxu1 }
 0x698   :  { %v10385_v44 = vpop.f32.mrb[213].mxu1 }
 0x699   :  { %v10386_v16 = vadd.f32 %v10385_v44, %v10384_v56  ;;  %v10387_v59 = vpop.f32.mrb[214].mxu1 }
 0x69a   :  { %v10388_v35 = vpop.f32.mrb[215].mxu1 }
 0x69b   :  { %v14664_v7 = vadd.f32 %v10386_v16, %v14506_v63  ;;  %v10389_v52 = vadd.f32 %v10388_v35, %v10387_v59 }
 0x69d   :  { %v14667_v39 = vadd.f32 %v10389_v52, %v14511_v23 }
 0x69f   :  { %v10390_v36 = vpop.f32.mrb[216].mxu1 }
 0x6a0   :  { %v10391_v15 = vpop.f32.mrb[217].mxu1 }
 0x6a1   :  { %v10392_v25 = vadd.f32 %v10391_v15, %v10390_v36  ;;  %v10393_v51 = vpop.f32.mrb[218].mxu1 }
 0x6a2   :  { %v10394_v28 = vpop.f32.mrb[219].mxu1 }
 0x6a3   :  { %v14670_v3 = vadd.f32 %v10392_v25, %v14516_v48  ;;  %v10395_v17 = vadd.f32 %v10394_v28, %v10393_v51 }
 0x6a5   :  { %v14673_v57 = vadd.f32 %v10395_v17, %v14521_v13 }
 0x6a7   :  { %v10396_v1 = vpop.f32.mrb[220].mxu1 }
 0x6a8   :  { %v10397_v61 = vpop.f32.mrb[221].mxu1 }
 0x6a9   :  { %v10398_v63 = vadd.f32 %v10397_v61, %v10396_v1  ;;  %v10399_v30 = vpop.f32.mrb[222].mxu1 }
 0x6aa   :  { %v10400_v11 = vpop.f32.mrb[223].mxu1 }
 0x6ab   :  { %v14676_v23 = vadd.f32 %v10398_v63, %v14526_v33  ;;  %v10401_v58 = vadd.f32 %v10400_v11, %v10399_v30 }
 0x6ad   :  { %v14679_v34 = vadd.f32 %v10401_v58, %v14531_v45 }
 0x6af   :  { %v10402_v2 = vpop.f32.mrb[224].mxu1 }
 0x6b0   :  { %v10403_v22 = vpop.f32.mrb[225].mxu1 }
 0x6b1   :  { %v10404_v48 = vadd.f32 %v10403_v22, %v10402_v2  ;;  %v10405_v12 = vpop.f32.mrb[226].mxu1 }
 0x6b2   :  { %v10406_v19 = vpop.f32.mrb[227].mxu1 }
 0x6b3   :  { %v14682_v13 = vadd.f32 %v10404_v48, %v14536_v24  ;;  %v10407_v46 = vadd.f32 %v10406_v19, %v10405_v12 }
 0x6b5   :  { %v14685_v14 = vadd.f32 %v10407_v46, %v14541_v60 }
 0x6b7   :  { %v10408_v47 = vpop.f32.mrb[228].mxu1 }
 0x6b8   :  { %v10409_v43 = vpop.f32.mrb[229].mxu1 }
 0x6b9   :  { %v10410_v33 = vadd.f32 %v10409_v43, %v10408_v47  ;;  %v10411_v10 = vpop.f32.mrb[230].mxu1 }
 0x6ba   :  { %v10412_v29 = vpop.f32.mrb[231].mxu1 }
 0x6bb   :  { %v14688_v45 = vadd.f32 %v10410_v33, %v14546_v54  ;;  %v10413_v56 = vadd.f32 %v10412_v29, %v10411_v10 }
 0x6bd   :  { %v14691_v44 = vadd.f32 %v10413_v56, %v14551_v5 }
 0x6bf   :  { %v10414_v16 = vpop.f32.mrb[232].mxu1 }
 0x6c0   :  { %v10415_v59 = vpop.f32.mrb[233].mxu1 }
 0x6c1   :  { %v10416_v24 = vadd.f32 %v10415_v59, %v10414_v16  ;;  %v10417_v35 = vpop.f32.mrb[234].mxu1 }
 0x6c2   :  { %v10418_v52 = vpop.f32.mrb[235].mxu1 }
 0x6c3   :  { %v14694_v60 = vadd.f32 %v10416_v24, %v14556_v27  ;;  %v10419_v36 = vadd.f32 %v10418_v52, %v10417_v35 }
 0x6c5   :  { %v14697_v15 = vadd.f32 %v10419_v36, %v14561_v0 }
 0x6c7   :  { %v10420_v25 = vpop.f32.mrb[236].mxu1 }
 0x6c8   :  { %v10421_v51 = vpop.f32.mrb[237].mxu1 }
 0x6c9   :  { %v10422_v54 = vadd.f32 %v10421_v51, %v10420_v25  ;;  %v10423_v28 = vpop.f32.mrb[238].mxu1  ;;  %v12704_v51 = vld [vmem:[#allocation10] sm:$0x7] }
 0x6ca   :  { %v10424_v17 = vpop.f32.mrb[239].mxu1 }
 0x6cb   :  { %v14700_v5 = vadd.f32 %v10422_v54, %v14566_v41  ;;  %v10425_v1 = vadd.f32 %v10424_v17, %v10423_v28  ;;  %v15284_v54 = vld [vmem:[#allocation16_spill] sm:$0xff]  ;;  %v15285_v17 = vld [vmem:[#allocation17_spill] sm:$0xff] }
 0x6cc   :  { %v14727_v28 = vrot.slane %v12704_v51, %v15284_v54 }
 0x6cd   :  { %v14703_v61 = vadd.f32 %v10425_v1, %v14571_v49  ;;  %v14733_v1 = vrot.slane %v12704_v51, %v15285_v17 }
 0x6cf   :  { %v10426_v63 = vpop.f32.mrb[240].mxu1 }
 0x6d0   :  { %v10427_v30 = vpop.f32.mrb[241].mxu1 }
 0x6d1   :  { %v10428_v27 = vadd.f32 %v10427_v30, %v10426_v63  ;;  %v10429_v11 = vpop.f32.mrb[242].mxu1 }
 0x6d2   :  { %v10430_v58 = vpop.f32.mrb[243].mxu1 }
 0x6d3   :  { %v14706_v0 = vadd.f32 %v10428_v27, %v14576_v32  ;;  %v10431_v2 = vadd.f32 %v10430_v58, %v10429_v11 }
 0x6d5   :  { %v14709_v22 = vadd.f32 %v10431_v2, %v14581_v8 }
 0x6d7   :  { %v10432_v48 = vpop.f32.mrb[244].mxu1 }
 0x6d8   :  { %v10433_v12 = vpop.f32.mrb[245].mxu1 }
 0x6d9   :  { %v10434_v41 = vadd.f32 %v10433_v12, %v10432_v48  ;;  %v10435_v19 = vpop.f32.mrb[246].mxu1 }
 0x6da   :  { %v10436_v46 = vpop.f32.mrb[247].mxu1 }
 0x6db   :  { %v14712_v49 = vadd.f32 %v10434_v41, %v14586_v18  ;;  %v10437_v47 = vadd.f32 %v10436_v46, %v10435_v19 }
 0x6dd   :  { %v14715_v43 = vadd.f32 %v10437_v47, %v14591_v50 }
 0x6df   :  { %v10438_v33 = vpop.f32.mrb[248].mxu1 }
 0x6e0   :  { %v10439_v10 = vpop.f32.mrb[249].mxu1 }
 0x6e1   :  { %v10440_v32 = vadd.f32 %v10439_v10, %v10438_v33  ;;  %v10441_v29 = vpop.f32.mrb[250].mxu1 }
 0x6e2   :  { %v10442_v56 = vpop.f32.mrb[251].mxu1 }
 0x6e3   :  { %v14718_v8 = vadd.f32 %v10440_v32, %v14596_v26  ;;  %v10443_v16 = vadd.f32 %v10442_v56, %v10441_v29 }
 0x6e5   :  { %v14721_v59 = vadd.f32 %v10443_v16, %v14601_v21 }
 0x6e7   :  { %v10444_v24 = vpop.f32.mrb[252].mxu1 }
 0x6e8   :  { %v10445_v35 = vpop.f32.mrb[253].mxu1 }
 0x6e9   :  { %v10446_v18 = vadd.f32 %v10445_v35, %v10444_v24  ;;  %v10447_v52 = vpop.f32.mrb[254].mxu1 }
 0x6ea   :  { %v10448_v36 = vpop.f32.mrb[255].mxu1 }
 0x6eb   :  { %v14724_v50 = vadd.f32 %v10446_v18, %v14606_v62  ;;  %v10449_v25 = vadd.f32 %v10448_v36, %v10447_v52 }
 0x6ed   :  { %v14730_v26 = vadd.f32 %v10449_v25, %v14611_v6 }
 0x6ef   :  { %v8026_v21 = vpop.f32.mrb[192].mxu0  ;;  %v10466_v63 = vpop.f32.mrb[0].mxu1 }
 0x6f0   :  { %v10946_v30 = vadd.f32 %v8026_v21, %v14727_v28  ;;  %v8028_v27 = vpop.f32.mrb[193].mxu0  ;;  %v10467_v11 = vpop.f32.mrb[1].mxu1 }
 0x6f1   :  { %v10947_v62 = vadd.f32 %v8028_v27, %v14733_v1  ;;  %v10468_v58 = vadd.f32 %v10467_v11, %v10466_v63  ;;  %v8030_v2 = vpop.f32.mrb[194].mxu0  ;;  %v10469_v48 = vpop.f32.mrb[2].mxu1 }
 0x6f2   :  { %9151 = vst [vmem:[#allocation11] sm:$0xff] %v10946_v30  ;;  %v10948_v12 = vadd.f32 %v8030_v2, %v14727_v28  ;;  %v8032_v41 = vpop.f32.mrb[195].mxu0  ;;  %v10470_v6 = vpop.f32.mrb[3].mxu1 }
 0x6f3   :  { %9152 = vst [vmem:[#allocation11 + $0x8] sm:$0xff] %v10947_v62  ;;  %v9025_v19 = vadd.f32 %v10468_v58, %v14616_v53  ;;  %v10949_v46 = vadd.f32 %v8032_v41, %v14733_v1  ;;  %v10471_v47 = vadd.f32 %v10470_v6, %v10469_v48 }
 0x6f4   :  { %9154 = vst [vmem:[#allocation11 + $0x18] sm:$0xff] %v10948_v12 }
 0x6f5   :  { %9153 = vst [vmem:[#allocation11 + $0x10] sm:$0xff] %v9025_v19  ;;  %9155 = vst [vmem:[#allocation11 + $0x20] sm:$0xff] %v10949_v46  ;;  %v9028_v33 = vadd.f32 %v10471_v47, %v14621_v38 }
 0x6f7   :  { %9156 = vst [vmem:[#allocation11 + $0x28] sm:$0xff] %v9028_v33  ;;  %v8036_v10 = vpop.f32.mrb[196].mxu0  ;;  %v10472_v32 = vpop.f32.mrb[4].mxu1 }
 0x6f8   :  { %v10950_v29 = vadd.f32 %v8036_v10, %v14727_v28  ;;  %v8038_v56 = vpop.f32.mrb[197].mxu0  ;;  %v10473_v16 = vpop.f32.mrb[5].mxu1 }
 0x6f9   :  { %v10951_v24 = vadd.f32 %v8038_v56, %v14733_v1  ;;  %v10474_v35 = vadd.f32 %v10473_v16, %v10472_v32  ;;  %v8040_v18 = vpop.f32.mrb[198].mxu0  ;;  %v10475_v53 = vpop.f32.mrb[6].mxu1 }
 0x6fa   :  { %9157 = vst [vmem:[#allocation11 + $0x30] sm:$0xff] %v10950_v29  ;;  %v10952_v52 = vadd.f32 %v8040_v18, %v14727_v28  ;;  %v8042_v36 = vpop.f32.mrb[199].mxu0  ;;  %v10476_v25 = vpop.f32.mrb[7].mxu1 }
 0x6fb   :  { %9158 = vst [vmem:[#allocation11 + $0x38] sm:$0xff] %v10951_v24  ;;  %v9033_v38 = vadd.f32 %v10474_v35, %v14626_v55  ;;  %v10953_v51 = vadd.f32 %v8042_v36, %v14733_v1  ;;  %v10477_v54 = vadd.f32 %v10476_v25, %v10475_v53 }
 0x6fc   :  { %9160 = vst [vmem:[#allocation11 + $0x48] sm:$0xff] %v10952_v52 }
 0x6fd   :  { %9159 = vst [vmem:[#allocation11 + $0x40] sm:$0xff] %v9033_v38  ;;  %9161 = vst [vmem:[#allocation11 + $0x50] sm:$0xff] %v10953_v51  ;;  %v9036_v17 = vadd.f32 %v10477_v54, %v14631_v20 }
 0x6ff   :  { %9162 = vst [vmem:[#allocation11 + $0x58] sm:$0xff] %v9036_v17  ;;  %v8046_v21 = vpop.f32.mrb[200].mxu0  ;;  %v10478_v63 = vpop.f32.mrb[8].mxu1 }
 0x700   :  { %v10954_v30 = vadd.f32 %v8046_v21, %v14727_v28  ;;  %v8048_v27 = vpop.f32.mrb[201].mxu0  ;;  %v10479_v11 = vpop.f32.mrb[9].mxu1 }
 0x701   :  { %v10955_v62 = vadd.f32 %v8048_v27, %v14733_v1  ;;  %v10480_v58 = vadd.f32 %v10479_v11, %v10478_v63  ;;  %v8050_v2 = vpop.f32.mrb[202].mxu0  ;;  %v10481_v55 = vpop.f32.mrb[10].mxu1 }
 0x702   :  { %9163 = vst [vmem:[#allocation11 + $0x60] sm:$0xff] %v10954_v30  ;;  %v10956_v48 = vadd.f32 %v8050_v2, %v14727_v28  ;;  %v8052_v12 = vpop.f32.mrb[203].mxu0  ;;  %v10482_v41 = vpop.f32.mrb[11].mxu1 }
 0x703   :  { %9164 = vst [vmem:[#allocation11 + $0x68] sm:$0xff] %v10955_v62  ;;  %v9041_v20 = vadd.f32 %v10480_v58, %v14636_v9  ;;  %v10957_v6 = vadd.f32 %v8052_v12, %v14733_v1  ;;  %v10483_v19 = vadd.f32 %v10482_v41, %v10481_v55 }
 0x704   :  { %9166 = vst [vmem:[#allocation11 + $0x78] sm:$0xff] %v10956_v48 }
 0x705   :  { %9165 = vst [vmem:[#allocation11 + $0x70] sm:$0xff] %v9041_v20  ;;  %9167 = vst [vmem:[#allocation11 + $0x80] sm:$0xff] %v10957_v6  ;;  %v9044_v46 = vadd.f32 %v10483_v19, %v14641_v31 }
 0x707   :  { %9168 = vst [vmem:[#allocation11 + $0x88] sm:$0xff] %v9044_v46  ;;  %v8056_v47 = vpop.f32.mrb[204].mxu0  ;;  %v10484_v33 = vpop.f32.mrb[12].mxu1 }
 0x708   :  { %v10958_v10 = vadd.f32 %v8056_v47, %v14727_v28  ;;  %v8058_v32 = vpop.f32.mrb[205].mxu0  ;;  %v10485_v29 = vpop.f32.mrb[13].mxu1 }
 0x709   :  { %v10959_v56 = vadd.f32 %v8058_v32, %v14733_v1  ;;  %v10486_v16 = vadd.f32 %v10485_v29, %v10484_v33  ;;  %v8060_v24 = vpop.f32.mrb[206].mxu0  ;;  %v10487_v9 = vpop.f32.mrb[14].mxu1 }
 0x70a   :  { %9169 = vst [vmem:[#allocation11 + $0x90] sm:$0xff] %v10958_v10  ;;  %v10960_v35 = vadd.f32 %v8060_v24, %v14727_v28  ;;  %v8062_v18 = vpop.f32.mrb[207].mxu0  ;;  %v10488_v53 = vpop.f32.mrb[15].mxu1 }
 0x70b   :  { %9170 = vst [vmem:[#allocation11 + $0x98] sm:$0xff] %v10959_v56  ;;  %v9049_v31 = vadd.f32 %v10486_v16, %v14646_v4  ;;  %v10961_v52 = vadd.f32 %v8062_v18, %v14733_v1  ;;  %v10489_v36 = vadd.f32 %v10488_v53, %v10487_v9 }
 0x70c   :  { %9172 = vst [vmem:[#allocation11 + $0xa8] sm:$0xff] %v10960_v35 }
 0x70d   :  { %9171 = vst [vmem:[#allocation11 + $0xa0] sm:$0xff] %v9049_v31  ;;  %9173 = vst [vmem:[#allocation11 + $0xb0] sm:$0xff] %v10961_v52  ;;  %v9052_v25 = vadd.f32 %v10489_v36, %v14651_v40 }
 0x70f   :  { %9174 = vst [vmem:[#allocation11 + $0xb8] sm:$0xff] %v9052_v25  ;;  %v8066_v38 = vpop.f32.mrb[208].mxu0  ;;  %v10490_v51 = vpop.f32.mrb[16].mxu1 }
 0x710   :  { %v10962_v54 = vadd.f32 %v8066_v38, %v14727_v28  ;;  %v8068_v17 = vpop.f32.mrb[209].mxu0  ;;  %v10491_v21 = vpop.f32.mrb[17].mxu1 }
 0x711   :  { %v10963_v63 = vadd.f32 %v8068_v17, %v14733_v1  ;;  %v10492_v30 = vadd.f32 %v10491_v21, %v10490_v51  ;;  %v8070_v27 = vpop.f32.mrb[210].mxu0  ;;  %v10493_v4 = vpop.f32.mrb[18].mxu1 }
 0x712   :  { %9175 = vst [vmem:[#allocation11 + $0xc0] sm:$0xff] %v10962_v54  ;;  %v10964_v11 = vadd.f32 %v8070_v27, %v14727_v28  ;;  %v8072_v62 = vpop.f32.mrb[211].mxu0  ;;  %v10494_v58 = vpop.f32.mrb[19].mxu1 }
 0x713   :  { %9176 = vst [vmem:[#allocation11 + $0xc8] sm:$0xff] %v10963_v63  ;;  %v9057_v40 = vadd.f32 %v10492_v30, %v14656_v42  ;;  %v10965_v2 = vadd.f32 %v8072_v62, %v14733_v1  ;;  %v10495_v55 = vadd.f32 %v10494_v58, %v10493_v4 }
 0x714   :  { %9178 = vst [vmem:[#allocation11 + $0xd8] sm:$0xff] %v10964_v11 }
 0x715   :  { %9177 = vst [vmem:[#allocation11 + $0xd0] sm:$0xff] %v9057_v40  ;;  %9179 = vst [vmem:[#allocation11 + $0xe0] sm:$0xff] %v10965_v2  ;;  %v9060_v48 = vadd.f32 %v10495_v55, %v14661_v37 }
 0x717   :  { %9180 = vst [vmem:[#allocation11 + $0xe8] sm:$0xff] %v9060_v48  ;;  %v8076_v12 = vpop.f32.mrb[212].mxu0  ;;  %v10496_v41 = vpop.f32.mrb[20].mxu1 }
 0x718   :  { %v10966_v20 = vadd.f32 %v8076_v12, %v14727_v28  ;;  %v8078_v6 = vpop.f32.mrb[213].mxu0  ;;  %v10497_v19 = vpop.f32.mrb[21].mxu1 }
 0x719   :  { %v10967_v46 = vadd.f32 %v8078_v6, %v14733_v1  ;;  %v10498_v47 = vadd.f32 %v10497_v19, %v10496_v41  ;;  %v8080_v33 = vpop.f32.mrb[214].mxu0  ;;  %v10499_v42 = vpop.f32.mrb[22].mxu1 }
 0x71a   :  { %9181 = vst [vmem:[#allocation11 + $0xf0] sm:$0xff] %v10966_v20  ;;  %v10968_v10 = vadd.f32 %v8080_v33, %v14727_v28  ;;  %v8082_v32 = vpop.f32.mrb[215].mxu0  ;;  %v10500_v29 = vpop.f32.mrb[23].mxu1 }
 0x71b   :  { %9182 = vst [vmem:[#allocation11 + $0xf8] sm:$0xff] %v10967_v46  ;;  %v9065_v37 = vadd.f32 %v10498_v47, %v14664_v7  ;;  %v10969_v56 = vadd.f32 %v8082_v32, %v14733_v1  ;;  %v10501_v16 = vadd.f32 %v10500_v29, %v10499_v42 }
 0x71c   :  { %9184 = vst [vmem:[#allocation11 + $0x108] sm:$0xff] %v10968_v10 }
 0x71d   :  { %9183 = vst [vmem:[#allocation11 + $0x100] sm:$0xff] %v9065_v37  ;;  %9185 = vst [vmem:[#allocation11 + $0x110] sm:$0xff] %v10969_v56  ;;  %v9068_v24 = vadd.f32 %v10501_v16, %v14667_v39 }
 0x71f   :  { %9186 = vst [vmem:[#allocation11 + $0x118] sm:$0xff] %v9068_v24  ;;  %v8086_v9 = vpop.f32.mrb[216].mxu0  ;;  %v10502_v35 = vpop.f32.mrb[24].mxu1 }
 0x720   :  { %v10970_v18 = vadd.f32 %v8086_v9, %v14727_v28  ;;  %v8088_v53 = vpop.f32.mrb[217].mxu0  ;;  %v10503_v31 = vpop.f32.mrb[25].mxu1 }
 0x721   :  { %v10971_v52 = vadd.f32 %v8088_v53, %v14733_v1  ;;  %v10504_v36 = vadd.f32 %v10503_v31, %v10502_v35  ;;  %v8090_v25 = vpop.f32.mrb[218].mxu0  ;;  %v10505_v7 = vpop.f32.mrb[26].mxu1 }
 0x722   :  { %9187 = vst [vmem:[#allocation11 + $0x120] sm:$0xff] %v10970_v18  ;;  %v10972_v38 = vadd.f32 %v8090_v25, %v14727_v28  ;;  %v8092_v51 = vpop.f32.mrb[219].mxu0  ;;  %v10506_v54 = vpop.f32.mrb[27].mxu1 }
 0x723   :  { %9188 = vst [vmem:[#allocation11 + $0x128] sm:$0xff] %v10971_v52  ;;  %v9073_v39 = vadd.f32 %v10504_v36, %v14670_v3  ;;  %v10973_v17 = vadd.f32 %v8092_v51, %v14733_v1  ;;  %v10507_v21 = vadd.f32 %v10506_v54, %v10505_v7 }
 0x724   :  { %9190 = vst [vmem:[#allocation11 + $0x138] sm:$0xff] %v10972_v38 }
 0x725   :  { %9189 = vst [vmem:[#allocation11 + $0x130] sm:$0xff] %v9073_v39  ;;  %9191 = vst [vmem:[#allocation11 + $0x140] sm:$0xff] %v10973_v17  ;;  %v9076_v63 = vadd.f32 %v10507_v21, %v14673_v57 }
 0x727   :  { %9192 = vst [vmem:[#allocation11 + $0x148] sm:$0xff] %v9076_v63  ;;  %v8096_v30 = vpop.f32.mrb[220].mxu0  ;;  %v10508_v27 = vpop.f32.mrb[28].mxu1 }
 0x728   :  { %v10974_v4 = vadd.f32 %v8096_v30, %v14727_v28  ;;  %v8098_v11 = vpop.f32.mrb[221].mxu0  ;;  %v10509_v62 = vpop.f32.mrb[29].mxu1 }
 0x729   :  { %v10975_v58 = vadd.f32 %v8098_v11, %v14733_v1  ;;  %v10510_v40 = vadd.f32 %v10509_v62, %v10508_v27  ;;  %v8100_v2 = vpop.f32.mrb[222].mxu0  ;;  %v10511_v3 = vpop.f32.mrb[30].mxu1 }
 0x72a   :  { %9193 = vst [vmem:[#allocation11 + $0x150] sm:$0xff] %v10974_v4  ;;  %v10976_v55 = vadd.f32 %v8100_v2, %v14727_v28  ;;  %v8102_v48 = vpop.f32.mrb[223].mxu0  ;;  %v10512_v12 = vpop.f32.mrb[31].mxu1 }
 0x72b   :  { %9194 = vst [vmem:[#allocation11 + $0x158] sm:$0xff] %v10975_v58  ;;  %v9081_v57 = vadd.f32 %v10510_v40, %v14676_v23  ;;  %v10977_v41 = vadd.f32 %v8102_v48, %v14733_v1  ;;  %v10513_v20 = vadd.f32 %v10512_v12, %v10511_v3 }
 0x72c   :  { %9196 = vst [vmem:[#allocation11 + $0x168] sm:$0xff] %v10976_v55 }
 0x72d   :  { %9195 = vst [vmem:[#allocation11 + $0x160] sm:$0xff] %v9081_v57  ;;  %9197 = vst [vmem:[#allocation11 + $0x170] sm:$0xff] %v10977_v41  ;;  %v9084_v6 = vadd.f32 %v10513_v20, %v14679_v34 }
 0x72f   :  { %9198 = vst [vmem:[#allocation11 + $0x178] sm:$0xff] %v9084_v6  ;;  %v8106_v19 = vpop.f32.mrb[224].mxu0  ;;  %v10514_v46 = vpop.f32.mrb[32].mxu1 }
 0x730   :  { %v10978_v47 = vadd.f32 %v8106_v19, %v14727_v28  ;;  %v8108_v33 = vpop.f32.mrb[225].mxu0  ;;  %v10515_v42 = vpop.f32.mrb[33].mxu1 }
 0x731   :  { %v10979_v10 = vadd.f32 %v8108_v33, %v14733_v1  ;;  %v10516_v32 = vadd.f32 %v10515_v42, %v10514_v46  ;;  %v8110_v29 = vpop.f32.mrb[226].mxu0  ;;  %v10517_v23 = vpop.f32.mrb[34].mxu1 }
 0x732   :  { %9199 = vst [vmem:[#allocation11 + $0x180] sm:$0xff] %v10978_v47  ;;  %v10980_v37 = vadd.f32 %v8110_v29, %v14727_v28  ;;  %v8112_v56 = vpop.f32.mrb[227].mxu0  ;;  %v10518_v16 = vpop.f32.mrb[35].mxu1 }
 0x733   :  { %9200 = vst [vmem:[#allocation11 + $0x188] sm:$0xff] %v10979_v10  ;;  %v9089_v34 = vadd.f32 %v10516_v32, %v14682_v13  ;;  %v10981_v24 = vadd.f32 %v8112_v56, %v14733_v1  ;;  %v10519_v9 = vadd.f32 %v10518_v16, %v10517_v23 }
 0x734   :  { %9202 = vst [vmem:[#allocation11 + $0x198] sm:$0xff] %v10980_v37 }
 0x735   :  { %9201 = vst [vmem:[#allocation11 + $0x190] sm:$0xff] %v9089_v34  ;;  %9203 = vst [vmem:[#allocation11 + $0x1a0] sm:$0xff] %v10981_v24  ;;  %v9092_v35 = vadd.f32 %v10519_v9, %v14685_v14 }
 0x737   :  { %9204 = vst [vmem:[#allocation11 + $0x1a8] sm:$0xff] %v9092_v35  ;;  %v8116_v18 = vpop.f32.mrb[228].mxu0  ;;  %v10520_v53 = vpop.f32.mrb[36].mxu1 }
 0x738   :  { %v10982_v31 = vadd.f32 %v8116_v18, %v14727_v28  ;;  %v8118_v52 = vpop.f32.mrb[229].mxu0  ;;  %v10521_v36 = vpop.f32.mrb[37].mxu1 }
 0x739   :  { %v10983_v25 = vadd.f32 %v8118_v52, %v14733_v1  ;;  %v10522_v7 = vadd.f32 %v10521_v36, %v10520_v53  ;;  %v8120_v38 = vpop.f32.mrb[230].mxu0  ;;  %v10523_v13 = vpop.f32.mrb[38].mxu1 }
 0x73a   :  { %9205 = vst [vmem:[#allocation11 + $0x1b0] sm:$0xff] %v10982_v31  ;;  %v10984_v51 = vadd.f32 %v8120_v38, %v14727_v28  ;;  %v8122_v54 = vpop.f32.mrb[231].mxu0  ;;  %v10524_v39 = vpop.f32.mrb[39].mxu1 }
 0x73b   :  { %9206 = vst [vmem:[#allocation11 + $0x1b8] sm:$0xff] %v10983_v25  ;;  %v9097_v14 = vadd.f32 %v10522_v7, %v14688_v45  ;;  %v10985_v17 = vadd.f32 %v8122_v54, %v14733_v1  ;;  %v10525_v21 = vadd.f32 %v10524_v39, %v10523_v13 }
 0x73c   :  { %9208 = vst [vmem:[#allocation11 + $0x1c8] sm:$0xff] %v10984_v51 }
 0x73d   :  { %9207 = vst [vmem:[#allocation11 + $0x1c0] sm:$0xff] %v9097_v14  ;;  %9209 = vst [vmem:[#allocation11 + $0x1d0] sm:$0xff] %v10985_v17  ;;  %v9100_v63 = vadd.f32 %v10525_v21, %v14691_v44 }
 0x73f   :  { %9210 = vst [vmem:[#allocation11 + $0x1d8] sm:$0xff] %v9100_v63  ;;  %v8126_v30 = vpop.f32.mrb[232].mxu0  ;;  %v10526_v27 = vpop.f32.mrb[40].mxu1 }
 0x740   :  { %v10986_v4 = vadd.f32 %v8126_v30, %v14727_v28  ;;  %v8128_v11 = vpop.f32.mrb[233].mxu0  ;;  %v10527_v62 = vpop.f32.mrb[41].mxu1 }
 0x741   :  { %v10987_v58 = vadd.f32 %v8128_v11, %v14733_v1  ;;  %v10528_v40 = vadd.f32 %v10527_v62, %v10526_v27  ;;  %v8130_v2 = vpop.f32.mrb[234].mxu0  ;;  %v10529_v45 = vpop.f32.mrb[42].mxu1 }
 0x742   :  { %9211 = vst [vmem:[#allocation11 + $0x1e0] sm:$0xff] %v10986_v4  ;;  %v10988_v3 = vadd.f32 %v8130_v2, %v14727_v28  ;;  %v8132_v55 = vpop.f32.mrb[235].mxu0  ;;  %v10530_v48 = vpop.f32.mrb[43].mxu1 }
 0x743   :  { %9212 = vst [vmem:[#allocation11 + $0x1e8] sm:$0xff] %v10987_v58  ;;  %v9105_v44 = vadd.f32 %v10528_v40, %v14694_v60  ;;  %v10989_v12 = vadd.f32 %v8132_v55, %v14733_v1  ;;  %v10531_v57 = vadd.f32 %v10530_v48, %v10529_v45 }
 0x744   :  { %9214 = vst [vmem:[#allocation11 + $0x1f8] sm:$0xff] %v10988_v3 }
 0x745   :  { %9213 = vst [vmem:[#allocation11 + $0x1f0] sm:$0xff] %v9105_v44  ;;  %9215 = vst [vmem:[#allocation11 + $0x200] sm:$0xff] %v10989_v12  ;;  %v9108_v41 = vadd.f32 %v10531_v57, %v14697_v15 }
 0x747   :  { %9216 = vst [vmem:[#allocation11 + $0x208] sm:$0xff] %v9108_v41  ;;  %v8136_v20 = vpop.f32.mrb[236].mxu0  ;;  %v10532_v6 = vpop.f32.mrb[44].mxu1 }
 0x748   :  { %v10990_v19 = vadd.f32 %v8136_v20, %v14727_v28  ;;  %v8138_v46 = vpop.f32.mrb[237].mxu0  ;;  %v10533_v47 = vpop.f32.mrb[45].mxu1 }
 0x749   :  { %v10991_v33 = vadd.f32 %v8138_v46, %v14733_v1  ;;  %v10534_v42 = vadd.f32 %v10533_v47, %v10532_v6  ;;  %v8140_v10 = vpop.f32.mrb[238].mxu0  ;;  %v10535_v60 = vpop.f32.mrb[46].mxu1 }
 0x74a   :  { %9217 = vst [vmem:[#allocation11 + $0x210] sm:$0xff] %v10990_v19  ;;  %v10992_v32 = vadd.f32 %v8140_v10, %v14727_v28  ;;  %v8142_v29 = vpop.f32.mrb[239].mxu0  ;;  %v10536_v23 = vpop.f32.mrb[47].mxu1 }
 0x74b   :  { %9218 = vst [vmem:[#allocation11 + $0x218] sm:$0xff] %v10991_v33  ;;  %v9113_v15 = vadd.f32 %v10534_v42, %v14700_v5  ;;  %v10993_v37 = vadd.f32 %v8142_v29, %v14733_v1  ;;  %v10537_v56 = vadd.f32 %v10536_v23, %v10535_v60 }
 0x74c   :  { %9220 = vst [vmem:[#allocation11 + $0x228] sm:$0xff] %v10992_v32 }
 0x74d   :  { %9219 = vst [vmem:[#allocation11 + $0x220] sm:$0xff] %v9113_v15  ;;  %9221 = vst [vmem:[#allocation11 + $0x230] sm:$0xff] %v10993_v37  ;;  %v9116_v16 = vadd.f32 %v10537_v56, %v14703_v61 }
 0x74f   :  { %9222 = vst [vmem:[#allocation11 + $0x238] sm:$0xff] %v9116_v16  ;;  %v8146_v34 = vpop.f32.mrb[240].mxu0  ;;  %v10538_v24 = vpop.f32.mrb[48].mxu1 }
 0x750   :  { %v10994_v9 = vadd.f32 %v8146_v34, %v14727_v28  ;;  %v8148_v35 = vpop.f32.mrb[241].mxu0  ;;  %v10539_v18 = vpop.f32.mrb[49].mxu1 }
 0x751   :  { %v10995_v53 = vadd.f32 %v8148_v35, %v14733_v1  ;;  %v10540_v31 = vadd.f32 %v10539_v18, %v10538_v24  ;;  %v8150_v52 = vpop.f32.mrb[242].mxu0  ;;  %v10541_v5 = vpop.f32.mrb[50].mxu1 }
 0x752   :  { %9223 = vst [vmem:[#allocation11 + $0x240] sm:$0xff] %v10994_v9  ;;  %v10996_v36 = vadd.f32 %v8150_v52, %v14727_v28  ;;  %v8152_v25 = vpop.f32.mrb[243].mxu0  ;;  %v10542_v7 = vpop.f32.mrb[51].mxu1 }
 0x753   :  { %9224 = vst [vmem:[#allocation11 + $0x248] sm:$0xff] %v10995_v53  ;;  %v9121_v61 = vadd.f32 %v10540_v31, %v14706_v0  ;;  %v10997_v38 = vadd.f32 %v8152_v25, %v14733_v1  ;;  %v10543_v13 = vadd.f32 %v10542_v7, %v10541_v5 }
 0x754   :  { %9226 = vst [vmem:[#allocation11 + $0x258] sm:$0xff] %v10996_v36 }
 0x755   :  { %9225 = vst [vmem:[#allocation11 + $0x250] sm:$0xff] %v9121_v61  ;;  %9227 = vst [vmem:[#allocation11 + $0x260] sm:$0xff] %v10997_v38  ;;  %v9124_v51 = vadd.f32 %v10543_v13, %v14709_v22 }
 0x757   :  { %9228 = vst [vmem:[#allocation11 + $0x268] sm:$0xff] %v9124_v51  ;;  %v8156_v54 = vpop.f32.mrb[244].mxu0  ;;  %v10544_v39 = vpop.f32.mrb[52].mxu1 }
 0x758   :  { %v10998_v14 = vadd.f32 %v8156_v54, %v14727_v28  ;;  %v8158_v17 = vpop.f32.mrb[245].mxu0  ;;  %v10545_v21 = vpop.f32.mrb[53].mxu1 }
 0x759   :  { %v10999_v63 = vadd.f32 %v8158_v17, %v14733_v1  ;;  %v10546_v30 = vadd.f32 %v10545_v21, %v10544_v39  ;;  %v8160_v27 = vpop.f32.mrb[246].mxu0  ;;  %v10547_v0 = vpop.f32.mrb[54].mxu1 }
 0x75a   :  { %9229 = vst [vmem:[#allocation11 + $0x270] sm:$0xff] %v10998_v14  ;;  %v11000_v4 = vadd.f32 %v8160_v27, %v14727_v28  ;;  %v8162_v11 = vpop.f32.mrb[247].mxu0  ;;  %v10548_v62 = vpop.f32.mrb[55].mxu1 }
 0x75b   :  { %9230 = vst [vmem:[#allocation11 + $0x278] sm:$0xff] %v10999_v63  ;;  %v9129_v22 = vadd.f32 %v10546_v30, %v14712_v49  ;;  %v11001_v58 = vadd.f32 %v8162_v11, %v14733_v1  ;;  %v10549_v40 = vadd.f32 %v10548_v62, %v10547_v0 }
 0x75c   :  { %9232 = vst [vmem:[#allocation11 + $0x288] sm:$0xff] %v11000_v4 }
 0x75d   :  { %9231 = vst [vmem:[#allocation11 + $0x280] sm:$0xff] %v9129_v22  ;;  %9233 = vst [vmem:[#allocation11 + $0x290] sm:$0xff] %v11001_v58  ;;  %v9132_v2 = vadd.f32 %v10549_v40, %v14715_v43 }
 0x75f   :  { %9234 = vst [vmem:[#allocation11 + $0x298] sm:$0xff] %v9132_v2  ;;  %v8166_v45 = vpop.f32.mrb[248].mxu0  ;;  %v10550_v3 = vpop.f32.mrb[56].mxu1 }
 0x760   :  { %v11002_v55 = vadd.f32 %v8166_v45, %v14727_v28  ;;  %v8168_v48 = vpop.f32.mrb[249].mxu0  ;;  %v10551_v44 = vpop.f32.mrb[57].mxu1 }
 0x761   :  { %v11003_v12 = vadd.f32 %v8168_v48, %v14733_v1  ;;  %v10552_v57 = vadd.f32 %v10551_v44, %v10550_v3  ;;  %v8170_v41 = vpop.f32.mrb[250].mxu0  ;;  %v10553_v49 = vpop.f32.mrb[58].mxu1 }
 0x762   :  { %9235 = vst [vmem:[#allocation11 + $0x2a0] sm:$0xff] %v11002_v55  ;;  %v11004_v20 = vadd.f32 %v8170_v41, %v14727_v28  ;;  %v8172_v6 = vpop.f32.mrb[251].mxu0  ;;  %v10554_v19 = vpop.f32.mrb[59].mxu1 }
 0x763   :  { %9236 = vst [vmem:[#allocation11 + $0x2a8] sm:$0xff] %v11003_v12  ;;  %v9137_v43 = vadd.f32 %v10552_v57, %v14718_v8  ;;  %v11005_v46 = vadd.f32 %v8172_v6, %v14733_v1  ;;  %v10555_v47 = vadd.f32 %v10554_v19, %v10553_v49 }
 0x764   :  { %9238 = vst [vmem:[#allocation11 + $0x2b8] sm:$0xff] %v11004_v20 }
 0x765   :  { %9237 = vst [vmem:[#allocation11 + $0x2b0] sm:$0xff] %v9137_v43  ;;  %9239 = vst [vmem:[#allocation11 + $0x2c0] sm:$0xff] %v11005_v46  ;;  %v9140_v33 = vadd.f32 %v10555_v47, %v14721_v59 }
 0x767   :  { %9240 = vst [vmem:[#allocation11 + $0x2c8] sm:$0xff] %v9140_v33  ;;  %v8176_v42 = vpop.f32.mrb[252].mxu0  ;;  %v10556_v10 = vpop.f32.mrb[60].mxu1 }
 0x768   :  { %v11006_v60 = vadd.f32 %v8176_v42, %v14727_v28  ;;  %v8178_v32 = vpop.f32.mrb[253].mxu0  ;;  %v10557_v29 = vpop.f32.mrb[61].mxu1 }
 0x769   :  { %v11007_v23 = vadd.f32 %v8178_v32, %v14733_v1  ;;  %v10558_v15 = vadd.f32 %v10557_v29, %v10556_v10  ;;  %v8180_v37 = vpop.f32.mrb[254].mxu0  ;;  %v10559_v8 = vpop.f32.mrb[62].mxu1 }
 0x76a   :  { %9241 = vst [vmem:[#allocation11 + $0x2d0] sm:$0xff] %v11006_v60  ;;  %v11008_v56 = vadd.f32 %v8180_v37, %v14727_v28  ;;  %v8182_v16 = vpop.f32.mrb[255].mxu0  ;;  %v10560_v34 = vpop.f32.mrb[63].mxu1 }
 0x76b   :  { %9242 = vst [vmem:[#allocation11 + $0x2d8] sm:$0xff] %v11007_v23  ;;  %v9145_v59 = vadd.f32 %v10558_v15, %v14724_v50  ;;  %v11009_v24 = vadd.f32 %v8182_v16, %v14733_v1  ;;  %v10561_v9 = vadd.f32 %v10560_v34, %v10559_v8 }
 0x76c   :  { %9244 = vst [vmem:[#allocation11 + $0x2e8] sm:$0xff] %v11008_v56 }
 0x76d   :  { %9243 = vst [vmem:[#allocation11 + $0x2e0] sm:$0xff] %v9145_v59  ;;  %9245 = vst [vmem:[#allocation11 + $0x2f0] sm:$0xff] %v11009_v24  ;;  %v9148_v35 = vadd.f32 %v10561_v9, %v14730_v26 }
 0x76f   :  { %9246 = vst [vmem:[#allocation11 + $0x2f8] sm:$0xff] %v9148_v35 }
 0x770   :  { %12826 = shalt.err (!%p12823_p2)
}
 0x771   :  { %s12827_s6 = scalar_lea.hbm %s14848_s5, 12288 }
 0x772   :  { %p12828_p3 = scmp.ne.s32.totalorder %s14848_s5, %s12827_s6  ;;  %p12831_p4 = scmp.lt.u32.totalorder %s12827_s6, %s14848_s5 }
 0x774   :  { %p12833_p5 = pnand %p12831_p4, %p12828_p3 }
 0x776   :  { %12836 = shalt.err (!%p12833_p5)
}
 0x777   :  { %s12856_s12 = smov 384   ;;  %s12857_s13 = smov 24  }
 0x778   :  { %9258 = dma.vmem_to_hbm [thread:$0]  %s9253_s28, 12288, %s14848_s5, [#allocation4], %s12856_s12, %s12856_s12, %s12857_s13  }
 0x779   :  { %12843 = dma.done.wait [#allocation4], 12288  }
 0x77a   :  { %12844 = vsyncadd [#allocation4], 4294955008 }
 0x77b   :  { %9262 = vsyncpa [#allocation3], 1 }
 0x77c   :  { %9263 = vsyncpa [#allocation6], 1 }
 0x77d   :  { %9264 = vsyncpa [#allocation9], 1 }
 0x77e   :  { %9265 = vsyncpa [#allocation4], 1 }

</bundles_post_ra>
